<compile_context>
chip_gen: v5e
topology: v5e:2x2
jax: 0.10.0
libtpu: 0.0.40
codegen_flags: <defaults>
</compile_context>

<pallas_src>
import functools
import math

import jax
import jax.numpy as jnp
from jax.experimental import pallas as pl
from jax.experimental.pallas import tpu as pltpu

D_MODEL = 32
NHEAD = 4
NEG_INF = -1.0e9

# Layout of the single SMEM scalar table.
_SA, _M2D, _M2P = 0, 5, 10       # per MHA block: exp_q, exp_k, exp_v, 1/att_scale, att_bias
_RES1, _RES2, _RES3, _RES4 = 15, 16, 17, 18
_FF1, _FF2 = 19, 20
_N_SCAL = 21


# ---------------------------------------------------------------------------
# Fused decoder kernel (single invocation, everything VMEM/SMEM resident)
# ---------------------------------------------------------------------------
def _decoder_kernel(scal_ref,
                    med_emb_ref, med_mem_ref, dis_emb_ref, proc_emb_ref,
                    self_mask_ref, d_mask_ref, p_mask_ref,
                    sa_w_ref, sa_b_ref, m2d_w_ref, m2d_b_ref,
                    m2p_w_ref, m2p_b_ref,
                    res1_w_ref, res2_w_ref, res3_w_ref, res4_w_ref,
                    ff1_w_ref, ff1_b_ref, ff2_w_ref, ff2_b_ref,
                    out_ref, ctx_ref, *, nhead):
    b, t, d = med_emb_ref.shape
    dh = d // nhead
    n = b * t

    # ---- Lorentz helpers (HyboNet semantics, curvature -1) -----------------
    def lorentz_normalize(h, exp_scale):
        h0 = h[:, :1]
        time = jax.nn.sigmoid(h0) * exp_scale + 1.1
        sq_space = jnp.maximum(
            jnp.sum(h * h, axis=-1, keepdims=True) - h0 * h0, 1e-8)
        coef = jnp.sqrt((time * time - 1.0) *
                        pl.reciprocal(sq_space, approx=True))
        col = jax.lax.broadcasted_iota(jnp.int32, h.shape, 1)
        return jnp.where(col == 0, time, h * coef)

    def lorentz_linear(x, w, bias, exp_scale, residual=None, use_relu=False):
        if use_relu:
            x = jnp.maximum(x, 0.0)
        h = jnp.dot(x, w, preferred_element_type=jnp.float32)
        if bias is not None:
            h = h + bias
        if residual is not None:
            h = h + residual
        return lorentz_normalize(h, exp_scale)

    def mha_block(x_btd, mem_btd, w_ref, b_ref, mask_btk, sbase, is_self):
        exp_q = scal_ref[sbase + 0]
        exp_k = scal_ref[sbase + 1]
        exp_v = scal_ref[sbase + 2]
        inv_scale = scal_ref[sbase + 3]
        att_bias = scal_ref[sbase + 4]

        tk = mem_btd.shape[1]
        w = w_ref[...]                                    # [d, 3d]
        bia = b_ref[...]                                  # [1, 3d]
        xq = x_btd.reshape(b * t, d)

        if is_self:
            # single fused [n, d] @ [d, 3d] projection
            hqkv = jnp.dot(xq, w, preferred_element_type=jnp.float32) + bia
            hq, hk, hv = hqkv[:, :d], hqkv[:, d:2 * d], hqkv[:, 2 * d:]
        else:
            xm = mem_btd.reshape(b * tk, d)
            hq = jnp.dot(xq, w[:, :d],
                         preferred_element_type=jnp.float32) + bia[:, :d]
            hkv = jnp.dot(xm, w[:, d:],
                          preferred_element_type=jnp.float32) + bia[:, d:]
            hk, hv = hkv[:, :d], hkv[:, d:]

        qn = lorentz_normalize(hq, exp_q).reshape(b, t, d)
        kn = lorentz_normalize(hk, exp_k).reshape(b, tk, d)
        vn = lorentz_normalize(hv, exp_v).reshape(b, tk, d)

        # per-head attention, batched over the batch dim (no per-(b,h) grid)
        for hd in range(nhead):
            lo = hd * dh
            q_h = qn[:, :, lo:lo + dh]                    # [b, t, dh]
            k_h = kn[:, :, lo:lo + dh]                    # [b, tk, dh]
            v_h = vn[:, :, lo:lo + dh]
            # Lorentzian inner product: negate the per-head time coordinate of k.
            colk = jax.lax.broadcasted_iota(jnp.int32, k_h.shape, 2)
            k_mink = jnp.where(colk == 0, -k_h, k_h)
            cin = jnp.einsum('bqd,bkd->bqk', q_h, k_mink,
                             preferred_element_type=jnp.float32)
            logits = (2.0 + 2.0 * cin) * inv_scale + att_bias + mask_btk
            logits = logits - jnp.max(logits, axis=-1, keepdims=True)
            p = jnp.exp(logits)
            p = p * pl.reciprocal(jnp.sum(p, axis=-1, keepdims=True),
                                  approx=True)
            ave = jnp.einsum('bqk,bkd->bqd', p, v_h,
                             preferred_element_type=jnp.float32)
            # Lorentz midpoint: divide by sqrt(|<ave, ave>_L|).
            a0 = ave[:, :, :1]
            l_inner = jnp.sum(ave * ave, axis=-1, keepdims=True) - 2.0 * a0 * a0
            inv_den = jax.lax.rsqrt(jnp.maximum(jnp.abs(l_inner), 1e-8))
            ctx_ref[:, :, pl.ds(lo, dh)] = ave * inv_den

        return ctx_ref[...].reshape(n, d)

    # ------------------------- decoder forward ------------------------------
    x3 = med_emb_ref[...] + med_mem_ref[...]              # [b, t, d]

    # Causal (subsequent) mask generated in-kernel + user self-attention mask.
    row = jax.lax.broadcasted_iota(jnp.int32, (t, t), 0)
    colm = jax.lax.broadcasted_iota(jnp.int32, (t, t), 1)
    causal = jnp.where(colm <= row, 0.0, NEG_INF)
    self_mask = self_mask_ref[...] + causal[None, :, :]

    # _sa_block + residual_1
    sa_ctx = mha_block(x3, x3, sa_w_ref, sa_b_ref, self_mask, _SA, True)
    x2 = lorentz_linear(sa_ctx, res1_w_ref[...], None, scal_ref[_RES1],
                        residual=x3.reshape(n, d))
    x3 = x2.reshape(b, t, d)

    # _m2d_mha_block + residual_2
    m2d_ctx = mha_block(x3, dis_emb_ref[...], m2d_w_ref, m2d_b_ref,
                        d_mask_ref[...], _M2D, False)
    x2 = lorentz_linear(m2d_ctx, res2_w_ref[...], None, scal_ref[_RES2],
                        residual=x2)
    x3 = x2.reshape(b, t, d)

    # _m2p_mha_block + residual_3
    m2p_ctx = mha_block(x3, proc_emb_ref[...], m2p_w_ref, m2p_b_ref,
                        p_mask_ref[...], _M2P, False)
    x2 = lorentz_linear(m2p_ctx, res3_w_ref[...], None, scal_ref[_RES3],
                        residual=x2)

    # feed_forward (two Lorentz linears, ReLU on the second's input) + residual_4
    h1 = lorentz_linear(x2, ff1_w_ref[...], ff1_b_ref[...], scal_ref[_FF1])
    h2 = lorentz_linear(h1, ff2_w_ref[...], ff2_b_ref[...], scal_ref[_FF2],
                        use_relu=True)
    x2 = lorentz_linear(h2, res4_w_ref[...], None, scal_ref[_RES4],
                        residual=x2)

    out_ref[...] = x2.reshape(b, t, d)


# ---------------------------------------------------------------------------
# Wrapper (padding + single pallas_call)
# ---------------------------------------------------------------------------
def _round_up(v, m=8):
    return -(-v // m) * m


def _pad_seq(x, t_pad):
    return jnp.pad(x, ((0, 0), (0, t_pad - x.shape[1]), (0, 0)))


def _pad_attn_mask(mask, tq_pad, tk_pad):
    _, tq, tk = mask.shape
    return jnp.pad(mask, ((0, 0), (0, tq_pad - tq), (0, tk_pad - tk)),
                   constant_values=NEG_INF)


def lorentz_med_transformer_decoder(params, med_emb, med_mem, dis_emb,
                                    proc_emb, med_self_mask, d_mask, p_mask,
                                    nhead=NHEAD):
    b, t_med, d = med_emb.shape
    t_pad = _round_up(t_med)
    td_pad = _round_up(dis_emb.shape[1])
    tp_pad = _round_up(proc_emb.shape[1])

    # Pad sequences to 8-sublane multiples (padded keys are masked out).
    med_emb_p = _pad_seq(med_emb, t_pad)
    med_mem_p = _pad_seq(med_mem, t_pad)
    dis_emb_p = _pad_seq(dis_emb, td_pad)
    proc_emb_p = _pad_seq(proc_emb, tp_pad)
    self_mask_p = _pad_attn_mask(med_self_mask, t_pad, t_pad)
    d_mask_p = _pad_attn_mask(d_mask, t_pad, td_pad)
    p_mask_p = _pad_attn_mask(p_mask, t_pad, tp_pad)

    # Scalar table (SMEM): changing these values does not recompile the kernel.
    def mha_scal(p):
        return [p["exp_q"], p["exp_k"], p["exp_v"],
                1.0 / p["att_scale"], p["att_bias"]]

    scal_vals = (mha_scal(params["self_attn"]) + mha_scal(params["m2d"]) +
                 mha_scal(params["m2p"]) +
                 [params["res1"]["exp_scale"], params["res2"]["exp_scale"],
                  params["res3"]["exp_scale"], params["res4"]["exp_scale"],
                  params["ff1"]["exp_scale"], params["ff2"]["exp_scale"]])
    assert len(scal_vals) == _N_SCAL
    scal = jnp.stack([jnp.asarray(v, jnp.float32) for v in scal_vals])

    smem_spec = pl.BlockSpec(memory_space=pltpu.MemorySpace.SMEM)
    vmem_spec = pl.BlockSpec(memory_space=pltpu.MemorySpace.VMEM)

    out = pl.pallas_call(
        functools.partial(_decoder_kernel, nhead=nhead),
        out_shape=jax.ShapeDtypeStruct((b, t_pad, d), jnp.float32),
        in_specs=[smem_spec] + [vmem_spec] * 21,
        out_specs=vmem_spec,
        scratch_shapes=[pltpu.VMEM((b, t_pad, d), jnp.float32)],
    )(scal, med_emb_p, med_mem_p, dis_emb_p, proc_emb_p,
      self_mask_p, d_mask_p, p_mask_p,
      params["self_attn"]["qkv_w"], params["self_attn"]["qkv_b"],
      params["m2d"]["qkv_w"], params["m2d"]["qkv_b"],
      params["m2p"]["qkv_w"], params["m2p"]["qkv_b"],
      params["res1"]["w"], params["res2"]["w"],
      params["res3"]["w"], params["res4"]["w"],
      params["ff1"]["w"], params["ff1"]["b"],
      params["ff2"]["w"], params["ff2"]["b"])

    return out[:, :t_med]


# ---------------------------------------------------------------------------
# Parameter init (deterministic, synthetic)
# ---------------------------------------------------------------------------
def init_params(key, d_model=D_MODEL):
    keys = iter(jax.random.split(key, 24))

    def rnd(shape, scale):
        return jax.random.normal(next(keys), shape, jnp.float32) * scale

    def mha():
        return {"qkv_w": rnd((d_model, 3 * d_model), 1.0 / math.sqrt(d_model)),
                "qkv_b": rnd((1, 3 * d_model), 0.01),
                "exp_q": 10.0, "exp_k": 10.0, "exp_v": 10.0,
                "att_scale": math.sqrt(d_model), "att_bias": 0.0}

    def lin(bias):
        p = {"w": rnd((d_model, d_model), 1.0 / math.sqrt(d_model)),
             "exp_scale": 10.0}
        if bias:
            p["b"] = rnd((1, d_model), 0.01)
        return p

    return {"self_attn": mha(), "m2d": mha(), "m2p": mha(),
            "res1": lin(False), "res2": lin(False),
            "res3": lin(False), "res4": lin(False),
            "ff1": lin(True), "ff2": lin(True)}


# ---------------------------------------------------------------------------
if __name__ == "__main__":
    key = jax.random.PRNGKey(0)
    kp, k1, k2, k3, k4 = jax.random.split(key, 5)

    B, T_MED, T_DIS, T_PROC = 2, 8, 10, 10
    params = init_params(kp)

    med_emb = jax.random.normal(k1, (B, T_MED, D_MODEL), jnp.float32)
    med_mem = jax.random.normal(k2, (B, T_MED, D_MODEL), jnp.float32)
    dis_emb = jax.random.normal(k3, (B, T_DIS, D_MODEL), jnp.float32)
    proc_emb = jax.random.normal(k4, (B, T_PROC, D_MODEL), jnp.float32)

    med_self_mask = jnp.zeros((B, T_MED, T_MED), jnp.float32)
    # additive key-padding masks: last two disease / procedure slots are padding
    d_mask = jnp.zeros((B, T_MED, T_DIS), jnp.float32).at[:, :, -2:].set(NEG_INF)
    p_mask = jnp.zeros((B, T_MED, T_PROC), jnp.float32).at[:, :, -2:].set(NEG_INF)

    fwd = jax.jit(lorentz_med_transformer_decoder)
    out = fwd(params, med_emb, med_mem, dis_emb, proc_emb,
              med_self_mask, d_mask, p_mask)
    out = jax.block_until_ready(out)

    assert out.shape == (B, T_MED, D_MODEL)
    assert bool(jnp.all(jnp.isfinite(out)))
    print("KERNEL_OK")
</pallas_src>

<mosaic_0001>
module attributes {stable_mosaic.version = 11 : i64} {
  func.func @_decoder_kernel(%arg0: memref<21xf32, #tpu.memory_space<smem>>, %arg1: memref<2x8x32xf32, #tpu.memory_space<vmem>>, %arg2: memref<2x8x32xf32, #tpu.memory_space<vmem>>, %arg3: memref<2x16x32xf32, #tpu.memory_space<vmem>>, %arg4: memref<2x16x32xf32, #tpu.memory_space<vmem>>, %arg5: memref<2x8x8xf32, #tpu.memory_space<vmem>>, %arg6: memref<2x8x16xf32, #tpu.memory_space<vmem>>, %arg7: memref<2x8x16xf32, #tpu.memory_space<vmem>>, %arg8: memref<32x96xf32, #tpu.memory_space<vmem>>, %arg9: memref<1x96xf32, #tpu.memory_space<vmem>>, %arg10: memref<32x96xf32, #tpu.memory_space<vmem>>, %arg11: memref<1x96xf32, #tpu.memory_space<vmem>>, %arg12: memref<32x96xf32, #tpu.memory_space<vmem>>, %arg13: memref<1x96xf32, #tpu.memory_space<vmem>>, %arg14: memref<32x32xf32, #tpu.memory_space<vmem>>, %arg15: memref<32x32xf32, #tpu.memory_space<vmem>>, %arg16: memref<32x32xf32, #tpu.memory_space<vmem>>, %arg17: memref<32x32xf32, #tpu.memory_space<vmem>>, %arg18: memref<32x32xf32, #tpu.memory_space<vmem>>, %arg19: memref<1x32xf32, #tpu.memory_space<vmem>>, %arg20: memref<32x32xf32, #tpu.memory_space<vmem>>, %arg21: memref<1x32xf32, #tpu.memory_space<vmem>>, %arg22: memref<2x8x32xf32, #tpu.memory_space<vmem>>, %arg23: memref<2x8x32xf32, #tpu.memory_space<vmem>>) attributes {dimension_semantics = [], scalar_prefetch = 0 : i64, scratch_operands = 1 : i64, tpu.core_type = #tpu.core_type<tc>} {
    %c0 = arith.constant 0 : index
    %c0_0 = arith.constant 0 : index
    %c0_1 = arith.constant 0 : index
    %0 = vector.load %arg1[%c0, %c0_0, %c0_1] : memref<2x8x32xf32, #tpu.memory_space<vmem>>, vector<2x8x32xf32>
    %c0_2 = arith.constant 0 : index
    %c0_3 = arith.constant 0 : index
    %c0_4 = arith.constant 0 : index
    %1 = vector.load %arg2[%c0_2, %c0_3, %c0_4] : memref<2x8x32xf32, #tpu.memory_space<vmem>>, vector<2x8x32xf32>
    %2 = arith.addf %0, %1 : vector<2x8x32xf32>
    %3 = tpu.iota {dimensions = array<i32: 0>} : vector<8x8xi32>
    %4 = tpu.iota {dimensions = array<i32: 1>} : vector<8x8xi32>
    %5 = arith.cmpi sle, %4, %3 : vector<8x8xi32>
    %cst = arith.constant 0.000000e+00 : f32
    %cst_5 = arith.constant -1.000000e+09 : f32
    %6 = vector.broadcast %cst : f32 to vector<8x8xf32>
    %7 = vector.broadcast %cst_5 : f32 to vector<8x8xf32>
    %8 = arith.select %5, %6, %7 : vector<8x8xi1>, vector<8x8xf32>
    %c0_6 = arith.constant 0 : index
    %c0_7 = arith.constant 0 : index
    %c0_8 = arith.constant 0 : index
    %9 = vector.load %arg5[%c0_6, %c0_7, %c0_8] : memref<2x8x8xf32, #tpu.memory_space<vmem>>, vector<2x8x8xf32>
    %10 = vector.shape_cast %8 : vector<8x8xf32> to vector<1x8x8xf32>
    %11 = vector.broadcast %10 : vector<1x8x8xf32> to vector<2x8x8xf32>
    %12 = arith.addf %9, %11 : vector<2x8x8xf32>
    %c0_9 = arith.constant 0 : index
    %13 = memref.load %arg0[%c0_9] : memref<21xf32, #tpu.memory_space<smem>>
    %c1 = arith.constant 1 : index
    %14 = memref.load %arg0[%c1] : memref<21xf32, #tpu.memory_space<smem>>
    %c2 = arith.constant 2 : index
    %15 = memref.load %arg0[%c2] : memref<21xf32, #tpu.memory_space<smem>>
    %c3 = arith.constant 3 : index
    %16 = memref.load %arg0[%c3] : memref<21xf32, #tpu.memory_space<smem>>
    %c4 = arith.constant 4 : index
    %17 = memref.load %arg0[%c4] : memref<21xf32, #tpu.memory_space<smem>>
    %c0_10 = arith.constant 0 : index
    %c0_11 = arith.constant 0 : index
    %18 = vector.load %arg8[%c0_10, %c0_11] : memref<32x96xf32, #tpu.memory_space<vmem>>, vector<32x96xf32>
    %c0_12 = arith.constant 0 : index
    %c0_13 = arith.constant 0 : index
    %19 = vector.load %arg9[%c0_12, %c0_13] : memref<1x96xf32, #tpu.memory_space<vmem>>, vector<1x96xf32>
    %20 = vector.shape_cast %2 : vector<2x8x32xf32> to vector<16x32xf32>
    %cst_14 = arith.constant dense<0.000000e+00> : vector<16x96xf32>
    %21 = tpu.matmul %20, %18, %cst_14 {dimension_numbers = #tpu.dot_dimension_numbers<[1], [0], [0], [1], [0, 0, 1, 1], [], []>} : vector<16x32xf32>, vector<32x96xf32>, vector<16x96xf32> -> vector<16x96xf32>
    %22 = vector.broadcast %19 : vector<1x96xf32> to vector<16x96xf32>
    %23 = arith.addf %21, %22 : vector<16x96xf32>
    %24 = vector.extract_strided_slice %23 {offsets = [0, 0], sizes = [16, 32], strides = [1, 1]} : vector<16x96xf32> to vector<16x32xf32>
    %25 = vector.extract_strided_slice %23 {offsets = [0, 32], sizes = [16, 32], strides = [1, 1]} : vector<16x96xf32> to vector<16x32xf32>
    %26 = vector.extract_strided_slice %23 {offsets = [0, 64], sizes = [16, 32], strides = [1, 1]} : vector<16x96xf32> to vector<16x32xf32>
    %27 = vector.extract_strided_slice %24 {offsets = [0, 0], sizes = [16, 1], strides = [1, 1]} : vector<16x32xf32> to vector<16x1xf32>
    %28 = arith.negf %27 : vector<16x1xf32>
    %29 = math.exp %28 : vector<16x1xf32>
    %cst_15 = arith.constant 1.000000e+00 : f32
    %30 = vector.broadcast %cst_15 : f32 to vector<16x1xf32>
    %31 = arith.addf %30, %29 : vector<16x1xf32>
    %32 = arith.divf %30, %31 : vector<16x1xf32>
    %33 = vector.broadcast %13 : f32 to vector<16x1xf32>
    %34 = arith.mulf %32, %33 : vector<16x1xf32>
    %cst_16 = arith.constant 1.100000e+00 : f32
    %35 = vector.broadcast %cst_16 : f32 to vector<16x1xf32>
    %36 = arith.addf %34, %35 : vector<16x1xf32>
    %37 = arith.mulf %24, %24 : vector<16x32xf32>
    %cst_17 = arith.constant dense<0.000000e+00> : vector<16xf32>
    %38 = vector.multi_reduction <add>, %37, %cst_17 [1] : vector<16x32xf32> to vector<16xf32>
    %39 = vector.shape_cast %38 : vector<16xf32> to vector<16x1xf32>
    %40 = arith.mulf %27, %27 : vector<16x1xf32>
    %41 = arith.subf %39, %40 : vector<16x1xf32>
    %cst_18 = arith.constant 9.99999993E-9 : f32
    %42 = vector.broadcast %cst_18 : f32 to vector<16x1xf32>
    %43 = arith.maximumf %41, %42 : vector<16x1xf32>
    %44 = arith.mulf %36, %36 : vector<16x1xf32>
    %cst_19 = arith.constant 1.000000e+00 : f32
    %45 = vector.broadcast %cst_19 : f32 to vector<16x1xf32>
    %46 = arith.subf %44, %45 : vector<16x1xf32>
    %47 = tpu.reciprocal %43 {approx = true} : vector<16x1xf32> -> vector<16x1xf32>
    %48 = arith.mulf %46, %47 : vector<16x1xf32>
    %49 = math.sqrt %48 : vector<16x1xf32>
    %50 = tpu.iota {dimensions = array<i32: 1>} : vector<16x32xi32>
    %c0_i32 = arith.constant 0 : i32
    %51 = vector.broadcast %c0_i32 : i32 to vector<16x32xi32>
    %52 = arith.cmpi eq, %50, %51 : vector<16x32xi32>
    %53 = vector.broadcast %49 : vector<16x1xf32> to vector<16x32xf32>
    %54 = arith.mulf %24, %53 : vector<16x32xf32>
    %55 = vector.shape_cast %36 : vector<16x1xf32> to vector<16x1xf32>
    %56 = vector.broadcast %55 : vector<16x1xf32> to vector<16x32xf32>
    %57 = arith.select %52, %56, %54 : vector<16x32xi1>, vector<16x32xf32>
    %58 = vector.shape_cast %57 : vector<16x32xf32> to vector<2x8x32xf32>
    %59 = vector.extract_strided_slice %25 {offsets = [0, 0], sizes = [16, 1], strides = [1, 1]} : vector<16x32xf32> to vector<16x1xf32>
    %60 = arith.negf %59 : vector<16x1xf32>
    %61 = math.exp %60 : vector<16x1xf32>
    %cst_20 = arith.constant 1.000000e+00 : f32
    %62 = vector.broadcast %cst_20 : f32 to vector<16x1xf32>
    %63 = arith.addf %62, %61 : vector<16x1xf32>
    %64 = arith.divf %62, %63 : vector<16x1xf32>
    %65 = vector.broadcast %14 : f32 to vector<16x1xf32>
    %66 = arith.mulf %64, %65 : vector<16x1xf32>
    %cst_21 = arith.constant 1.100000e+00 : f32
    %67 = vector.broadcast %cst_21 : f32 to vector<16x1xf32>
    %68 = arith.addf %66, %67 : vector<16x1xf32>
    %69 = arith.mulf %25, %25 : vector<16x32xf32>
    %cst_22 = arith.constant dense<0.000000e+00> : vector<16xf32>
    %70 = vector.multi_reduction <add>, %69, %cst_22 [1] : vector<16x32xf32> to vector<16xf32>
    %71 = vector.shape_cast %70 : vector<16xf32> to vector<16x1xf32>
    %72 = arith.mulf %59, %59 : vector<16x1xf32>
    %73 = arith.subf %71, %72 : vector<16x1xf32>
    %cst_23 = arith.constant 9.99999993E-9 : f32
    %74 = vector.broadcast %cst_23 : f32 to vector<16x1xf32>
    %75 = arith.maximumf %73, %74 : vector<16x1xf32>
    %76 = arith.mulf %68, %68 : vector<16x1xf32>
    %cst_24 = arith.constant 1.000000e+00 : f32
    %77 = vector.broadcast %cst_24 : f32 to vector<16x1xf32>
    %78 = arith.subf %76, %77 : vector<16x1xf32>
    %79 = tpu.reciprocal %75 {approx = true} : vector<16x1xf32> -> vector<16x1xf32>
    %80 = arith.mulf %78, %79 : vector<16x1xf32>
    %81 = math.sqrt %80 : vector<16x1xf32>
    %82 = tpu.iota {dimensions = array<i32: 1>} : vector<16x32xi32>
    %c0_i32_25 = arith.constant 0 : i32
    %83 = vector.broadcast %c0_i32_25 : i32 to vector<16x32xi32>
    %84 = arith.cmpi eq, %82, %83 : vector<16x32xi32>
    %85 = vector.broadcast %81 : vector<16x1xf32> to vector<16x32xf32>
    %86 = arith.mulf %25, %85 : vector<16x32xf32>
    %87 = vector.shape_cast %68 : vector<16x1xf32> to vector<16x1xf32>
    %88 = vector.broadcast %87 : vector<16x1xf32> to vector<16x32xf32>
    %89 = arith.select %84, %88, %86 : vector<16x32xi1>, vector<16x32xf32>
    %90 = vector.shape_cast %89 : vector<16x32xf32> to vector<2x8x32xf32>
    %91 = vector.extract_strided_slice %26 {offsets = [0, 0], sizes = [16, 1], strides = [1, 1]} : vector<16x32xf32> to vector<16x1xf32>
    %92 = arith.negf %91 : vector<16x1xf32>
    %93 = math.exp %92 : vector<16x1xf32>
    %cst_26 = arith.constant 1.000000e+00 : f32
    %94 = vector.broadcast %cst_26 : f32 to vector<16x1xf32>
    %95 = arith.addf %94, %93 : vector<16x1xf32>
    %96 = arith.divf %94, %95 : vector<16x1xf32>
    %97 = vector.broadcast %15 : f32 to vector<16x1xf32>
    %98 = arith.mulf %96, %97 : vector<16x1xf32>
    %cst_27 = arith.constant 1.100000e+00 : f32
    %99 = vector.broadcast %cst_27 : f32 to vector<16x1xf32>
    %100 = arith.addf %98, %99 : vector<16x1xf32>
    %101 = arith.mulf %26, %26 : vector<16x32xf32>
    %cst_28 = arith.constant dense<0.000000e+00> : vector<16xf32>
    %102 = vector.multi_reduction <add>, %101, %cst_28 [1] : vector<16x32xf32> to vector<16xf32>
    %103 = vector.shape_cast %102 : vector<16xf32> to vector<16x1xf32>
    %104 = arith.mulf %91, %91 : vector<16x1xf32>
    %105 = arith.subf %103, %104 : vector<16x1xf32>
    %cst_29 = arith.constant 9.99999993E-9 : f32
    %106 = vector.broadcast %cst_29 : f32 to vector<16x1xf32>
    %107 = arith.maximumf %105, %106 : vector<16x1xf32>
    %108 = arith.mulf %100, %100 : vector<16x1xf32>
    %cst_30 = arith.constant 1.000000e+00 : f32
    %109 = vector.broadcast %cst_30 : f32 to vector<16x1xf32>
    %110 = arith.subf %108, %109 : vector<16x1xf32>
    %111 = tpu.reciprocal %107 {approx = true} : vector<16x1xf32> -> vector<16x1xf32>
    %112 = arith.mulf %110, %111 : vector<16x1xf32>
    %113 = math.sqrt %112 : vector<16x1xf32>
    %114 = tpu.iota {dimensions = array<i32: 1>} : vector<16x32xi32>
    %c0_i32_31 = arith.constant 0 : i32
    %115 = vector.broadcast %c0_i32_31 : i32 to vector<16x32xi32>
    %116 = arith.cmpi eq, %114, %115 : vector<16x32xi32>
    %117 = vector.broadcast %113 : vector<16x1xf32> to vector<16x32xf32>
    %118 = arith.mulf %26, %117 : vector<16x32xf32>
    %119 = vector.shape_cast %100 : vector<16x1xf32> to vector<16x1xf32>
    %120 = vector.broadcast %119 : vector<16x1xf32> to vector<16x32xf32>
    %121 = arith.select %116, %120, %118 : vector<16x32xi1>, vector<16x32xf32>
    %122 = vector.shape_cast %121 : vector<16x32xf32> to vector<2x8x32xf32>
    %123 = vector.extract_strided_slice %58 {offsets = [0, 0, 0], sizes = [2, 8, 8], strides = [1, 1, 1]} : vector<2x8x32xf32> to vector<2x8x8xf32>
    %124 = vector.extract_strided_slice %90 {offsets = [0, 0, 0], sizes = [2, 8, 8], strides = [1, 1, 1]} : vector<2x8x32xf32> to vector<2x8x8xf32>
    %125 = vector.extract_strided_slice %122 {offsets = [0, 0, 0], sizes = [2, 8, 8], strides = [1, 1, 1]} : vector<2x8x32xf32> to vector<2x8x8xf32>
    %126 = tpu.iota {dimensions = array<i32: 2>} : vector<2x8x8xi32>
    %c0_i32_32 = arith.constant 0 : i32
    %127 = vector.broadcast %c0_i32_32 : i32 to vector<2x8x8xi32>
    %128 = arith.cmpi eq, %126, %127 : vector<2x8x8xi32>
    %cst_33 = arith.constant 0.000000e+00 : f32
    %129 = vector.broadcast %cst_33 : f32 to vector<2x8x8xf32>
    %130 = arith.subf %129, %124 : vector<2x8x8xf32>
    %131 = arith.select %128, %130, %124 : vector<2x8x8xi1>, vector<2x8x8xf32>
    "tpu.trace_start"() <{level = 10 : i32, message = "bqd,bkd->bqk"}> : () -> ()
    %cst_34 = arith.constant dense<0.000000e+00> : vector<2x8x8xf32>
    %132 = tpu.matmul %123, %131, %cst_34 {dimension_numbers = #tpu.dot_dimension_numbers<[2], [2], [1], [1], [0, 0, 0, 1, 1, 1], [0], [0]>} : vector<2x8x8xf32>, vector<2x8x8xf32>, vector<2x8x8xf32> -> vector<2x8x8xf32>
    "tpu.trace_stop"() : () -> ()
    %cst_35 = arith.constant 2.000000e+00 : f32
    %133 = vector.broadcast %cst_35 : f32 to vector<2x8x8xf32>
    %134 = arith.mulf %133, %132 : vector<2x8x8xf32>
    %cst_36 = arith.constant 2.000000e+00 : f32
    %135 = vector.broadcast %cst_36 : f32 to vector<2x8x8xf32>
    %136 = arith.addf %135, %134 : vector<2x8x8xf32>
    %137 = vector.broadcast %16 : f32 to vector<2x8x8xf32>
    %138 = arith.mulf %136, %137 : vector<2x8x8xf32>
    %139 = vector.broadcast %17 : f32 to vector<2x8x8xf32>
    %140 = arith.addf %138, %139 : vector<2x8x8xf32>
    %141 = arith.addf %140, %12 : vector<2x8x8xf32>
    %cst_37 = arith.constant dense<0xFF800000> : vector<2x8xf32>
    %142 = vector.multi_reduction <maximumf>, %141, %cst_37 [2] : vector<2x8x8xf32> to vector<2x8xf32>
    %143 = vector.shape_cast %142 : vector<2x8xf32> to vector<2x8x1xf32>
    %144 = vector.broadcast %143 : vector<2x8x1xf32> to vector<2x8x8xf32>
    %145 = arith.subf %141, %144 : vector<2x8x8xf32>
    %146 = math.exp %145 : vector<2x8x8xf32>
    %cst_38 = arith.constant dense<0.000000e+00> : vector<2x8xf32>
    %147 = vector.multi_reduction <add>, %146, %cst_38 [2] : vector<2x8x8xf32> to vector<2x8xf32>
    %148 = vector.shape_cast %147 : vector<2x8xf32> to vector<2x8x1xf32>
    %149 = tpu.reciprocal %148 {approx = true} : vector<2x8x1xf32> -> vector<2x8x1xf32>
    %150 = vector.broadcast %149 : vector<2x8x1xf32> to vector<2x8x8xf32>
    %151 = arith.mulf %146, %150 : vector<2x8x8xf32>
    "tpu.trace_start"() <{level = 10 : i32, message = "bqk,bkd->bqd"}> : () -> ()
    %cst_39 = arith.constant dense<0.000000e+00> : vector<2x8x8xf32>
    %152 = tpu.matmul %151, %125, %cst_39 {dimension_numbers = #tpu.dot_dimension_numbers<[2], [1], [1], [2], [0, 0, 0, 1, 1, 2], [0], [0]>} : vector<2x8x8xf32>, vector<2x8x8xf32>, vector<2x8x8xf32> -> vector<2x8x8xf32>
    "tpu.trace_stop"() : () -> ()
    %153 = vector.extract_strided_slice %152 {offsets = [0, 0, 0], sizes = [2, 8, 1], strides = [1, 1, 1]} : vector<2x8x8xf32> to vector<2x8x1xf32>
    %154 = arith.mulf %152, %152 : vector<2x8x8xf32>
    %cst_40 = arith.constant dense<0.000000e+00> : vector<2x8xf32>
    %155 = vector.multi_reduction <add>, %154, %cst_40 [2] : vector<2x8x8xf32> to vector<2x8xf32>
    %156 = vector.shape_cast %155 : vector<2x8xf32> to vector<2x8x1xf32>
    %cst_41 = arith.constant 2.000000e+00 : f32
    %157 = vector.broadcast %cst_41 : f32 to vector<2x8x1xf32>
    %158 = arith.mulf %157, %153 : vector<2x8x1xf32>
    %159 = arith.mulf %158, %153 : vector<2x8x1xf32>
    %160 = arith.subf %156, %159 : vector<2x8x1xf32>
    %161 = math.absf %160 : vector<2x8x1xf32>
    %cst_42 = arith.constant 9.99999993E-9 : f32
    %162 = vector.broadcast %cst_42 : f32 to vector<2x8x1xf32>
    %163 = arith.maximumf %161, %162 : vector<2x8x1xf32>
    %164 = math.rsqrt %163 : vector<2x8x1xf32>
    %165 = vector.broadcast %164 : vector<2x8x1xf32> to vector<2x8x8xf32>
    %166 = arith.mulf %152, %165 : vector<2x8x8xf32>
    %c0_43 = arith.constant 0 : index
    %c0_44 = arith.constant 0 : index
    %c0_45 = arith.constant 0 : index
    %167 = vector.load %arg23[%c0_43, %c0_44, %c0_45] : memref<2x8x32xf32, #tpu.memory_space<vmem>>, vector<2x8x8xf32>
    tpu.vector_store %arg23[%c0_43, %c0_44, %c0_45], %166 {strides = array<i32>} : memref<2x8x32xf32, #tpu.memory_space<vmem>>, vector<2x8x8xf32>,
    %168 = vector.extract_strided_slice %58 {offsets = [0, 0, 8], sizes = [2, 8, 8], strides = [1, 1, 1]} : vector<2x8x32xf32> to vector<2x8x8xf32>
    %169 = vector.extract_strided_slice %90 {offsets = [0, 0, 8], sizes = [2, 8, 8], strides = [1, 1, 1]} : vector<2x8x32xf32> to vector<2x8x8xf32>
    %170 = vector.extract_strided_slice %122 {offsets = [0, 0, 8], sizes = [2, 8, 8], strides = [1, 1, 1]} : vector<2x8x32xf32> to vector<2x8x8xf32>
    %171 = tpu.iota {dimensions = array<i32: 2>} : vector<2x8x8xi32>
    %c0_i32_46 = arith.constant 0 : i32
    %172 = vector.broadcast %c0_i32_46 : i32 to vector<2x8x8xi32>
    %173 = arith.cmpi eq, %171, %172 : vector<2x8x8xi32>
    %cst_47 = arith.constant 0.000000e+00 : f32
    %174 = vector.broadcast %cst_47 : f32 to vector<2x8x8xf32>
    %175 = arith.subf %174, %169 : vector<2x8x8xf32>
    %176 = arith.select %173, %175, %169 : vector<2x8x8xi1>, vector<2x8x8xf32>
    "tpu.trace_start"() <{level = 10 : i32, message = "bqd,bkd->bqk"}> : () -> ()
    %cst_48 = arith.constant dense<0.000000e+00> : vector<2x8x8xf32>
    %177 = tpu.matmul %168, %176, %cst_48 {dimension_numbers = #tpu.dot_dimension_numbers<[2], [2], [1], [1], [0, 0, 0, 1, 1, 1], [0], [0]>} : vector<2x8x8xf32>, vector<2x8x8xf32>, vector<2x8x8xf32> -> vector<2x8x8xf32>
    "tpu.trace_stop"() : () -> ()
    %cst_49 = arith.constant 2.000000e+00 : f32
    %178 = vector.broadcast %cst_49 : f32 to vector<2x8x8xf32>
    %179 = arith.mulf %178, %177 : vector<2x8x8xf32>
    %cst_50 = arith.constant 2.000000e+00 : f32
    %180 = vector.broadcast %cst_50 : f32 to vector<2x8x8xf32>
    %181 = arith.addf %180, %179 : vector<2x8x8xf32>
    %182 = vector.broadcast %16 : f32 to vector<2x8x8xf32>
    %183 = arith.mulf %181, %182 : vector<2x8x8xf32>
    %184 = vector.broadcast %17 : f32 to vector<2x8x8xf32>
    %185 = arith.addf %183, %184 : vector<2x8x8xf32>
    %186 = arith.addf %185, %12 : vector<2x8x8xf32>
    %cst_51 = arith.constant dense<0xFF800000> : vector<2x8xf32>
    %187 = vector.multi_reduction <maximumf>, %186, %cst_51 [2] : vector<2x8x8xf32> to vector<2x8xf32>
    %188 = vector.shape_cast %187 : vector<2x8xf32> to vector<2x8x1xf32>
    %189 = vector.broadcast %188 : vector<2x8x1xf32> to vector<2x8x8xf32>
    %190 = arith.subf %186, %189 : vector<2x8x8xf32>
    %191 = math.exp %190 : vector<2x8x8xf32>
    %cst_52 = arith.constant dense<0.000000e+00> : vector<2x8xf32>
    %192 = vector.multi_reduction <add>, %191, %cst_52 [2] : vector<2x8x8xf32> to vector<2x8xf32>
    %193 = vector.shape_cast %192 : vector<2x8xf32> to vector<2x8x1xf32>
    %194 = tpu.reciprocal %193 {approx = true} : vector<2x8x1xf32> -> vector<2x8x1xf32>
    %195 = vector.broadcast %194 : vector<2x8x1xf32> to vector<2x8x8xf32>
    %196 = arith.mulf %191, %195 : vector<2x8x8xf32>
    "tpu.trace_start"() <{level = 10 : i32, message = "bqk,bkd->bqd"}> : () -> ()
    %cst_53 = arith.constant dense<0.000000e+00> : vector<2x8x8xf32>
    %197 = tpu.matmul %196, %170, %cst_53 {dimension_numbers = #tpu.dot_dimension_numbers<[2], [1], [1], [2], [0, 0, 0, 1, 1, 2], [0], [0]>} : vector<2x8x8xf32>, vector<2x8x8xf32>, vector<2x8x8xf32> -> vector<2x8x8xf32>
    "tpu.trace_stop"() : () -> ()
    %198 = vector.extract_strided_slice %197 {offsets = [0, 0, 0], sizes = [2, 8, 1], strides = [1, 1, 1]} : vector<2x8x8xf32> to vector<2x8x1xf32>
    %199 = arith.mulf %197, %197 : vector<2x8x8xf32>
    %cst_54 = arith.constant dense<0.000000e+00> : vector<2x8xf32>
    %200 = vector.multi_reduction <add>, %199, %cst_54 [2] : vector<2x8x8xf32> to vector<2x8xf32>
    %201 = vector.shape_cast %200 : vector<2x8xf32> to vector<2x8x1xf32>
    %cst_55 = arith.constant 2.000000e+00 : f32
    %202 = vector.broadcast %cst_55 : f32 to vector<2x8x1xf32>
    %203 = arith.mulf %202, %198 : vector<2x8x1xf32>
    %204 = arith.mulf %203, %198 : vector<2x8x1xf32>
    %205 = arith.subf %201, %204 : vector<2x8x1xf32>
    %206 = math.absf %205 : vector<2x8x1xf32>
    %cst_56 = arith.constant 9.99999993E-9 : f32
    %207 = vector.broadcast %cst_56 : f32 to vector<2x8x1xf32>
    %208 = arith.maximumf %206, %207 : vector<2x8x1xf32>
    %209 = math.rsqrt %208 : vector<2x8x1xf32>
    %210 = vector.broadcast %209 : vector<2x8x1xf32> to vector<2x8x8xf32>
    %211 = arith.mulf %197, %210 : vector<2x8x8xf32>
    %c0_57 = arith.constant 0 : index
    %c0_58 = arith.constant 0 : index
    %c8 = arith.constant 8 : index
    %212 = vector.load %arg23[%c0_57, %c0_58, %c8] : memref<2x8x32xf32, #tpu.memory_space<vmem>>, vector<2x8x8xf32>
    tpu.vector_store %arg23[%c0_57, %c0_58, %c8], %211 {strides = array<i32>} : memref<2x8x32xf32, #tpu.memory_space<vmem>>, vector<2x8x8xf32>,
    %213 = vector.extract_strided_slice %58 {offsets = [0, 0, 16], sizes = [2, 8, 8], strides = [1, 1, 1]} : vector<2x8x32xf32> to vector<2x8x8xf32>
    %214 = vector.extract_strided_slice %90 {offsets = [0, 0, 16], sizes = [2, 8, 8], strides = [1, 1, 1]} : vector<2x8x32xf32> to vector<2x8x8xf32>
    %215 = vector.extract_strided_slice %122 {offsets = [0, 0, 16], sizes = [2, 8, 8], strides = [1, 1, 1]} : vector<2x8x32xf32> to vector<2x8x8xf32>
    %216 = tpu.iota {dimensions = array<i32: 2>} : vector<2x8x8xi32>
    %c0_i32_59 = arith.constant 0 : i32
    %217 = vector.broadcast %c0_i32_59 : i32 to vector<2x8x8xi32>
    %218 = arith.cmpi eq, %216, %217 : vector<2x8x8xi32>
    %cst_60 = arith.constant 0.000000e+00 : f32
    %219 = vector.broadcast %cst_60 : f32 to vector<2x8x8xf32>
    %220 = arith.subf %219, %214 : vector<2x8x8xf32>
    %221 = arith.select %218, %220, %214 : vector<2x8x8xi1>, vector<2x8x8xf32>
    "tpu.trace_start"() <{level = 10 : i32, message = "bqd,bkd->bqk"}> : () -> ()
    %cst_61 = arith.constant dense<0.000000e+00> : vector<2x8x8xf32>
    %222 = tpu.matmul %213, %221, %cst_61 {dimension_numbers = #tpu.dot_dimension_numbers<[2], [2], [1], [1], [0, 0, 0, 1, 1, 1], [0], [0]>} : vector<2x8x8xf32>, vector<2x8x8xf32>, vector<2x8x8xf32> -> vector<2x8x8xf32>
    "tpu.trace_stop"() : () -> ()
    %cst_62 = arith.constant 2.000000e+00 : f32
    %223 = vector.broadcast %cst_62 : f32 to vector<2x8x8xf32>
    %224 = arith.mulf %223, %222 : vector<2x8x8xf32>
    %cst_63 = arith.constant 2.000000e+00 : f32
    %225 = vector.broadcast %cst_63 : f32 to vector<2x8x8xf32>
    %226 = arith.addf %225, %224 : vector<2x8x8xf32>
    %227 = vector.broadcast %16 : f32 to vector<2x8x8xf32>
    %228 = arith.mulf %226, %227 : vector<2x8x8xf32>
    %229 = vector.broadcast %17 : f32 to vector<2x8x8xf32>
    %230 = arith.addf %228, %229 : vector<2x8x8xf32>
    %231 = arith.addf %230, %12 : vector<2x8x8xf32>
    %cst_64 = arith.constant dense<0xFF800000> : vector<2x8xf32>
    %232 = vector.multi_reduction <maximumf>, %231, %cst_64 [2] : vector<2x8x8xf32> to vector<2x8xf32>
    %233 = vector.shape_cast %232 : vector<2x8xf32> to vector<2x8x1xf32>
    %234 = vector.broadcast %233 : vector<2x8x1xf32> to vector<2x8x8xf32>
    %235 = arith.subf %231, %234 : vector<2x8x8xf32>
    %236 = math.exp %235 : vector<2x8x8xf32>
    %cst_65 = arith.constant dense<0.000000e+00> : vector<2x8xf32>
    %237 = vector.multi_reduction <add>, %236, %cst_65 [2] : vector<2x8x8xf32> to vector<2x8xf32>
    %238 = vector.shape_cast %237 : vector<2x8xf32> to vector<2x8x1xf32>
    %239 = tpu.reciprocal %238 {approx = true} : vector<2x8x1xf32> -> vector<2x8x1xf32>
    %240 = vector.broadcast %239 : vector<2x8x1xf32> to vector<2x8x8xf32>
    %241 = arith.mulf %236, %240 : vector<2x8x8xf32>
    "tpu.trace_start"() <{level = 10 : i32, message = "bqk,bkd->bqd"}> : () -> ()
    %cst_66 = arith.constant dense<0.000000e+00> : vector<2x8x8xf32>
    %242 = tpu.matmul %241, %215, %cst_66 {dimension_numbers = #tpu.dot_dimension_numbers<[2], [1], [1], [2], [0, 0, 0, 1, 1, 2], [0], [0]>} : vector<2x8x8xf32>, vector<2x8x8xf32>, vector<2x8x8xf32> -> vector<2x8x8xf32>
    "tpu.trace_stop"() : () -> ()
    %243 = vector.extract_strided_slice %242 {offsets = [0, 0, 0], sizes = [2, 8, 1], strides = [1, 1, 1]} : vector<2x8x8xf32> to vector<2x8x1xf32>
    %244 = arith.mulf %242, %242 : vector<2x8x8xf32>
    %cst_67 = arith.constant dense<0.000000e+00> : vector<2x8xf32>
    %245 = vector.multi_reduction <add>, %244, %cst_67 [2] : vector<2x8x8xf32> to vector<2x8xf32>
    %246 = vector.shape_cast %245 : vector<2x8xf32> to vector<2x8x1xf32>
    %cst_68 = arith.constant 2.000000e+00 : f32
    %247 = vector.broadcast %cst_68 : f32 to vector<2x8x1xf32>
    %248 = arith.mulf %247, %243 : vector<2x8x1xf32>
    %249 = arith.mulf %248, %243 : vector<2x8x1xf32>
    %250 = arith.subf %246, %249 : vector<2x8x1xf32>
    %251 = math.absf %250 : vector<2x8x1xf32>
    %cst_69 = arith.constant 9.99999993E-9 : f32
    %252 = vector.broadcast %cst_69 : f32 to vector<2x8x1xf32>
    %253 = arith.maximumf %251, %252 : vector<2x8x1xf32>
    %254 = math.rsqrt %253 : vector<2x8x1xf32>
    %255 = vector.broadcast %254 : vector<2x8x1xf32> to vector<2x8x8xf32>
    %256 = arith.mulf %242, %255 : vector<2x8x8xf32>
    %c0_70 = arith.constant 0 : index
    %c0_71 = arith.constant 0 : index
    %c16 = arith.constant 16 : index
    %257 = vector.load %arg23[%c0_70, %c0_71, %c16] : memref<2x8x32xf32, #tpu.memory_space<vmem>>, vector<2x8x8xf32>
    tpu.vector_store %arg23[%c0_70, %c0_71, %c16], %256 {strides = array<i32>} : memref<2x8x32xf32, #tpu.memory_space<vmem>>, vector<2x8x8xf32>,
    %258 = vector.extract_strided_slice %58 {offsets = [0, 0, 24], sizes = [2, 8, 8], strides = [1, 1, 1]} : vector<2x8x32xf32> to vector<2x8x8xf32>
    %259 = vector.extract_strided_slice %90 {offsets = [0, 0, 24], sizes = [2, 8, 8], strides = [1, 1, 1]} : vector<2x8x32xf32> to vector<2x8x8xf32>
    %260 = vector.extract_strided_slice %122 {offsets = [0, 0, 24], sizes = [2, 8, 8], strides = [1, 1, 1]} : vector<2x8x32xf32> to vector<2x8x8xf32>
    %261 = tpu.iota {dimensions = array<i32: 2>} : vector<2x8x8xi32>
    %c0_i32_72 = arith.constant 0 : i32
    %262 = vector.broadcast %c0_i32_72 : i32 to vector<2x8x8xi32>
    %263 = arith.cmpi eq, %261, %262 : vector<2x8x8xi32>
    %cst_73 = arith.constant 0.000000e+00 : f32
    %264 = vector.broadcast %cst_73 : f32 to vector<2x8x8xf32>
    %265 = arith.subf %264, %259 : vector<2x8x8xf32>
    %266 = arith.select %263, %265, %259 : vector<2x8x8xi1>, vector<2x8x8xf32>
    "tpu.trace_start"() <{level = 10 : i32, message = "bqd,bkd->bqk"}> : () -> ()
    %cst_74 = arith.constant dense<0.000000e+00> : vector<2x8x8xf32>
    %267 = tpu.matmul %258, %266, %cst_74 {dimension_numbers = #tpu.dot_dimension_numbers<[2], [2], [1], [1], [0, 0, 0, 1, 1, 1], [0], [0]>} : vector<2x8x8xf32>, vector<2x8x8xf32>, vector<2x8x8xf32> -> vector<2x8x8xf32>
    "tpu.trace_stop"() : () -> ()
    %cst_75 = arith.constant 2.000000e+00 : f32
    %268 = vector.broadcast %cst_75 : f32 to vector<2x8x8xf32>
    %269 = arith.mulf %268, %267 : vector<2x8x8xf32>
    %cst_76 = arith.constant 2.000000e+00 : f32
    %270 = vector.broadcast %cst_76 : f32 to vector<2x8x8xf32>
    %271 = arith.addf %270, %269 : vector<2x8x8xf32>
    %272 = vector.broadcast %16 : f32 to vector<2x8x8xf32>
    %273 = arith.mulf %271, %272 : vector<2x8x8xf32>
    %274 = vector.broadcast %17 : f32 to vector<2x8x8xf32>
    %275 = arith.addf %273, %274 : vector<2x8x8xf32>
    %276 = arith.addf %275, %12 : vector<2x8x8xf32>
    %cst_77 = arith.constant dense<0xFF800000> : vector<2x8xf32>
    %277 = vector.multi_reduction <maximumf>, %276, %cst_77 [2] : vector<2x8x8xf32> to vector<2x8xf32>
    %278 = vector.shape_cast %277 : vector<2x8xf32> to vector<2x8x1xf32>
    %279 = vector.broadcast %278 : vector<2x8x1xf32> to vector<2x8x8xf32>
    %280 = arith.subf %276, %279 : vector<2x8x8xf32>
    %281 = math.exp %280 : vector<2x8x8xf32>
    %cst_78 = arith.constant dense<0.000000e+00> : vector<2x8xf32>
    %282 = vector.multi_reduction <add>, %281, %cst_78 [2] : vector<2x8x8xf32> to vector<2x8xf32>
    %283 = vector.shape_cast %282 : vector<2x8xf32> to vector<2x8x1xf32>
    %284 = tpu.reciprocal %283 {approx = true} : vector<2x8x1xf32> -> vector<2x8x1xf32>
    %285 = vector.broadcast %284 : vector<2x8x1xf32> to vector<2x8x8xf32>
    %286 = arith.mulf %281, %285 : vector<2x8x8xf32>
    "tpu.trace_start"() <{level = 10 : i32, message = "bqk,bkd->bqd"}> : () -> ()
    %cst_79 = arith.constant dense<0.000000e+00> : vector<2x8x8xf32>
    %287 = tpu.matmul %286, %260, %cst_79 {dimension_numbers = #tpu.dot_dimension_numbers<[2], [1], [1], [2], [0, 0, 0, 1, 1, 2], [0], [0]>} : vector<2x8x8xf32>, vector<2x8x8xf32>, vector<2x8x8xf32> -> vector<2x8x8xf32>
    "tpu.trace_stop"() : () -> ()
    %288 = vector.extract_strided_slice %287 {offsets = [0, 0, 0], sizes = [2, 8, 1], strides = [1, 1, 1]} : vector<2x8x8xf32> to vector<2x8x1xf32>
    %289 = arith.mulf %287, %287 : vector<2x8x8xf32>
    %cst_80 = arith.constant dense<0.000000e+00> : vector<2x8xf32>
    %290 = vector.multi_reduction <add>, %289, %cst_80 [2] : vector<2x8x8xf32> to vector<2x8xf32>
    %291 = vector.shape_cast %290 : vector<2x8xf32> to vector<2x8x1xf32>
    %cst_81 = arith.constant 2.000000e+00 : f32
    %292 = vector.broadcast %cst_81 : f32 to vector<2x8x1xf32>
    %293 = arith.mulf %292, %288 : vector<2x8x1xf32>
    %294 = arith.mulf %293, %288 : vector<2x8x1xf32>
    %295 = arith.subf %291, %294 : vector<2x8x1xf32>
    %296 = math.absf %295 : vector<2x8x1xf32>
    %cst_82 = arith.constant 9.99999993E-9 : f32
    %297 = vector.broadcast %cst_82 : f32 to vector<2x8x1xf32>
    %298 = arith.maximumf %296, %297 : vector<2x8x1xf32>
    %299 = math.rsqrt %298 : vector<2x8x1xf32>
    %300 = vector.broadcast %299 : vector<2x8x1xf32> to vector<2x8x8xf32>
    %301 = arith.mulf %287, %300 : vector<2x8x8xf32>
    %c0_83 = arith.constant 0 : index
    %c0_84 = arith.constant 0 : index
    %c24 = arith.constant 24 : index
    %302 = vector.load %arg23[%c0_83, %c0_84, %c24] : memref<2x8x32xf32, #tpu.memory_space<vmem>>, vector<2x8x8xf32>
    tpu.vector_store %arg23[%c0_83, %c0_84, %c24], %301 {strides = array<i32>} : memref<2x8x32xf32, #tpu.memory_space<vmem>>, vector<2x8x8xf32>,
    %c0_85 = arith.constant 0 : index
    %c0_86 = arith.constant 0 : index
    %c0_87 = arith.constant 0 : index
    %303 = vector.load %arg23[%c0_85, %c0_86, %c0_87] : memref<2x8x32xf32, #tpu.memory_space<vmem>>, vector<2x8x32xf32>
    %304 = vector.shape_cast %303 : vector<2x8x32xf32> to vector<16x32xf32>
    %c0_88 = arith.constant 0 : index
    %c0_89 = arith.constant 0 : index
    %305 = vector.load %arg14[%c0_88, %c0_89] : memref<32x32xf32, #tpu.memory_space<vmem>>, vector<32x32xf32>
    %c15 = arith.constant 15 : index
    %306 = memref.load %arg0[%c15] : memref<21xf32, #tpu.memory_space<smem>>
    %307 = vector.shape_cast %2 : vector<2x8x32xf32> to vector<16x32xf32>
    %cst_90 = arith.constant dense<0.000000e+00> : vector<16x32xf32>
    %308 = tpu.matmul %304, %305, %cst_90 {dimension_numbers = #tpu.dot_dimension_numbers<[1], [0], [0], [1], [0, 0, 1, 1], [], []>} : vector<16x32xf32>, vector<32x32xf32>, vector<16x32xf32> -> vector<16x32xf32>
    %309 = arith.addf %308, %307 : vector<16x32xf32>
    %310 = vector.extract_strided_slice %309 {offsets = [0, 0], sizes = [16, 1], strides = [1, 1]} : vector<16x32xf32> to vector<16x1xf32>
    %311 = arith.negf %310 : vector<16x1xf32>
    %312 = math.exp %311 : vector<16x1xf32>
    %cst_91 = arith.constant 1.000000e+00 : f32
    %313 = vector.broadcast %cst_91 : f32 to vector<16x1xf32>
    %314 = arith.addf %313, %312 : vector<16x1xf32>
    %315 = arith.divf %313, %314 : vector<16x1xf32>
    %316 = vector.broadcast %306 : f32 to vector<16x1xf32>
    %317 = arith.mulf %315, %316 : vector<16x1xf32>
    %cst_92 = arith.constant 1.100000e+00 : f32
    %318 = vector.broadcast %cst_92 : f32 to vector<16x1xf32>
    %319 = arith.addf %317, %318 : vector<16x1xf32>
    %320 = arith.mulf %309, %309 : vector<16x32xf32>
    %cst_93 = arith.constant dense<0.000000e+00> : vector<16xf32>
    %321 = vector.multi_reduction <add>, %320, %cst_93 [1] : vector<16x32xf32> to vector<16xf32>
    %322 = vector.shape_cast %321 : vector<16xf32> to vector<16x1xf32>
    %323 = arith.mulf %310, %310 : vector<16x1xf32>
    %324 = arith.subf %322, %323 : vector<16x1xf32>
    %cst_94 = arith.constant 9.99999993E-9 : f32
    %325 = vector.broadcast %cst_94 : f32 to vector<16x1xf32>
    %326 = arith.maximumf %324, %325 : vector<16x1xf32>
    %327 = arith.mulf %319, %319 : vector<16x1xf32>
    %cst_95 = arith.constant 1.000000e+00 : f32
    %328 = vector.broadcast %cst_95 : f32 to vector<16x1xf32>
    %329 = arith.subf %327, %328 : vector<16x1xf32>
    %330 = tpu.reciprocal %326 {approx = true} : vector<16x1xf32> -> vector<16x1xf32>
    %331 = arith.mulf %329, %330 : vector<16x1xf32>
    %332 = math.sqrt %331 : vector<16x1xf32>
    %333 = tpu.iota {dimensions = array<i32: 1>} : vector<16x32xi32>
    %c0_i32_96 = arith.constant 0 : i32
    %334 = vector.broadcast %c0_i32_96 : i32 to vector<16x32xi32>
    %335 = arith.cmpi eq, %333, %334 : vector<16x32xi32>
    %336 = vector.broadcast %332 : vector<16x1xf32> to vector<16x32xf32>
    %337 = arith.mulf %309, %336 : vector<16x32xf32>
    %338 = vector.shape_cast %319 : vector<16x1xf32> to vector<16x1xf32>
    %339 = vector.broadcast %338 : vector<16x1xf32> to vector<16x32xf32>
    %340 = arith.select %335, %339, %337 : vector<16x32xi1>, vector<16x32xf32>
    %341 = vector.shape_cast %340 : vector<16x32xf32> to vector<2x8x32xf32>
    %c0_97 = arith.constant 0 : index
    %c0_98 = arith.constant 0 : index
    %c0_99 = arith.constant 0 : index
    %342 = vector.load %arg3[%c0_97, %c0_98, %c0_99] : memref<2x16x32xf32, #tpu.memory_space<vmem>>, vector<2x16x32xf32>
    %c0_100 = arith.constant 0 : index
    %c0_101 = arith.constant 0 : index
    %c0_102 = arith.constant 0 : index
    %343 = vector.load %arg6[%c0_100, %c0_101, %c0_102] : memref<2x8x16xf32, #tpu.memory_space<vmem>>, vector<2x8x16xf32>
    %c5 = arith.constant 5 : index
    %344 = memref.load %arg0[%c5] : memref<21xf32, #tpu.memory_space<smem>>
    %c6 = arith.constant 6 : index
    %345 = memref.load %arg0[%c6] : memref<21xf32, #tpu.memory_space<smem>>
    %c7 = arith.constant 7 : index
    %346 = memref.load %arg0[%c7] : memref<21xf32, #tpu.memory_space<smem>>
    %c8_103 = arith.constant 8 : index
    %347 = memref.load %arg0[%c8_103] : memref<21xf32, #tpu.memory_space<smem>>
    %c9 = arith.constant 9 : index
    %348 = memref.load %arg0[%c9] : memref<21xf32, #tpu.memory_space<smem>>
    %c0_104 = arith.constant 0 : index
    %c0_105 = arith.constant 0 : index
    %349 = vector.load %arg10[%c0_104, %c0_105] : memref<32x96xf32, #tpu.memory_space<vmem>>, vector<32x96xf32>
    %c0_106 = arith.constant 0 : index
    %c0_107 = arith.constant 0 : index
    %350 = vector.load %arg11[%c0_106, %c0_107] : memref<1x96xf32, #tpu.memory_space<vmem>>, vector<1x96xf32>
    %351 = vector.shape_cast %341 : vector<2x8x32xf32> to vector<16x32xf32>
    %352 = vector.shape_cast %342 : vector<2x16x32xf32> to vector<32x32xf32>
    %353 = vector.extract_strided_slice %349 {offsets = [0, 0], sizes = [32, 32], strides = [1, 1]} : vector<32x96xf32> to vector<32x32xf32>
    %cst_108 = arith.constant dense<0.000000e+00> : vector<16x32xf32>
    %354 = tpu.matmul %351, %353, %cst_108 {dimension_numbers = #tpu.dot_dimension_numbers<[1], [0], [0], [1], [0, 0, 1, 1], [], []>} : vector<16x32xf32>, vector<32x32xf32>, vector<16x32xf32> -> vector<16x32xf32>
    %355 = vector.extract_strided_slice %350 {offsets = [0, 0], sizes = [1, 32], strides = [1, 1]} : vector<1x96xf32> to vector<1x32xf32>
    %356 = vector.broadcast %355 : vector<1x32xf32> to vector<16x32xf32>
    %357 = arith.addf %354, %356 : vector<16x32xf32>
    %358 = vector.extract_strided_slice %349 {offsets = [0, 32], sizes = [32, 64], strides = [1, 1]} : vector<32x96xf32> to vector<32x64xf32>
    %cst_109 = arith.constant dense<0.000000e+00> : vector<32x64xf32>
    %359 = tpu.matmul %352, %358, %cst_109 {dimension_numbers = #tpu.dot_dimension_numbers<[1], [0], [0], [1], [0, 0, 1, 1], [], []>} : vector<32x32xf32>, vector<32x64xf32>, vector<32x64xf32> -> vector<32x64xf32>
    %360 = vector.extract_strided_slice %350 {offsets = [0, 32], sizes = [1, 64], strides = [1, 1]} : vector<1x96xf32> to vector<1x64xf32>
    %361 = vector.broadcast %360 : vector<1x64xf32> to vector<32x64xf32>
    %362 = arith.addf %359, %361 : vector<32x64xf32>
    %363 = vector.extract_strided_slice %362 {offsets = [0, 0], sizes = [32, 32], strides = [1, 1]} : vector<32x64xf32> to vector<32x32xf32>
    %364 = vector.extract_strided_slice %362 {offsets = [0, 32], sizes = [32, 32], strides = [1, 1]} : vector<32x64xf32> to vector<32x32xf32>
    %365 = vector.extract_strided_slice %357 {offsets = [0, 0], sizes = [16, 1], strides = [1, 1]} : vector<16x32xf32> to vector<16x1xf32>
    %366 = arith.negf %365 : vector<16x1xf32>
    %367 = math.exp %366 : vector<16x1xf32>
    %cst_110 = arith.constant 1.000000e+00 : f32
    %368 = vector.broadcast %cst_110 : f32 to vector<16x1xf32>
    %369 = arith.addf %368, %367 : vector<16x1xf32>
    %370 = arith.divf %368, %369 : vector<16x1xf32>
    %371 = vector.broadcast %344 : f32 to vector<16x1xf32>
    %372 = arith.mulf %370, %371 : vector<16x1xf32>
    %cst_111 = arith.constant 1.100000e+00 : f32
    %373 = vector.broadcast %cst_111 : f32 to vector<16x1xf32>
    %374 = arith.addf %372, %373 : vector<16x1xf32>
    %375 = arith.mulf %357, %357 : vector<16x32xf32>
    %cst_112 = arith.constant dense<0.000000e+00> : vector<16xf32>
    %376 = vector.multi_reduction <add>, %375, %cst_112 [1] : vector<16x32xf32> to vector<16xf32>
    %377 = vector.shape_cast %376 : vector<16xf32> to vector<16x1xf32>
    %378 = arith.mulf %365, %365 : vector<16x1xf32>
    %379 = arith.subf %377, %378 : vector<16x1xf32>
    %cst_113 = arith.constant 9.99999993E-9 : f32
    %380 = vector.broadcast %cst_113 : f32 to vector<16x1xf32>
    %381 = arith.maximumf %379, %380 : vector<16x1xf32>
    %382 = arith.mulf %374, %374 : vector<16x1xf32>
    %cst_114 = arith.constant 1.000000e+00 : f32
    %383 = vector.broadcast %cst_114 : f32 to vector<16x1xf32>
    %384 = arith.subf %382, %383 : vector<16x1xf32>
    %385 = tpu.reciprocal %381 {approx = true} : vector<16x1xf32> -> vector<16x1xf32>
    %386 = arith.mulf %384, %385 : vector<16x1xf32>
    %387 = math.sqrt %386 : vector<16x1xf32>
    %388 = tpu.iota {dimensions = array<i32: 1>} : vector<16x32xi32>
    %c0_i32_115 = arith.constant 0 : i32
    %389 = vector.broadcast %c0_i32_115 : i32 to vector<16x32xi32>
    %390 = arith.cmpi eq, %388, %389 : vector<16x32xi32>
    %391 = vector.broadcast %387 : vector<16x1xf32> to vector<16x32xf32>
    %392 = arith.mulf %357, %391 : vector<16x32xf32>
    %393 = vector.shape_cast %374 : vector<16x1xf32> to vector<16x1xf32>
    %394 = vector.broadcast %393 : vector<16x1xf32> to vector<16x32xf32>
    %395 = arith.select %390, %394, %392 : vector<16x32xi1>, vector<16x32xf32>
    %396 = vector.shape_cast %395 : vector<16x32xf32> to vector<2x8x32xf32>
    %397 = vector.extract_strided_slice %363 {offsets = [0, 0], sizes = [32, 1], strides = [1, 1]} : vector<32x32xf32> to vector<32x1xf32>
    %398 = arith.negf %397 : vector<32x1xf32>
    %399 = math.exp %398 : vector<32x1xf32>
    %cst_116 = arith.constant 1.000000e+00 : f32
    %400 = vector.broadcast %cst_116 : f32 to vector<32x1xf32>
    %401 = arith.addf %400, %399 : vector<32x1xf32>
    %402 = arith.divf %400, %401 : vector<32x1xf32>
    %403 = vector.broadcast %345 : f32 to vector<32x1xf32>
    %404 = arith.mulf %402, %403 : vector<32x1xf32>
    %cst_117 = arith.constant 1.100000e+00 : f32
    %405 = vector.broadcast %cst_117 : f32 to vector<32x1xf32>
    %406 = arith.addf %404, %405 : vector<32x1xf32>
    %407 = arith.mulf %363, %363 : vector<32x32xf32>
    %cst_118 = arith.constant dense<0.000000e+00> : vector<32xf32>
    %408 = vector.multi_reduction <add>, %407, %cst_118 [1] : vector<32x32xf32> to vector<32xf32>
    %409 = vector.shape_cast %408 : vector<32xf32> to vector<32x1xf32>
    %410 = arith.mulf %397, %397 : vector<32x1xf32>
    %411 = arith.subf %409, %410 : vector<32x1xf32>
    %cst_119 = arith.constant 9.99999993E-9 : f32
    %412 = vector.broadcast %cst_119 : f32 to vector<32x1xf32>
    %413 = arith.maximumf %411, %412 : vector<32x1xf32>
    %414 = arith.mulf %406, %406 : vector<32x1xf32>
    %cst_120 = arith.constant 1.000000e+00 : f32
    %415 = vector.broadcast %cst_120 : f32 to vector<32x1xf32>
    %416 = arith.subf %414, %415 : vector<32x1xf32>
    %417 = tpu.reciprocal %413 {approx = true} : vector<32x1xf32> -> vector<32x1xf32>
    %418 = arith.mulf %416, %417 : vector<32x1xf32>
    %419 = math.sqrt %418 : vector<32x1xf32>
    %420 = tpu.iota {dimensions = array<i32: 1>} : vector<32x32xi32>
    %c0_i32_121 = arith.constant 0 : i32
    %421 = vector.broadcast %c0_i32_121 : i32 to vector<32x32xi32>
    %422 = arith.cmpi eq, %420, %421 : vector<32x32xi32>
    %423 = vector.broadcast %419 : vector<32x1xf32> to vector<32x32xf32>
    %424 = arith.mulf %363, %423 : vector<32x32xf32>
    %425 = vector.shape_cast %406 : vector<32x1xf32> to vector<32x1xf32>
    %426 = vector.broadcast %425 : vector<32x1xf32> to vector<32x32xf32>
    %427 = arith.select %422, %426, %424 : vector<32x32xi1>, vector<32x32xf32>
    %428 = vector.shape_cast %427 : vector<32x32xf32> to vector<2x16x32xf32>
    %429 = vector.extract_strided_slice %364 {offsets = [0, 0], sizes = [32, 1], strides = [1, 1]} : vector<32x32xf32> to vector<32x1xf32>
    %430 = arith.negf %429 : vector<32x1xf32>
    %431 = math.exp %430 : vector<32x1xf32>
    %cst_122 = arith.constant 1.000000e+00 : f32
    %432 = vector.broadcast %cst_122 : f32 to vector<32x1xf32>
    %433 = arith.addf %432, %431 : vector<32x1xf32>
    %434 = arith.divf %432, %433 : vector<32x1xf32>
    %435 = vector.broadcast %346 : f32 to vector<32x1xf32>
    %436 = arith.mulf %434, %435 : vector<32x1xf32>
    %cst_123 = arith.constant 1.100000e+00 : f32
    %437 = vector.broadcast %cst_123 : f32 to vector<32x1xf32>
    %438 = arith.addf %436, %437 : vector<32x1xf32>
    %439 = arith.mulf %364, %364 : vector<32x32xf32>
    %cst_124 = arith.constant dense<0.000000e+00> : vector<32xf32>
    %440 = vector.multi_reduction <add>, %439, %cst_124 [1] : vector<32x32xf32> to vector<32xf32>
    %441 = vector.shape_cast %440 : vector<32xf32> to vector<32x1xf32>
    %442 = arith.mulf %429, %429 : vector<32x1xf32>
    %443 = arith.subf %441, %442 : vector<32x1xf32>
    %cst_125 = arith.constant 9.99999993E-9 : f32
    %444 = vector.broadcast %cst_125 : f32 to vector<32x1xf32>
    %445 = arith.maximumf %443, %444 : vector<32x1xf32>
    %446 = arith.mulf %438, %438 : vector<32x1xf32>
    %cst_126 = arith.constant 1.000000e+00 : f32
    %447 = vector.broadcast %cst_126 : f32 to vector<32x1xf32>
    %448 = arith.subf %446, %447 : vector<32x1xf32>
    %449 = tpu.reciprocal %445 {approx = true} : vector<32x1xf32> -> vector<32x1xf32>
    %450 = arith.mulf %448, %449 : vector<32x1xf32>
    %451 = math.sqrt %450 : vector<32x1xf32>
    %452 = tpu.iota {dimensions = array<i32: 1>} : vector<32x32xi32>
    %c0_i32_127 = arith.constant 0 : i32
    %453 = vector.broadcast %c0_i32_127 : i32 to vector<32x32xi32>
    %454 = arith.cmpi eq, %452, %453 : vector<32x32xi32>
    %455 = vector.broadcast %451 : vector<32x1xf32> to vector<32x32xf32>
    %456 = arith.mulf %364, %455 : vector<32x32xf32>
    %457 = vector.shape_cast %438 : vector<32x1xf32> to vector<32x1xf32>
    %458 = vector.broadcast %457 : vector<32x1xf32> to vector<32x32xf32>
    %459 = arith.select %454, %458, %456 : vector<32x32xi1>, vector<32x32xf32>
    %460 = vector.shape_cast %459 : vector<32x32xf32> to vector<2x16x32xf32>
    %461 = vector.extract_strided_slice %396 {offsets = [0, 0, 0], sizes = [2, 8, 8], strides = [1, 1, 1]} : vector<2x8x32xf32> to vector<2x8x8xf32>
    %462 = vector.extract_strided_slice %428 {offsets = [0, 0, 0], sizes = [2, 16, 8], strides = [1, 1, 1]} : vector<2x16x32xf32> to vector<2x16x8xf32>
    %463 = vector.extract_strided_slice %460 {offsets = [0, 0, 0], sizes = [2, 16, 8], strides = [1, 1, 1]} : vector<2x16x32xf32> to vector<2x16x8xf32>
    %464 = tpu.iota {dimensions = array<i32: 2>} : vector<2x16x8xi32>
    %c0_i32_128 = arith.constant 0 : i32
    %465 = vector.broadcast %c0_i32_128 : i32 to vector<2x16x8xi32>
    %466 = arith.cmpi eq, %464, %465 : vector<2x16x8xi32>
    %cst_129 = arith.constant 0.000000e+00 : f32
    %467 = vector.broadcast %cst_129 : f32 to vector<2x16x8xf32>
    %468 = arith.subf %467, %462 : vector<2x16x8xf32>
    %469 = arith.select %466, %468, %462 : vector<2x16x8xi1>, vector<2x16x8xf32>
    "tpu.trace_start"() <{level = 10 : i32, message = "bqd,bkd->bqk"}> : () -> ()
    %cst_130 = arith.constant dense<0.000000e+00> : vector<2x8x16xf32>
    %470 = tpu.matmul %461, %469, %cst_130 {dimension_numbers = #tpu.dot_dimension_numbers<[2], [2], [1], [1], [0, 0, 0, 1, 1, 1], [0], [0]>} : vector<2x8x8xf32>, vector<2x16x8xf32>, vector<2x8x16xf32> -> vector<2x8x16xf32>
    "tpu.trace_stop"() : () -> ()
    %cst_131 = arith.constant 2.000000e+00 : f32
    %471 = vector.broadcast %cst_131 : f32 to vector<2x8x16xf32>
    %472 = arith.mulf %471, %470 : vector<2x8x16xf32>
    %cst_132 = arith.constant 2.000000e+00 : f32
    %473 = vector.broadcast %cst_132 : f32 to vector<2x8x16xf32>
    %474 = arith.addf %473, %472 : vector<2x8x16xf32>
    %475 = vector.broadcast %347 : f32 to vector<2x8x16xf32>
    %476 = arith.mulf %474, %475 : vector<2x8x16xf32>
    %477 = vector.broadcast %348 : f32 to vector<2x8x16xf32>
    %478 = arith.addf %476, %477 : vector<2x8x16xf32>
    %479 = arith.addf %478, %343 : vector<2x8x16xf32>
    %cst_133 = arith.constant dense<0xFF800000> : vector<2x8xf32>
    %480 = vector.multi_reduction <maximumf>, %479, %cst_133 [2] : vector<2x8x16xf32> to vector<2x8xf32>
    %481 = vector.shape_cast %480 : vector<2x8xf32> to vector<2x8x1xf32>
    %482 = vector.broadcast %481 : vector<2x8x1xf32> to vector<2x8x16xf32>
    %483 = arith.subf %479, %482 : vector<2x8x16xf32>
    %484 = math.exp %483 : vector<2x8x16xf32>
    %cst_134 = arith.constant dense<0.000000e+00> : vector<2x8xf32>
    %485 = vector.multi_reduction <add>, %484, %cst_134 [2] : vector<2x8x16xf32> to vector<2x8xf32>
    %486 = vector.shape_cast %485 : vector<2x8xf32> to vector<2x8x1xf32>
    %487 = tpu.reciprocal %486 {approx = true} : vector<2x8x1xf32> -> vector<2x8x1xf32>
    %488 = vector.broadcast %487 : vector<2x8x1xf32> to vector<2x8x16xf32>
    %489 = arith.mulf %484, %488 : vector<2x8x16xf32>
    "tpu.trace_start"() <{level = 10 : i32, message = "bqk,bkd->bqd"}> : () -> ()
    %cst_135 = arith.constant dense<0.000000e+00> : vector<2x8x8xf32>
    %490 = tpu.matmul %489, %463, %cst_135 {dimension_numbers = #tpu.dot_dimension_numbers<[2], [1], [1], [2], [0, 0, 0, 1, 1, 2], [0], [0]>} : vector<2x8x16xf32>, vector<2x16x8xf32>, vector<2x8x8xf32> -> vector<2x8x8xf32>
    "tpu.trace_stop"() : () -> ()
    %491 = vector.extract_strided_slice %490 {offsets = [0, 0, 0], sizes = [2, 8, 1], strides = [1, 1, 1]} : vector<2x8x8xf32> to vector<2x8x1xf32>
    %492 = arith.mulf %490, %490 : vector<2x8x8xf32>
    %cst_136 = arith.constant dense<0.000000e+00> : vector<2x8xf32>
    %493 = vector.multi_reduction <add>, %492, %cst_136 [2] : vector<2x8x8xf32> to vector<2x8xf32>
    %494 = vector.shape_cast %493 : vector<2x8xf32> to vector<2x8x1xf32>
    %cst_137 = arith.constant 2.000000e+00 : f32
    %495 = vector.broadcast %cst_137 : f32 to vector<2x8x1xf32>
    %496 = arith.mulf %495, %491 : vector<2x8x1xf32>
    %497 = arith.mulf %496, %491 : vector<2x8x1xf32>
    %498 = arith.subf %494, %497 : vector<2x8x1xf32>
    %499 = math.absf %498 : vector<2x8x1xf32>
    %cst_138 = arith.constant 9.99999993E-9 : f32
    %500 = vector.broadcast %cst_138 : f32 to vector<2x8x1xf32>
    %501 = arith.maximumf %499, %500 : vector<2x8x1xf32>
    %502 = math.rsqrt %501 : vector<2x8x1xf32>
    %503 = vector.broadcast %502 : vector<2x8x1xf32> to vector<2x8x8xf32>
    %504 = arith.mulf %490, %503 : vector<2x8x8xf32>
    %c0_139 = arith.constant 0 : index
    %c0_140 = arith.constant 0 : index
    %c0_141 = arith.constant 0 : index
    %505 = vector.load %arg23[%c0_139, %c0_140, %c0_141] : memref<2x8x32xf32, #tpu.memory_space<vmem>>, vector<2x8x8xf32>
    tpu.vector_store %arg23[%c0_139, %c0_140, %c0_141], %504 {strides = array<i32>} : memref<2x8x32xf32, #tpu.memory_space<vmem>>, vector<2x8x8xf32>,
    %506 = vector.extract_strided_slice %396 {offsets = [0, 0, 8], sizes = [2, 8, 8], strides = [1, 1, 1]} : vector<2x8x32xf32> to vector<2x8x8xf32>
    %507 = vector.extract_strided_slice %428 {offsets = [0, 0, 8], sizes = [2, 16, 8], strides = [1, 1, 1]} : vector<2x16x32xf32> to vector<2x16x8xf32>
    %508 = vector.extract_strided_slice %460 {offsets = [0, 0, 8], sizes = [2, 16, 8], strides = [1, 1, 1]} : vector<2x16x32xf32> to vector<2x16x8xf32>
    %509 = tpu.iota {dimensions = array<i32: 2>} : vector<2x16x8xi32>
    %c0_i32_142 = arith.constant 0 : i32
    %510 = vector.broadcast %c0_i32_142 : i32 to vector<2x16x8xi32>
    %511 = arith.cmpi eq, %509, %510 : vector<2x16x8xi32>
    %cst_143 = arith.constant 0.000000e+00 : f32
    %512 = vector.broadcast %cst_143 : f32 to vector<2x16x8xf32>
    %513 = arith.subf %512, %507 : vector<2x16x8xf32>
    %514 = arith.select %511, %513, %507 : vector<2x16x8xi1>, vector<2x16x8xf32>
    "tpu.trace_start"() <{level = 10 : i32, message = "bqd,bkd->bqk"}> : () -> ()
    %cst_144 = arith.constant dense<0.000000e+00> : vector<2x8x16xf32>
    %515 = tpu.matmul %506, %514, %cst_144 {dimension_numbers = #tpu.dot_dimension_numbers<[2], [2], [1], [1], [0, 0, 0, 1, 1, 1], [0], [0]>} : vector<2x8x8xf32>, vector<2x16x8xf32>, vector<2x8x16xf32> -> vector<2x8x16xf32>
    "tpu.trace_stop"() : () -> ()
    %cst_145 = arith.constant 2.000000e+00 : f32
    %516 = vector.broadcast %cst_145 : f32 to vector<2x8x16xf32>
    %517 = arith.mulf %516, %515 : vector<2x8x16xf32>
    %cst_146 = arith.constant 2.000000e+00 : f32
    %518 = vector.broadcast %cst_146 : f32 to vector<2x8x16xf32>
    %519 = arith.addf %518, %517 : vector<2x8x16xf32>
    %520 = vector.broadcast %347 : f32 to vector<2x8x16xf32>
    %521 = arith.mulf %519, %520 : vector<2x8x16xf32>
    %522 = vector.broadcast %348 : f32 to vector<2x8x16xf32>
    %523 = arith.addf %521, %522 : vector<2x8x16xf32>
    %524 = arith.addf %523, %343 : vector<2x8x16xf32>
    %cst_147 = arith.constant dense<0xFF800000> : vector<2x8xf32>
    %525 = vector.multi_reduction <maximumf>, %524, %cst_147 [2] : vector<2x8x16xf32> to vector<2x8xf32>
    %526 = vector.shape_cast %525 : vector<2x8xf32> to vector<2x8x1xf32>
    %527 = vector.broadcast %526 : vector<2x8x1xf32> to vector<2x8x16xf32>
    %528 = arith.subf %524, %527 : vector<2x8x16xf32>
    %529 = math.exp %528 : vector<2x8x16xf32>
    %cst_148 = arith.constant dense<0.000000e+00> : vector<2x8xf32>
    %530 = vector.multi_reduction <add>, %529, %cst_148 [2] : vector<2x8x16xf32> to vector<2x8xf32>
    %531 = vector.shape_cast %530 : vector<2x8xf32> to vector<2x8x1xf32>
    %532 = tpu.reciprocal %531 {approx = true} : vector<2x8x1xf32> -> vector<2x8x1xf32>
    %533 = vector.broadcast %532 : vector<2x8x1xf32> to vector<2x8x16xf32>
    %534 = arith.mulf %529, %533 : vector<2x8x16xf32>
    "tpu.trace_start"() <{level = 10 : i32, message = "bqk,bkd->bqd"}> : () -> ()
    %cst_149 = arith.constant dense<0.000000e+00> : vector<2x8x8xf32>
    %535 = tpu.matmul %534, %508, %cst_149 {dimension_numbers = #tpu.dot_dimension_numbers<[2], [1], [1], [2], [0, 0, 0, 1, 1, 2], [0], [0]>} : vector<2x8x16xf32>, vector<2x16x8xf32>, vector<2x8x8xf32> -> vector<2x8x8xf32>
    "tpu.trace_stop"() : () -> ()
    %536 = vector.extract_strided_slice %535 {offsets = [0, 0, 0], sizes = [2, 8, 1], strides = [1, 1, 1]} : vector<2x8x8xf32> to vector<2x8x1xf32>
    %537 = arith.mulf %535, %535 : vector<2x8x8xf32>
    %cst_150 = arith.constant dense<0.000000e+00> : vector<2x8xf32>
    %538 = vector.multi_reduction <add>, %537, %cst_150 [2] : vector<2x8x8xf32> to vector<2x8xf32>
    %539 = vector.shape_cast %538 : vector<2x8xf32> to vector<2x8x1xf32>
    %cst_151 = arith.constant 2.000000e+00 : f32
    %540 = vector.broadcast %cst_151 : f32 to vector<2x8x1xf32>
    %541 = arith.mulf %540, %536 : vector<2x8x1xf32>
    %542 = arith.mulf %541, %536 : vector<2x8x1xf32>
    %543 = arith.subf %539, %542 : vector<2x8x1xf32>
    %544 = math.absf %543 : vector<2x8x1xf32>
    %cst_152 = arith.constant 9.99999993E-9 : f32
    %545 = vector.broadcast %cst_152 : f32 to vector<2x8x1xf32>
    %546 = arith.maximumf %544, %545 : vector<2x8x1xf32>
    %547 = math.rsqrt %546 : vector<2x8x1xf32>
    %548 = vector.broadcast %547 : vector<2x8x1xf32> to vector<2x8x8xf32>
    %549 = arith.mulf %535, %548 : vector<2x8x8xf32>
    %c0_153 = arith.constant 0 : index
    %c0_154 = arith.constant 0 : index
    %c8_155 = arith.constant 8 : index
    %550 = vector.load %arg23[%c0_153, %c0_154, %c8_155] : memref<2x8x32xf32, #tpu.memory_space<vmem>>, vector<2x8x8xf32>
    tpu.vector_store %arg23[%c0_153, %c0_154, %c8_155], %549 {strides = array<i32>} : memref<2x8x32xf32, #tpu.memory_space<vmem>>, vector<2x8x8xf32>,
    %551 = vector.extract_strided_slice %396 {offsets = [0, 0, 16], sizes = [2, 8, 8], strides = [1, 1, 1]} : vector<2x8x32xf32> to vector<2x8x8xf32>
    %552 = vector.extract_strided_slice %428 {offsets = [0, 0, 16], sizes = [2, 16, 8], strides = [1, 1, 1]} : vector<2x16x32xf32> to vector<2x16x8xf32>
    %553 = vector.extract_strided_slice %460 {offsets = [0, 0, 16], sizes = [2, 16, 8], strides = [1, 1, 1]} : vector<2x16x32xf32> to vector<2x16x8xf32>
    %554 = tpu.iota {dimensions = array<i32: 2>} : vector<2x16x8xi32>
    %c0_i32_156 = arith.constant 0 : i32
    %555 = vector.broadcast %c0_i32_156 : i32 to vector<2x16x8xi32>
    %556 = arith.cmpi eq, %554, %555 : vector<2x16x8xi32>
    %cst_157 = arith.constant 0.000000e+00 : f32
    %557 = vector.broadcast %cst_157 : f32 to vector<2x16x8xf32>
    %558 = arith.subf %557, %552 : vector<2x16x8xf32>
    %559 = arith.select %556, %558, %552 : vector<2x16x8xi1>, vector<2x16x8xf32>
    "tpu.trace_start"() <{level = 10 : i32, message = "bqd,bkd->bqk"}> : () -> ()
    %cst_158 = arith.constant dense<0.000000e+00> : vector<2x8x16xf32>
    %560 = tpu.matmul %551, %559, %cst_158 {dimension_numbers = #tpu.dot_dimension_numbers<[2], [2], [1], [1], [0, 0, 0, 1, 1, 1], [0], [0]>} : vector<2x8x8xf32>, vector<2x16x8xf32>, vector<2x8x16xf32> -> vector<2x8x16xf32>
    "tpu.trace_stop"() : () -> ()
    %cst_159 = arith.constant 2.000000e+00 : f32
    %561 = vector.broadcast %cst_159 : f32 to vector<2x8x16xf32>
    %562 = arith.mulf %561, %560 : vector<2x8x16xf32>
    %cst_160 = arith.constant 2.000000e+00 : f32
    %563 = vector.broadcast %cst_160 : f32 to vector<2x8x16xf32>
    %564 = arith.addf %563, %562 : vector<2x8x16xf32>
    %565 = vector.broadcast %347 : f32 to vector<2x8x16xf32>
    %566 = arith.mulf %564, %565 : vector<2x8x16xf32>
    %567 = vector.broadcast %348 : f32 to vector<2x8x16xf32>
    %568 = arith.addf %566, %567 : vector<2x8x16xf32>
    %569 = arith.addf %568, %343 : vector<2x8x16xf32>
    %cst_161 = arith.constant dense<0xFF800000> : vector<2x8xf32>
    %570 = vector.multi_reduction <maximumf>, %569, %cst_161 [2] : vector<2x8x16xf32> to vector<2x8xf32>
    %571 = vector.shape_cast %570 : vector<2x8xf32> to vector<2x8x1xf32>
    %572 = vector.broadcast %571 : vector<2x8x1xf32> to vector<2x8x16xf32>
    %573 = arith.subf %569, %572 : vector<2x8x16xf32>
    %574 = math.exp %573 : vector<2x8x16xf32>
    %cst_162 = arith.constant dense<0.000000e+00> : vector<2x8xf32>
    %575 = vector.multi_reduction <add>, %574, %cst_162 [2] : vector<2x8x16xf32> to vector<2x8xf32>
    %576 = vector.shape_cast %575 : vector<2x8xf32> to vector<2x8x1xf32>
    %577 = tpu.reciprocal %576 {approx = true} : vector<2x8x1xf32> -> vector<2x8x1xf32>
    %578 = vector.broadcast %577 : vector<2x8x1xf32> to vector<2x8x16xf32>
    %579 = arith.mulf %574, %578 : vector<2x8x16xf32>
    "tpu.trace_start"() <{level = 10 : i32, message = "bqk,bkd->bqd"}> : () -> ()
    %cst_163 = arith.constant dense<0.000000e+00> : vector<2x8x8xf32>
    %580 = tpu.matmul %579, %553, %cst_163 {dimension_numbers = #tpu.dot_dimension_numbers<[2], [1], [1], [2], [0, 0, 0, 1, 1, 2], [0], [0]>} : vector<2x8x16xf32>, vector<2x16x8xf32>, vector<2x8x8xf32> -> vector<2x8x8xf32>
    "tpu.trace_stop"() : () -> ()
    %581 = vector.extract_strided_slice %580 {offsets = [0, 0, 0], sizes = [2, 8, 1], strides = [1, 1, 1]} : vector<2x8x8xf32> to vector<2x8x1xf32>
    %582 = arith.mulf %580, %580 : vector<2x8x8xf32>
    %cst_164 = arith.constant dense<0.000000e+00> : vector<2x8xf32>
    %583 = vector.multi_reduction <add>, %582, %cst_164 [2] : vector<2x8x8xf32> to vector<2x8xf32>
    %584 = vector.shape_cast %583 : vector<2x8xf32> to vector<2x8x1xf32>
    %cst_165 = arith.constant 2.000000e+00 : f32
    %585 = vector.broadcast %cst_165 : f32 to vector<2x8x1xf32>
    %586 = arith.mulf %585, %581 : vector<2x8x1xf32>
    %587 = arith.mulf %586, %581 : vector<2x8x1xf32>
    %588 = arith.subf %584, %587 : vector<2x8x1xf32>
    %589 = math.absf %588 : vector<2x8x1xf32>
    %cst_166 = arith.constant 9.99999993E-9 : f32
    %590 = vector.broadcast %cst_166 : f32 to vector<2x8x1xf32>
    %591 = arith.maximumf %589, %590 : vector<2x8x1xf32>
    %592 = math.rsqrt %591 : vector<2x8x1xf32>
    %593 = vector.broadcast %592 : vector<2x8x1xf32> to vector<2x8x8xf32>
    %594 = arith.mulf %580, %593 : vector<2x8x8xf32>
    %c0_167 = arith.constant 0 : index
    %c0_168 = arith.constant 0 : index
    %c16_169 = arith.constant 16 : index
    %595 = vector.load %arg23[%c0_167, %c0_168, %c16_169] : memref<2x8x32xf32, #tpu.memory_space<vmem>>, vector<2x8x8xf32>
    tpu.vector_store %arg23[%c0_167, %c0_168, %c16_169], %594 {strides = array<i32>} : memref<2x8x32xf32, #tpu.memory_space<vmem>>, vector<2x8x8xf32>,
    %596 = vector.extract_strided_slice %396 {offsets = [0, 0, 24], sizes = [2, 8, 8], strides = [1, 1, 1]} : vector<2x8x32xf32> to vector<2x8x8xf32>
    %597 = vector.extract_strided_slice %428 {offsets = [0, 0, 24], sizes = [2, 16, 8], strides = [1, 1, 1]} : vector<2x16x32xf32> to vector<2x16x8xf32>
    %598 = vector.extract_strided_slice %460 {offsets = [0, 0, 24], sizes = [2, 16, 8], strides = [1, 1, 1]} : vector<2x16x32xf32> to vector<2x16x8xf32>
    %599 = tpu.iota {dimensions = array<i32: 2>} : vector<2x16x8xi32>
    %c0_i32_170 = arith.constant 0 : i32
    %600 = vector.broadcast %c0_i32_170 : i32 to vector<2x16x8xi32>
    %601 = arith.cmpi eq, %599, %600 : vector<2x16x8xi32>
    %cst_171 = arith.constant 0.000000e+00 : f32
    %602 = vector.broadcast %cst_171 : f32 to vector<2x16x8xf32>
    %603 = arith.subf %602, %597 : vector<2x16x8xf32>
    %604 = arith.select %601, %603, %597 : vector<2x16x8xi1>, vector<2x16x8xf32>
    "tpu.trace_start"() <{level = 10 : i32, message = "bqd,bkd->bqk"}> : () -> ()
    %cst_172 = arith.constant dense<0.000000e+00> : vector<2x8x16xf32>
    %605 = tpu.matmul %596, %604, %cst_172 {dimension_numbers = #tpu.dot_dimension_numbers<[2], [2], [1], [1], [0, 0, 0, 1, 1, 1], [0], [0]>} : vector<2x8x8xf32>, vector<2x16x8xf32>, vector<2x8x16xf32> -> vector<2x8x16xf32>
    "tpu.trace_stop"() : () -> ()
    %cst_173 = arith.constant 2.000000e+00 : f32
    %606 = vector.broadcast %cst_173 : f32 to vector<2x8x16xf32>
    %607 = arith.mulf %606, %605 : vector<2x8x16xf32>
    %cst_174 = arith.constant 2.000000e+00 : f32
    %608 = vector.broadcast %cst_174 : f32 to vector<2x8x16xf32>
    %609 = arith.addf %608, %607 : vector<2x8x16xf32>
    %610 = vector.broadcast %347 : f32 to vector<2x8x16xf32>
    %611 = arith.mulf %609, %610 : vector<2x8x16xf32>
    %612 = vector.broadcast %348 : f32 to vector<2x8x16xf32>
    %613 = arith.addf %611, %612 : vector<2x8x16xf32>
    %614 = arith.addf %613, %343 : vector<2x8x16xf32>
    %cst_175 = arith.constant dense<0xFF800000> : vector<2x8xf32>
    %615 = vector.multi_reduction <maximumf>, %614, %cst_175 [2] : vector<2x8x16xf32> to vector<2x8xf32>
    %616 = vector.shape_cast %615 : vector<2x8xf32> to vector<2x8x1xf32>
    %617 = vector.broadcast %616 : vector<2x8x1xf32> to vector<2x8x16xf32>
    %618 = arith.subf %614, %617 : vector<2x8x16xf32>
    %619 = math.exp %618 : vector<2x8x16xf32>
    %cst_176 = arith.constant dense<0.000000e+00> : vector<2x8xf32>
    %620 = vector.multi_reduction <add>, %619, %cst_176 [2] : vector<2x8x16xf32> to vector<2x8xf32>
    %621 = vector.shape_cast %620 : vector<2x8xf32> to vector<2x8x1xf32>
    %622 = tpu.reciprocal %621 {approx = true} : vector<2x8x1xf32> -> vector<2x8x1xf32>
    %623 = vector.broadcast %622 : vector<2x8x1xf32> to vector<2x8x16xf32>
    %624 = arith.mulf %619, %623 : vector<2x8x16xf32>
    "tpu.trace_start"() <{level = 10 : i32, message = "bqk,bkd->bqd"}> : () -> ()
    %cst_177 = arith.constant dense<0.000000e+00> : vector<2x8x8xf32>
    %625 = tpu.matmul %624, %598, %cst_177 {dimension_numbers = #tpu.dot_dimension_numbers<[2], [1], [1], [2], [0, 0, 0, 1, 1, 2], [0], [0]>} : vector<2x8x16xf32>, vector<2x16x8xf32>, vector<2x8x8xf32> -> vector<2x8x8xf32>
    "tpu.trace_stop"() : () -> ()
    %626 = vector.extract_strided_slice %625 {offsets = [0, 0, 0], sizes = [2, 8, 1], strides = [1, 1, 1]} : vector<2x8x8xf32> to vector<2x8x1xf32>
    %627 = arith.mulf %625, %625 : vector<2x8x8xf32>
    %cst_178 = arith.constant dense<0.000000e+00> : vector<2x8xf32>
    %628 = vector.multi_reduction <add>, %627, %cst_178 [2] : vector<2x8x8xf32> to vector<2x8xf32>
    %629 = vector.shape_cast %628 : vector<2x8xf32> to vector<2x8x1xf32>
    %cst_179 = arith.constant 2.000000e+00 : f32
    %630 = vector.broadcast %cst_179 : f32 to vector<2x8x1xf32>
    %631 = arith.mulf %630, %626 : vector<2x8x1xf32>
    %632 = arith.mulf %631, %626 : vector<2x8x1xf32>
    %633 = arith.subf %629, %632 : vector<2x8x1xf32>
    %634 = math.absf %633 : vector<2x8x1xf32>
    %cst_180 = arith.constant 9.99999993E-9 : f32
    %635 = vector.broadcast %cst_180 : f32 to vector<2x8x1xf32>
    %636 = arith.maximumf %634, %635 : vector<2x8x1xf32>
    %637 = math.rsqrt %636 : vector<2x8x1xf32>
    %638 = vector.broadcast %637 : vector<2x8x1xf32> to vector<2x8x8xf32>
    %639 = arith.mulf %625, %638 : vector<2x8x8xf32>
    %c0_181 = arith.constant 0 : index
    %c0_182 = arith.constant 0 : index
    %c24_183 = arith.constant 24 : index
    %640 = vector.load %arg23[%c0_181, %c0_182, %c24_183] : memref<2x8x32xf32, #tpu.memory_space<vmem>>, vector<2x8x8xf32>
    tpu.vector_store %arg23[%c0_181, %c0_182, %c24_183], %639 {strides = array<i32>} : memref<2x8x32xf32, #tpu.memory_space<vmem>>, vector<2x8x8xf32>,
    %c0_184 = arith.constant 0 : index
    %c0_185 = arith.constant 0 : index
    %c0_186 = arith.constant 0 : index
    %641 = vector.load %arg23[%c0_184, %c0_185, %c0_186] : memref<2x8x32xf32, #tpu.memory_space<vmem>>, vector<2x8x32xf32>
    %642 = vector.shape_cast %641 : vector<2x8x32xf32> to vector<16x32xf32>
    %c0_187 = arith.constant 0 : index
    %c0_188 = arith.constant 0 : index
    %643 = vector.load %arg15[%c0_187, %c0_188] : memref<32x32xf32, #tpu.memory_space<vmem>>, vector<32x32xf32>
    %c16_189 = arith.constant 16 : index
    %644 = memref.load %arg0[%c16_189] : memref<21xf32, #tpu.memory_space<smem>>
    %cst_190 = arith.constant dense<0.000000e+00> : vector<16x32xf32>
    %645 = tpu.matmul %642, %643, %cst_190 {dimension_numbers = #tpu.dot_dimension_numbers<[1], [0], [0], [1], [0, 0, 1, 1], [], []>} : vector<16x32xf32>, vector<32x32xf32>, vector<16x32xf32> -> vector<16x32xf32>
    %646 = arith.addf %645, %340 : vector<16x32xf32>
    %647 = vector.extract_strided_slice %646 {offsets = [0, 0], sizes = [16, 1], strides = [1, 1]} : vector<16x32xf32> to vector<16x1xf32>
    %648 = arith.negf %647 : vector<16x1xf32>
    %649 = math.exp %648 : vector<16x1xf32>
    %cst_191 = arith.constant 1.000000e+00 : f32
    %650 = vector.broadcast %cst_191 : f32 to vector<16x1xf32>
    %651 = arith.addf %650, %649 : vector<16x1xf32>
    %652 = arith.divf %650, %651 : vector<16x1xf32>
    %653 = vector.broadcast %644 : f32 to vector<16x1xf32>
    %654 = arith.mulf %652, %653 : vector<16x1xf32>
    %cst_192 = arith.constant 1.100000e+00 : f32
    %655 = vector.broadcast %cst_192 : f32 to vector<16x1xf32>
    %656 = arith.addf %654, %655 : vector<16x1xf32>
    %657 = arith.mulf %646, %646 : vector<16x32xf32>
    %cst_193 = arith.constant dense<0.000000e+00> : vector<16xf32>
    %658 = vector.multi_reduction <add>, %657, %cst_193 [1] : vector<16x32xf32> to vector<16xf32>
    %659 = vector.shape_cast %658 : vector<16xf32> to vector<16x1xf32>
    %660 = arith.mulf %647, %647 : vector<16x1xf32>
    %661 = arith.subf %659, %660 : vector<16x1xf32>
    %cst_194 = arith.constant 9.99999993E-9 : f32
    %662 = vector.broadcast %cst_194 : f32 to vector<16x1xf32>
    %663 = arith.maximumf %661, %662 : vector<16x1xf32>
    %664 = arith.mulf %656, %656 : vector<16x1xf32>
    %cst_195 = arith.constant 1.000000e+00 : f32
    %665 = vector.broadcast %cst_195 : f32 to vector<16x1xf32>
    %666 = arith.subf %664, %665 : vector<16x1xf32>
    %667 = tpu.reciprocal %663 {approx = true} : vector<16x1xf32> -> vector<16x1xf32>
    %668 = arith.mulf %666, %667 : vector<16x1xf32>
    %669 = math.sqrt %668 : vector<16x1xf32>
    %670 = tpu.iota {dimensions = array<i32: 1>} : vector<16x32xi32>
    %c0_i32_196 = arith.constant 0 : i32
    %671 = vector.broadcast %c0_i32_196 : i32 to vector<16x32xi32>
    %672 = arith.cmpi eq, %670, %671 : vector<16x32xi32>
    %673 = vector.broadcast %669 : vector<16x1xf32> to vector<16x32xf32>
    %674 = arith.mulf %646, %673 : vector<16x32xf32>
    %675 = vector.shape_cast %656 : vector<16x1xf32> to vector<16x1xf32>
    %676 = vector.broadcast %675 : vector<16x1xf32> to vector<16x32xf32>
    %677 = arith.select %672, %676, %674 : vector<16x32xi1>, vector<16x32xf32>
    %678 = vector.shape_cast %677 : vector<16x32xf32> to vector<2x8x32xf32>
    %c0_197 = arith.constant 0 : index
    %c0_198 = arith.constant 0 : index
    %c0_199 = arith.constant 0 : index
    %679 = vector.load %arg4[%c0_197, %c0_198, %c0_199] : memref<2x16x32xf32, #tpu.memory_space<vmem>>, vector<2x16x32xf32>
    %c0_200 = arith.constant 0 : index
    %c0_201 = arith.constant 0 : index
    %c0_202 = arith.constant 0 : index
    %680 = vector.load %arg7[%c0_200, %c0_201, %c0_202] : memref<2x8x16xf32, #tpu.memory_space<vmem>>, vector<2x8x16xf32>
    %c10 = arith.constant 10 : index
    %681 = memref.load %arg0[%c10] : memref<21xf32, #tpu.memory_space<smem>>
    %c11 = arith.constant 11 : index
    %682 = memref.load %arg0[%c11] : memref<21xf32, #tpu.memory_space<smem>>
    %c12 = arith.constant 12 : index
    %683 = memref.load %arg0[%c12] : memref<21xf32, #tpu.memory_space<smem>>
    %c13 = arith.constant 13 : index
    %684 = memref.load %arg0[%c13] : memref<21xf32, #tpu.memory_space<smem>>
    %c14 = arith.constant 14 : index
    %685 = memref.load %arg0[%c14] : memref<21xf32, #tpu.memory_space<smem>>
    %c0_203 = arith.constant 0 : index
    %c0_204 = arith.constant 0 : index
    %686 = vector.load %arg12[%c0_203, %c0_204] : memref<32x96xf32, #tpu.memory_space<vmem>>, vector<32x96xf32>
    %c0_205 = arith.constant 0 : index
    %c0_206 = arith.constant 0 : index
    %687 = vector.load %arg13[%c0_205, %c0_206] : memref<1x96xf32, #tpu.memory_space<vmem>>, vector<1x96xf32>
    %688 = vector.shape_cast %678 : vector<2x8x32xf32> to vector<16x32xf32>
    %689 = vector.shape_cast %679 : vector<2x16x32xf32> to vector<32x32xf32>
    %690 = vector.extract_strided_slice %686 {offsets = [0, 0], sizes = [32, 32], strides = [1, 1]} : vector<32x96xf32> to vector<32x32xf32>
    %cst_207 = arith.constant dense<0.000000e+00> : vector<16x32xf32>
    %691 = tpu.matmul %688, %690, %cst_207 {dimension_numbers = #tpu.dot_dimension_numbers<[1], [0], [0], [1], [0, 0, 1, 1], [], []>} : vector<16x32xf32>, vector<32x32xf32>, vector<16x32xf32> -> vector<16x32xf32>
    %692 = vector.extract_strided_slice %687 {offsets = [0, 0], sizes = [1, 32], strides = [1, 1]} : vector<1x96xf32> to vector<1x32xf32>
    %693 = vector.broadcast %692 : vector<1x32xf32> to vector<16x32xf32>
    %694 = arith.addf %691, %693 : vector<16x32xf32>
    %695 = vector.extract_strided_slice %686 {offsets = [0, 32], sizes = [32, 64], strides = [1, 1]} : vector<32x96xf32> to vector<32x64xf32>
    %cst_208 = arith.constant dense<0.000000e+00> : vector<32x64xf32>
    %696 = tpu.matmul %689, %695, %cst_208 {dimension_numbers = #tpu.dot_dimension_numbers<[1], [0], [0], [1], [0, 0, 1, 1], [], []>} : vector<32x32xf32>, vector<32x64xf32>, vector<32x64xf32> -> vector<32x64xf32>
    %697 = vector.extract_strided_slice %687 {offsets = [0, 32], sizes = [1, 64], strides = [1, 1]} : vector<1x96xf32> to vector<1x64xf32>
    %698 = vector.broadcast %697 : vector<1x64xf32> to vector<32x64xf32>
    %699 = arith.addf %696, %698 : vector<32x64xf32>
    %700 = vector.extract_strided_slice %699 {offsets = [0, 0], sizes = [32, 32], strides = [1, 1]} : vector<32x64xf32> to vector<32x32xf32>
    %701 = vector.extract_strided_slice %699 {offsets = [0, 32], sizes = [32, 32], strides = [1, 1]} : vector<32x64xf32> to vector<32x32xf32>
    %702 = vector.extract_strided_slice %694 {offsets = [0, 0], sizes = [16, 1], strides = [1, 1]} : vector<16x32xf32> to vector<16x1xf32>
    %703 = arith.negf %702 : vector<16x1xf32>
    %704 = math.exp %703 : vector<16x1xf32>
    %cst_209 = arith.constant 1.000000e+00 : f32
    %705 = vector.broadcast %cst_209 : f32 to vector<16x1xf32>
    %706 = arith.addf %705, %704 : vector<16x1xf32>
    %707 = arith.divf %705, %706 : vector<16x1xf32>
    %708 = vector.broadcast %681 : f32 to vector<16x1xf32>
    %709 = arith.mulf %707, %708 : vector<16x1xf32>
    %cst_210 = arith.constant 1.100000e+00 : f32
    %710 = vector.broadcast %cst_210 : f32 to vector<16x1xf32>
    %711 = arith.addf %709, %710 : vector<16x1xf32>
    %712 = arith.mulf %694, %694 : vector<16x32xf32>
    %cst_211 = arith.constant dense<0.000000e+00> : vector<16xf32>
    %713 = vector.multi_reduction <add>, %712, %cst_211 [1] : vector<16x32xf32> to vector<16xf32>
    %714 = vector.shape_cast %713 : vector<16xf32> to vector<16x1xf32>
    %715 = arith.mulf %702, %702 : vector<16x1xf32>
    %716 = arith.subf %714, %715 : vector<16x1xf32>
    %cst_212 = arith.constant 9.99999993E-9 : f32
    %717 = vector.broadcast %cst_212 : f32 to vector<16x1xf32>
    %718 = arith.maximumf %716, %717 : vector<16x1xf32>
    %719 = arith.mulf %711, %711 : vector<16x1xf32>
    %cst_213 = arith.constant 1.000000e+00 : f32
    %720 = vector.broadcast %cst_213 : f32 to vector<16x1xf32>
    %721 = arith.subf %719, %720 : vector<16x1xf32>
    %722 = tpu.reciprocal %718 {approx = true} : vector<16x1xf32> -> vector<16x1xf32>
    %723 = arith.mulf %721, %722 : vector<16x1xf32>
    %724 = math.sqrt %723 : vector<16x1xf32>
    %725 = tpu.iota {dimensions = array<i32: 1>} : vector<16x32xi32>
    %c0_i32_214 = arith.constant 0 : i32
    %726 = vector.broadcast %c0_i32_214 : i32 to vector<16x32xi32>
    %727 = arith.cmpi eq, %725, %726 : vector<16x32xi32>
    %728 = vector.broadcast %724 : vector<16x1xf32> to vector<16x32xf32>
    %729 = arith.mulf %694, %728 : vector<16x32xf32>
    %730 = vector.shape_cast %711 : vector<16x1xf32> to vector<16x1xf32>
    %731 = vector.broadcast %730 : vector<16x1xf32> to vector<16x32xf32>
    %732 = arith.select %727, %731, %729 : vector<16x32xi1>, vector<16x32xf32>
    %733 = vector.shape_cast %732 : vector<16x32xf32> to vector<2x8x32xf32>
    %734 = vector.extract_strided_slice %700 {offsets = [0, 0], sizes = [32, 1], strides = [1, 1]} : vector<32x32xf32> to vector<32x1xf32>
    %735 = arith.negf %734 : vector<32x1xf32>
    %736 = math.exp %735 : vector<32x1xf32>
    %cst_215 = arith.constant 1.000000e+00 : f32
    %737 = vector.broadcast %cst_215 : f32 to vector<32x1xf32>
    %738 = arith.addf %737, %736 : vector<32x1xf32>
    %739 = arith.divf %737, %738 : vector<32x1xf32>
    %740 = vector.broadcast %682 : f32 to vector<32x1xf32>
    %741 = arith.mulf %739, %740 : vector<32x1xf32>
    %cst_216 = arith.constant 1.100000e+00 : f32
    %742 = vector.broadcast %cst_216 : f32 to vector<32x1xf32>
    %743 = arith.addf %741, %742 : vector<32x1xf32>
    %744 = arith.mulf %700, %700 : vector<32x32xf32>
    %cst_217 = arith.constant dense<0.000000e+00> : vector<32xf32>
    %745 = vector.multi_reduction <add>, %744, %cst_217 [1] : vector<32x32xf32> to vector<32xf32>
    %746 = vector.shape_cast %745 : vector<32xf32> to vector<32x1xf32>
    %747 = arith.mulf %734, %734 : vector<32x1xf32>
    %748 = arith.subf %746, %747 : vector<32x1xf32>
    %cst_218 = arith.constant 9.99999993E-9 : f32
    %749 = vector.broadcast %cst_218 : f32 to vector<32x1xf32>
    %750 = arith.maximumf %748, %749 : vector<32x1xf32>
    %751 = arith.mulf %743, %743 : vector<32x1xf32>
    %cst_219 = arith.constant 1.000000e+00 : f32
    %752 = vector.broadcast %cst_219 : f32 to vector<32x1xf32>
    %753 = arith.subf %751, %752 : vector<32x1xf32>
    %754 = tpu.reciprocal %750 {approx = true} : vector<32x1xf32> -> vector<32x1xf32>
    %755 = arith.mulf %753, %754 : vector<32x1xf32>
    %756 = math.sqrt %755 : vector<32x1xf32>
    %757 = tpu.iota {dimensions = array<i32: 1>} : vector<32x32xi32>
    %c0_i32_220 = arith.constant 0 : i32
    %758 = vector.broadcast %c0_i32_220 : i32 to vector<32x32xi32>
    %759 = arith.cmpi eq, %757, %758 : vector<32x32xi32>
    %760 = vector.broadcast %756 : vector<32x1xf32> to vector<32x32xf32>
    %761 = arith.mulf %700, %760 : vector<32x32xf32>
    %762 = vector.shape_cast %743 : vector<32x1xf32> to vector<32x1xf32>
    %763 = vector.broadcast %762 : vector<32x1xf32> to vector<32x32xf32>
    %764 = arith.select %759, %763, %761 : vector<32x32xi1>, vector<32x32xf32>
    %765 = vector.shape_cast %764 : vector<32x32xf32> to vector<2x16x32xf32>
    %766 = vector.extract_strided_slice %701 {offsets = [0, 0], sizes = [32, 1], strides = [1, 1]} : vector<32x32xf32> to vector<32x1xf32>
    %767 = arith.negf %766 : vector<32x1xf32>
    %768 = math.exp %767 : vector<32x1xf32>
    %cst_221 = arith.constant 1.000000e+00 : f32
    %769 = vector.broadcast %cst_221 : f32 to vector<32x1xf32>
    %770 = arith.addf %769, %768 : vector<32x1xf32>
    %771 = arith.divf %769, %770 : vector<32x1xf32>
    %772 = vector.broadcast %683 : f32 to vector<32x1xf32>
    %773 = arith.mulf %771, %772 : vector<32x1xf32>
    %cst_222 = arith.constant 1.100000e+00 : f32
    %774 = vector.broadcast %cst_222 : f32 to vector<32x1xf32>
    %775 = arith.addf %773, %774 : vector<32x1xf32>
    %776 = arith.mulf %701, %701 : vector<32x32xf32>
    %cst_223 = arith.constant dense<0.000000e+00> : vector<32xf32>
    %777 = vector.multi_reduction <add>, %776, %cst_223 [1] : vector<32x32xf32> to vector<32xf32>
    %778 = vector.shape_cast %777 : vector<32xf32> to vector<32x1xf32>
    %779 = arith.mulf %766, %766 : vector<32x1xf32>
    %780 = arith.subf %778, %779 : vector<32x1xf32>
    %cst_224 = arith.constant 9.99999993E-9 : f32
    %781 = vector.broadcast %cst_224 : f32 to vector<32x1xf32>
    %782 = arith.maximumf %780, %781 : vector<32x1xf32>
    %783 = arith.mulf %775, %775 : vector<32x1xf32>
    %cst_225 = arith.constant 1.000000e+00 : f32
    %784 = vector.broadcast %cst_225 : f32 to vector<32x1xf32>
    %785 = arith.subf %783, %784 : vector<32x1xf32>
    %786 = tpu.reciprocal %782 {approx = true} : vector<32x1xf32> -> vector<32x1xf32>
    %787 = arith.mulf %785, %786 : vector<32x1xf32>
    %788 = math.sqrt %787 : vector<32x1xf32>
    %789 = tpu.iota {dimensions = array<i32: 1>} : vector<32x32xi32>
    %c0_i32_226 = arith.constant 0 : i32
    %790 = vector.broadcast %c0_i32_226 : i32 to vector<32x32xi32>
    %791 = arith.cmpi eq, %789, %790 : vector<32x32xi32>
    %792 = vector.broadcast %788 : vector<32x1xf32> to vector<32x32xf32>
    %793 = arith.mulf %701, %792 : vector<32x32xf32>
    %794 = vector.shape_cast %775 : vector<32x1xf32> to vector<32x1xf32>
    %795 = vector.broadcast %794 : vector<32x1xf32> to vector<32x32xf32>
    %796 = arith.select %791, %795, %793 : vector<32x32xi1>, vector<32x32xf32>
    %797 = vector.shape_cast %796 : vector<32x32xf32> to vector<2x16x32xf32>
    %798 = vector.extract_strided_slice %733 {offsets = [0, 0, 0], sizes = [2, 8, 8], strides = [1, 1, 1]} : vector<2x8x32xf32> to vector<2x8x8xf32>
    %799 = vector.extract_strided_slice %765 {offsets = [0, 0, 0], sizes = [2, 16, 8], strides = [1, 1, 1]} : vector<2x16x32xf32> to vector<2x16x8xf32>
    %800 = vector.extract_strided_slice %797 {offsets = [0, 0, 0], sizes = [2, 16, 8], strides = [1, 1, 1]} : vector<2x16x32xf32> to vector<2x16x8xf32>
    %801 = tpu.iota {dimensions = array<i32: 2>} : vector<2x16x8xi32>
    %c0_i32_227 = arith.constant 0 : i32
    %802 = vector.broadcast %c0_i32_227 : i32 to vector<2x16x8xi32>
    %803 = arith.cmpi eq, %801, %802 : vector<2x16x8xi32>
    %cst_228 = arith.constant 0.000000e+00 : f32
    %804 = vector.broadcast %cst_228 : f32 to vector<2x16x8xf32>
    %805 = arith.subf %804, %799 : vector<2x16x8xf32>
    %806 = arith.select %803, %805, %799 : vector<2x16x8xi1>, vector<2x16x8xf32>
    "tpu.trace_start"() <{level = 10 : i32, message = "bqd,bkd->bqk"}> : () -> ()
    %cst_229 = arith.constant dense<0.000000e+00> : vector<2x8x16xf32>
    %807 = tpu.matmul %798, %806, %cst_229 {dimension_numbers = #tpu.dot_dimension_numbers<[2], [2], [1], [1], [0, 0, 0, 1, 1, 1], [0], [0]>} : vector<2x8x8xf32>, vector<2x16x8xf32>, vector<2x8x16xf32> -> vector<2x8x16xf32>
    "tpu.trace_stop"() : () -> ()
    %cst_230 = arith.constant 2.000000e+00 : f32
    %808 = vector.broadcast %cst_230 : f32 to vector<2x8x16xf32>
    %809 = arith.mulf %808, %807 : vector<2x8x16xf32>
    %cst_231 = arith.constant 2.000000e+00 : f32
    %810 = vector.broadcast %cst_231 : f32 to vector<2x8x16xf32>
    %811 = arith.addf %810, %809 : vector<2x8x16xf32>
    %812 = vector.broadcast %684 : f32 to vector<2x8x16xf32>
    %813 = arith.mulf %811, %812 : vector<2x8x16xf32>
    %814 = vector.broadcast %685 : f32 to vector<2x8x16xf32>
    %815 = arith.addf %813, %814 : vector<2x8x16xf32>
    %816 = arith.addf %815, %680 : vector<2x8x16xf32>
    %cst_232 = arith.constant dense<0xFF800000> : vector<2x8xf32>
    %817 = vector.multi_reduction <maximumf>, %816, %cst_232 [2] : vector<2x8x16xf32> to vector<2x8xf32>
    %818 = vector.shape_cast %817 : vector<2x8xf32> to vector<2x8x1xf32>
    %819 = vector.broadcast %818 : vector<2x8x1xf32> to vector<2x8x16xf32>
    %820 = arith.subf %816, %819 : vector<2x8x16xf32>
    %821 = math.exp %820 : vector<2x8x16xf32>
    %cst_233 = arith.constant dense<0.000000e+00> : vector<2x8xf32>
    %822 = vector.multi_reduction <add>, %821, %cst_233 [2] : vector<2x8x16xf32> to vector<2x8xf32>
    %823 = vector.shape_cast %822 : vector<2x8xf32> to vector<2x8x1xf32>
    %824 = tpu.reciprocal %823 {approx = true} : vector<2x8x1xf32> -> vector<2x8x1xf32>
    %825 = vector.broadcast %824 : vector<2x8x1xf32> to vector<2x8x16xf32>
    %826 = arith.mulf %821, %825 : vector<2x8x16xf32>
    "tpu.trace_start"() <{level = 10 : i32, message = "bqk,bkd->bqd"}> : () -> ()
    %cst_234 = arith.constant dense<0.000000e+00> : vector<2x8x8xf32>
    %827 = tpu.matmul %826, %800, %cst_234 {dimension_numbers = #tpu.dot_dimension_numbers<[2], [1], [1], [2], [0, 0, 0, 1, 1, 2], [0], [0]>} : vector<2x8x16xf32>, vector<2x16x8xf32>, vector<2x8x8xf32> -> vector<2x8x8xf32>
    "tpu.trace_stop"() : () -> ()
    %828 = vector.extract_strided_slice %827 {offsets = [0, 0, 0], sizes = [2, 8, 1], strides = [1, 1, 1]} : vector<2x8x8xf32> to vector<2x8x1xf32>
    %829 = arith.mulf %827, %827 : vector<2x8x8xf32>
    %cst_235 = arith.constant dense<0.000000e+00> : vector<2x8xf32>
    %830 = vector.multi_reduction <add>, %829, %cst_235 [2] : vector<2x8x8xf32> to vector<2x8xf32>
    %831 = vector.shape_cast %830 : vector<2x8xf32> to vector<2x8x1xf32>
    %cst_236 = arith.constant 2.000000e+00 : f32
    %832 = vector.broadcast %cst_236 : f32 to vector<2x8x1xf32>
    %833 = arith.mulf %832, %828 : vector<2x8x1xf32>
    %834 = arith.mulf %833, %828 : vector<2x8x1xf32>
    %835 = arith.subf %831, %834 : vector<2x8x1xf32>
    %836 = math.absf %835 : vector<2x8x1xf32>
    %cst_237 = arith.constant 9.99999993E-9 : f32
    %837 = vector.broadcast %cst_237 : f32 to vector<2x8x1xf32>
    %838 = arith.maximumf %836, %837 : vector<2x8x1xf32>
    %839 = math.rsqrt %838 : vector<2x8x1xf32>
    %840 = vector.broadcast %839 : vector<2x8x1xf32> to vector<2x8x8xf32>
    %841 = arith.mulf %827, %840 : vector<2x8x8xf32>
    %c0_238 = arith.constant 0 : index
    %c0_239 = arith.constant 0 : index
    %c0_240 = arith.constant 0 : index
    %842 = vector.load %arg23[%c0_238, %c0_239, %c0_240] : memref<2x8x32xf32, #tpu.memory_space<vmem>>, vector<2x8x8xf32>
    tpu.vector_store %arg23[%c0_238, %c0_239, %c0_240], %841 {strides = array<i32>} : memref<2x8x32xf32, #tpu.memory_space<vmem>>, vector<2x8x8xf32>,
    %843 = vector.extract_strided_slice %733 {offsets = [0, 0, 8], sizes = [2, 8, 8], strides = [1, 1, 1]} : vector<2x8x32xf32> to vector<2x8x8xf32>
    %844 = vector.extract_strided_slice %765 {offsets = [0, 0, 8], sizes = [2, 16, 8], strides = [1, 1, 1]} : vector<2x16x32xf32> to vector<2x16x8xf32>
    %845 = vector.extract_strided_slice %797 {offsets = [0, 0, 8], sizes = [2, 16, 8], strides = [1, 1, 1]} : vector<2x16x32xf32> to vector<2x16x8xf32>
    %846 = tpu.iota {dimensions = array<i32: 2>} : vector<2x16x8xi32>
    %c0_i32_241 = arith.constant 0 : i32
    %847 = vector.broadcast %c0_i32_241 : i32 to vector<2x16x8xi32>
    %848 = arith.cmpi eq, %846, %847 : vector<2x16x8xi32>
    %cst_242 = arith.constant 0.000000e+00 : f32
    %849 = vector.broadcast %cst_242 : f32 to vector<2x16x8xf32>
    %850 = arith.subf %849, %844 : vector<2x16x8xf32>
    %851 = arith.select %848, %850, %844 : vector<2x16x8xi1>, vector<2x16x8xf32>
    "tpu.trace_start"() <{level = 10 : i32, message = "bqd,bkd->bqk"}> : () -> ()
    %cst_243 = arith.constant dense<0.000000e+00> : vector<2x8x16xf32>
    %852 = tpu.matmul %843, %851, %cst_243 {dimension_numbers = #tpu.dot_dimension_numbers<[2], [2], [1], [1], [0, 0, 0, 1, 1, 1], [0], [0]>} : vector<2x8x8xf32>, vector<2x16x8xf32>, vector<2x8x16xf32> -> vector<2x8x16xf32>
    "tpu.trace_stop"() : () -> ()
    %cst_244 = arith.constant 2.000000e+00 : f32
    %853 = vector.broadcast %cst_244 : f32 to vector<2x8x16xf32>
    %854 = arith.mulf %853, %852 : vector<2x8x16xf32>
    %cst_245 = arith.constant 2.000000e+00 : f32
    %855 = vector.broadcast %cst_245 : f32 to vector<2x8x16xf32>
    %856 = arith.addf %855, %854 : vector<2x8x16xf32>
    %857 = vector.broadcast %684 : f32 to vector<2x8x16xf32>
    %858 = arith.mulf %856, %857 : vector<2x8x16xf32>
    %859 = vector.broadcast %685 : f32 to vector<2x8x16xf32>
    %860 = arith.addf %858, %859 : vector<2x8x16xf32>
    %861 = arith.addf %860, %680 : vector<2x8x16xf32>
    %cst_246 = arith.constant dense<0xFF800000> : vector<2x8xf32>
    %862 = vector.multi_reduction <maximumf>, %861, %cst_246 [2] : vector<2x8x16xf32> to vector<2x8xf32>
    %863 = vector.shape_cast %862 : vector<2x8xf32> to vector<2x8x1xf32>
    %864 = vector.broadcast %863 : vector<2x8x1xf32> to vector<2x8x16xf32>
    %865 = arith.subf %861, %864 : vector<2x8x16xf32>
    %866 = math.exp %865 : vector<2x8x16xf32>
    %cst_247 = arith.constant dense<0.000000e+00> : vector<2x8xf32>
    %867 = vector.multi_reduction <add>, %866, %cst_247 [2] : vector<2x8x16xf32> to vector<2x8xf32>
    %868 = vector.shape_cast %867 : vector<2x8xf32> to vector<2x8x1xf32>
    %869 = tpu.reciprocal %868 {approx = true} : vector<2x8x1xf32> -> vector<2x8x1xf32>
    %870 = vector.broadcast %869 : vector<2x8x1xf32> to vector<2x8x16xf32>
    %871 = arith.mulf %866, %870 : vector<2x8x16xf32>
    "tpu.trace_start"() <{level = 10 : i32, message = "bqk,bkd->bqd"}> : () -> ()
    %cst_248 = arith.constant dense<0.000000e+00> : vector<2x8x8xf32>
    %872 = tpu.matmul %871, %845, %cst_248 {dimension_numbers = #tpu.dot_dimension_numbers<[2], [1], [1], [2], [0, 0, 0, 1, 1, 2], [0], [0]>} : vector<2x8x16xf32>, vector<2x16x8xf32>, vector<2x8x8xf32> -> vector<2x8x8xf32>
    "tpu.trace_stop"() : () -> ()
    %873 = vector.extract_strided_slice %872 {offsets = [0, 0, 0], sizes = [2, 8, 1], strides = [1, 1, 1]} : vector<2x8x8xf32> to vector<2x8x1xf32>
    %874 = arith.mulf %872, %872 : vector<2x8x8xf32>
    %cst_249 = arith.constant dense<0.000000e+00> : vector<2x8xf32>
    %875 = vector.multi_reduction <add>, %874, %cst_249 [2] : vector<2x8x8xf32> to vector<2x8xf32>
    %876 = vector.shape_cast %875 : vector<2x8xf32> to vector<2x8x1xf32>
    %cst_250 = arith.constant 2.000000e+00 : f32
    %877 = vector.broadcast %cst_250 : f32 to vector<2x8x1xf32>
    %878 = arith.mulf %877, %873 : vector<2x8x1xf32>
    %879 = arith.mulf %878, %873 : vector<2x8x1xf32>
    %880 = arith.subf %876, %879 : vector<2x8x1xf32>
    %881 = math.absf %880 : vector<2x8x1xf32>
    %cst_251 = arith.constant 9.99999993E-9 : f32
    %882 = vector.broadcast %cst_251 : f32 to vector<2x8x1xf32>
    %883 = arith.maximumf %881, %882 : vector<2x8x1xf32>
    %884 = math.rsqrt %883 : vector<2x8x1xf32>
    %885 = vector.broadcast %884 : vector<2x8x1xf32> to vector<2x8x8xf32>
    %886 = arith.mulf %872, %885 : vector<2x8x8xf32>
    %c0_252 = arith.constant 0 : index
    %c0_253 = arith.constant 0 : index
    %c8_254 = arith.constant 8 : index
    %887 = vector.load %arg23[%c0_252, %c0_253, %c8_254] : memref<2x8x32xf32, #tpu.memory_space<vmem>>, vector<2x8x8xf32>
    tpu.vector_store %arg23[%c0_252, %c0_253, %c8_254], %886 {strides = array<i32>} : memref<2x8x32xf32, #tpu.memory_space<vmem>>, vector<2x8x8xf32>,
    %888 = vector.extract_strided_slice %733 {offsets = [0, 0, 16], sizes = [2, 8, 8], strides = [1, 1, 1]} : vector<2x8x32xf32> to vector<2x8x8xf32>
    %889 = vector.extract_strided_slice %765 {offsets = [0, 0, 16], sizes = [2, 16, 8], strides = [1, 1, 1]} : vector<2x16x32xf32> to vector<2x16x8xf32>
    %890 = vector.extract_strided_slice %797 {offsets = [0, 0, 16], sizes = [2, 16, 8], strides = [1, 1, 1]} : vector<2x16x32xf32> to vector<2x16x8xf32>
    %891 = tpu.iota {dimensions = array<i32: 2>} : vector<2x16x8xi32>
    %c0_i32_255 = arith.constant 0 : i32
    %892 = vector.broadcast %c0_i32_255 : i32 to vector<2x16x8xi32>
    %893 = arith.cmpi eq, %891, %892 : vector<2x16x8xi32>
    %cst_256 = arith.constant 0.000000e+00 : f32
    %894 = vector.broadcast %cst_256 : f32 to vector<2x16x8xf32>
    %895 = arith.subf %894, %889 : vector<2x16x8xf32>
    %896 = arith.select %893, %895, %889 : vector<2x16x8xi1>, vector<2x16x8xf32>
    "tpu.trace_start"() <{level = 10 : i32, message = "bqd,bkd->bqk"}> : () -> ()
    %cst_257 = arith.constant dense<0.000000e+00> : vector<2x8x16xf32>
    %897 = tpu.matmul %888, %896, %cst_257 {dimension_numbers = #tpu.dot_dimension_numbers<[2], [2], [1], [1], [0, 0, 0, 1, 1, 1], [0], [0]>} : vector<2x8x8xf32>, vector<2x16x8xf32>, vector<2x8x16xf32> -> vector<2x8x16xf32>
    "tpu.trace_stop"() : () -> ()
    %cst_258 = arith.constant 2.000000e+00 : f32
    %898 = vector.broadcast %cst_258 : f32 to vector<2x8x16xf32>
    %899 = arith.mulf %898, %897 : vector<2x8x16xf32>
    %cst_259 = arith.constant 2.000000e+00 : f32
    %900 = vector.broadcast %cst_259 : f32 to vector<2x8x16xf32>
    %901 = arith.addf %900, %899 : vector<2x8x16xf32>
    %902 = vector.broadcast %684 : f32 to vector<2x8x16xf32>
    %903 = arith.mulf %901, %902 : vector<2x8x16xf32>
    %904 = vector.broadcast %685 : f32 to vector<2x8x16xf32>
    %905 = arith.addf %903, %904 : vector<2x8x16xf32>
    %906 = arith.addf %905, %680 : vector<2x8x16xf32>
    %cst_260 = arith.constant dense<0xFF800000> : vector<2x8xf32>
    %907 = vector.multi_reduction <maximumf>, %906, %cst_260 [2] : vector<2x8x16xf32> to vector<2x8xf32>
    %908 = vector.shape_cast %907 : vector<2x8xf32> to vector<2x8x1xf32>
    %909 = vector.broadcast %908 : vector<2x8x1xf32> to vector<2x8x16xf32>
    %910 = arith.subf %906, %909 : vector<2x8x16xf32>
    %911 = math.exp %910 : vector<2x8x16xf32>
    %cst_261 = arith.constant dense<0.000000e+00> : vector<2x8xf32>
    %912 = vector.multi_reduction <add>, %911, %cst_261 [2] : vector<2x8x16xf32> to vector<2x8xf32>
    %913 = vector.shape_cast %912 : vector<2x8xf32> to vector<2x8x1xf32>
    %914 = tpu.reciprocal %913 {approx = true} : vector<2x8x1xf32> -> vector<2x8x1xf32>
    %915 = vector.broadcast %914 : vector<2x8x1xf32> to vector<2x8x16xf32>
    %916 = arith.mulf %911, %915 : vector<2x8x16xf32>
    "tpu.trace_start"() <{level = 10 : i32, message = "bqk,bkd->bqd"}> : () -> ()
    %cst_262 = arith.constant dense<0.000000e+00> : vector<2x8x8xf32>
    %917 = tpu.matmul %916, %890, %cst_262 {dimension_numbers = #tpu.dot_dimension_numbers<[2], [1], [1], [2], [0, 0, 0, 1, 1, 2], [0], [0]>} : vector<2x8x16xf32>, vector<2x16x8xf32>, vector<2x8x8xf32> -> vector<2x8x8xf32>
    "tpu.trace_stop"() : () -> ()
    %918 = vector.extract_strided_slice %917 {offsets = [0, 0, 0], sizes = [2, 8, 1], strides = [1, 1, 1]} : vector<2x8x8xf32> to vector<2x8x1xf32>
    %919 = arith.mulf %917, %917 : vector<2x8x8xf32>
    %cst_263 = arith.constant dense<0.000000e+00> : vector<2x8xf32>
    %920 = vector.multi_reduction <add>, %919, %cst_263 [2] : vector<2x8x8xf32> to vector<2x8xf32>
    %921 = vector.shape_cast %920 : vector<2x8xf32> to vector<2x8x1xf32>
    %cst_264 = arith.constant 2.000000e+00 : f32
    %922 = vector.broadcast %cst_264 : f32 to vector<2x8x1xf32>
    %923 = arith.mulf %922, %918 : vector<2x8x1xf32>
    %924 = arith.mulf %923, %918 : vector<2x8x1xf32>
    %925 = arith.subf %921, %924 : vector<2x8x1xf32>
    %926 = math.absf %925 : vector<2x8x1xf32>
    %cst_265 = arith.constant 9.99999993E-9 : f32
    %927 = vector.broadcast %cst_265 : f32 to vector<2x8x1xf32>
    %928 = arith.maximumf %926, %927 : vector<2x8x1xf32>
    %929 = math.rsqrt %928 : vector<2x8x1xf32>
    %930 = vector.broadcast %929 : vector<2x8x1xf32> to vector<2x8x8xf32>
    %931 = arith.mulf %917, %930 : vector<2x8x8xf32>
    %c0_266 = arith.constant 0 : index
    %c0_267 = arith.constant 0 : index
    %c16_268 = arith.constant 16 : index
    %932 = vector.load %arg23[%c0_266, %c0_267, %c16_268] : memref<2x8x32xf32, #tpu.memory_space<vmem>>, vector<2x8x8xf32>
    tpu.vector_store %arg23[%c0_266, %c0_267, %c16_268], %931 {strides = array<i32>} : memref<2x8x32xf32, #tpu.memory_space<vmem>>, vector<2x8x8xf32>,
    %933 = vector.extract_strided_slice %733 {offsets = [0, 0, 24], sizes = [2, 8, 8], strides = [1, 1, 1]} : vector<2x8x32xf32> to vector<2x8x8xf32>
    %934 = vector.extract_strided_slice %765 {offsets = [0, 0, 24], sizes = [2, 16, 8], strides = [1, 1, 1]} : vector<2x16x32xf32> to vector<2x16x8xf32>
    %935 = vector.extract_strided_slice %797 {offsets = [0, 0, 24], sizes = [2, 16, 8], strides = [1, 1, 1]} : vector<2x16x32xf32> to vector<2x16x8xf32>
    %936 = tpu.iota {dimensions = array<i32: 2>} : vector<2x16x8xi32>
    %c0_i32_269 = arith.constant 0 : i32
    %937 = vector.broadcast %c0_i32_269 : i32 to vector<2x16x8xi32>
    %938 = arith.cmpi eq, %936, %937 : vector<2x16x8xi32>
    %cst_270 = arith.constant 0.000000e+00 : f32
    %939 = vector.broadcast %cst_270 : f32 to vector<2x16x8xf32>
    %940 = arith.subf %939, %934 : vector<2x16x8xf32>
    %941 = arith.select %938, %940, %934 : vector<2x16x8xi1>, vector<2x16x8xf32>
    "tpu.trace_start"() <{level = 10 : i32, message = "bqd,bkd->bqk"}> : () -> ()
    %cst_271 = arith.constant dense<0.000000e+00> : vector<2x8x16xf32>
    %942 = tpu.matmul %933, %941, %cst_271 {dimension_numbers = #tpu.dot_dimension_numbers<[2], [2], [1], [1], [0, 0, 0, 1, 1, 1], [0], [0]>} : vector<2x8x8xf32>, vector<2x16x8xf32>, vector<2x8x16xf32> -> vector<2x8x16xf32>
    "tpu.trace_stop"() : () -> ()
    %cst_272 = arith.constant 2.000000e+00 : f32
    %943 = vector.broadcast %cst_272 : f32 to vector<2x8x16xf32>
    %944 = arith.mulf %943, %942 : vector<2x8x16xf32>
    %cst_273 = arith.constant 2.000000e+00 : f32
    %945 = vector.broadcast %cst_273 : f32 to vector<2x8x16xf32>
    %946 = arith.addf %945, %944 : vector<2x8x16xf32>
    %947 = vector.broadcast %684 : f32 to vector<2x8x16xf32>
    %948 = arith.mulf %946, %947 : vector<2x8x16xf32>
    %949 = vector.broadcast %685 : f32 to vector<2x8x16xf32>
    %950 = arith.addf %948, %949 : vector<2x8x16xf32>
    %951 = arith.addf %950, %680 : vector<2x8x16xf32>
    %cst_274 = arith.constant dense<0xFF800000> : vector<2x8xf32>
    %952 = vector.multi_reduction <maximumf>, %951, %cst_274 [2] : vector<2x8x16xf32> to vector<2x8xf32>
    %953 = vector.shape_cast %952 : vector<2x8xf32> to vector<2x8x1xf32>
    %954 = vector.broadcast %953 : vector<2x8x1xf32> to vector<2x8x16xf32>
    %955 = arith.subf %951, %954 : vector<2x8x16xf32>
    %956 = math.exp %955 : vector<2x8x16xf32>
    %cst_275 = arith.constant dense<0.000000e+00> : vector<2x8xf32>
    %957 = vector.multi_reduction <add>, %956, %cst_275 [2] : vector<2x8x16xf32> to vector<2x8xf32>
    %958 = vector.shape_cast %957 : vector<2x8xf32> to vector<2x8x1xf32>
    %959 = tpu.reciprocal %958 {approx = true} : vector<2x8x1xf32> -> vector<2x8x1xf32>
    %960 = vector.broadcast %959 : vector<2x8x1xf32> to vector<2x8x16xf32>
    %961 = arith.mulf %956, %960 : vector<2x8x16xf32>
    "tpu.trace_start"() <{level = 10 : i32, message = "bqk,bkd->bqd"}> : () -> ()
    %cst_276 = arith.constant dense<0.000000e+00> : vector<2x8x8xf32>
    %962 = tpu.matmul %961, %935, %cst_276 {dimension_numbers = #tpu.dot_dimension_numbers<[2], [1], [1], [2], [0, 0, 0, 1, 1, 2], [0], [0]>} : vector<2x8x16xf32>, vector<2x16x8xf32>, vector<2x8x8xf32> -> vector<2x8x8xf32>
    "tpu.trace_stop"() : () -> ()
    %963 = vector.extract_strided_slice %962 {offsets = [0, 0, 0], sizes = [2, 8, 1], strides = [1, 1, 1]} : vector<2x8x8xf32> to vector<2x8x1xf32>
    %964 = arith.mulf %962, %962 : vector<2x8x8xf32>
    %cst_277 = arith.constant dense<0.000000e+00> : vector<2x8xf32>
    %965 = vector.multi_reduction <add>, %964, %cst_277 [2] : vector<2x8x8xf32> to vector<2x8xf32>
    %966 = vector.shape_cast %965 : vector<2x8xf32> to vector<2x8x1xf32>
    %cst_278 = arith.constant 2.000000e+00 : f32
    %967 = vector.broadcast %cst_278 : f32 to vector<2x8x1xf32>
    %968 = arith.mulf %967, %963 : vector<2x8x1xf32>
    %969 = arith.mulf %968, %963 : vector<2x8x1xf32>
    %970 = arith.subf %966, %969 : vector<2x8x1xf32>
    %971 = math.absf %970 : vector<2x8x1xf32>
    %cst_279 = arith.constant 9.99999993E-9 : f32
    %972 = vector.broadcast %cst_279 : f32 to vector<2x8x1xf32>
    %973 = arith.maximumf %971, %972 : vector<2x8x1xf32>
    %974 = math.rsqrt %973 : vector<2x8x1xf32>
    %975 = vector.broadcast %974 : vector<2x8x1xf32> to vector<2x8x8xf32>
    %976 = arith.mulf %962, %975 : vector<2x8x8xf32>
    %c0_280 = arith.constant 0 : index
    %c0_281 = arith.constant 0 : index
    %c24_282 = arith.constant 24 : index
    %977 = vector.load %arg23[%c0_280, %c0_281, %c24_282] : memref<2x8x32xf32, #tpu.memory_space<vmem>>, vector<2x8x8xf32>
    tpu.vector_store %arg23[%c0_280, %c0_281, %c24_282], %976 {strides = array<i32>} : memref<2x8x32xf32, #tpu.memory_space<vmem>>, vector<2x8x8xf32>,
    %c0_283 = arith.constant 0 : index
    %c0_284 = arith.constant 0 : index
    %c0_285 = arith.constant 0 : index
    %978 = vector.load %arg23[%c0_283, %c0_284, %c0_285] : memref<2x8x32xf32, #tpu.memory_space<vmem>>, vector<2x8x32xf32>
    %979 = vector.shape_cast %978 : vector<2x8x32xf32> to vector<16x32xf32>
    %c0_286 = arith.constant 0 : index
    %c0_287 = arith.constant 0 : index
    %980 = vector.load %arg16[%c0_286, %c0_287] : memref<32x32xf32, #tpu.memory_space<vmem>>, vector<32x32xf32>
    %c17 = arith.constant 17 : index
    %981 = memref.load %arg0[%c17] : memref<21xf32, #tpu.memory_space<smem>>
    %cst_288 = arith.constant dense<0.000000e+00> : vector<16x32xf32>
    %982 = tpu.matmul %979, %980, %cst_288 {dimension_numbers = #tpu.dot_dimension_numbers<[1], [0], [0], [1], [0, 0, 1, 1], [], []>} : vector<16x32xf32>, vector<32x32xf32>, vector<16x32xf32> -> vector<16x32xf32>
    %983 = arith.addf %982, %677 : vector<16x32xf32>
    %984 = vector.extract_strided_slice %983 {offsets = [0, 0], sizes = [16, 1], strides = [1, 1]} : vector<16x32xf32> to vector<16x1xf32>
    %985 = arith.negf %984 : vector<16x1xf32>
    %986 = math.exp %985 : vector<16x1xf32>
    %cst_289 = arith.constant 1.000000e+00 : f32
    %987 = vector.broadcast %cst_289 : f32 to vector<16x1xf32>
    %988 = arith.addf %987, %986 : vector<16x1xf32>
    %989 = arith.divf %987, %988 : vector<16x1xf32>
    %990 = vector.broadcast %981 : f32 to vector<16x1xf32>
    %991 = arith.mulf %989, %990 : vector<16x1xf32>
    %cst_290 = arith.constant 1.100000e+00 : f32
    %992 = vector.broadcast %cst_290 : f32 to vector<16x1xf32>
    %993 = arith.addf %991, %992 : vector<16x1xf32>
    %994 = arith.mulf %983, %983 : vector<16x32xf32>
    %cst_291 = arith.constant dense<0.000000e+00> : vector<16xf32>
    %995 = vector.multi_reduction <add>, %994, %cst_291 [1] : vector<16x32xf32> to vector<16xf32>
    %996 = vector.shape_cast %995 : vector<16xf32> to vector<16x1xf32>
    %997 = arith.mulf %984, %984 : vector<16x1xf32>
    %998 = arith.subf %996, %997 : vector<16x1xf32>
    %cst_292 = arith.constant 9.99999993E-9 : f32
    %999 = vector.broadcast %cst_292 : f32 to vector<16x1xf32>
    %1000 = arith.maximumf %998, %999 : vector<16x1xf32>
    %1001 = arith.mulf %993, %993 : vector<16x1xf32>
    %cst_293 = arith.constant 1.000000e+00 : f32
    %1002 = vector.broadcast %cst_293 : f32 to vector<16x1xf32>
    %1003 = arith.subf %1001, %1002 : vector<16x1xf32>
    %1004 = tpu.reciprocal %1000 {approx = true} : vector<16x1xf32> -> vector<16x1xf32>
    %1005 = arith.mulf %1003, %1004 : vector<16x1xf32>
    %1006 = math.sqrt %1005 : vector<16x1xf32>
    %1007 = tpu.iota {dimensions = array<i32: 1>} : vector<16x32xi32>
    %c0_i32_294 = arith.constant 0 : i32
    %1008 = vector.broadcast %c0_i32_294 : i32 to vector<16x32xi32>
    %1009 = arith.cmpi eq, %1007, %1008 : vector<16x32xi32>
    %1010 = vector.broadcast %1006 : vector<16x1xf32> to vector<16x32xf32>
    %1011 = arith.mulf %983, %1010 : vector<16x32xf32>
    %1012 = vector.shape_cast %993 : vector<16x1xf32> to vector<16x1xf32>
    %1013 = vector.broadcast %1012 : vector<16x1xf32> to vector<16x32xf32>
    %1014 = arith.select %1009, %1013, %1011 : vector<16x32xi1>, vector<16x32xf32>
    %c0_295 = arith.constant 0 : index
    %c0_296 = arith.constant 0 : index
    %1015 = vector.load %arg18[%c0_295, %c0_296] : memref<32x32xf32, #tpu.memory_space<vmem>>, vector<32x32xf32>
    %c0_297 = arith.constant 0 : index
    %c0_298 = arith.constant 0 : index
    %1016 = vector.load %arg19[%c0_297, %c0_298] : memref<1x32xf32, #tpu.memory_space<vmem>>, vector<1x32xf32>
    %c19 = arith.constant 19 : index
    %1017 = memref.load %arg0[%c19] : memref<21xf32, #tpu.memory_space<smem>>
    %cst_299 = arith.constant dense<0.000000e+00> : vector<16x32xf32>
    %1018 = tpu.matmul %1014, %1015, %cst_299 {dimension_numbers = #tpu.dot_dimension_numbers<[1], [0], [0], [1], [0, 0, 1, 1], [], []>} : vector<16x32xf32>, vector<32x32xf32>, vector<16x32xf32> -> vector<16x32xf32>
    %1019 = vector.broadcast %1016 : vector<1x32xf32> to vector<16x32xf32>
    %1020 = arith.addf %1018, %1019 : vector<16x32xf32>
    %1021 = vector.extract_strided_slice %1020 {offsets = [0, 0], sizes = [16, 1], strides = [1, 1]} : vector<16x32xf32> to vector<16x1xf32>
    %1022 = arith.negf %1021 : vector<16x1xf32>
    %1023 = math.exp %1022 : vector<16x1xf32>
    %cst_300 = arith.constant 1.000000e+00 : f32
    %1024 = vector.broadcast %cst_300 : f32 to vector<16x1xf32>
    %1025 = arith.addf %1024, %1023 : vector<16x1xf32>
    %1026 = arith.divf %1024, %1025 : vector<16x1xf32>
    %1027 = vector.broadcast %1017 : f32 to vector<16x1xf32>
    %1028 = arith.mulf %1026, %1027 : vector<16x1xf32>
    %cst_301 = arith.constant 1.100000e+00 : f32
    %1029 = vector.broadcast %cst_301 : f32 to vector<16x1xf32>
    %1030 = arith.addf %1028, %1029 : vector<16x1xf32>
    %1031 = arith.mulf %1020, %1020 : vector<16x32xf32>
    %cst_302 = arith.constant dense<0.000000e+00> : vector<16xf32>
    %1032 = vector.multi_reduction <add>, %1031, %cst_302 [1] : vector<16x32xf32> to vector<16xf32>
    %1033 = vector.shape_cast %1032 : vector<16xf32> to vector<16x1xf32>
    %1034 = arith.mulf %1021, %1021 : vector<16x1xf32>
    %1035 = arith.subf %1033, %1034 : vector<16x1xf32>
    %cst_303 = arith.constant 9.99999993E-9 : f32
    %1036 = vector.broadcast %cst_303 : f32 to vector<16x1xf32>
    %1037 = arith.maximumf %1035, %1036 : vector<16x1xf32>
    %1038 = arith.mulf %1030, %1030 : vector<16x1xf32>
    %cst_304 = arith.constant 1.000000e+00 : f32
    %1039 = vector.broadcast %cst_304 : f32 to vector<16x1xf32>
    %1040 = arith.subf %1038, %1039 : vector<16x1xf32>
    %1041 = tpu.reciprocal %1037 {approx = true} : vector<16x1xf32> -> vector<16x1xf32>
    %1042 = arith.mulf %1040, %1041 : vector<16x1xf32>
    %1043 = math.sqrt %1042 : vector<16x1xf32>
    %1044 = tpu.iota {dimensions = array<i32: 1>} : vector<16x32xi32>
    %c0_i32_305 = arith.constant 0 : i32
    %1045 = vector.broadcast %c0_i32_305 : i32 to vector<16x32xi32>
    %1046 = arith.cmpi eq, %1044, %1045 : vector<16x32xi32>
    %1047 = vector.broadcast %1043 : vector<16x1xf32> to vector<16x32xf32>
    %1048 = arith.mulf %1020, %1047 : vector<16x32xf32>
    %1049 = vector.shape_cast %1030 : vector<16x1xf32> to vector<16x1xf32>
    %1050 = vector.broadcast %1049 : vector<16x1xf32> to vector<16x32xf32>
    %1051 = arith.select %1046, %1050, %1048 : vector<16x32xi1>, vector<16x32xf32>
    %c0_306 = arith.constant 0 : index
    %c0_307 = arith.constant 0 : index
    %1052 = vector.load %arg20[%c0_306, %c0_307] : memref<32x32xf32, #tpu.memory_space<vmem>>, vector<32x32xf32>
    %c0_308 = arith.constant 0 : index
    %c0_309 = arith.constant 0 : index
    %1053 = vector.load %arg21[%c0_308, %c0_309] : memref<1x32xf32, #tpu.memory_space<vmem>>, vector<1x32xf32>
    %c20 = arith.constant 20 : index
    %1054 = memref.load %arg0[%c20] : memref<21xf32, #tpu.memory_space<smem>>
    %cst_310 = arith.constant 0.000000e+00 : f32
    %1055 = vector.broadcast %cst_310 : f32 to vector<16x32xf32>
    %1056 = arith.maximumf %1051, %1055 : vector<16x32xf32>
    %cst_311 = arith.constant dense<0.000000e+00> : vector<16x32xf32>
    %1057 = tpu.matmul %1056, %1052, %cst_311 {dimension_numbers = #tpu.dot_dimension_numbers<[1], [0], [0], [1], [0, 0, 1, 1], [], []>} : vector<16x32xf32>, vector<32x32xf32>, vector<16x32xf32> -> vector<16x32xf32>
    %1058 = vector.broadcast %1053 : vector<1x32xf32> to vector<16x32xf32>
    %1059 = arith.addf %1057, %1058 : vector<16x32xf32>
    %1060 = vector.extract_strided_slice %1059 {offsets = [0, 0], sizes = [16, 1], strides = [1, 1]} : vector<16x32xf32> to vector<16x1xf32>
    %1061 = arith.negf %1060 : vector<16x1xf32>
    %1062 = math.exp %1061 : vector<16x1xf32>
    %cst_312 = arith.constant 1.000000e+00 : f32
    %1063 = vector.broadcast %cst_312 : f32 to vector<16x1xf32>
    %1064 = arith.addf %1063, %1062 : vector<16x1xf32>
    %1065 = arith.divf %1063, %1064 : vector<16x1xf32>
    %1066 = vector.broadcast %1054 : f32 to vector<16x1xf32>
    %1067 = arith.mulf %1065, %1066 : vector<16x1xf32>
    %cst_313 = arith.constant 1.100000e+00 : f32
    %1068 = vector.broadcast %cst_313 : f32 to vector<16x1xf32>
    %1069 = arith.addf %1067, %1068 : vector<16x1xf32>
    %1070 = arith.mulf %1059, %1059 : vector<16x32xf32>
    %cst_314 = arith.constant dense<0.000000e+00> : vector<16xf32>
    %1071 = vector.multi_reduction <add>, %1070, %cst_314 [1] : vector<16x32xf32> to vector<16xf32>
    %1072 = vector.shape_cast %1071 : vector<16xf32> to vector<16x1xf32>
    %1073 = arith.mulf %1060, %1060 : vector<16x1xf32>
    %1074 = arith.subf %1072, %1073 : vector<16x1xf32>
    %cst_315 = arith.constant 9.99999993E-9 : f32
    %1075 = vector.broadcast %cst_315 : f32 to vector<16x1xf32>
    %1076 = arith.maximumf %1074, %1075 : vector<16x1xf32>
    %1077 = arith.mulf %1069, %1069 : vector<16x1xf32>
    %cst_316 = arith.constant 1.000000e+00 : f32
    %1078 = vector.broadcast %cst_316 : f32 to vector<16x1xf32>
    %1079 = arith.subf %1077, %1078 : vector<16x1xf32>
    %1080 = tpu.reciprocal %1076 {approx = true} : vector<16x1xf32> -> vector<16x1xf32>
    %1081 = arith.mulf %1079, %1080 : vector<16x1xf32>
    %1082 = math.sqrt %1081 : vector<16x1xf32>
    %1083 = tpu.iota {dimensions = array<i32: 1>} : vector<16x32xi32>
    %c0_i32_317 = arith.constant 0 : i32
    %1084 = vector.broadcast %c0_i32_317 : i32 to vector<16x32xi32>
    %1085 = arith.cmpi eq, %1083, %1084 : vector<16x32xi32>
    %1086 = vector.broadcast %1082 : vector<16x1xf32> to vector<16x32xf32>
    %1087 = arith.mulf %1059, %1086 : vector<16x32xf32>
    %1088 = vector.shape_cast %1069 : vector<16x1xf32> to vector<16x1xf32>
    %1089 = vector.broadcast %1088 : vector<16x1xf32> to vector<16x32xf32>
    %1090 = arith.select %1085, %1089, %1087 : vector<16x32xi1>, vector<16x32xf32>
    %c0_318 = arith.constant 0 : index
    %c0_319 = arith.constant 0 : index
    %1091 = vector.load %arg17[%c0_318, %c0_319] : memref<32x32xf32, #tpu.memory_space<vmem>>, vector<32x32xf32>
    %c18 = arith.constant 18 : index
    %1092 = memref.load %arg0[%c18] : memref<21xf32, #tpu.memory_space<smem>>
    %cst_320 = arith.constant dense<0.000000e+00> : vector<16x32xf32>
    %1093 = tpu.matmul %1090, %1091, %cst_320 {dimension_numbers = #tpu.dot_dimension_numbers<[1], [0], [0], [1], [0, 0, 1, 1], [], []>} : vector<16x32xf32>, vector<32x32xf32>, vector<16x32xf32> -> vector<16x32xf32>
    %1094 = arith.addf %1093, %1014 : vector<16x32xf32>
    %1095 = vector.extract_strided_slice %1094 {offsets = [0, 0], sizes = [16, 1], strides = [1, 1]} : vector<16x32xf32> to vector<16x1xf32>
    %1096 = arith.negf %1095 : vector<16x1xf32>
    %1097 = math.exp %1096 : vector<16x1xf32>
    %cst_321 = arith.constant 1.000000e+00 : f32
    %1098 = vector.broadcast %cst_321 : f32 to vector<16x1xf32>
    %1099 = arith.addf %1098, %1097 : vector<16x1xf32>
    %1100 = arith.divf %1098, %1099 : vector<16x1xf32>
    %1101 = vector.broadcast %1092 : f32 to vector<16x1xf32>
    %1102 = arith.mulf %1100, %1101 : vector<16x1xf32>
    %cst_322 = arith.constant 1.100000e+00 : f32
    %1103 = vector.broadcast %cst_322 : f32 to vector<16x1xf32>
    %1104 = arith.addf %1102, %1103 : vector<16x1xf32>
    %1105 = arith.mulf %1094, %1094 : vector<16x32xf32>
    %cst_323 = arith.constant dense<0.000000e+00> : vector<16xf32>
    %1106 = vector.multi_reduction <add>, %1105, %cst_323 [1] : vector<16x32xf32> to vector<16xf32>
    %1107 = vector.shape_cast %1106 : vector<16xf32> to vector<16x1xf32>
    %1108 = arith.mulf %1095, %1095 : vector<16x1xf32>
    %1109 = arith.subf %1107, %1108 : vector<16x1xf32>
    %cst_324 = arith.constant 9.99999993E-9 : f32
    %1110 = vector.broadcast %cst_324 : f32 to vector<16x1xf32>
    %1111 = arith.maximumf %1109, %1110 : vector<16x1xf32>
    %1112 = arith.mulf %1104, %1104 : vector<16x1xf32>
    %cst_325 = arith.constant 1.000000e+00 : f32
    %1113 = vector.broadcast %cst_325 : f32 to vector<16x1xf32>
    %1114 = arith.subf %1112, %1113 : vector<16x1xf32>
    %1115 = tpu.reciprocal %1111 {approx = true} : vector<16x1xf32> -> vector<16x1xf32>
    %1116 = arith.mulf %1114, %1115 : vector<16x1xf32>
    %1117 = math.sqrt %1116 : vector<16x1xf32>
    %1118 = tpu.iota {dimensions = array<i32: 1>} : vector<16x32xi32>
    %c0_i32_326 = arith.constant 0 : i32
    %1119 = vector.broadcast %c0_i32_326 : i32 to vector<16x32xi32>
    %1120 = arith.cmpi eq, %1118, %1119 : vector<16x32xi32>
    %1121 = vector.broadcast %1117 : vector<16x1xf32> to vector<16x32xf32>
    %1122 = arith.mulf %1094, %1121 : vector<16x32xf32>
    %1123 = vector.shape_cast %1104 : vector<16x1xf32> to vector<16x1xf32>
    %1124 = vector.broadcast %1123 : vector<16x1xf32> to vector<16x32xf32>
    %1125 = arith.select %1120, %1124, %1122 : vector<16x32xi1>, vector<16x32xf32>
    %1126 = vector.shape_cast %1125 : vector<16x32xf32> to vector<2x8x32xf32>
    %c0_327 = arith.constant 0 : index
    %c0_328 = arith.constant 0 : index
    %c0_329 = arith.constant 0 : index
    %1127 = vector.load %arg22[%c0_327, %c0_328, %c0_329] : memref<2x8x32xf32, #tpu.memory_space<vmem>>, vector<2x8x32xf32>
    tpu.vector_store %arg22[%c0_327, %c0_328, %c0_329], %1126 {strides = array<i32>} : memref<2x8x32xf32, #tpu.memory_space<vmem>>, vector<2x8x32xf32>,
    return
  }
}

</mosaic_0001>

<bundles_post_ra>
// kernel: lorentz_med_transformer_decoder.1
= control target key start
LH: loop header
LB: loop body
LE: loop exit
PB: predicated region body
PF: predicated region fallthrough
CT: control target
= control target key end

     0   :  { %s7960_s0 = inlined_call_operand.vmem [shape: f32[21], index: 0, kind: input, shape index: {}]   ;;  %s7961_s1 = inlined_call_operand.vmem [shape: f32[2,8,32], index: 1, kind: input, shape index: {}]   ;;  %s7962_s2 = inlined_call_operand.vmem [shape: f32[2,8,32], index: 2, kind: input, shape index: {}]   ;;  %s7963_s3 = inlined_call_operand.vmem [shape: f32[2,16,32], index: 3, kind: input, shape index: {}]   ;;  %s7964_s4 = inlined_call_operand.vmem [shape: f32[2,16,32], index: 4, kind: input, shape index: {}]   ;;  %s7965_s5 = inlined_call_operand.vmem [shape: f32[2,8,8], index: 5, kind: input, shape index: {}]   ;;  %s7966_s6 = inlined_call_operand.vmem [shape: f32[2,8,16], index: 6, kind: input, shape index: {}]   ;;  %s7967_s7 = inlined_call_operand.vmem [shape: f32[2,8,16], index: 7, kind: input, shape index: {}]   ;;  %s7968_s8 = inlined_call_operand.vmem [shape: f32[32,96], index: 8, kind: input, shape index: {}]   ;;  %s7969_s9 = inlined_call_operand.vmem [shape: f32[1,96], index: 9, kind: input, shape index: {}]   ;;  %s7970_s10 = inlined_call_operand.vmem [shape: f32[32,96], index: 10, kind: input, shape index: {}]   ;;  %s7971_s11 = inlined_call_operand.vmem [shape: f32[1,96], index: 11, kind: input, shape index: {}]   ;;  %s7972_s12 = inlined_call_operand.vmem [shape: f32[32,96], index: 12, kind: input, shape index: {}]   ;;  %s7973_s13 = inlined_call_operand.vmem [shape: f32[1,96], index: 13, kind: input, shape index: {}]   ;;  %s7974_s14 = inlined_call_operand.vmem [shape: f32[32,32], index: 14, kind: input, shape index: {}]   ;;  %s7975_s15 = inlined_call_operand.vmem [shape: f32[32,32], index: 15, kind: input, shape index: {}]   ;;  %s7976_s16 = inlined_call_operand.vmem [shape: f32[32,32], index: 16, kind: input, shape index: {}]   ;;  %s7977_s17 = inlined_call_operand.vmem [shape: f32[32,32], index: 17, kind: input, shape index: {}]   ;;  %s7978_s18 = inlined_call_operand.vmem [shape: f32[32,32], index: 18, kind: input, shape index: {}]   ;;  %s7979_s19 = inlined_call_operand.vmem [shape: f32[1,32], index: 19, kind: input, shape index: {}]   ;;  %s7980_s20 = inlined_call_operand.vmem [shape: f32[32,32], index: 20, kind: input, shape index: {}]   ;;  %s7981_s21 = inlined_call_operand.vmem [shape: f32[1,32], index: 21, kind: input, shape index: {}]   ;;  %s7982_s22 = inlined_call_operand.hbm [shape: f32[2,8,32], index: 22, kind: output, shape index: {}]  }
   0x1   :  { %7993 = sst [smem:[#allocation9_spill]] %s7960_s0 }
   0x2   :  { %7994 = sst [smem:[#allocation10_spill]] %s7961_s1 }
   0x3   :  { %7995 = sst [smem:[#allocation11_spill]] %s7962_s2 }
   0x4   :  { %7996 = sst [smem:[#allocation12_spill]] %s7963_s3 }
   0x5   :  { %7997 = sst [smem:[#allocation13_spill]] %s7964_s4 }
   0x6   :  { %7998 = sst [smem:[#allocation14_spill]] %s7965_s5 }
   0x7   :  { %7999 = sst [smem:[#allocation15_spill]] %s7966_s6 }
   0x8   :  { %27 = vsyncpa [#allocation5], 0 }
   0x9   :  { %28 = vsyncpa [#allocation4], 0  ;;  %s8000_s29 = sld [smem:[#allocation9_spill]]  ;;  %s6056_s4 = smov [#allocation3]  }
   0xf   :  { %s34_s30 = sshll.u32 %s8000_s29, 4  ;;  %s35_s30 = int_to_ptr.vmem [resolvable:$true] %s34_s30 }
  0x10   :  { %37 = dma.vmem_to_smem %s35_s30, 16, %s6056_s4, [#allocation5]  }
  0x11   :  { %6052 = dma.done.wait [#allocation5], 16  }
  0x12   :  { %6053 = vsyncadd [#allocation5], 4294967280 }
  0x13   :  { %84 = sfence }
  0x14   :  { %v109_v0 = vld [vmem:[%s7968_s8 + $0x18] sm:$0xff]  ;;  %v108_v1 = vld [vmem:[%s7968_s8 + $0x10] sm:$0xff]  ;;  %s8001_s25 = sld [smem:[#allocation10_spill]]  ;;  %v107_v4 = vld [vmem:[%s7968_s8 + $0x8] sm:$0xff]  ;;  %vm114_vm0 = vcmask 261120   ;;  %v6057_v10 = vmov 32  }
  0x15   :  { %133 = vmatpush.msra.mxu0 %v109_v0  ;;  %s8002_s27 = sld [smem:[#allocation11_spill]]  ;;  %v106_v5 = vld [vmem:[%s7968_s8] sm:$0xff]  ;;  %5459 = vset.pattern.permute.xlu2 %v6057_v10  ;;  %s6058_s24 = smov 96   ;;  %v6059_v58 = vmov 0  }
  0x16   :  { %5457 = vset.pattern.permute.xlu0 %v6057_v10  ;;  %5458 = vset.pattern.permute.xlu1 %v6057_v10  ;;  %v5611_v11 = vld [vmem:[%s7969_s9] ss:$0 sm:$0xff]  ;;  %s5245_s9 = sld [smem:[#allocation3 + $0x2]]  ;;  %s6060_s26 = smov 120  }
  0x17   :  { %134 = vmatpush.msra.mxu0 %v108_v1  ;;  %s6249_s6 = sld [smem:[#allocation3 + $0x1]]  ;;  %s6061_s2 = smov 112  }
  0x18   :  { %s6063_s3 = smov 64   ;;  %s5246_s28 = sld [smem:[#allocation3 + $0x3]] }
  0x19   :  { %135 = vmatpush.msra.mxu0 %v107_v4  ;;  %s5247_s29 = sld [smem:[#allocation3 + $0x4]]  ;;  %s6066_s8 = smov 8  }
  0x1a   :  { %v85_v2 = vld [vmem:[%s8001_s25] sm:$0xff]  ;;  %v86_v7 = vld [vmem:[%s8001_s25 + $0x8] sm:$0xff]  ;;  %s101_s25 = sld [smem:[#allocation3]]  ;;  %s6067_s5 = smov 16  }
  0x1b   :  { %v87_v3 = vld [vmem:[%s8002_s27] sm:$0xff]  ;;  %136 = vmatpush.msra.mxu0 %v106_v5  ;;  %v88_v8 = vld [vmem:[%s8002_s27 + $0x8] sm:$0xff]  ;;  %s6062_s27 = smov 104   ;;  %s8003_s0 = sld [smem:[#allocation14_spill]] }
  0x1c   :  { %v6207_v6 = vadd.f32 %v87_v3, %v85_v2  ;;  %v6217_v9 = vadd.f32 %v88_v8, %v86_v7  ;;  %v343_v42 = vstv %s5245_s9  ;;  %s6068_s9 = smov 24   ;;  %s8004_s4 = sld [smem:[#allocation12_spill]] }
  0x1d   :  { %v256_v48 = vstv %s6249_s6  ;;  %s6590_s6 = sld [smem:[#allocation3 + $0xf]] }
  0x1e   :  { %5248 = vmatmul.msk.f32.vlgmr.msra.gmra.mxu0 %vm114_vm0, %v6207_v6  ;;  %s6740_s30 = sld [smem:[#allocation3 + $0x5]] }
  0x1f   :  { %s8013_s1 = sld [smem:[#allocation15_spill]] }
  0x20   :  { %v182_v55 = vstv %s101_s25  ;;  %s5357_s25 = sld [smem:[#allocation3 + $0xc]] }
  0x26   :  { %5249 = vmatmul.msk.f32.gmra.mxu0 %vm114_vm0, %v6217_v9 }
  0x9b   :  { %v138_v12 = vpop.f32.mrf.mxu0 }
  0x9c   :  { %v6227_v13 = vadd.f32 %v5611_v11, %v138_v12 }
  0x9e   :  { %v5250_v14 = vmul.f32 -1.442695, %v6227_v13  ;;  %v6243_v22 = vmul.f32 %v6227_v13, %v6227_v13 }
  0xa0   :  { %5616 = vpow2.f32 %v5250_v14  ;;  %v189_v26 = vsel %vm114_vm0, %v6243_v22, 0.0 }
  0xa3   :  { %v141_v15 = vpop.f32.mrf.mxu0 }
  0xa4   :  { %v6230_v16 = vadd.f32 %v5611_v11, %v141_v15 }
  0xa6   :  { %v5617_v17 = vpop.eup %5616  ;;  %v5251_v18 = vmul.f32 -1.442695, %v6230_v16  ;;  %v6235_v19 = vmul.f32 %v6230_v16, %v6230_v16 }
  0xa7   :  { %v150_v20 = vadd.f32 1.0, %v5617_v17 }
  0xa8   :  { %5618 = vpow2.f32 %v5251_v18  ;;  %265 = vrot.lane.b32.xlu0 %v6235_v19, %s6058_s24  ;;  %v192_v21 = vsel %vm114_vm0, %v6235_v19, 0.0 }
  0xa9   :  { %5620 = vrcp.f32 %v150_v20  ;;  %193 = vadd.xlane.f32.xlu2 %v192_v21  ;;  %v163_v32 = vand.u32 2147483648, %v150_v20  ;;  %vm157_vm2 = vweird.f32 %v150_v20  ;;  %v161_v34 = vand.u32 2147483647, %v150_v20 }
  0xab   :  { %v164_v38 = vor.u32 1.1754944e-38, %v163_v32  ;;  %vm162_vm5 = vcmp.eq.f32.partialorder %v161_v34, 8.507059e+37 }
  0xae   :  { %v5619_v23 = vpop.eup %5618 }
  0xaf   :  { %v5621_v24 = vpop.eup %5620  ;;  %v151_v25 = vadd.f32 1.0, %v5619_v23 }
  0xb0   :  { %263 = vrot.lane.b32.xlu0 %v6243_v22, %s6058_s24  ;;  %v153_v27 = vmul.f32 %v5621_v24, %v150_v20  ;;  %vm158_vm1 = vweird.f32 %v5621_v24 }
  0xb1   :  { %5622 = vrcp.f32 %v151_v25  ;;  %190 = vadd.xlane.f32.xlu2 %v189_v26  ;;  %vm159_vm3 = vmor %vm157_vm2, %vm158_vm1  ;;  %v178_v37 = vand.u32 2147483648, %v151_v25  ;;  %v176_v40 = vand.u32 2147483647, %v151_v25  ;;  %vm172_vm6 = vweird.f32 %v151_v25 }
  0xb2   :  { %v154_v28 = vsub.f32 1.0, %v153_v27 }
  0xb3   :  { %v179_v44 = vor.u32 1.1754944e-38, %v178_v37  ;;  %vm177_vm8 = vcmp.eq.f32.partialorder %v176_v40, 8.507059e+37 }
  0xb4   :  { %v155_v29 = vmul.f32 %v5621_v24, %v154_v28 }
  0xb6   :  { %v156_v30 = vadd.f32 %v5621_v24, %v155_v29 }
  0xb7   :  { %v5623_v31 = vpop.eup %5622 }
  0xb8   :  { %v168_v33 = vmul.f32 %v5623_v31, %v151_v25  ;;  %v160_v36 = vsel %vm159_vm3, %v5621_v24, %v156_v30  ;;  %vm173_vm4 = vweird.f32 %v5623_v31  ;;  %vm432_vm3 = vcmask 64512  }
  0xb9   :  { %v165_v41 = vsel %vm162_vm5, %v164_v38, %v160_v36  ;;  %vm174_vm7 = vmor %vm172_vm6, %vm173_vm4 }
  0xba   :  { %v169_v35 = vsub.f32 1.0, %v168_v33  ;;  %v344_v46 = vmul.f32 %v343_v42, %v165_v41  ;;  %v183_v5 = vmul.f32 %v182_v55, %v165_v41  ;;  %v257_v8 = vmul.f32 %v256_v48, %v165_v41 }
  0xbc   :  { %v170_v39 = vmul.f32 %v5623_v31, %v169_v35  ;;  %v6252_v51 = vadd.f32 1.1, %v344_v46  ;;  %v6268_v14 = vadd.f32 1.1, %v183_v5  ;;  %v259_v18 = vadd.f32 1.1, %v257_v8 }
  0xbe   :  { %v171_v43 = vadd.f32 %v5623_v31, %v170_v39  ;;  %v199_v24 = vmul.f32 %v6268_v14, %v6268_v14  ;;  %v279_v25 = vmul.f32 %v259_v18, %v259_v18 }
  0xc0   :  { %v175_v45 = vsel %vm174_vm7, %v5623_v31, %v171_v43  ;;  %v5252_v27 = vadd.f32 -1.0, %v199_v24  ;;  %v5254_v28 = vadd.f32 -1.0, %v279_v25 }
  0xc1   :  { %v180_v47 = vsel %vm177_vm8, %v179_v44, %v175_v45 }
  0xc2   :  { %v345_v49 = vmul.f32 %v343_v42, %v180_v47  ;;  %v258_v50 = vmul.f32 %v256_v48, %v180_v47  ;;  %v184_v56 = vmul.f32 %v182_v55, %v180_v47 }
  0xc4   :  { %v6254_v52 = vadd.f32 1.1, %v345_v49  ;;  %v260_v54 = vadd.f32 1.1, %v258_v50  ;;  %v6258_v57 = vadd.f32 1.1, %v184_v56 }
  0xc6   :  { %v5466_v53 = vpack.i.bf16 %v6254_v52, %v6252_v51  ;;  %v280_v7 = vmul.f32 %v260_v54, %v260_v54 }
  0xc8   :  { %v5255_v17 = vadd.f32 -1.0, %v280_v7  ;;  %v200_v7 = vmul.f32 %v6258_v57, %v6258_v57 }
  0xc9   :  { %330 = vperm.xlu2 %5459, %v260_v54  }
  0xd1   :  { %5461 = vset.pattern.permute.xlu2 %v6059_v58 }
  0xd2   :  { %251 = vperm.xlu2 %5461, %v6258_v57  }
 0x11a   :  { %v266_v59 = vpop.permute.xlu0 %265 }
 0x11b   :  { %v272_v60 = vsel %vm114_vm0, %v266_v59, 0.0 }
 0x11c   :  { %273 = vadd.xlane.f32.xlu1 %v272_v60  ;;  %v6264_v63 = vpop.xlane.xlu2 %193 }
 0x122   :  { %v264_v61 = vpop.permute.xlu0 %263 }
 0x123   :  { %v269_v62 = vsel %vm114_vm0, %v264_v61, 0.0 }
 0x124   :  { %270 = vadd.xlane.f32.xlu1 %v269_v62  ;;  %v191_v0 = vpop.xlane.xlu2 %190 }
 0x125   :  { %v195_v3 = vsub.f32 %v191_v0, %v6243_v22 }
 0x127   :  { %v197_v11 = vmax.f32 %v195_v3, 1e-08 }
 0x18f   :  { %v274_v1 = vpop.xlane.xlu1 %273 }
 0x190   :  { %v276_v2 = vsub.f32 %v274_v1, %v6235_v19 }
 0x192   :  { %v278_v4 = vmax.f32 %v276_v2, 1e-08 }
 0x194   :  { %5624 = vrcp.f32 %v278_v4  ;;  %v196_v4 = vsub.f32 %v6264_v63, %v6235_v19 }
 0x195   :  { %5626 = vrcp.f32 %v197_v11  ;;  %v5253_v11 = vadd.f32 -1.0, %v200_v7 }
 0x196   :  { %v198_v5 = vmax.f32 %v196_v4, 1e-08 }
 0x197   :  { %v271_v12 = vpop.xlane.xlu1 %270 }
 0x198   :  { %v275_v15 = vsub.f32 %v271_v12, %v6243_v22 }
 0x19a   :  { %v5625_v20 = vpop.eup %5624  ;;  %v277_v21 = vmax.f32 %v275_v15, 1e-08 }
 0x19b   :  { %v286_v23 = vmul.f32 %v5625_v20, %v5255_v17  ;;  %v5627_v26 = vpop.eup %5626 }
 0x19c   :  { %5628 = vrcp.f32 %v277_v21  ;;  %v205_v30 = vmul.f32 %v5627_v26, %v5252_v27 }
 0x19d   :  { %5630 = vrsqrt.f32 %v286_v23  ;;  %vm306_vm9 = vcmp.eq.f32.partialorder %v286_v23, inf  ;;  %v309_v43 = vand.u32 2147483648, %v286_v23  ;;  %vm308_vm10 = vcmp.eq.f32.partialorder %v286_v23, 0.0 }
 0x19e   :  { %vm214_vm13 = vcmp.eq.f32.partialorder %v205_v30, inf  ;;  %v217_v2 = vand.u32 2147483648, %v205_v30  ;;  %vm216_vm14 = vcmp.eq.f32.partialorder %v205_v30, 0.0 }
 0x1a2   :  { %v5629_v29 = vpop.eup %5628 }
 0x1a3   :  { %v5631_v31 = vpop.eup %5630  ;;  %v285_v32 = vmul.f32 %v5629_v29, %v5254_v28 }
 0x1a4   :  { %v300_v33 = vmul.f32 %v5631_v31, %v286_v23 }
 0x1a5   :  { %5632 = vrsqrt.f32 %v285_v32  ;;  %vm294_vm11 = vcmp.eq.f32.partialorder %v285_v32, inf  ;;  %v297_v55 = vand.u32 2147483648, %v285_v32  ;;  %vm296_vm12 = vcmp.eq.f32.partialorder %v285_v32, 0.0 }
 0x1a6   :  { %v301_v34 = vmul.f32 %v5631_v31, %v300_v33  ;;  %5634 = vrsqrt.f32 %v205_v30 }
 0x1a7   :  { %5636 = vrcp.f32 %v198_v5 }
 0x1a8   :  { %v302_v35 = vmul.f32 0.5, %v301_v34 }
 0x1aa   :  { %v303_v36 = vsub.f32 1.5, %v302_v35 }
 0x1ab   :  { %v5633_v37 = vpop.eup %5632 }
 0x1ac   :  { %v5635_v38 = vpop.eup %5634  ;;  %v304_v39 = vmul.f32 %v5631_v31, %v303_v36  ;;  %v288_v40 = vmul.f32 %v5633_v37, %v285_v32  ;;  %v91_v31 = vlaneseq }
 0x1ad   :  { %v208_v44 = vmul.f32 %v5635_v38, %v205_v30  ;;  %v5637_v8 = vpop.eup %5636 }
 0x1ae   :  { %v305_v41 = vmul.f32 %v304_v39, %v286_v23  ;;  %v289_v42 = vmul.f32 %v5633_v37, %v288_v40  ;;  %v206_v12 = vmul.f32 %v5637_v8, %v5253_v11  ;;  %v6285_v33 = vand.u32 127, %v91_v31 }
 0x1af   :  { %v209_v49 = vmul.f32 %v5635_v38, %v208_v44  ;;  %v6064_v11 = vmov 64  }
 0x1b0   :  { %v307_v45 = vsel %vm306_vm9, %v286_v23, %v305_v41  ;;  %v290_v46 = vmul.f32 0.5, %v289_v42  ;;  %5638 = vrsqrt.f32 %v206_v12  ;;  %vm226_vm15 = vcmp.eq.f32.partialorder %v206_v12, inf  ;;  %5465 = vset.pattern.permute.xlu2 %v6064_v11 }
 0x1b1   :  { %v310_v47 = vsel %vm308_vm10, %v309_v43, %v307_v45  ;;  %v210_v56 = vmul.f32 0.5, %v209_v49  ;;  %v229_v57 = vand.u32 2147483648, %v206_v12  ;;  %vm228_vm1 = vcmp.eq.f32.partialorder %v206_v12, 0.0 }
 0x1b2   :  { %318 = vperm.xlu0 %5457, %v310_v47   ;;  %v291_v48 = vsub.f32 1.5, %v290_v46  ;;  %vm231_vm2 = vcmp.eq.s32.totalorder %v6285_v33, 0 }
 0x1b3   :  { %v211_v61 = vsub.f32 1.5, %v210_v56 }
 0x1b4   :  { %v292_v50 = vmul.f32 %v5633_v37, %v291_v48 }
 0x1b5   :  { %v212_v62 = vmul.f32 %v5635_v38, %v211_v61 }
 0x1b6   :  { %v293_v54 = vmul.f32 %v292_v50, %v285_v32  ;;  %v5639_v15 = vpop.eup %5638 }
 0x1b7   :  { %v213_v0 = vmul.f32 %v212_v62, %v205_v30  ;;  %v220_v17 = vmul.f32 %v5639_v15, %v206_v12 }
 0x1b8   :  { %v295_v59 = vsel %vm294_vm11, %v285_v32, %v293_v54 }
 0x1b9   :  { %v298_v60 = vsel %vm296_vm12, %v297_v55, %v295_v59  ;;  %v215_v1 = vsel %vm214_vm13, %v205_v30, %v213_v0  ;;  %v331_v30 = vpop.permute.xlu2 %330 }
 0x1ba   :  { %313 = vperm.xlu1 %5458, %v298_v60   ;;  %5460 = vset.pattern.permute.xlu0 %v6059_v58  ;;  %v218_v3 = vsel %vm216_vm14, %v217_v2, %v215_v1 }
 0x1c1   :  { %v252_v32 = vpop.permute.xlu2 %251 }
 0x1c2   :  { %325 = vperm.xlu1 %5458, %v259_v18   ;;  %v221_v18 = vmul.f32 %v5639_v15, %v220_v17 }
 0x1c4   :  { %v222_v20 = vmul.f32 0.5, %v221_v18 }
 0x1c6   :  { %v223_v21 = vsub.f32 1.5, %v222_v20  ;;  %v92_v20 = vshrl.u32 %v91_v31, 7 }
 0x1c8   :  { %v224_v23 = vmul.f32 %v5639_v15, %v223_v21  ;;  %vm95_vm4 = vcmp.le.s32.totalorder %v6285_v33, %v92_v20 }
 0x1ca   :  { %5462 = vset.pattern.permute.xlu1 %v6059_v58  ;;  %v225_v63 = vmul.f32 %v224_v23, %v206_v12 }
 0x1cb   :  { %234 = vperm.xlu1 %5462, %v218_v3  }
 0x1cc   :  { %v227_v26 = vsel %vm226_vm15, %v206_v12, %v225_v63 }
 0x1cd   :  { %v230_v29 = vsel %vm228_vm1, %v229_v57, %v227_v26  ;;  %v6065_v57 = vmov -1e+09  }
 0x1d3   :  { %5463 = vset.pattern.permute.xlu1 %v6064_v11 }
 0x224   :  { %v319_v24 = vpop.permute.xlu0 %318 }
 0x225   :  { %v322_v25 = vmul.f32 %v319_v24, %v6230_v16  ;;  %v6346_v24 = vstv %s5246_s28  ;;  %s5358_s28 = sld [smem:[#allocation3 + $0xd]] }
 0x227   :  { %337 = vrot.lane.b32.xlu0 %v322_v25, %s6058_s24 }
 0x22c   :  { %v314_v27 = vpop.permute.xlu1 %313 }
 0x22d   :  { %v321_v28 = vmul.f32 %v314_v27, %v6227_v13 }
 0x22f   :  { %239 = vperm.xlu0 %5460, %v230_v29   ;;  %335 = vrot.lane.b32.xlu2 %v321_v28, %s6058_s24  ;;  %v96_v28 = vsel %vm95_vm4, 0.0, %v6065_v57  ;;  %v98_v29 = vld [vmem:[%s8003_s0 + $0x8] sm:$0xff] }
 0x234   :  { %v326_v34 = vpop.permute.xlu1 %325 }
 0x237   :  { %246 = vperm.xlu0 %5460, %v6268_v14  }
 0x23d   :  { %v235_v45 = vpop.permute.xlu1 %234 }
 0x23e   :  { %v242_v46 = vmul.f32 %v235_v45, %v6227_v13 }
 0x23f   :  { %5464 = vset.pattern.permute.xlu0 %v6064_v11 }
 0x289   :  { %v336_v35 = vpop.permute.xlu2 %335 }
 0x28a   :  { %v341_v36 = vsel %vm231_vm2, %v326_v34, %v336_v35  ;;  %v6360_v34 = vadd.f32 %v98_v29, %v96_v28 }
 0x28b   :  { %627 = vrot.lane.b32.xlu1 %v341_v36, %s6060_s26  ;;  %v428_v37 = vsub.f32 0.0, %v341_v36 }
 0x28d   :  { %619 = vrot.lane.b32.xlu2 %v428_v37, %s6060_s26  ;;  %v430_v14 = vsel %vm231_vm2, %v428_v37, %v341_v36 }
 0x28e   :  { %5258 = vmatpush.xpose.msk.msra.mxu1 %vm432_vm3, %v430_v14 }
 0x299   :  { %v338_v38 = vpop.permute.xlu0 %337 }
 0x29a   :  { %v342_v39 = vsel %vm231_vm2, %v331_v30, %v338_v38  ;;  %v6356_v30 = vstv %s5247_s29  ;;  %s5359_s29 = sld [smem:[#allocation3 + $0xe]] }
 0x29b   :  { %629 = vrot.lane.b32.xlu1 %v342_v39, %s6060_s26  ;;  %v429_v40 = vsub.f32 0.0, %v342_v39 }
 0x29d   :  { %621 = vrot.lane.b32.xlu2 %v429_v40, %s6060_s26  ;;  %v431_v41 = vsel %vm231_vm2, %v429_v40, %v342_v39 }
 0x29e   :  { %5260 = vmatpush.xpose.msk.msra.mxu2 %vm432_vm3, %v431_v41 }
 0x2a1   :  { %v240_v42 = vpop.permute.xlu0 %239 }
 0x2a2   :  { %v243_v43 = vmul.f32 %v240_v42, %v6230_v16 }
 0x2a4   :  { %v255_v44 = vsel %vm231_vm2, %v252_v32, %v243_v43  ;;  %v364_v43 = vmul.f32 %v6252_v51, %v6252_v51 }
 0x2a5   :  { %5261 = vmatmul.msk.f32.vlgmr.msra.gmra.mxu2 %vm432_vm3, %v255_v44  ;;  %842 = vrot.lane.b32.xlu2 %v341_v36, %s6061_s2 }
 0x2a6   :  { %662 = vrot.lane.b32.xlu0 %v255_v44, %s6060_s26 }
 0x2a9   :  { %v247_v47 = vpop.permute.xlu0 %246 }
 0x2aa   :  { %v254_v48 = vsel %vm231_vm2, %v247_v47, %v242_v46 }
 0x2ab   :  { %635 = vrot.lane.b32.xlu1 %v254_v48, %s6060_s26  ;;  %5259 = vmatmul.msk.f32.vlgmr.msra.gmra.mxu1 %vm432_vm3, %v254_v48 }
 0x2ad   :  { %1049 = vrot.lane.b32.xlu2 %v428_v37, %s6062_s27 }
 0x2ae   :  { %836 = vrot.lane.b32.xlu0 %v428_v37, %s6061_s2 }
 0x2b3   :  { %1055 = vrot.lane.b32.xlu1 %v341_v36, %s6062_s27 }
 0x2b5   :  { %348 = vrot.lane.b32.xlu2 %v6243_v22, %s6063_s3 }
 0x2b6   :  { %850 = vrot.lane.b32.xlu0 %v254_v48, %s6061_s2 }
 0x2bb   :  { %838 = vrot.lane.b32.xlu1 %v429_v40, %s6061_s2 }
 0x2bd   :  { %877 = vrot.lane.b32.xlu2 %v255_v44, %s6061_s2 }
 0x2be   :  { %1063 = vrot.lane.b32.xlu0 %v254_v48, %s6062_s27 }
 0x2c3   :  { %1051 = vrot.lane.b32.xlu1 %v429_v40, %s6062_s27 }
 0x2c5   :  { %1090 = vrot.lane.b32.xlu2 %v255_v44, %s6062_s27  ;;  %v5256_v44 = vadd.f32 -1.0, %v364_v43 }
 0x2c6   :  { %844 = vrot.lane.b32.xlu0 %v342_v39, %s6061_s2 }
 0x2cb   :  { %350 = vrot.lane.b32.xlu1 %v6235_v19, %s6063_s3 }
 0x2ce   :  { %1057 = vrot.lane.b32.xlu0 %v342_v39, %s6062_s27 }
 0x2e7   :  { %v620_v49 = vpop.permute.xlu2 %619 }
 0x2f7   :  { %v622_v50 = vpop.permute.xlu2 %621 }
 0x2fd   :  { %v628_v54 = vpop.permute.xlu1 %627 }
 0x2fe   :  { %v633_v55 = vsel %vm231_vm2, %v620_v49, %v628_v54 }
 0x2ff   :  { %v843_v56 = vpop.permute.xlu2 %842  ;;  %5264 = vmatpush.xpose.msk.msrb.mxu1 %vm432_vm3, %v633_v55 }
 0x307   :  { %v1050_v59 = vpop.permute.xlu2 %1049 }
 0x30d   :  { %v630_v60 = vpop.permute.xlu1 %629 }
 0x30e   :  { %v634_v61 = vsel %vm231_vm2, %v622_v50, %v630_v60 }
 0x30f   :  { %v349_v62 = vpop.permute.xlu2 %348  ;;  %5266 = vmatpush.xpose.msk.msrb.mxu2 %vm432_vm3, %v634_v61 }
 0x310   :  { %v354_v0 = vsel %vm114_vm0, %v349_v62, 0.0 }
 0x311   :  { %355 = vadd.xlane.f32.xlu0 %v354_v0 }
 0x317   :  { %v878_v26 = vpop.permute.xlu2 %877 }
 0x318   :  { %v663_v1 = vpop.permute.xlu0 %662 }
 0x319   :  { %5267 = vmatmul.msk.f32.vlgmr.msrb.gmra.mxu2 %vm432_vm3, %v663_v1 }
 0x31d   :  { %v636_v2 = vpop.permute.xlu1 %635 }
 0x31e   :  { %5265 = vmatmul.msk.f32.vlgmr.msrb.gmra.mxu1 %vm432_vm3, %v636_v2 }
 0x31f   :  { %v1091_v38 = vpop.permute.xlu2 %1090 }
 0x320   :  { %v837_v3 = vpop.permute.xlu0 %836 }
 0x321   :  { %v848_v4 = vsel %vm231_vm2, %v837_v3, %v843_v56 }
 0x322   :  { %5270 = vmatpush.xpose.msk.msra.mxu2 %vm432_vm3, %v848_v4 }
 0x325   :  { %v1056_v5 = vpop.permute.xlu1 %1055 }
 0x326   :  { %v1061_v7 = vsel %vm231_vm2, %v1050_v59, %v1056_v5 }
 0x327   :  { %5276 = vmatpush.xpose.msk.msrb.mxu2 %vm432_vm3, %v1061_v7 }
 0x328   :  { %v851_v8 = vpop.permute.xlu0 %850  ;;  %v482_v15 = vpop.f32.mrf.mxu2 }
 0x329   :  { %5271 = vmatmul.msk.f32.vlgmr.msra.gmra.mxu2 %vm432_vm3, %v851_v8  ;;  %v486_v18 = vmul.f32 2.0, %v482_v15  ;;  %v456_v47 = vpop.f32.mrf.mxu1 }
 0x32a   :  { %v485_v15 = vmul.f32 2.0, %v456_v47 }
 0x32b   :  { %v488_v23 = vadd.f32 2.0, %v486_v18 }
 0x32d   :  { %v839_v12 = vpop.permute.xlu1 %838  ;;  %v491_v27 = vmul.f32 %v6346_v24, %v488_v23 }
 0x32f   :  { %v494_v35 = vadd.f32 %v6356_v30, %v491_v27 }
 0x330   :  { %v1064_v17 = vpop.permute.xlu0 %1063 }
 0x331   :  { %5277 = vmatmul.msk.f32.vlgmr.msrb.gmra.mxu2 %vm432_vm3, %v1064_v17  ;;  %v6367_v14 = vadd.f32 %v494_v35, %v6360_v34 }
 0x333   :  { %v500_v39 = vsel %vm432_vm3, %v6367_v14, -inf }
 0x335   :  { %v1052_v21 = vpop.permute.xlu1 %1051 }
 0x338   :  { %v845_v25 = vpop.permute.xlu0 %844 }
 0x339   :  { %v849_v63 = vsel %vm231_vm2, %v839_v12, %v845_v25  ;;  %v365_v12 = vmul.f32 %v6254_v52, %v6254_v52 }
 0x33a   :  { %5272 = vmatpush.xpose.msk.msrb.mxu0 %vm432_vm3, %v849_v63 }
 0x33b   :  { %v5257_v17 = vadd.f32 -1.0, %v365_v12 }
 0x33d   :  { %5273 = vmatmul.msk.f32.vlgmr.msrb.gmra.mxu0 %vm432_vm3, %v878_v26  ;;  %v351_v31 = vpop.permute.xlu1 %350 }
 0x33e   :  { %v357_v32 = vsel %vm114_vm0, %v351_v31, 0.0 }
 0x33f   :  { %358 = vadd.xlane.f32.xlu2 %v357_v32 }
 0x340   :  { %v1058_v36 = vpop.permute.xlu0 %1057 }
 0x341   :  { %v1062_v37 = vsel %vm231_vm2, %v1052_v21, %v1058_v36  ;;  %v487_v21 = vadd.f32 2.0, %v485_v15 }
 0x342   :  { %5278 = vmatpush.xpose.msk.msra.mxu0 %vm432_vm3, %v1062_v37 }
 0x343   :  { %v490_v23 = vmul.f32 %v6346_v24, %v487_v21 }
 0x345   :  { %5279 = vmatmul.msk.f32.vlgmr.msra.gmra.mxu0 %vm432_vm3, %v1091_v38  ;;  %v493_v26 = vadd.f32 %v6356_v30, %v490_v23 }
 0x347   :  { %501 = vmax.xlane.f32.xlu2 %v500_v39 }
 0x35f   :  { %5467 = vperm.xlu2 %5465, %v5466_v53  }
 0x367   :  { %5477 = vset.pattern.permute.xlu2 %v6059_v58 }
 0x384   :  { %v356_v40 = vpop.xlane.xlu0 %355 }
 0x385   :  { %v360_v41 = vsub.f32 %v356_v40, %v6243_v22  ;;  %v97_v22 = vld [vmem:[%s8003_s0] sm:$0xff]  ;;  %s5293_s0 = sld [smem:[#allocation3 + $0x9]] }
 0x386   :  { %v6383_v61 = vadd.f32 %v97_v22, %v96_v28 }
 0x387   :  { %v362_v42 = vmax.f32 %v360_v41, 1e-08 }
 0x389   :  { %5640 = vrcp.f32 %v362_v42 }
 0x38f   :  { %v5641_v45 = vpop.eup %5640 }
 0x390   :  { %v370_v46 = vmul.f32 %v5641_v45, %v5256_v44 }
 0x392   :  { %5642 = vrsqrt.f32 %v370_v46  ;;  %vm379_vm5 = vcmp.eq.f32.partialorder %v370_v46, inf  ;;  %v382_v1 = vand.u32 2147483648, %v370_v46  ;;  %vm381_vm6 = vcmp.eq.f32.partialorder %v370_v46, 0.0 }
 0x398   :  { %v5643_v48 = vpop.eup %5642 }
 0x399   :  { %v373_v49 = vmul.f32 %v5643_v48, %v370_v46 }
 0x39b   :  { %v659_v50 = vpop.f32.mrf.mxu1  ;;  %v374_v54 = vmul.f32 %v5643_v48, %v373_v49 }
 0x39c   :  { %v689_v53 = vmul.f32 2.0, %v659_v50  ;;  %v686_v37 = vpop.f32.mrf.mxu2 }
 0x39d   :  { %v375_v55 = vmul.f32 0.5, %v374_v54  ;;  %v690_v38 = vmul.f32 2.0, %v686_v37 }
 0x39e   :  { %v691_v56 = vadd.f32 2.0, %v689_v53 }
 0x39f   :  { %v376_v59 = vsub.f32 1.5, %v375_v55  ;;  %v692_v39 = vadd.f32 2.0, %v690_v38 }
 0x3a0   :  { %v693_v60 = vmul.f32 %v691_v56, %v6346_v24 }
 0x3a1   :  { %v377_v51 = vmul.f32 %v5643_v48, %v376_v59  ;;  %v694_v40 = vmul.f32 %v692_v39, %v6346_v24 }
 0x3a2   :  { %v695_v62 = vadd.f32 %v693_v60, %v6356_v30 }
 0x3a3   :  { %v378_v0 = vmul.f32 %v377_v51, %v370_v46  ;;  %v696_v41 = vadd.f32 %v694_v40, %v6356_v30 }
 0x3a4   :  { %v6387_v2 = vadd.f32 %v695_v62, %v6383_v61 }
 0x3a5   :  { %v380_v3 = vsel %vm379_vm5, %v370_v46, %v378_v0  ;;  %v6403_v42 = vadd.f32 %v696_v41, %v6360_v34 }
 0x3a6   :  { %v383_v4 = vsel %vm381_vm6, %v382_v1, %v380_v3  ;;  %v699_v5 = vsel %vm432_vm3, %v6387_v2, -inf }
 0x3a7   :  { %398 = vperm.xlu1 %5463, %v383_v4   ;;  %700 = vmax.xlane.f32.xlu0 %v699_v5  ;;  %v702_v43 = vsel %vm432_vm3, %v6403_v42, -inf }
 0x3ac   :  { %v874_v46 = vpop.f32.mrf.mxu2 }
 0x3ad   :  { %v904_v47 = vmul.f32 2.0, %v874_v46 }
 0x3af   :  { %5478 = vset.pattern.permute.xlu1 %v6059_v58  ;;  %v906_v53 = vadd.f32 2.0, %v904_v47 }
 0x3b1   :  { %v908_v22 = vmul.f32 %v906_v53, %v6346_v24 }
 0x3b2   :  { %v359_v7 = vpop.xlane.xlu2 %358 }
 0x3b3   :  { %v361_v8 = vsub.f32 %v359_v7, %v6235_v19  ;;  %v495_v19 = vadd.f32 %v493_v26, %v6383_v61  ;;  %v910_v62 = vadd.f32 %v908_v22, %v6356_v30 }
 0x3b5   :  { %v363_v11 = vmax.f32 %v361_v8, 1e-08  ;;  %v497_v52 = vsel %vm432_vm3, %v495_v19, -inf  ;;  %v912_v0 = vadd.f32 %v910_v62, %v6383_v61 }
 0x3b7   :  { %5644 = vrcp.f32 %v363_v11  ;;  %v914_v1 = vsel %vm432_vm3, %v912_v0, -inf  ;;  %v1087_v11 = vpop.f32.mrf.mxu2 }
 0x3b8   :  { %v1117_v15 = vmul.f32 2.0, %v1087_v11 }
 0x3ba   :  { %v502_v5 = vpop.xlane.xlu2 %501 }
 0x3bb   :  { %v504_v7 = vsub.f32 %v6367_v14, %v502_v5 }
 0x3bd   :  { %v5645_v18 = vpop.eup %5644  ;;  %v507_v12 = vmul.f32 1.442695, %v504_v7 }
 0x3be   :  { %v371_v20 = vmul.f32 %v5645_v18, %v5257_v17  ;;  %v1119_v18 = vadd.f32 2.0, %v1117_v15 }
 0x3c0   :  { %5646 = vrsqrt.f32 %v371_v20  ;;  %vm391_vm7 = vcmp.eq.f32.partialorder %v371_v20, inf  ;;  %v394_v32 = vand.u32 2147483648, %v371_v20  ;;  %vm393_vm8 = vcmp.eq.f32.partialorder %v371_v20, 0.0 }
 0x3c1   :  { %v1121_v23 = vmul.f32 %v1119_v18, %v6346_v24 }
 0x3c6   :  { %v5647_v25 = vpop.eup %5646 }
 0x3c7   :  { %v385_v63 = vmul.f32 %v5647_v25, %v371_v20 }
 0x3c9   :  { %v386_v27 = vmul.f32 %v5647_v25, %v385_v63 }
 0x3cb   :  { %v387_v57 = vmul.f32 0.5, %v386_v27  ;;  %v1123_v27 = vadd.f32 %v1121_v23, %v6356_v30 }
 0x3cd   :  { %v388_v28 = vsub.f32 1.5, %v387_v57 }
 0x3cf   :  { %v389_v29 = vmul.f32 %v5647_v25, %v388_v28 }
 0x3d1   :  { %498 = vmax.xlane.f32.xlu1 %v497_v52  ;;  %v390_v31 = vmul.f32 %v389_v29, %v371_v20 }
 0x3d3   :  { %v392_v35 = vsel %vm391_vm7, %v371_v20, %v390_v31 }
 0x3d4   :  { %v395_v36 = vsel %vm393_vm8, %v394_v32, %v392_v35  ;;  %v5468_v32 = vpop.permute.xlu2 %5467 }
 0x3d5   :  { %403 = vperm.xlu0 %5464, %v395_v36   ;;  %v5470_v36 = vunpack.i.h.bf16 %v5468_v32  ;;  %v5469_v37 = vunpack.i.l.bf16 %v5468_v32 }
 0x3dd   :  { %5476 = vset.pattern.permute.xlu0 %v6059_v58 }
 0x3ff   :  { %703 = vmax.xlane.f32.xlu0 %v702_v43 }
 0x419   :  { %v399_v44 = vpop.permute.xlu1 %398 }
 0x41a   :  { %v6407_v45 = vpop.xlane.xlu0 %700  ;;  %v406_v55 = vmul.f32 %v399_v44, %v6227_v13  ;;  %v901_v13 = vpop.f32.mrf.mxu0 }
 0x41b   :  { %v905_v3 = vmul.f32 2.0, %v901_v13  ;;  %v705_v43 = vsub.f32 %v6387_v2, %v6407_v45 }
 0x41d   :  { %v707_v46 = vmul.f32 1.442695, %v705_v43 }
 0x422   :  { %v1114_v21 = vpop.f32.mrf.mxu0 }
 0x423   :  { %v1118_v25 = vmul.f32 2.0, %v1114_v21 }
 0x425   :  { %v1120_v26 = vadd.f32 2.0, %v1118_v25 }
 0x427   :  { %v1122_v57 = vmul.f32 %v1120_v26, %v6346_v24 }
 0x429   :  { %v1124_v29 = vadd.f32 %v1122_v57, %v6356_v30 }
 0x42b   :  { %v6430_v52 = vadd.f32 %v1124_v29, %v6360_v34 }
 0x42d   :  { %v1130_v31 = vsel %vm432_vm3, %v6430_v52, -inf }
 0x444   :  { %v499_v48 = vpop.xlane.xlu1 %498 }
 0x445   :  { %v503_v49 = vsub.f32 %v495_v19, %v499_v48  ;;  %v1125_v19 = vadd.f32 %v1123_v27, %v6383_v61 }
 0x447   :  { %v505_v50 = vmul.f32 1.442695, %v503_v49  ;;  %v404_v54 = vpop.permute.xlu0 %403  ;;  %v1127_v28 = vsel %vm432_vm3, %v1125_v19, -inf }
 0x448   :  { %v407_v56 = vmul.f32 %v404_v54, %v6230_v16  ;;  %v907_v16 = vadd.f32 2.0, %v905_v3 }
 0x449   :  { %5648 = vpow2.f32 %v505_v50 }
 0x44a   :  { %v5471_v59 = vpack.i.bf16 %v407_v56, %v406_v55  ;;  %v909_v4 = vmul.f32 %v907_v16, %v6346_v24  ;;  %5650 = vpow2.f32 %v507_v12 }
 0x44c   :  { %5472 = vrot.lane.b32.xlu1 %v5471_v59, %s6063_s3  ;;  %v911_v8 = vadd.f32 %v909_v4, %v6356_v30  ;;  %s7357_s3 = sld [smem:[#allocation3 + $0xa]] }
 0x44e   :  { %v913_v17 = vadd.f32 %v911_v8, %v6360_v34 }
 0x44f   :  { %v5649_v60 = vpop.eup %5648 }
 0x450   :  { %v509_v51 = vsel %vm432_vm3, %v5649_v60, 0.0  ;;  %v917_v20 = vsel %vm432_vm3, %v913_v17, -inf  ;;  %v5651_v63 = vpop.eup %5650 }
 0x451   :  { %510 = vadd.xlane.f32.xlu2 %v509_v51  ;;  %v512_v14 = vsel %vm432_vm3, %v5651_v63, 0.0 }
 0x459   :  { %915 = vmax.xlane.f32.xlu2 %v914_v1 }
 0x472   :  { %v704_v41 = vpop.xlane.xlu0 %703 }
 0x473   :  { %v706_v44 = vsub.f32 %v6403_v42, %v704_v41 }
 0x475   :  { %v709_v48 = vmul.f32 1.442695, %v706_v44 }
 0x476   :  { %918 = vmax.xlane.f32.xlu1 %v917_v20 }
 0x47e   :  { %513 = vadd.xlane.f32.xlu1 %v512_v14 }
 0x486   :  { %1128 = vmax.xlane.f32.xlu1 %v1127_v28 }
 0x48e   :  { %1131 = vmax.xlane.f32.xlu1 %v1130_v31 }
 0x4be   :  { %v5473_v35 = vpop.permute.xlu1 %5472 }
 0x4bf   :  { %v5475_v38 = vunpack.i.h.bf16 %v5473_v35  ;;  %v5474_v24 = vunpack.i.l.bf16 %v5473_v35 }
 0x4c1   :  { %v426_v61 = vsel %vm231_vm2, %v5469_v37, %v5474_v24  ;;  %v427_v30 = vsel %vm231_vm2, %v5470_v36, %v5475_v38 }
 0x4c2   :  { %1149 = vrot.lane.b32.xlu2 %v426_v61, %s6062_s27  ;;  %936 = vrot.lane.b32.xlu1 %v426_v61, %s6061_s2 }
 0x4c3   :  { %722 = vrot.lane.b32.xlu0 %v426_v61, %s6060_s26  ;;  %537 = vmatpush.msra.mxu3 %v426_v61 }
 0x4c4   :  { %v511_v34 = vpop.xlane.xlu2 %510 }
 0x4c5   :  { %560 = vmatpush.msrb.mxu3 %v427_v30  ;;  %5652 = vrcp.f32 %v511_v34 }
 0x4c6   :  { %5654 = vpow2.f32 %v707_v46 }
 0x4c7   :  { %5656 = vpow2.f32 %v709_v48 }
 0x4cb   :  { %v5653_v39 = vpop.eup %5652 }
 0x4cc   :  { %v517_v40 = vmul.f32 %v5653_v39, %v5649_v60  ;;  %v916_v47 = vpop.xlane.xlu2 %915  ;;  %v5655_v54 = vpop.eup %5654 }
 0x4cd   :  { %v920_v49 = vsub.f32 %v912_v0, %v916_v47  ;;  %v6445_v53 = vpop.eup %5656  ;;  %v711_v59 = vsel %vm432_vm3, %v5655_v54, 0.0 }
 0x4ce   :  { %5262 = vmatmul.msk.f32.vlgmr.msra.gmra.mxu3 %vm432_vm3, %v517_v40  ;;  %v714_v2 = vsel %vm432_vm3, %v6445_v53, 0.0 }
 0x4cf   :  { %v922_v50 = vmul.f32 1.442695, %v920_v49 }
 0x4d1   :  { %5658 = vpow2.f32 %v922_v50 }
 0x4d7   :  { %v5659_v42 = vpop.eup %5658 }
 0x4d8   :  { %v926_v60 = vsel %vm432_vm3, %v5659_v42, 0.0 }
 0x4e9   :  { %v919_v55 = vpop.xlane.xlu1 %918 }
 0x4ea   :  { %v921_v56 = vsub.f32 %v913_v17, %v919_v55 }
 0x4eb   :  { %712 = vadd.xlane.f32.xlu2 %v711_v59 }
 0x4ec   :  { %v924_v22 = vmul.f32 1.442695, %v921_v56 }
 0x4ed   :  { %715 = vadd.xlane.f32.xlu0 %v714_v2 }
 0x4ee   :  { %5660 = vpow2.f32 %v924_v22 }
 0x4f1   :  { %v514_v45 = vpop.xlane.xlu1 %513 }
 0x4f2   :  { %5662 = vrcp.f32 %v514_v45 }
 0x4f3   :  { %927 = vadd.xlane.f32.xlu2 %v926_v60 }
 0x4f4   :  { %v5661_v51 = vpop.eup %5660 }
 0x4f5   :  { %v929_v62 = vsel %vm432_vm3, %v5661_v51, 0.0 }
 0x4f6   :  { %930 = vadd.xlane.f32.xlu1 %v929_v62 }
 0x4f8   :  { %v5663_v0 = vpop.eup %5662 }
 0x4f9   :  { %v1129_v1 = vpop.xlane.xlu1 %1128  ;;  %v518_v13 = vmul.f32 %v5663_v0, %v5651_v63 }
 0x4fa   :  { %v1133_v3 = vsub.f32 %v1125_v19, %v1129_v1 }
 0x4fb   :  { %5263 = vmatmul.msk.f32.vlgmr.msrb.gmra.mxu3 %vm432_vm3, %v518_v13 }
 0x4fc   :  { %v1135_v16 = vmul.f32 1.442695, %v1133_v3 }
 0x4fe   :  { %5664 = vpow2.f32 %v1135_v16 }
 0x501   :  { %962 = vrot.lane.b32.xlu0 %v427_v30, %s6061_s2  ;;  %v1132_v7 = vpop.xlane.xlu1 %1131 }
 0x502   :  { %v1134_v11 = vsub.f32 %v6430_v52, %v1132_v7 }
 0x504   :  { %v5665_v4 = vpop.eup %5664  ;;  %v1137_v15 = vmul.f32 1.442695, %v1134_v11 }
 0x505   :  { %v1139_v5 = vsel %vm432_vm3, %v5665_v4, 0.0 }
 0x506   :  { %1140 = vadd.xlane.f32.xlu2 %v1139_v5  ;;  %5666 = vpow2.f32 %v1137_v15 }
 0x50c   :  { %v5667_v17 = vpop.eup %5666 }
 0x50d   :  { %v1142_v18 = vsel %vm432_vm3, %v5667_v17, 0.0 }
 0x50f   :  { %1175 = vrot.lane.b32.xlu1 %v427_v30, %s6062_s27 }
 0x51c   :  { %v1150_v25 = vpop.permute.xlu2 %1149 }
 0x51e   :  { %749 = vrot.lane.b32.xlu2 %v427_v30, %s6060_s26 }
 0x534   :  { %v937_v8 = vpop.permute.xlu1 %936 }
 0x535   :  { %v723_v12 = vpop.permute.xlu0 %722 }
 0x536   :  { %743 = vmatpush.msra.mxu3 %v723_v12 }
 0x538   :  { %957 = vmatpush.msrb.mxu3 %v937_v8 }
 0x547   :  { %1143 = vadd.xlane.f32.xlu2 %v1142_v18 }
 0x551   :  { %v6459_v20 = vpop.f32.mrf.mxu3 }
 0x552   :  { %v565_v21 = vmul.f32 %v6459_v20, %v6459_v20  ;;  %v573_v62 = vmul.f32 2.0, %v6459_v20 }
 0x554   :  { %v567_v23 = vsel %vm432_vm3, %v565_v21, 0.0  ;;  %v575_v1 = vmul.f32 %v573_v62, %v6459_v20 }
 0x555   :  { %568 = vadd.xlane.f32.xlu1 %v567_v23 }
 0x55e   :  { %v713_v63 = vpop.xlane.xlu2 %712 }
 0x55f   :  { %5668 = vrcp.f32 %v713_v63 }
 0x560   :  { %v716_v28 = vpop.xlane.xlu0 %715 }
 0x565   :  { %v5669_v26 = vpop.eup %5668 }
 0x566   :  { %v719_v14 = vmul.f32 %v5669_v26, %v5655_v54  ;;  %v928_v27 = vpop.xlane.xlu2 %927 }
 0x567   :  { %5670 = vrcp.f32 %v928_v27 }
 0x568   :  { %5268 = vmatmul.msk.f32.vlgmr.msra.gmra.mxu3 %vm432_vm3, %v719_v14  ;;  %5672 = vrcp.f32 %v716_v28 }
 0x569   :  { %1170 = vmatpush.msra.mxu3 %v1150_v25  ;;  %v931_v52 = vpop.xlane.xlu1 %930 }
 0x56d   :  { %v5671_v57 = vpop.eup %5670 }
 0x56e   :  { %v934_v19 = vmul.f32 %v5671_v57, %v5659_v42  ;;  %v5673_v31 = vpop.eup %5672 }
 0x56f   :  { %v720_v35 = vmul.f32 %v5673_v31, %v6445_v53 }
 0x570   :  { %5274 = vmatmul.msk.f32.vlgmr.msrb.gmra.mxu3 %vm432_vm3, %v934_v19 }
 0x573   :  { %v963_v38 = vpop.permute.xlu0 %962 }
 0x579   :  { %v1141_v29 = vpop.xlane.xlu2 %1140 }
 0x57a   :  { %5674 = vrcp.f32 %v1141_v29 }
 0x57b   :  { %5676 = vrcp.f32 %v931_v52 }
 0x57e   :  { %v6471_v41 = vpop.f32.mrf.mxu3 }
 0x580   :  { %v5675_v32 = vpop.eup %5674 }
 0x581   :  { %v1147_v36 = vmul.f32 %v5675_v32, %v5665_v4  ;;  %v750_v37 = vpop.permute.xlu2 %749  ;;  %v1176_v24 = vpop.permute.xlu1 %1175 }
 0x582   :  { %770 = vmatpush.msra.mxu1 %v750_v37  ;;  %v5677_v61 = vpop.eup %5676 }
 0x583   :  { %5269 = vmatmul.msk.f32.vlgmr.msra.gmra.mxu1 %vm432_vm3, %v720_v35  ;;  %5280 = vmatmul.msk.f32.vlgmr.msra.gmra.mxu3 %vm432_vm3, %v1147_v36  ;;  %v935_v30 = vmul.f32 %v5677_v61, %v5661_v51 }
 0x584   :  { %983 = vmatpush.msrb.mxu1 %v963_v38 }
 0x586   :  { %1196 = vmatpush.msra.mxu1 %v1176_v24 }
 0x58b   :  { %5275 = vmatmul.msk.f32.vlgmr.msrb.gmra.mxu1 %vm432_vm3, %v935_v30 }
 0x5ba   :  { %v1144_v34 = vpop.xlane.xlu2 %1143 }
 0x5bb   :  { %5678 = vrcp.f32 %v1144_v34 }
 0x5c1   :  { %v5679_v39 = vpop.eup %5678 }
 0x5c2   :  { %v1148_v40 = vmul.f32 %v5679_v39, %v5667_v17 }
 0x5c4   :  { %5281 = vmatmul.msk.f32.vlgmr.msra.gmra.mxu1 %vm432_vm3, %v1148_v40 }
 0x5c8   :  { %v569_v0 = vpop.xlane.xlu1 %568 }
 0x5c9   :  { %v577_v13 = vsub.f32 %v569_v0, %v575_v1 }
 0x5cb   :  { %v579_v3 = vand.u32 2147483647, %v577_v13 }
 0x5cd   :  { %v581_v4 = vmax.f32 %v579_v3, 1e-08 }
 0x5cf   :  { %5680 = vrsqrt.f32 %v581_v4  ;;  %vm589_vm13 = vweird.f32 %v581_v4 }
 0x5d5   :  { %v5681_v15 = vpop.eup %5680 }
 0x5d6   :  { %v584_v17 = vmul.f32 %v5681_v15, %v581_v4  ;;  %vm590_vm12 = vweird.f32 %v5681_v15 }
 0x5d7   :  { %vm591_vm14 = vmor %vm589_vm13, %vm590_vm12 }
 0x5d8   :  { %v585_v25 = vmul.f32 %v5681_v15, %v584_v17 }
 0x5da   :  { %v586_v14 = vmul.f32 0.5, %v585_v25 }
 0x5dc   :  { %v587_v52 = vsub.f32 1.5, %v586_v14 }
 0x5de   :  { %v588_v36 = vmul.f32 %v5681_v15, %v587_v52 }
 0x5e0   :  { %v592_v30 = vsel %vm591_vm14, %v5681_v15, %v588_v36 }
 0x5eb   :  { %v6473_v43 = vpop.f32.mrf.mxu3 }
 0x5ec   :  { %v775_v44 = vmul.f32 %v6473_v43, %v6473_v43  ;;  %v783_v16 = vmul.f32 2.0, %v6473_v43 }
 0x5ee   :  { %v777_v46 = vsel %vm432_vm3, %v775_v44, 0.0  ;;  %v785_v5 = vmul.f32 %v783_v16, %v6473_v43 }
 0x5ef   :  { %778 = vadd.xlane.f32.xlu0 %v777_v46 }
 0x5f3   :  { %v6483_v50 = vpop.f32.mrf.mxu3 }
 0x5f4   :  { %v988_v54 = vmul.f32 %v6483_v50, %v6483_v50  ;;  %v996_v29 = vmul.f32 2.0, %v6483_v50 }
 0x5f6   :  { %v990_v53 = vsel %vm432_vm3, %v988_v54, 0.0  ;;  %v998_v35 = vmul.f32 %v996_v29, %v6483_v50 }
 0x600   :  { %v6478_v47 = vpop.f32.mrf.mxu1 }
 0x601   :  { %v776_v48 = vmul.f32 %v6478_v47, %v6478_v47  ;;  %v784_v57 = vmul.f32 2.0, %v6478_v47 }
 0x603   :  { %v780_v49 = vsel %vm432_vm3, %v776_v48, 0.0  ;;  %v786_v31 = vmul.f32 %v784_v57, %v6478_v47 }
 0x604   :  { %781 = vadd.xlane.f32.xlu2 %v780_v49 }
 0x606   :  { %v6488_v55 = vpop.f32.mrf.mxu3 }
 0x607   :  { %v1201_v56 = vmul.f32 %v6488_v55, %v6488_v55  ;;  %v1209_v34 = vmul.f32 2.0, %v6488_v55 }
 0x608   :  { %v6493_v22 = vpop.f32.mrf.mxu1 }
 0x609   :  { %v1203_v59 = vsel %vm432_vm3, %v1201_v56, 0.0  ;;  %v989_v2 = vmul.f32 %v6493_v22, %v6493_v22  ;;  %v1211_v44 = vmul.f32 %v1209_v34, %v6488_v55 }
 0x60b   :  { %v993_v42 = vsel %vm432_vm3, %v989_v2, 0.0 }
 0x60c   :  { %991 = vadd.xlane.f32.xlu2 %v990_v53 }
 0x614   :  { %1204 = vadd.xlane.f32.xlu2 %v1203_v59 }
 0x61c   :  { %994 = vadd.xlane.f32.xlu2 %v993_v42 }
 0x641   :  { %v6498_v45 = vpop.f32.mrf.mxu1 }
 0x642   :  { %v1202_v60 = vmul.f32 %v6498_v45, %v6498_v45 }
 0x644   :  { %v1206_v51 = vsel %vm432_vm3, %v1202_v60, 0.0 }
 0x645   :  { %1207 = vadd.xlane.f32.xlu2 %v1206_v51 }
 0x662   :  { %v779_v7 = vpop.xlane.xlu0 %778 }
 0x663   :  { %v787_v8 = vsub.f32 %v779_v7, %v785_v5 }
 0x665   :  { %v789_v11 = vand.u32 2147483647, %v787_v8 }
 0x667   :  { %v791_v12 = vmax.f32 %v789_v11, 1e-08 }
 0x669   :  { %5682 = vrsqrt.f32 %v791_v12  ;;  %vm799_vm10 = vweird.f32 %v791_v12 }
 0x66f   :  { %v5683_v18 = vpop.eup %5682 }
 0x670   :  { %v794_v21 = vmul.f32 %v5683_v18, %v791_v12  ;;  %vm800_vm9 = vweird.f32 %v5683_v18 }
 0x671   :  { %vm801_vm11 = vmor %vm799_vm10, %vm800_vm9 }
 0x672   :  { %v795_v23 = vmul.f32 %v5683_v18, %v794_v21 }
 0x674   :  { %v796_v63 = vmul.f32 0.5, %v795_v23  ;;  %v997_v23 = vmul.f32 2.0, %v6493_v22 }
 0x676   :  { %v797_v26 = vsub.f32 1.5, %v796_v63  ;;  %v999_v63 = vmul.f32 %v997_v23, %v6493_v22  ;;  %v1264_v23 = vld [vmem:[%s7974_s14] sm:$0xff] }
 0x677   :  { %v782_v27 = vpop.xlane.xlu2 %781 }
 0x678   :  { %v798_v19 = vmul.f32 %v5683_v18, %v797_v26  ;;  %v788_v32 = vsub.f32 %v782_v27, %v786_v31  ;;  %v1210_v31 = vmul.f32 2.0, %v6498_v45 }
 0x67a   :  { %v802_v28 = vsel %vm801_vm11, %v5683_v18, %v798_v19  ;;  %v790_v24 = vand.u32 2147483647, %v788_v32  ;;  %v566_v18 = vmul.f32 %v6471_v41, %v6471_v41 }
 0x67b   :  { %815 = vperm.xlu0 %5476, %v802_v28  }
 0x67c   :  { %v792_v40 = vmax.f32 %v790_v24, 1e-08  ;;  %v570_v21 = vsel %vm432_vm3, %v566_v18, 0.0  ;;  %v1265_v18 = vld [vmem:[%s7974_s14 + $0x8] sm:$0xff] }
 0x67e   :  { %vm809_vm9 = vweird.f32 %v792_v40 }
 0x67f   :  { %v992_v37 = vpop.xlane.xlu2 %991 }
 0x680   :  { %v1000_v38 = vsub.f32 %v992_v37, %v998_v35  ;;  %v1212_v37 = vmul.f32 %v1210_v31, %v6498_v45  ;;  %v1420_v31 = vld [vmem:[%s7970_s10] sm:$0xff] }
 0x682   :  { %v1002_v61 = vand.u32 2147483647, %v1000_v38 }
 0x683   :  { %605 = vperm.xlu0 %5476, %v592_v30  }
 0x684   :  { %v1004_v39 = vmax.f32 %v1002_v61, 1e-08 }
 0x686   :  { %5684 = vrsqrt.f32 %v1004_v39  ;;  %vm1012_vm1 = vweird.f32 %v1004_v39 }
 0x687   :  { %v1205_v46 = vpop.xlane.xlu2 %1204  ;;  %5686 = vrsqrt.f32 %v792_v40 }
 0x688   :  { %v1213_v48 = vsub.f32 %v1205_v46, %v1211_v44 }
 0x68a   :  { %v1215_v49 = vand.u32 2147483647, %v1213_v48 }
 0x68c   :  { %v5685_v54 = vpop.eup %5684  ;;  %v1217_v53 = vmax.f32 %v1215_v49, 1e-08 }
 0x68d   :  { %v1007_v56 = vmul.f32 %v5685_v54, %v1004_v39  ;;  %v5687_v2 = vpop.eup %5686  ;;  %vm1013_vm15 = vweird.f32 %v5685_v54 }
 0x68e   :  { %5688 = vrsqrt.f32 %v1217_v53  ;;  %v804_v60 = vmul.f32 %v5687_v2, %v792_v40  ;;  %vm1014_vm4 = vmor %vm1012_vm1, %vm1013_vm15  ;;  %vm1225_vm6 = vweird.f32 %v1217_v53  ;;  %vm810_vm8 = vweird.f32 %v5687_v2 }
 0x68f   :  { %v1008_v59 = vmul.f32 %v5685_v54, %v1007_v56  ;;  %vm811_vm10 = vmor %vm809_vm9, %vm810_vm8  ;;  %v995_v25 = vpop.xlane.xlu2 %994  ;;  %vm7990_vm8 = vcmask 195712   ;;  %vm7989_vm9 = vcmask 261312  }
 0x690   :  { %v805_v16 = vmul.f32 %v5687_v2, %v804_v60  ;;  %v1001_v26 = vsub.f32 %v995_v25, %v999_v63  ;;  %v574_v60 = vmul.f32 2.0, %v6471_v41 }
 0x691   :  { %v1009_v42 = vmul.f32 0.5, %v1008_v59 }
 0x692   :  { %v806_v7 = vmul.f32 0.5, %v805_v16  ;;  %v1003_v14 = vand.u32 2147483647, %v1001_v26 }
 0x693   :  { %v1010_v51 = vsub.f32 1.5, %v1009_v42 }
 0x694   :  { %v5689_v62 = vpop.eup %5688  ;;  %v807_v12 = vsub.f32 1.5, %v806_v7  ;;  %v1005_v27 = vmax.f32 %v1003_v14, 1e-08 }
 0x695   :  { %v1220_v0 = vmul.f32 %v5689_v62, %v1217_v53  ;;  %v1011_v1 = vmul.f32 %v5685_v54, %v1010_v51  ;;  %vm1226_vm5 = vweird.f32 %v5689_v62  ;;  %v576_v51 = vmul.f32 %v574_v60, %v6471_v41 }
 0x696   :  { %vm1227_vm7 = vmor %vm1225_vm6, %vm1226_vm5  ;;  %v808_v15 = vmul.f32 %v5687_v2, %v807_v12  ;;  %5690 = vrsqrt.f32 %v1005_v27  ;;  %vm1022_vm12 = vweird.f32 %v1005_v27  ;;  %v1267_v12 = vld [vmem:[%s7974_s14 + $0x18] sm:$0xff] }
 0x697   :  { %v1015_v13 = vsel %vm1014_vm4, %v5685_v54, %v1011_v1  ;;  %v1221_v3 = vmul.f32 %v5689_v62, %v1220_v0  ;;  %1287 = vmatpush.msra.mxu2 %v1267_v12 }
 0x698   :  { %1028 = vperm.xlu2 %5477, %v1015_v13   ;;  %v812_v17 = vsel %vm811_vm10, %v5687_v2, %v808_v15  ;;  %v1266_v15 = vld [vmem:[%s7974_s14 + $0x10] sm:$0xff] }
 0x699   :  { %v1222_v4 = vmul.f32 0.5, %v1221_v3  ;;  %1288 = vmatpush.msra.mxu2 %v1266_v15 }
 0x69b   :  { %v1223_v5 = vsub.f32 1.5, %v1222_v4  ;;  %1289 = vmatpush.msra.mxu2 %v1265_v18 }
 0x69c   :  { %v5691_v57 = vpop.eup %5690 }
 0x69d   :  { %v1224_v8 = vmul.f32 %v5689_v62, %v1223_v5  ;;  %v1017_v19 = vmul.f32 %v5691_v57, %v1005_v27  ;;  %vm1023_vm11 = vweird.f32 %v5691_v57  ;;  %1290 = vmatpush.msra.mxu2 %v1264_v23 }
 0x69e   :  { %vm1024_vm13 = vmor %vm1022_vm12, %vm1023_vm11 }
 0x69f   :  { %v1228_v11 = vsel %vm1227_vm7, %v5689_v62, %v1224_v8  ;;  %v1018_v28 = vmul.f32 %v5691_v57, %v1017_v19  ;;  %vm7991_vm7 = vcmask 130112  }
 0x6a0   :  { %1241 = vperm.xlu1 %5478, %v1228_v11  }
 0x6a1   :  { %v1019_v52 = vmul.f32 0.5, %v1018_v28 }
 0x6a3   :  { %v1020_v36 = vsub.f32 1.5, %v1019_v52 }
 0x6a5   :  { %v1021_v30 = vmul.f32 %v5691_v57, %v1020_v36 }
 0x6a7   :  { %v1025_v40 = vsel %vm1024_vm13, %v5691_v57, %v1021_v30 }
 0x6a8   :  { %820 = vperm.xlu1 %5478, %v812_v17  }
 0x6b8   :  { %v1208_v29 = vpop.xlane.xlu2 %1207 }
 0x6b9   :  { %v1214_v24 = vsub.f32 %v1208_v29, %v1212_v37  ;;  %v1423_v29 = vld [vmem:[%s7970_s10 + $0x18] sm:$0xff] }
 0x6ba   :  { %1446 = vmatpush.msrb.mxu0 %v1423_v29 }
 0x6c1   :  { %571 = vadd.xlane.f32.xlu2 %v570_v21 }
 0x6ed   :  { %v816_v32 = vpop.permute.xlu0 %815 }
 0x6ee   :  { %v823_v35 = vmul.f32 %v816_v32, %v6473_v43  ;;  %v1216_v43 = vand.u32 2147483647, %v1214_v24  ;;  %v1421_v32 = vld [vmem:[%s7970_s10 + $0x8] sm:$0xff] }
 0x6f0   :  { %827 = vrot.lane.b32.xlu1 %v823_v35, %s6066_s8  ;;  %v1218_v44 = vmax.f32 %v1216_v43, 1e-08  ;;  %v5484_v35 = vpack.i.bf16 %v1420_v31, %v1421_v32 }
 0x6f2   :  { %v1029_v38 = vpop.permute.xlu2 %1028  ;;  %5692 = vrsqrt.f32 %v1218_v44  ;;  %vm1235_vm15 = vweird.f32 %v1218_v44 }
 0x6f3   :  { %v1036_v61 = vmul.f32 %v1029_v38, %v6483_v50 }
 0x6f5   :  { %1040 = vrot.lane.b32.xlu0 %v1036_v61, %s6067_s5  ;;  %v606_v34 = vpop.permute.xlu0 %605 }
 0x6f6   :  { %v613_v39 = vmul.f32 %v606_v34, %v6459_v20 }
 0x6f8   :  { %615 = vst.msk [vmem:[#allocation2] sm:$0xff] %vm432_vm3, %v613_v39  ;;  %1033 = vperm.xlu1 %5478, %v1025_v40   ;;  %v5693_v46 = vpop.eup %5692 }
 0x6f9   :  { %v1230_v48 = vmul.f32 %v5693_v46, %v1218_v44  ;;  %vm1236_vm14 = vweird.f32 %v5693_v46 }
 0x6fa   :  { %vm1237_vm1 = vmor %vm1235_vm15, %vm1236_vm14 }
 0x6fb   :  { %v1231_v50 = vmul.f32 %v5693_v46, %v1230_v48  ;;  %v1409_v48 = vld [vmem:[%s8004_s4] sm:$0xff] }
 0x6fd   :  { %v1232_v49 = vmul.f32 0.5, %v1231_v50 }
 0x6ff   :  { %v1233_v56 = vsub.f32 1.5, %v1232_v49 }
 0x701   :  { %v1234_v20 = vmul.f32 %v5693_v46, %v1233_v56 }
 0x703   :  { %v1238_v42 = vsel %vm1237_vm1, %v5693_v46, %v1234_v20  ;;  %v1411_v20 = vld [vmem:[%s8004_s4 + $0x10] sm:$0xff] }
 0x712   :  { %v1242_v54 = vpop.permute.xlu1 %1241 }
 0x713   :  { %v1249_v53 = vmul.f32 %v1242_v54, %v6488_v55  ;;  %v1410_v54 = vld [vmem:[%s8004_s4 + $0x8] sm:$0xff] }
 0x715   :  { %1253 = vrot.lane.b32.xlu0 %v1249_v53, %s6068_s9 }
 0x71a   :  { %v821_v59 = vpop.permute.xlu1 %820 }
 0x71b   :  { %v824_v2 = vmul.f32 %v821_v59, %v6478_v47 }
 0x71d   :  { %1246 = vperm.xlu0 %5476, %v1238_v42   ;;  %829 = vrot.lane.b32.xlu1 %v824_v2, %s6066_s8 }
 0x734   :  { %v572_v55 = vpop.xlane.xlu2 %571 }
 0x735   :  { %v578_v62 = vsub.f32 %v572_v55, %v576_v51  ;;  %v1412_v51 = vld [vmem:[%s8004_s4 + $0x18] sm:$0xff]  ;;  %s5292_s4 = sld [smem:[#allocation3 + $0x8]] }
 0x737   :  { %v580_v0 = vand.u32 2147483647, %v578_v62 }
 0x739   :  { %v582_v1 = vmax.f32 %v580_v0, 1e-08  ;;  %v1336_v0 = vstv %s6590_s6  ;;  %s7206_s6 = sld [smem:[#allocation3 + $0x10]] }
 0x73b   :  { %5694 = vrsqrt.f32 %v582_v1  ;;  %vm599_vm5 = vweird.f32 %v582_v1 }
 0x741   :  { %v5695_v13 = vpop.eup %5694 }
 0x742   :  { %v594_v3 = vmul.f32 %v5695_v13, %v582_v1  ;;  %vm600_vm4 = vweird.f32 %v5695_v13 }
 0x743   :  { %vm601_vm6 = vmor %vm599_vm5, %vm600_vm4 }
 0x744   :  { %v595_v16 = vmul.f32 %v5695_v13, %v594_v3 }
 0x746   :  { %v596_v4 = vmul.f32 0.5, %v595_v16 }
 0x748   :  { %v597_v5 = vsub.f32 1.5, %v596_v4 }
 0x74a   :  { %v598_v47 = vmul.f32 %v5695_v13, %v597_v5 }
 0x74c   :  { %v602_v7 = vsel %vm601_vm6, %v5695_v13, %v598_v47 }
 0x74d   :  { %610 = vperm.xlu2 %5477, %v602_v7  }
 0x762   :  { %v828_v8 = vpop.permute.xlu1 %827 }
 0x763   :  { %834 = vst.msk [vmem:[#allocation2] sm:$0xff] %vm7991_vm7, %v828_v8 }
 0x767   :  { %v1041_v11 = vpop.permute.xlu0 %1040 }
 0x768   :  { %1047 = vst.msk [vmem:[#allocation2] sm:$0xff] %vm7990_vm8, %v1041_v11 }
 0x76a   :  { %v1034_v17 = vpop.permute.xlu1 %1033 }
 0x76b   :  { %v1037_v21 = vmul.f32 %v1034_v17, %v6493_v22 }
 0x76d   :  { %1042 = vrot.lane.b32.xlu0 %v1037_v21, %s6067_s5 }
 0x787   :  { %v1254_v25 = vpop.permute.xlu0 %1253 }
 0x788   :  { %1260 = vst.msk [vmem:[#allocation2] sm:$0xff] %vm7989_vm9, %v1254_v25 }
 0x78f   :  { %v1247_v63 = vpop.permute.xlu0 %1246  ;;  %v1262_v26 = vld [vmem:[#allocation2] sm:$0xff]  ;;  %v830_v57 = vpop.permute.xlu1 %829 }
 0x790   :  { %v1250_v14 = vmul.f32 %v1247_v63, %v6498_v45  ;;  %5283 = vmatmul.msk.f32.vlgmr.msra.gmra.mxu2 %vm114_vm0, %v1262_v26  ;;  %v1422_v45 = vld [vmem:[%s7970_s10 + $0x10] sm:$0xff]  ;;  %s5290_s10 = sld [smem:[#allocation3 + $0x6]] }
 0x791   :  { %1447 = vmatpush.msrb.mxu0 %v1422_v45 }
 0x792   :  { %1255 = vrot.lane.b32.xlu1 %v1250_v14, %s6068_s9 }
 0x793   :  { %1448 = vmatpush.msrb.mxu0 %v1421_v32 }
 0x795   :  { %1449 = vmatpush.msrb.mxu0 %v1420_v31 }
 0x7a7   :  { %v611_v22 = vpop.permute.xlu2 %610 }
 0x7a8   :  { %v614_v27 = vmul.f32 %v611_v22, %v6471_v41  ;;  %v5479_v41 = vpack.i.bf16 %v1422_v45, %v1423_v29  ;;  %v6608_v45 = vld [vmem:[%s7971_s11] ss:$0 sm:$0xff]  ;;  %s6661_s11 = sld [smem:[#allocation3 + $0x7]] }
 0x7aa   :  { %616 = vst.msk [vmem:[#allocation2 + $0x8] sm:$0xff] %vm432_vm3, %v614_v27  ;;  %5480 = vrot.lane.b32.xlu2 %v5479_v41, %s6058_s24 }
 0x7ab   :  { %835 = vst.msk [vmem:[#allocation2 + $0x8] sm:$0xff] %vm7991_vm7, %v830_v57 }
 0x7b2   :  { %5485 = vrot.lane.b32.xlu2 %v5484_v35, %s6058_s24 }
 0x7df   :  { %v1043_v19 = vpop.permute.xlu0 %1042 }
 0x7e0   :  { %1048 = vst.msk [vmem:[#allocation2 + $0x8] sm:$0xff] %vm7990_vm8, %v1043_v19 }
 0x804   :  { %v1256_v28 = vpop.permute.xlu1 %1255  ;;  %v5481_v30 = vpop.permute.xlu2 %5480 }
 0x805   :  { %1261 = vst.msk [vmem:[#allocation2 + $0x8] sm:$0xff] %vm7989_vm9, %v1256_v28  ;;  %v5483_v34 = vunpack.i.h.bf16 %v5481_v30  ;;  %v5482_v39 = vunpack.i.l.bf16 %v5481_v30 }
 0x807   :  { %1500 = vmatpush.msrb.mxu3 %v5482_v39 }
 0x809   :  { %1501 = vmatpush.msrb.mxu3 %v5483_v34 }
 0x80c   :  { %v1263_v52 = vld [vmem:[#allocation2 + $0x8] sm:$0xff]  ;;  %v5486_v44 = vpop.permute.xlu2 %5485 }
 0x80d   :  { %5284 = vmatmul.msk.f32.gmra.mxu2 %vm114_vm0, %v1263_v52  ;;  %v5488_v46 = vunpack.i.h.bf16 %v5486_v44 }
 0x813   :  { %v1292_v36 = vpop.f32.mrf.mxu2 }
 0x814   :  { %v6573_v37 = vadd.f32 %v1292_v36, %v6207_v6  ;;  %v5487_v6 = vunpack.i.l.bf16 %v5486_v44 }
 0x816   :  { %v1341_v38 = vmul.f32 %v6573_v37, %v6573_v37  ;;  %v5285_v61 = vmul.f32 -1.442695, %v6573_v37  ;;  %1502 = vmatpush.msrb.mxu3 %v5487_v6 }
 0x818   :  { %v1343_v24 = vsel %vm114_vm0, %v1341_v38, 0.0  ;;  %5696 = vpow2.f32 %v5285_v61  ;;  %1503 = vmatpush.msrb.mxu3 %v5488_v46 }
 0x819   :  { %1344 = vadd.xlane.f32.xlu0 %v1343_v24  ;;  %5296 = vmatmul.msk.f32.vlgmr.msrb.gmra.mxu3 %vm114_vm0, %v1409_v48 }
 0x81e   :  { %v5697_v43 = vpop.eup %5696 }
 0x81f   :  { %v1304_v40 = vadd.f32 1.0, %v5697_v43 }
 0x821   :  { %5698 = vrcp.f32 %v1304_v40  ;;  %5297 = vmatmul.msk.f32.gmra.mxu3 %vm114_vm0, %v1410_v54  ;;  %v1317_v2 = vand.u32 2147483648, %v1304_v40  ;;  %vm1311_vm11 = vweird.f32 %v1304_v40  ;;  %v1315_v42 = vand.u32 2147483647, %v1304_v40 }
 0x823   :  { %v1318_v55 = vor.u32 1.1754944e-38, %v1317_v2  ;;  %vm1316_vm13 = vcmp.eq.f32.partialorder %v1315_v42, 8.507059e+37 }
 0x827   :  { %v5699_v50 = vpop.eup %5698 }
 0x828   :  { %v1307_v49 = vmul.f32 %v5699_v50, %v1304_v40  ;;  %vm1312_vm10 = vweird.f32 %v5699_v50 }
 0x829   :  { %5298 = vmatmul.msk.f32.gmra.mxu3 %vm114_vm0, %v1411_v20  ;;  %vm1313_vm12 = vmor %vm1311_vm11, %vm1312_vm10 }
 0x82a   :  { %v1308_v53 = vsub.f32 1.0, %v1307_v49 }
 0x82c   :  { %v1309_v56 = vmul.f32 %v5699_v50, %v1308_v53 }
 0x82e   :  { %v1310_v59 = vadd.f32 %v5699_v50, %v1309_v56 }
 0x830   :  { %v1314_v60 = vsel %vm1313_vm12, %v5699_v50, %v1310_v59 }
 0x831   :  { %v1319_v62 = vsel %vm1316_vm13, %v1318_v55, %v1314_v60  ;;  %5299 = vmatmul.msk.f32.gmra.mxu3 %vm114_vm0, %v1412_v51 }
 0x832   :  { %v1337_v1 = vmul.f32 %v1336_v0, %v1319_v62 }
 0x834   :  { %v1339_v16 = vadd.f32 1.1, %v1337_v1 }
 0x836   :  { %v1353_v7 = vmul.f32 %v1339_v16, %v1339_v16 }
 0x838   :  { %v5287_v15 = vadd.f32 -1.0, %v1353_v7 }
 0x88c   :  { %v1345_v13 = vpop.xlane.xlu0 %1344 }
 0x88d   :  { %v1349_v3 = vsub.f32 %v1345_v13, %v1341_v38 }
 0x88f   :  { %v1351_v4 = vmax.f32 %v1349_v3, 1e-08 }
 0x890   :  { %v1295_v5 = vpop.f32.mrf.mxu2 }
 0x891   :  { %5700 = vrcp.f32 %v1351_v4  ;;  %v6599_v47 = vadd.f32 %v1295_v5, %v6217_v9 }
 0x893   :  { %v5286_v8 = vmul.f32 -1.442695, %v6599_v47  ;;  %v1342_v11 = vmul.f32 %v6599_v47, %v6599_v47 }
 0x895   :  { %5702 = vpow2.f32 %v5286_v8  ;;  %v1346_v12 = vsel %vm114_vm0, %v1342_v11, 0.0 }
 0x896   :  { %1347 = vadd.xlane.f32.xlu1 %v1346_v12 }
 0x897   :  { %v5701_v17 = vpop.eup %5700 }
 0x898   :  { %v1359_v18 = vmul.f32 %v5701_v17, %v5287_v15 }
 0x89a   :  { %5704 = vrsqrt.f32 %v1359_v18  ;;  %vm1368_vm14 = vcmp.eq.f32.partialorder %v1359_v18, inf  ;;  %v1371_v41 = vand.u32 2147483648, %v1359_v18  ;;  %vm1370_vm15 = vcmp.eq.f32.partialorder %v1359_v18, 0.0 }
 0x89b   :  { %v5703_v21 = vpop.eup %5702 }
 0x89c   :  { %v1305_v23 = vadd.f32 1.0, %v5703_v21  ;;  %v1505_v39 = vpop.f32.mrf.mxu3 }
 0x89e   :  { %5706 = vrcp.f32 %v1305_v23  ;;  %v1332_v35 = vand.u32 2147483648, %v1305_v23  ;;  %vm1326_vm4 = vweird.f32 %v1305_v23  ;;  %v1330_v36 = vand.u32 2147483647, %v1305_v23 }
 0x8a0   :  { %v5705_v25 = vpop.eup %5704  ;;  %v1333_v24 = vor.u32 1.1754944e-38, %v1332_v35  ;;  %vm1331_vm6 = vcmp.eq.f32.partialorder %v1330_v36, 8.507059e+37 }
 0x8a1   :  { %v1362_v9 = vmul.f32 %v5705_v25, %v1359_v18 }
 0x8a3   :  { %v1363_v63 = vmul.f32 %v5705_v25, %v1362_v9 }
 0x8a4   :  { %v5707_v26 = vpop.eup %5706  ;;  %v1508_v6 = vpop.f32.mrf.mxu3 }
 0x8a5   :  { %v1364_v14 = vmul.f32 0.5, %v1363_v63  ;;  %v1322_v22 = vmul.f32 %v5707_v26, %v1305_v23  ;;  %vm1327_vm1 = vweird.f32 %v5707_v26 }
 0x8a6   :  { %vm1328_vm5 = vmor %vm1326_vm4, %vm1327_vm1 }
 0x8a7   :  { %v1365_v27 = vsub.f32 1.5, %v1364_v14  ;;  %v1323_v57 = vsub.f32 1.0, %v1322_v22 }
 0x8a9   :  { %v1366_v19 = vmul.f32 %v5705_v25, %v1365_v27  ;;  %v1324_v29 = vmul.f32 %v5707_v26, %v1323_v57 }
 0x8ab   :  { %v1367_v28 = vmul.f32 %v1366_v19, %v1359_v18  ;;  %v1325_v32 = vadd.f32 %v5707_v26, %v1324_v29 }
 0x8ac   :  { %v1511_v59 = vpop.f32.mrf.mxu3 }
 0x8ad   :  { %v1369_v52 = vsel %vm1368_vm14, %v1359_v18, %v1367_v28  ;;  %v1329_v38 = vsel %vm1328_vm5, %v5707_v26, %v1325_v32 }
 0x8ae   :  { %v1372_v31 = vsel %vm1370_vm15, %v1371_v41, %v1369_v52  ;;  %v1334_v61 = vsel %vm1331_vm6, %v1333_v24, %v1329_v38 }
 0x8af   :  { %1387 = vperm.xlu2 %5477, %v1372_v31   ;;  %1473 = vrot.lane.b32.xlu1 %v6608_v45, %s6058_s24  ;;  %v1338_v30 = vmul.f32 %v1336_v0, %v1334_v61 }
 0x8b1   :  { %v1340_v34 = vadd.f32 1.1, %v1338_v30 }
 0x8b3   :  { %v1354_v48 = vmul.f32 %v1340_v34, %v1340_v34 }
 0x8b4   :  { %v1514_v60 = vpop.f32.mrf.mxu3 }
 0x8b5   :  { %v5288_v53 = vadd.f32 -1.0, %v1354_v48 }
 0x8b7   :  { %1399 = vperm.xlu2 %5477, %v1339_v16  }
 0x8bf   :  { %1404 = vperm.xlu2 %5477, %v1340_v34  }
 0x909   :  { %v1348_v43 = vpop.xlane.xlu1 %1347  ;;  %v1388_v40 = vpop.permute.xlu2 %1387 }
 0x90a   :  { %v1350_v44 = vsub.f32 %v1348_v43, %v1342_v11  ;;  %v1395_v50 = vmul.f32 %v1388_v40, %v6573_v37 }
 0x90c   :  { %v1352_v46 = vmax.f32 %v1350_v44, 1e-08 }
 0x90e   :  { %5708 = vrcp.f32 %v1352_v46 }
 0x911   :  { %v1400_v49 = vpop.permute.xlu2 %1399 }
 0x912   :  { %v6615_v54 = vsel %vm231_vm2, %v1400_v49, %v1395_v50 }
 0x913   :  { %5294 = vmatmul.msk.f32.vlgmr.msrb.gmra.mxu0 %vm114_vm0, %v6615_v54 }
 0x914   :  { %v5709_v56 = vpop.eup %5708 }
 0x915   :  { %v1360_v20 = vmul.f32 %v5709_v56, %v5288_v53 }
 0x917   :  { %5710 = vrsqrt.f32 %v1360_v20  ;;  %vm1380_vm10 = vcmp.eq.f32.partialorder %v1360_v20, inf  ;;  %v1383_v18 = vand.u32 2147483648, %v1360_v20  ;;  %vm1382_vm11 = vcmp.eq.f32.partialorder %v1360_v20, 0.0 }
 0x91d   :  { %v5711_v2 = vpop.eup %5710 }
 0x91e   :  { %v1374_v42 = vmul.f32 %v5711_v2, %v1360_v20 }
 0x920   :  { %v1375_v51 = vmul.f32 %v5711_v2, %v1374_v42 }
 0x921   :  { %v1474_v55 = vpop.permute.xlu1 %1473 }
 0x922   :  { %v6619_v62 = vadd.f32 %v1505_v39, %v1474_v55  ;;  %v6621_v37 = vadd.f32 %v1508_v6, %v1474_v55  ;;  %v6623_v0 = vadd.f32 %v1511_v59, %v1474_v55  ;;  %v6625_v1 = vadd.f32 %v1514_v60, %v1474_v55 }
 0x923   :  { %v1376_v13 = vmul.f32 0.5, %v1375_v51 }
 0x924   :  { %v5304_v3 = vmul.f32 -1.442695, %v6619_v62  ;;  %v5305_v16 = vmul.f32 -1.442695, %v6621_v37  ;;  %v5306_v4 = vmul.f32 -1.442695, %v6623_v0  ;;  %v6632_v5 = vmul.f32 %v6621_v37, %v6621_v37 }
 0x925   :  { %v5307_v7 = vmul.f32 -1.442695, %v6625_v1  ;;  %v1377_v8 = vsub.f32 1.5, %v1376_v13  ;;  %v6639_v15 = vmul.f32 %v6625_v1, %v6625_v1  ;;  %v6647_v28 = vmul.f32 %v6623_v0, %v6623_v0 }
 0x926   :  { %5712 = vpow2.f32 %v5304_v3  ;;  %v1720_v11 = vsel %vm114_vm0, %v6632_v5, 0.0 }
 0x927   :  { %5714 = vpow2.f32 %v5305_v16  ;;  %1721 = vadd.xlane.f32.xlu2 %v1720_v11  ;;  %v1378_v12 = vmul.f32 %v5711_v2, %v1377_v8  ;;  %v1726_v9 = vsel %vm114_vm0, %v6639_v15, 0.0  ;;  %v1723_v29 = vsel %vm114_vm0, %v6647_v28, 0.0 }
 0x928   :  { %5716 = vpow2.f32 %v5306_v4 }
 0x929   :  { %5718 = vpow2.f32 %v5307_v7  ;;  %v1379_v17 = vmul.f32 %v1378_v12, %v1360_v20 }
 0x92b   :  { %v1381_v21 = vsel %vm1380_vm10, %v1360_v20, %v1379_v17 }
 0x92c   :  { %v5713_v23 = vpop.eup %5712  ;;  %v1384_v25 = vsel %vm1382_vm11, %v1383_v18, %v1381_v21 }
 0x92d   :  { %v5715_v63 = vpop.eup %5714  ;;  %v1640_v26 = vadd.f32 1.0, %v5713_v23  ;;  %1392 = vperm.xlu0 %5476, %v1384_v25  }
 0x92e   :  { %v5717_v14 = vpop.eup %5716  ;;  %v1641_v22 = vadd.f32 1.0, %v5715_v63 }
 0x92f   :  { %v5719_v27 = vpop.eup %5718  ;;  %5720 = vrcp.f32 %v1640_v26  ;;  %v1642_v57 = vadd.f32 1.0, %v5717_v14  ;;  %1727 = vadd.xlane.f32.xlu2 %v1726_v9  ;;  %v1655_v51 = vand.u32 2147483648, %v1640_v26  ;;  %vm1649_vm10 = vweird.f32 %v1640_v26 }
 0x930   :  { %5722 = vrcp.f32 %v1641_v22  ;;  %v6643_v19 = vadd.f32 1.0, %v5719_v27  ;;  %vm1664_vm12 = vweird.f32 %v1641_v22  ;;  %v1668_v38 = vand.u32 2147483647, %v1641_v22 }
 0x931   :  { %5724 = vrcp.f32 %v1642_v57  ;;  %v1670_v61 = vand.u32 2147483648, %v1641_v22  ;;  %vm1679_vm14 = vweird.f32 %v1642_v57  ;;  %v1683_v30 = vand.u32 2147483647, %v1642_v57 }
 0x932   :  { %5726 = vrcp.f32 %v6643_v19  ;;  %v1685_v39 = vand.u32 2147483648, %v1642_v57  ;;  %vm6657_vm4 = vcmp.eq.f32.partialorder %v1668_v38, 8.507059e+37  ;;  %v1653_v13 = vand.u32 2147483647, %v1640_v26 }
 0x933   :  { %v1671_v53 = vor.u32 1.1754944e-38, %v1670_v61  ;;  %vm6668_vm6 = vcmp.eq.f32.partialorder %v1683_v30, 8.507059e+37  ;;  %v1656_v4 = vor.u32 1.1754944e-38, %v1655_v51  ;;  %v1700_v7 = vand.u32 2147483648, %v6643_v19 }
 0x934   :  { %v1686_v42 = vor.u32 1.1754944e-38, %v1685_v39  ;;  %v1698_v23 = vand.u32 2147483647, %v6643_v19  ;;  %v1849_v9 = vstv %s6661_s11  ;;  %v6708_v38 = vstv %s5290_s10  ;;  %s8014_s10 = sld [smem:[#allocation13_spill]] }
 0x935   :  { %v5721_v41 = vpop.eup %5720  ;;  %v1701_v25 = vor.u32 1.1754944e-38, %v1700_v7 }
 0x936   :  { %v5723_v52 = vpop.eup %5722  ;;  %v1645_v43 = vmul.f32 %v5721_v41, %v1640_v26  ;;  %vm1650_vm11 = vweird.f32 %v5721_v41 }
 0x937   :  { %v5725_v31 = vpop.eup %5724  ;;  %1724 = vadd.xlane.f32.xlu2 %v1723_v29  ;;  %v1660_v32 = vmul.f32 %v5723_v52, %v1641_v22  ;;  %vm1665_vm13 = vweird.f32 %v5723_v52 }
 0x938   :  { %v5727_v35 = vpop.eup %5726  ;;  %v1675_v36 = vmul.f32 %v5725_v31, %v1642_v57  ;;  %vm1680_vm15 = vweird.f32 %v5725_v31  ;;  %vm6653_vm1 = vmor %vm1664_vm12, %vm1665_vm13  ;;  %v1646_v50 = vsub.f32 1.0, %v1645_v43  ;;  %vm1654_vm13 = vcmp.eq.f32.partialorder %v1653_v13, 8.507059e+37 }
 0x939   :  { %v1661_v24 = vsub.f32 1.0, %v1660_v32  ;;  %v1690_v44 = vmul.f32 %v5727_v35, %v6643_v19  ;;  %vm6664_vm5 = vmor %vm1679_vm14, %vm1680_vm15  ;;  %vm1694_vm14 = vweird.f32 %v6643_v19  ;;  %vm1695_vm15 = vweird.f32 %v5727_v35 }
 0x93a   :  { %v1676_v34 = vsub.f32 1.0, %v1675_v36  ;;  %v1647_v60 = vmul.f32 %v5721_v41, %v1646_v50  ;;  %vm1651_vm12 = vmor %vm1649_vm10, %vm1650_vm11 }
 0x93b   :  { %v1662_v40 = vmul.f32 %v5723_v52, %v1661_v24  ;;  %v1691_v59 = vsub.f32 1.0, %v1690_v44 }
 0x93c   :  { %v1677_v48 = vmul.f32 %v5725_v31, %v1676_v34  ;;  %v1648_v16 = vadd.f32 %v5721_v41, %v1647_v60 }
 0x93d   :  { %v1663_v49 = vadd.f32 %v5723_v52, %v1662_v40  ;;  %v1692_v8 = vmul.f32 %v5727_v35, %v1691_v59  ;;  %v1405_v40 = vpop.permute.xlu2 %1404 }
 0x93e   :  { %v1678_v2 = vadd.f32 %v5725_v31, %v1677_v48  ;;  %v1652_v12 = vsel %vm1651_vm12, %v5721_v41, %v1648_v16 }
 0x93f   :  { %v1667_v55 = vsel %vm6653_vm1, %v5723_v52, %v1663_v49  ;;  %v1657_v18 = vsel %vm1654_vm13, %v1656_v4, %v1652_v12  ;;  %v1693_v21 = vadd.f32 %v5727_v35, %v1692_v8  ;;  %vm1696_vm1 = vmor %vm1694_vm14, %vm1695_vm15 }
 0x940   :  { %v1682_v3 = vsel %vm6664_vm5, %v5725_v31, %v1678_v2  ;;  %v1672_v11 = vsel %vm6657_vm4, %v1671_v53, %v1667_v55  ;;  %vm1699_vm5 = vcmp.eq.f32.partialorder %v1698_v23, 8.507059e+37  ;;  %v1850_v26 = vmul.f32 %v1849_v9, %v1657_v18 }
 0x941   :  { %v6682_v17 = vsel %vm6668_vm6, %v1686_v42, %v1682_v3  ;;  %v1697_v63 = vsel %vm1696_vm1, %v5727_v35, %v1693_v21  ;;  %v1851_v22 = vmul.f32 %v1849_v9, %v1672_v11  ;;  %v6704_v35 = vmul.f32 %v6619_v62, %v6619_v62 }
 0x942   :  { %v6686_v14 = vsel %vm1699_vm5, %v1701_v25, %v1697_v63  ;;  %v1852_v27 = vmul.f32 %v1849_v9, %v6682_v17  ;;  %v6689_v57 = vadd.f32 1.1, %v1850_v26  ;;  %v1706_v24 = vmul.f32 %v6708_v38, %v1672_v11 }
 0x943   :  { %v6691_v29 = vadd.f32 1.1, %v1851_v22  ;;  %v1853_v41 = vmul.f32 %v1849_v9, %v6686_v14  ;;  %v1717_v36 = vsel %vm114_vm0, %v6704_v35, 0.0  ;;  %v1705_v30 = vmul.f32 %v6708_v38, %v1657_v18 }
 0x944   :  { %v6694_v52 = vadd.f32 1.1, %v1852_v27  ;;  %v1710_v61 = vadd.f32 1.1, %v1706_v24  ;;  %v1707_v23 = vmul.f32 %v6708_v38, %v6682_v17 }
 0x945   :  { %v5492_v19 = vpack.i.bf16 %v6689_v57, %v6691_v29  ;;  %v6698_v31 = vadd.f32 1.1, %v1853_v41  ;;  %v1709_v34 = vadd.f32 1.1, %v1705_v30 }
 0x946   :  { %v1738_v53 = vmul.f32 %v1710_v61, %v1710_v61  ;;  %v6735_v63 = vadd.f32 1.1, %v1707_v23 }
 0x947   :  { %v5502_v32 = vpack.i.bf16 %v6694_v52, %v6698_v31 }
 0x948   :  { %v5309_v59 = vadd.f32 -1.0, %v1738_v53  ;;  %v1739_v41 = vmul.f32 %v6735_v63, %v6735_v63 }
 0x94a   :  { %v5310_v30 = vadd.f32 -1.0, %v1739_v41 }
 0x957   :  { %1718 = vadd.xlane.f32.xlu0 %v1717_v36 }
 0x96b   :  { %1832 = vperm.xlu0 %5476, %v1710_v61   ;;  %v1737_v61 = vmul.f32 %v1709_v34, %v1709_v34 }
 0x96d   :  { %v5308_v17 = vadd.f32 -1.0, %v1737_v61 }
 0x973   :  { %1827 = vperm.xlu0 %5476, %v1709_v34  }
 0x990   :  { %v1451_v39 = vpop.f32.mrf.mxu0 }
 0x991   :  { %v6713_v43 = vadd.f32 %v6608_v45, %v1451_v39 }
 0x993   :  { %v6717_v44 = vmul.f32 %v6713_v43, %v6713_v43  ;;  %v5300_v12 = vmul.f32 -1.442695, %v6713_v43 }
 0x995   :  { %v1562_v46 = vsel %vm114_vm0, %v6717_v44, 0.0 }
 0x996   :  { %1563 = vadd.xlane.f32.xlu1 %v1562_v46 }
 0x99a   :  { %v1722_v6 = vpop.xlane.xlu2 %1721 }
 0x99b   :  { %v1730_v48 = vsub.f32 %v1722_v6, %v6632_v5 }
 0x99d   :  { %v1734_v50 = vmax.f32 %v1730_v48, 1e-08 }
 0x99f   :  { %5728 = vrcp.f32 %v1734_v50  ;;  %v1393_v49 = vpop.permute.xlu0 %1392 }
 0x9a0   :  { %v1396_v56 = vmul.f32 %v1393_v49, %v6599_v47 }
 0x9a2   :  { %v6725_v20 = vsel %vm231_vm2, %v1405_v40, %v1396_v56  ;;  %v6729_v3 = vpop.xlane.xlu2 %1727 }
 0x9a3   :  { %5295 = vmatmul.msk.f32.gmra.mxu0 %vm114_vm0, %v6725_v20 }
 0x9a5   :  { %v5729_v2 = vpop.eup %5728 }
 0x9a6   :  { %v1750_v42 = vmul.f32 %v5729_v2, %v5309_v59 }
 0x9a8   :  { %5730 = vrsqrt.f32 %v1750_v42  ;;  %vm1772_vm4 = vcmp.eq.f32.partialorder %v1750_v42, inf  ;;  %v1775_v7 = vand.u32 2147483648, %v1750_v42  ;;  %vm1774_vm6 = vcmp.eq.f32.partialorder %v1750_v42, 0.0 }
 0x9a9   :  { %5732 = vpow2.f32 %v5300_v12 }
 0x9aa   :  { %v1725_v18 = vpop.xlane.xlu2 %1724 }
 0x9ab   :  { %v1731_v21 = vsub.f32 %v1725_v18, %v6647_v28 }
 0x9ad   :  { %v1735_v25 = vmax.f32 %v1731_v21, 1e-08 }
 0x9ae   :  { %v5731_v60 = vpop.eup %5730 }
 0x9af   :  { %v1766_v51 = vmul.f32 %v5731_v60, %v1750_v42  ;;  %v5733_v9 = vpop.eup %5732  ;;  %5734 = vrcp.f32 %v1735_v25  ;;  %v1555_v25 = vstv %s6740_s30 }
 0x9b0   :  { %v1523_v27 = vadd.f32 1.0, %v5733_v9 }
 0x9b1   :  { %v1767_v55 = vmul.f32 %v5731_v60, %v1766_v51 }
 0x9b2   :  { %vm1530_vm11 = vweird.f32 %v1523_v27 }
 0x9b3   :  { %v1768_v13 = vmul.f32 0.5, %v1767_v55 }
 0x9b5   :  { %v1769_v16 = vsub.f32 1.5, %v1768_v13  ;;  %v5735_v24 = vpop.eup %5734  ;;  %v1536_v13 = vand.u32 2147483648, %v1523_v27 }
 0x9b6   :  { %v1751_v39 = vmul.f32 %v5735_v24, %v5310_v30  ;;  %v1732_v30 = vsub.f32 %v6729_v3, %v6639_v15 }
 0x9b7   :  { %v1770_v4 = vmul.f32 %v5731_v60, %v1769_v16  ;;  %v1537_v12 = vor.u32 1.1754944e-38, %v1536_v13 }
 0x9b8   :  { %vm1784_vm1 = vcmp.eq.f32.partialorder %v1751_v39, inf  ;;  %v1787_v24 = vand.u32 2147483648, %v1751_v39  ;;  %vm1786_vm5 = vcmp.eq.f32.partialorder %v1751_v39, 0.0 }
 0x9b9   :  { %v1771_v47 = vmul.f32 %v1770_v4, %v1750_v42  ;;  %v1534_v4 = vand.u32 2147483647, %v1523_v27 }
 0x9bb   :  { %v1773_v8 = vsel %vm1772_vm4, %v1750_v42, %v1771_v47  ;;  %vm1535_vm15 = vcmp.eq.f32.partialorder %v1534_v4, 8.507059e+37 }
 0x9bc   :  { %v1776_v11 = vsel %vm1774_vm6, %v1775_v7, %v1773_v8 }
 0x9bd   :  { %1808 = vperm.xlu2 %5477, %v1776_v11  }
 0x9ca   :  { %v1719_v26 = vpop.xlane.xlu0 %1718 }
 0x9cb   :  { %v1729_v22 = vsub.f32 %v1719_v26, %v6704_v35 }
 0x9cd   :  { %v1733_v36 = vmax.f32 %v1729_v22, 1e-08 }
 0x9cf   :  { %5736 = vrcp.f32 %v1733_v36 }
 0x9d0   :  { %5738 = vrcp.f32 %v1523_v27 }
 0x9d1   :  { %5740 = vrsqrt.f32 %v1751_v39 }
 0x9d5   :  { %v5737_v40 = vpop.eup %5736 }
 0x9d6   :  { %v5739_v46 = vpop.eup %5738  ;;  %v1749_v6 = vmul.f32 %v5737_v40, %v5308_v17  ;;  %v1708_v17 = vmul.f32 %v6708_v38, %v6686_v14  ;;  %v1736_v40 = vmax.f32 %v1732_v30, 1e-08 }
 0x9d7   :  { %v1526_v48 = vmul.f32 %v5739_v46, %v1523_v27  ;;  %v5741_v50 = vpop.eup %5740  ;;  %vm1531_vm10 = vweird.f32 %v5739_v46 }
 0x9d8   :  { %5742 = vrsqrt.f32 %v1749_v6  ;;  %v1778_v42 = vmul.f32 %v5741_v50, %v1751_v39  ;;  %vm1532_vm12 = vmor %vm1530_vm11, %vm1531_vm10  ;;  %vm1760_vm13 = vcmp.eq.f32.partialorder %v1749_v6, inf  ;;  %v1763_v11 = vand.u32 2147483648, %v1749_v6 }
 0x9d9   :  { %v1527_v49 = vsub.f32 1.0, %v1526_v48  ;;  %vm1762_vm14 = vcmp.eq.f32.partialorder %v1749_v6, 0.0  ;;  %5744 = vrcp.f32 %v1736_v40 }
 0x9da   :  { %v1779_v55 = vmul.f32 %v5741_v50, %v1778_v42 }
 0x9db   :  { %v1528_v2 = vmul.f32 %v5739_v46, %v1527_v49 }
 0x9dc   :  { %v1780_v8 = vmul.f32 0.5, %v1779_v55 }
 0x9dd   :  { %v1529_v51 = vadd.f32 %v5739_v46, %v1528_v2  ;;  %v1833_v38 = vpop.permute.xlu0 %1832 }
 0x9de   :  { %v5743_v53 = vpop.eup %5742  ;;  %v1781_v9 = vsub.f32 1.5, %v1780_v8 }
 0x9df   :  { %v1754_v56 = vmul.f32 %v5743_v53, %v1749_v6  ;;  %v1533_v7 = vsel %vm1532_vm12, %v5739_v46, %v1529_v51  ;;  %v1712_v46 = vadd.f32 1.1, %v1708_v17 }
 0x9e0   :  { %v1538_v23 = vsel %vm1535_vm15, %v1537_v12, %v1533_v7  ;;  %v1782_v22 = vmul.f32 %v5741_v50, %v1781_v9 }
 0x9e1   :  { %v1755_v59 = vmul.f32 %v5743_v53, %v1754_v56  ;;  %v1556_v26 = vmul.f32 %v1555_v25, %v1538_v23  ;;  %v1740_v50 = vmul.f32 %v1712_v46, %v1712_v46 }
 0x9e2   :  { %v1783_v41 = vmul.f32 %v1782_v22, %v1751_v39 }
 0x9e3   :  { %v1756_v60 = vmul.f32 0.5, %v1755_v59  ;;  %v1558_v27 = vadd.f32 1.1, %v1556_v26 }
 0x9e4   :  { %v1785_v36 = vsel %vm1784_vm1, %v1751_v39, %v1783_v41  ;;  %v5311_v39 = vadd.f32 -1.0, %v1740_v50 }
 0x9e5   :  { %v1757_v34 = vsub.f32 1.5, %v1756_v60  ;;  %v1788_v61 = vsel %vm1786_vm5, %v1787_v24, %v1785_v36  ;;  %v1572_v56 = vmul.f32 %v1558_v27, %v1558_v27 }
 0x9e7   :  { %v1758_v16 = vmul.f32 %v5743_v53, %v1757_v34  ;;  %v5745_v53 = vpop.eup %5744  ;;  %v5302_v2 = vadd.f32 -1.0, %v1572_v56 }
 0x9e8   :  { %v1752_v59 = vmul.f32 %v5745_v53, %v5311_v39 }
 0x9e9   :  { %v1759_v47 = vmul.f32 %v1758_v16, %v1749_v6 }
 0x9ea   :  { %vm1796_vm10 = vcmp.eq.f32.partialorder %v1752_v59, inf  ;;  %vm1798_vm11 = vcmp.eq.f32.partialorder %v1752_v59, 0.0 }
 0x9eb   :  { %v1761_v18 = vsel %vm1760_vm13, %v1749_v6, %v1759_v47 }
 0x9ec   :  { %v1764_v21 = vsel %vm1762_vm14, %v1763_v11, %v1761_v18 }
 0x9ed   :  { %1803 = vperm.xlu1 %5478, %v1764_v21  }
 0x9f5   :  { %1618 = vperm.xlu1 %5478, %v1558_v27  }
 0x9fd   :  { %1813 = vperm.xlu1 %5478, %v1788_v61  }
 0xa09   :  { %v1564_v6 = vpop.xlane.xlu1 %1563 }
 0xa0a   :  { %v1568_v48 = vsub.f32 %v1564_v6, %v6717_v44 }
 0xa0c   :  { %v1570_v49 = vmax.f32 %v1568_v48, 1e-08 }
 0xa0e   :  { %5746 = vrcp.f32 %v1570_v49  ;;  %v1799_v49 = vand.u32 2147483648, %v1752_v59 }
 0xa0f   :  { %5748 = vrsqrt.f32 %v1752_v59 }
 0xa14   :  { %v5747_v42 = vpop.eup %5746 }
 0xa15   :  { %v1578_v60 = vmul.f32 %v5747_v42, %v5302_v2  ;;  %v5749_v44 = vpop.eup %5748 }
 0xa16   :  { %v1790_v4 = vmul.f32 %v5749_v44, %v1752_v59 }
 0xa17   :  { %v1809_v3 = vpop.permute.xlu2 %1808  ;;  %5750 = vrsqrt.f32 %v1578_v60  ;;  %vm1587_vm4 = vcmp.eq.f32.partialorder %v1578_v60, inf  ;;  %vm1589_vm6 = vcmp.eq.f32.partialorder %v1578_v60, 0.0 }
 0xa18   :  { %v1822_v14 = vmul.f32 %v1809_v3, %v6621_v37  ;;  %v1791_v12 = vmul.f32 %v5749_v44, %v1790_v4 }
 0xa1a   :  { %v6753_v34 = vsel %vm231_vm2, %v1833_v38, %v1822_v14  ;;  %v1792_v22 = vmul.f32 0.5, %v1791_v12 }
 0xa1b   :  { %v6756_v51 = vsub.f32 0.0, %v6753_v34 }
 0xa1c   :  { %v1793_v36 = vsub.f32 1.5, %v1792_v22 }
 0xa1d   :  { %v5751_v55 = vpop.eup %5750  ;;  %v2027_v13 = vsel %vm231_vm2, %v6756_v51, %v6753_v34 }
 0xa1e   :  { %5316 = vmatpush.xpose.msk.msrb.mxu1 %vm432_vm3, %v2027_v13  ;;  %v1581_v16 = vmul.f32 %v5751_v55, %v1578_v60  ;;  %v1794_v17 = vmul.f32 %v5749_v44, %v1793_v36  ;;  %v1828_v13 = vpop.permute.xlu0 %1827 }
 0xa20   :  { %v1454_v47 = vpop.f32.mrf.mxu0  ;;  %v1582_v7 = vmul.f32 %v5751_v55, %v1581_v16  ;;  %v1795_v40 = vmul.f32 %v1794_v17, %v1752_v59 }
 0xa21   :  { %v6764_v8 = vadd.f32 %v6608_v45, %v1454_v47  ;;  %v1590_v45 = vand.u32 2147483648, %v1578_v60 }
 0xa22   :  { %v1583_v11 = vmul.f32 0.5, %v1582_v7  ;;  %v1797_v50 = vsel %vm1796_vm10, %v1752_v59, %v1795_v40 }
 0xa23   :  { %v5301_v18 = vmul.f32 -1.442695, %v6764_v8  ;;  %v6769_v21 = vmul.f32 %v6764_v8, %v6764_v8  ;;  %v1800_v39 = vsel %vm1798_vm11, %v1799_v49, %v1797_v50 }
 0xa24   :  { %v1584_v23 = vsub.f32 1.5, %v1583_v11 }
 0xa25   :  { %5752 = vpow2.f32 %v5301_v18  ;;  %v1565_v9 = vsel %vm114_vm0, %v6769_v21, 0.0 }
 0xa26   :  { %1566 = vadd.xlane.f32.xlu0 %v1565_v9  ;;  %v1585_v26 = vmul.f32 %v5751_v55, %v1584_v23 }
 0xa28   :  { %v1586_v27 = vmul.f32 %v1585_v26, %v1578_v60 }
 0xa2a   :  { %v1588_v41 = vsel %vm1587_vm4, %v1578_v60, %v1586_v27 }
 0xa2b   :  { %v5753_v24 = vpop.eup %5752  ;;  %v1591_v61 = vsel %vm1589_vm6, %v1590_v45, %v1588_v41 }
 0xa2c   :  { %v1524_v30 = vadd.f32 1.0, %v5753_v24  ;;  %1606 = vperm.xlu2 %5477, %v1591_v61  }
 0xa2e   :  { %5754 = vrcp.f32 %v1524_v30  ;;  %v1551_v56 = vand.u32 2147483648, %v1524_v30  ;;  %v1549_v42 = vand.u32 2147483647, %v1524_v30  ;;  %vm1545_vm13 = vweird.f32 %v1524_v30 }
 0xa30   :  { %v1552_v3 = vor.u32 1.1754944e-38, %v1551_v56  ;;  %vm1550_vm15 = vcmp.eq.f32.partialorder %v1549_v42, 8.507059e+37 }
 0xa34   :  { %v5755_v6 = vpop.eup %5754  ;;  %1842 = vperm.xlu2 %5477, %v1712_v46  }
 0xa35   :  { %v1541_v48 = vmul.f32 %v5755_v6, %v1524_v30  ;;  %vm1546_vm12 = vweird.f32 %v5755_v6 }
 0xa36   :  { %vm1547_vm14 = vmor %vm1545_vm13, %vm1546_vm12  ;;  %vm7992_vm12 = vcmask 130048  }
 0xa37   :  { %v1542_v53 = vsub.f32 1.0, %v1541_v48 }
 0xa39   :  { %v1543_v2 = vmul.f32 %v5755_v6, %v1542_v53 }
 0xa3a   :  { %1818 = vperm.xlu0 %5476, %v1800_v39  }
 0xa3b   :  { %v1544_v60 = vadd.f32 %v5755_v6, %v1543_v2 }
 0xa3d   :  { %v1548_v14 = vsel %vm1547_vm14, %v5755_v6, %v1544_v60 }
 0xa3e   :  { %v1553_v46 = vsel %vm1550_vm15, %v1552_v3, %v1548_v14 }
 0xa3f   :  { %v1557_v38 = vmul.f32 %v1555_v25, %v1553_v46 }
 0xa41   :  { %v1559_v44 = vadd.f32 1.1, %v1557_v38 }
 0xa42   :  { %1837 = vperm.xlu0 %5476, %v6735_v63  }
 0xa43   :  { %1623 = vperm.xlu1 %5478, %v1559_v44   ;;  %v1573_v9 = vmul.f32 %v1559_v44, %v1559_v44 }
 0xa45   :  { %v5303_v26 = vadd.f32 -1.0, %v1573_v9 }
 0xa4a   :  { %2227 = vrot.lane.b32.xlu0 %v6756_v51, %s6060_s26 }
 0xa4b   :  { %5491 = vset.pattern.permute.xlu0 %v6057_v10  ;;  %5490 = vset.pattern.permute.xlu1 %v6057_v10 }
 0xa5f   :  { %v1804_v59 = vpop.permute.xlu1 %1803 }
 0xa60   :  { %v1821_v55 = vmul.f32 %v1804_v59, %v6619_v62 }
 0xa62   :  { %v6783_v16 = vsel %vm231_vm2, %v1828_v13, %v1821_v55 }
 0xa63   :  { %2241 = vrot.lane.b32.xlu0 %v6783_v16, %s6060_s26  ;;  %v6788_v63 = vsub.f32 0.0, %v6783_v16 }
 0xa65   :  { %2225 = vrot.lane.b32.xlu1 %v6788_v63, %s6060_s26  ;;  %v2026_v25 = vsel %vm231_vm2, %v6788_v63, %v6783_v16 }
 0xa66   :  { %5317 = vmatpush.xpose.msk.msrb.mxu1 %vm432_vm3, %v2026_v25 }
 0xa67   :  { %v1619_v7 = vpop.permute.xlu1 %1618 }
 0xa6b   :  { %1862 = vrot.lane.b32.xlu0 %v6704_v35, %s6058_s24 }
 0xa6d   :  { %1864 = vrot.lane.b32.xlu1 %v6632_v5, %s6058_s24 }
 0xa6f   :  { %v1814_v30 = vpop.permute.xlu1 %1813 }
 0xa70   :  { %v1823_v48 = vmul.f32 %v1814_v30, %v6623_v0 }
 0xa73   :  { %1868 = vrot.lane.b32.xlu0 %v6639_v15, %s6058_s24 }
 0xa7b   :  { %1866 = vrot.lane.b32.xlu0 %v6647_v28, %s6058_s24 }
 0xa86   :  { %v1607_v4 = vpop.permute.xlu2 %1606 }
 0xa87   :  { %v1614_v47 = vmul.f32 %v1607_v4, %v6713_v43 }
 0xa89   :  { %v6808_v11 = vsel %vm231_vm2, %v1619_v7, %v1614_v47 }
 0xa8a   :  { %5318 = vmatmul.msk.f32.vlgmr.msrb.gmra.mxu1 %vm432_vm3, %v6808_v11 }
 0xa8e   :  { %v1843_v36 = vpop.permute.xlu2 %1842 }
 0xa99   :  { %v1567_v12 = vpop.xlane.xlu0 %1566 }
 0xa9a   :  { %v1569_v18 = vsub.f32 %v1567_v12, %v6769_v21 }
 0xa9c   :  { %v1571_v23 = vmax.f32 %v1569_v18, 1e-08 }
 0xa9e   :  { %5756 = vrcp.f32 %v1571_v23 }
 0xaa4   :  { %v5757_v22 = vpop.eup %5756 }
 0xaa5   :  { %v1579_v27 = vmul.f32 %v5757_v22, %v5303_v26 }
 0xaa7   :  { %5758 = vrsqrt.f32 %v1579_v27  ;;  %vm1599_vm1 = vcmp.eq.f32.partialorder %v1579_v27, inf  ;;  %v1602_v60 = vand.u32 2147483648, %v1579_v27  ;;  %vm1601_vm5 = vcmp.eq.f32.partialorder %v1579_v27, 0.0 }
 0xaac   :  { %v1819_v45 = vpop.permute.xlu0 %1818 }
 0xaad   :  { %v5759_v43 = vpop.eup %5758  ;;  %v1824_v41 = vmul.f32 %v1819_v45, %v6625_v1 }
 0xaae   :  { %v1593_v24 = vmul.f32 %v5759_v43, %v1579_v27 }
 0xaaf   :  { %v6816_v61 = vsel %vm231_vm2, %v1843_v36, %v1824_v41  ;;  %v1894_v41 = vmul.f32 %v6689_v57, %v6689_v57 }
 0xab0   :  { %v6819_v21 = vsub.f32 0.0, %v6816_v61  ;;  %v1594_v17 = vmul.f32 %v5759_v43, %v1593_v24 }
 0xab1   :  { %v5312_v36 = vadd.f32 -1.0, %v1894_v41 }
 0xab2   :  { %v2029_v40 = vsel %vm231_vm2, %v6819_v21, %v6816_v61  ;;  %v1595_v6 = vmul.f32 0.5, %v1594_v17 }
 0xab3   :  { %5319 = vmatpush.xpose.msk.msra.mxu1 %vm432_vm3, %v2029_v40 }
 0xab4   :  { %v1838_v50 = vpop.permute.xlu0 %1837  ;;  %v1596_v49 = vsub.f32 1.5, %v1595_v6 }
 0xab5   :  { %v6829_v53 = vsel %vm231_vm2, %v1838_v50, %v1823_v48  ;;  %v1624_v55 = vpop.permute.xlu1 %1623 }
 0xab6   :  { %v6832_v56 = vsub.f32 0.0, %v6829_v53  ;;  %v1597_v39 = vmul.f32 %v5759_v43, %v1596_v49 }
 0xab8   :  { %v2028_v2 = vsel %vm231_vm2, %v6832_v56, %v6829_v53  ;;  %v1598_v42 = vmul.f32 %v1597_v39, %v1579_v27 }
 0xab9   :  { %5320 = vmatpush.xpose.msk.msra.mxu1 %vm432_vm3, %v2028_v2 }
 0xaba   :  { %v1600_v3 = vsel %vm1599_vm1, %v1579_v27, %v1598_v42 }
 0xabb   :  { %v1603_v14 = vsel %vm1601_vm5, %v1602_v60, %v1600_v3 }
 0xabc   :  { %1611 = vperm.xlu2 %5477, %v1603_v14   ;;  %v2228_v46 = vpop.permute.xlu0 %2227 }
 0xac4   :  { %2243 = vrot.lane.b32.xlu2 %v6753_v34, %s6060_s26 }
 0xac5   :  { %5489 = vset.pattern.permute.xlu2 %v6057_v10 }
 0xacc   :  { %2257 = vrot.lane.b32.xlu2 %v6808_v11, %s6060_s26 }
 0xad5   :  { %v2242_v38 = vpop.permute.xlu0 %2241 }
 0xad7   :  { %v2226_v4 = vpop.permute.xlu1 %2225 }
 0xad8   :  { %v2253_v27 = vsel %vm231_vm2, %v2226_v4, %v2242_v38 }
 0xadd   :  { %v1863_v44 = vpop.permute.xlu0 %1862 }
 0xade   :  { %v1874_v59 = vsel %vm114_vm0, %v1863_v44, 0.0 }
 0xadf   :  { %1875 = vadd.xlane.f32.xlu1 %v1874_v59  ;;  %v1865_v47 = vpop.permute.xlu1 %1864 }
 0xae0   :  { %v1877_v7 = vsel %vm114_vm0, %v1865_v47, 0.0 }
 0xae5   :  { %v1869_v13 = vpop.permute.xlu0 %1868 }
 0xae6   :  { %v1883_v25 = vsel %vm114_vm0, %v1869_v13, 0.0 }
 0xae7   :  { %1884 = vadd.xlane.f32.xlu0 %v1883_v25 }
 0xaed   :  { %v1867_v12 = vpop.permute.xlu0 %1866 }
 0xaee   :  { %v1880_v18 = vsel %vm114_vm0, %v1867_v12, 0.0 }
 0xaf5   :  { %1878 = vadd.xlane.f32.xlu2 %v1877_v7 }
 0xafb   :  { %5493 = vperm.xlu0 %5491, %v5492_v19  }
 0xafd   :  { %1881 = vadd.xlane.f32.xlu2 %v1880_v18 }
 0xb03   :  { %2245 = vrot.lane.b32.xlu0 %v6829_v53, %s6060_s26 }
 0xb07   :  { %v6881_v18 = vpop.f32.mrf.mxu1 }
 0xb0b   :  { %2473 = vrot.lane.b32.xlu0 %v6756_v51, %s6061_s2 }
 0xb13   :  { %2471 = vrot.lane.b32.xlu0 %v6788_v63, %s6061_s2 }
 0xb16   :  { %v1612_v23 = vpop.permute.xlu2 %1611 }
 0xb17   :  { %v1615_v9 = vmul.f32 %v1612_v23, %v6764_v8 }
 0xb19   :  { %v6860_v26 = vsel %vm231_vm2, %v1624_v55, %v1615_v9 }
 0xb1a   :  { %5321 = vmatmul.msk.f32.vlgmr.msra.gmra.mxu1 %vm432_vm3, %v6860_v26 }
 0xb1b   :  { %2711 = vrot.lane.b32.xlu0 %v6756_v51, %s6062_s27 }
 0xb1e   :  { %v2244_v19 = vpop.permute.xlu2 %2243 }
 0xb1f   :  { %v2254_v22 = vsel %vm231_vm2, %v2228_v46, %v2244_v19 }
 0xb20   :  { %5324 = vmatpush.xpose.msk.msrb.mxu1 %vm432_vm3, %v2254_v22  ;;  %v6886_v22 = vstv %s5292_s4 }
 0xb23   :  { %2721 = vrot.lane.b32.xlu0 %v6783_v16, %s6062_s27 }
 0xb24   :  { %5325 = vmatpush.xpose.msk.msrb.mxu1 %vm432_vm3, %v2253_v27 }
 0xb26   :  { %v2258_v8 = vpop.permute.xlu2 %2257 }
 0xb27   :  { %5326 = vmatmul.msk.f32.vlgmr.msrb.gmra.mxu1 %vm432_vm3, %v2258_v8  ;;  %v6894_v8 = vld [vmem:[%s8013_s1 + $0x8] sm:$0xff] }
 0xb52   :  { %v1876_v45 = vpop.xlane.xlu1 %1875 }
 0xb53   :  { %v1886_v51 = vsub.f32 %v1876_v45, %v6704_v35  ;;  %v1895_v35 = vmul.f32 %v6691_v29, %v6691_v29  ;;  %v6896_v45 = vstv %s5293_s0 }
 0xb55   :  { %v1890_v43 = vmax.f32 %v1886_v51, 1e-08  ;;  %v5313_v57 = vadd.f32 -1.0, %v1895_v35 }
 0xb57   :  { %5760 = vrcp.f32 %v1890_v43 }
 0xb5d   :  { %v5761_v24 = vpop.eup %5760 }
 0xb5e   :  { %v1906_v30 = vmul.f32 %v5761_v24, %v5312_v36 }
 0xb60   :  { %5762 = vrsqrt.f32 %v1906_v30  ;;  %vm1917_vm4 = vcmp.eq.f32.partialorder %v1906_v30, inf  ;;  %v1920_v3 = vand.u32 2147483648, %v1906_v30  ;;  %vm1919_vm6 = vcmp.eq.f32.partialorder %v1906_v30, 0.0 }
 0xb66   :  { %v5763_v17 = vpop.eup %5762 }
 0xb67   :  { %v1911_v40 = vmul.f32 %v5763_v17, %v1906_v30 }
 0xb68   :  { %v1879_v6 = vpop.xlane.xlu2 %1878 }
 0xb69   :  { %v1887_v48 = vsub.f32 %v1879_v6, %v6632_v5  ;;  %v1912_v50 = vmul.f32 %v5763_v17, %v1911_v40  ;;  %v6911_v6 = vld [vmem:[%s8013_s1] sm:$0xff]  ;;  %s5231_s1 = sshll.u32 %s7982_s22, 4  ;;  %s5232_s1 = int_to_ptr.hbm [resolvable:$true] %s5231_s1 }
 0xb6b   :  { %v1891_v49 = vmax.f32 %v1887_v48, 1e-08  ;;  %v1913_v39 = vmul.f32 0.5, %v1912_v50 }
 0xb6d   :  { %5764 = vrcp.f32 %v1891_v49  ;;  %v1914_v2 = vsub.f32 1.5, %v1913_v39 }
 0xb6f   :  { %v1915_v42 = vmul.f32 %v5763_v17, %v1914_v2 }
 0xb70   :  { %v1882_v2 = vpop.xlane.xlu2 %1881 }
 0xb71   :  { %v1916_v60 = vmul.f32 %v1915_v42, %v1906_v30  ;;  %v1888_v35 = vsub.f32 %v1882_v2, %v6647_v28  ;;  %v1897_v42 = vmul.f32 %v6698_v31, %v6698_v31 }
 0xb73   :  { %v5765_v14 = vpop.eup %5764  ;;  %v1918_v46 = vsel %vm1917_vm4, %v1906_v30, %v1916_v60  ;;  %v1892_v60 = vmax.f32 %v1888_v35, 1e-08 }
 0xb74   :  { %v1907_v38 = vmul.f32 %v5765_v14, %v5313_v57  ;;  %v1921_v44 = vsel %vm1919_vm6, %v1920_v3, %v1918_v46  ;;  %v5315_v3 = vadd.f32 -1.0, %v1897_v42 }
 0xb75   :  { %1960 = vperm.xlu1 %5490, %v1921_v44  }
 0xb76   :  { %5766 = vrsqrt.f32 %v1907_v38  ;;  %vm1929_vm10 = vcmp.eq.f32.partialorder %v1907_v38, inf  ;;  %v1932_v29 = vand.u32 2147483648, %v1907_v38  ;;  %vm1931_vm11 = vcmp.eq.f32.partialorder %v1907_v38, 0.0 }
 0xb7c   :  { %v5767_v5 = vpop.eup %5766 }
 0xb7d   :  { %v1923_v59 = vmul.f32 %v5767_v5, %v1907_v38 }
 0xb7f   :  { %v1924_v55 = vmul.f32 %v5767_v5, %v1923_v59 }
 0xb81   :  { %v1925_v13 = vmul.f32 0.5, %v1924_v55 }
 0xb83   :  { %v1926_v25 = vsub.f32 1.5, %v1925_v13 }
 0xb85   :  { %v1927_v4 = vmul.f32 %v5767_v5, %v1926_v25 }
 0xb87   :  { %v1928_v47 = vmul.f32 %v1927_v4, %v1907_v38 }
 0xb89   :  { %v1930_v7 = vsel %vm1929_vm10, %v1907_v38, %v1928_v47 }
 0xb8a   :  { %v1933_v12 = vsel %vm1931_vm11, %v1932_v29, %v1930_v7 }
 0xb8b   :  { %1965 = vperm.xlu2 %5489, %v1933_v12  }
 0xb93   :  { %2229 = vrot.lane.b32.xlu2 %v6832_v56, %s6060_s26 }
 0xb94   :  { %5543 = vset.pattern.permute.xlu2 %v6059_v58 }
 0xb97   :  { %v2085_v23 = vpop.f32.mrf.mxu1 }
 0xb98   :  { %v2089_v9 = vmul.f32 2.0, %v2085_v23 }
 0xb9a   :  { %v2091_v19 = vadd.f32 2.0, %v2089_v9 }
 0xb9b   :  { %2499 = vrot.lane.b32.xlu2 %v6808_v11, %s6061_s2 }
 0xb9c   :  { %v2094_v27 = vmul.f32 %v6886_v22, %v2091_v19 }
 0xb9e   :  { %v2097_v51 = vadd.f32 %v6896_v45, %v2094_v27 }
 0xba0   :  { %v6900_v43 = vadd.f32 %v2097_v51, %v6894_v8 }
 0xba2   :  { %v2104_v41 = vsel %vm7992_vm12, %v6900_v43, -inf }
 0xba3   :  { %2105 = vmax.xlane.f32.xlu0 %v2104_v41  ;;  %2709 = vrot.lane.b32.xlu2 %v6788_v63, %s6062_s27  ;;  %v1885_v63 = vpop.xlane.xlu0 %1884 }
 0xba4   :  { %v2284_v36 = vpop.f32.mrf.mxu1  ;;  %v1889_v49 = vsub.f32 %v1885_v63, %v6639_v15  ;;  %v1896_v15 = vmul.f32 %v6694_v52, %v6694_v52 }
 0xba5   :  { %v2317_v24 = vmul.f32 2.0, %v2284_v36 }
 0xba6   :  { %v1893_v39 = vmax.f32 %v1889_v49, 1e-08  ;;  %v5314_v28 = vadd.f32 -1.0, %v1896_v15 }
 0xba7   :  { %v2319_v30 = vadd.f32 2.0, %v2317_v24 }
 0xba8   :  { %5768 = vrcp.f32 %v1893_v39 }
 0xba9   :  { %v2321_v17 = vmul.f32 %v2319_v30, %v6886_v22  ;;  %5770 = vrcp.f32 %v1892_v60 }
 0xbab   :  { %v2323_v40 = vadd.f32 %v2321_v17, %v6896_v45  ;;  %v5494_v13 = vpop.permute.xlu0 %5493 }
 0xbad   :  { %v6914_v48 = vadd.f32 %v2323_v40, %v6911_v6 }
 0xbae   :  { %v5769_v57 = vpop.eup %5768 }
 0xbaf   :  { %v2327_v50 = vsel %vm7992_vm12, %v6914_v48, -inf  ;;  %v1909_v14 = vmul.f32 %v5769_v57, %v5315_v3  ;;  %v5771_v46 = vpop.eup %5770 }
 0xbb0   :  { %2328 = vmax.xlane.f32.xlu0 %v2327_v50  ;;  %v1908_v38 = vmul.f32 %v5771_v46, %v5314_v28 }
 0xbb1   :  { %5772 = vrsqrt.f32 %v1909_v14  ;;  %vm1953_vm13 = vcmp.eq.f32.partialorder %v1909_v14, inf  ;;  %v1956_v24 = vand.u32 2147483648, %v1909_v14  ;;  %vm1955_vm14 = vcmp.eq.f32.partialorder %v1909_v14, 0.0 }
 0xbb2   :  { %5774 = vrsqrt.f32 %v1908_v38  ;;  %vm1941_vm15 = vcmp.eq.f32.partialorder %v1908_v38, inf  ;;  %v1944_v40 = vand.u32 2147483648, %v1908_v38  ;;  %vm1943_vm1 = vcmp.eq.f32.partialorder %v1908_v38, 0.0 }
 0xbb3   :  { %v6930_v19 = vpop.permute.xlu0 %2245 }
 0xbb7   :  { %v5773_v44 = vpop.eup %5772 }
 0xbb8   :  { %v5775_v59 = vpop.eup %5774 }
 0xbb9   :  { %v1935_v55 = vmul.f32 %v5775_v59, %v1908_v38 }
 0xbbb   :  { %v1936_v4 = vmul.f32 %v5775_v59, %v1935_v55 }
 0xbbd   :  { %v1937_v23 = vmul.f32 0.5, %v1936_v4 }
 0xbbf   :  { %v1938_v51 = vsub.f32 1.5, %v1937_v23 }
 0xbc1   :  { %v1939_v36 = vmul.f32 %v5775_v59, %v1938_v51 }
 0xbc3   :  { %v1940_v17 = vmul.f32 %v1939_v36, %v1908_v38 }
 0xbc4   :  { %5503 = vperm.xlu0 %5491, %v5502_v32   ;;  %v1947_v32 = vmul.f32 %v5773_v44, %v1909_v14 }
 0xbc6   :  { %v1948_v5 = vmul.f32 %v5773_v44, %v1947_v32  ;;  %v5496_v32 = vunpack.i.h.bf16 %v5494_v13 }
 0xbc8   :  { %v1949_v31 = vmul.f32 0.5, %v1948_v5  ;;  %v5495_v5 = vunpack.i.l.bf16 %v5494_v13 }
 0xbca   :  { %v1950_v25 = vsub.f32 1.5, %v1949_v31 }
 0xbcc   :  { %5542 = vset.pattern.permute.xlu0 %v6059_v58  ;;  %v1951_v12 = vmul.f32 %v5773_v44, %v1950_v25 }
 0xbce   :  { %v1952_v27 = vmul.f32 %v1951_v12, %v1909_v14 }
 0xbd0   :  { %v1954_v41 = vsel %vm1953_vm13, %v1909_v14, %v1952_v27  ;;  %v2088_v14 = vmul.f32 2.0, %v6881_v18 }
 0xbd1   :  { %v1957_v30 = vsel %vm1955_vm14, %v1956_v24, %v1954_v41 }
 0xbd2   :  { %v2090_v15 = vadd.f32 2.0, %v2088_v14 }
 0xbd4   :  { %v2093_v46 = vmul.f32 %v6886_v22, %v2090_v15 }
 0xbd6   :  { %v2096_v28 = vadd.f32 %v6896_v45, %v2093_v46 }
 0xbe5   :  { %v1966_v47 = vpop.permute.xlu2 %1965 }
 0xbe6   :  { %v1979_v7 = vmul.f32 %v1966_v47, %v6621_v37  ;;  %v6933_v37 = vpop.permute.xlu0 %2473 }
 0xbe7   :  { %v1961_v29 = vpop.permute.xlu1 %1960 }
 0xbe8   :  { %v1978_v52 = vmul.f32 %v1961_v29, %v6619_v62  ;;  %v1942_v62 = vsel %vm1941_vm15, %v1908_v38, %v1940_v17  ;;  %v2098_v38 = vadd.f32 %v2096_v28, %v6911_v6 }
 0xbe9   :  { %v1945_v50 = vsel %vm1943_vm1, %v1944_v40, %v1942_v62 }
 0xbea   :  { %v5497_v9 = vpack.i.bf16 %v1978_v52, %v1979_v7 }
 0xbec   :  { %5498 = vrot.lane.b32.xlu1 %v5497_v9, %s6058_s24 }
 0xbee   :  { %v6935_v63 = vpop.permute.xlu0 %2471 }
 0xbf4   :  { %1975 = vperm.xlu1 %5490, %v1957_v30  }
 0xbf6   :  { %v6940_v49 = vpop.permute.xlu0 %2711 }
 0xbfc   :  { %1970 = vperm.xlu1 %5490, %v1945_v50  }
 0xbfe   :  { %v6944_v39 = vpop.permute.xlu0 %2721 }
 0xc04   :  { %2231 = vrot.lane.b32.xlu1 %v6819_v21, %s6060_s26 }
 0xc05   :  { %5544 = vset.pattern.permute.xlu1 %v6059_v58 }
 0xc0c   :  { %2247 = vrot.lane.b32.xlu1 %v6816_v61, %s6060_s26 }
 0xc14   :  { %2485 = vrot.lane.b32.xlu1 %v6753_v34, %s6061_s2 }
 0xc16   :  { %v6948_v2 = vpop.xlane.xlu0 %2105 }
 0xc1c   :  { %2287 = vrot.lane.b32.xlu1 %v6860_v26, %s6060_s26 }
 0xc23   :  { %v2329_v35 = vpop.xlane.xlu0 %2328 }
 0xc24   :  { %v2333_v42 = vsub.f32 %v6914_v48, %v2329_v35  ;;  %v2101_v48 = vsel %vm7992_vm12, %v2098_v38, -inf }
 0xc26   :  { %v2335_v60 = vmul.f32 1.442695, %v2333_v42 }
 0xc28   :  { %5776 = vpow2.f32 %v2335_v60 }
 0xc2e   :  { %v6953_v57 = vpop.eup %5776 }
 0xc2f   :  { %v2339_v3 = vsel %vm7992_vm12, %v6953_v57, 0.0 }
 0xc30   :  { %2340 = vadd.xlane.f32.xlu0 %v2339_v3  ;;  %v2108_v3 = vsub.f32 %v6900_v43, %v6948_v2 }
 0xc32   :  { %v2111_v14 = vmul.f32 1.442695, %v2108_v3 }
 0xc36   :  { %v5504_v36 = vpop.permute.xlu0 %5503 }
 0xc37   :  { %v5506_v24 = vunpack.i.h.bf16 %v5504_v36  ;;  %v5505_v30 = vunpack.i.l.bf16 %v5504_v36 }
 0xc44   :  { %2727 = vrot.lane.b32.xlu0 %v6816_v61, %s6062_s27 }
 0xc46   :  { %2102 = vmax.xlane.f32.xlu1 %v2101_v48 }
 0xc5e   :  { %v5499_v44 = vpop.permute.xlu1 %5498 }
 0xc5f   :  { %v5501_v59 = vunpack.i.h.bf16 %v5499_v44  ;;  %v5500_v31 = vunpack.i.l.bf16 %v5499_v44  ;;  %2483 = vrot.lane.b32.xlu1 %v6783_v16, %s6061_s2 }
 0xc61   :  { %v2019_v18 = vsel %vm231_vm2, %v5495_v5, %v5500_v31  ;;  %v2018_v55 = vsel %vm231_vm2, %v5496_v32, %v5501_v59 }
 0xc62   :  { %2140 = vmatpush.msrb.mxu2 %v2019_v18  ;;  %v6970_v25 = vpack.i.bf16 %v2018_v55, %v2019_v18 }
 0xc64   :  { %2141 = vmatpush.msrb.mxu2 %v2018_v55 }
 0xc66   :  { %v1976_v4 = vpop.permute.xlu1 %1975 }
 0xc67   :  { %2723 = vrot.lane.b32.xlu1 %v6753_v34, %s6062_s27  ;;  %v1981_v47 = vmul.f32 %v1976_v4, %v6625_v1  ;;  %v2230_v34 = vpop.permute.xlu2 %2229 }
 0xc6e   :  { %v1971_v13 = vpop.permute.xlu1 %1970 }
 0xc6f   :  { %2737 = vrot.lane.b32.xlu1 %v6808_v11, %s6062_s27  ;;  %v1980_v16 = vmul.f32 %v1971_v13, %v6623_v0  ;;  %v2255_v0 = vsel %vm231_vm2, %v2230_v34, %v6930_v19  ;;  %v2500_v28 = vpop.permute.xlu2 %2499 }
 0xc71   :  { %v5507_v29 = vpack.i.bf16 %v1980_v16, %v1981_v47 }
 0xc76   :  { %v2232_v7 = vpop.permute.xlu1 %2231 }
 0xc77   :  { %5508 = vrot.lane.b32.xlu1 %v5507_v29, %s6058_s24 }
 0xc7e   :  { %v2248_v52 = vpop.permute.xlu1 %2247 }
 0xc7f   :  { %v2256_v12 = vsel %vm231_vm2, %v2232_v7, %v2248_v52  ;;  %5513 = vrot.lane.b32.xlu1 %v6970_v25, %s6060_s26 }
 0xc80   :  { %5327 = vmatpush.xpose.msk.msra.mxu2 %vm432_vm3, %v2256_v12 }
 0xc84   :  { %5328 = vmatpush.xpose.msk.msra.mxu2 %vm432_vm3, %v2255_v0 }
 0xc86   :  { %v2486_v1 = vpop.permute.xlu1 %2485 }
 0xc87   :  { %2477 = vrot.lane.b32.xlu1 %v6819_v21, %s6061_s2  ;;  %v2496_v43 = vsel %vm231_vm2, %v6933_v37, %v2486_v1 }
 0xc8e   :  { %v2288_v11 = vpop.permute.xlu1 %2287 }
 0xc8f   :  { %2489 = vrot.lane.b32.xlu1 %v6816_v61, %s6061_s2 }
 0xc97   :  { %2475 = vrot.lane.b32.xlu1 %v6832_v56, %s6061_s2 }
 0xc9f   :  { %2529 = vrot.lane.b32.xlu1 %v6860_v26, %s6061_s2 }
 0xca3   :  { %v2341_v55 = vpop.xlane.xlu0 %2340 }
 0xca7   :  { %2715 = vrot.lane.b32.xlu1 %v6819_v21, %s6062_s27 }
 0xcaf   :  { %2713 = vrot.lane.b32.xlu1 %v6832_v56, %s6062_s27 }
 0xcb6   :  { %v2728_v52 = vpop.permute.xlu0 %2727 }
 0xcb7   :  { %2767 = vrot.lane.b32.xlu1 %v6860_v26, %s6062_s27 }
 0xcb9   :  { %v2103_v23 = vpop.xlane.xlu1 %2102 }
 0xcba   :  { %v2107_v9 = vsub.f32 %v2098_v38, %v2103_v23  ;;  %v2710_v38 = vpop.permute.xlu2 %2709 }
 0xcbb   :  { %v2733_v37 = vsel %vm231_vm2, %v2710_v38, %v6944_v39 }
 0xcbc   :  { %v2109_v61 = vmul.f32 1.442695, %v2107_v9 }
 0xcbe   :  { %5778 = vpow2.f32 %v2109_v61 }
 0xcbf   :  { %5780 = vpow2.f32 %v2111_v14 }
 0xcc4   :  { %v5779_v19 = vpop.eup %5778 }
 0xcc5   :  { %v2113_v27 = vsel %vm7992_vm12, %v5779_v19, 0.0  ;;  %v5781_v15 = vpop.eup %5780 }
 0xcc6   :  { %2114 = vadd.xlane.f32.xlu2 %v2113_v27  ;;  %v2116_v46 = vsel %vm7992_vm12, %v5781_v15, 0.0 }
 0xcd1   :  { %v2484_v51 = vpop.permute.xlu1 %2483 }
 0xcd2   :  { %v2495_v2 = vsel %vm231_vm2, %v6935_v63, %v2484_v51 }
 0xcd9   :  { %v2724_v41 = vpop.permute.xlu1 %2723 }
 0xcde   :  { %2487 = vrot.lane.b32.xlu2 %v6829_v53, %s6061_s2 }
 0xce1   :  { %v2738_v21 = vpop.permute.xlu1 %2737 }
 0xce9   :  { %v5509_v56 = vpop.permute.xlu1 %5508 }
 0xcea   :  { %v5511_v17 = vunpack.i.h.bf16 %v5509_v56  ;;  %v5510_v26 = vunpack.i.l.bf16 %v5509_v56 }
 0xcec   :  { %v2021_v62 = vsel %vm231_vm2, %v5505_v30, %v5510_v26  ;;  %v2020_v40 = vsel %vm231_vm2, %v5506_v24, %v5511_v17 }
 0xced   :  { %2163 = vmatpush.msra.mxu0 %v2021_v62  ;;  %v7009_v50 = vpack.i.bf16 %v2020_v40, %v2021_v62 }
 0xcef   :  { %2164 = vmatpush.msra.mxu0 %v2020_v40 }
 0xcf1   :  { %v5514_v35 = vpop.permute.xlu1 %5513 }
 0xcf2   :  { %v5515_v42 = vunpack.i.l.bf16 %v5514_v35  ;;  %v5516_v60 = vunpack.i.h.bf16 %v5514_v35 }
 0xcf4   :  { %2374 = vmatpush.msrb.mxu0 %v5515_v42 }
 0xcf6   :  { %2375 = vmatpush.msrb.mxu0 %v5516_v60 }
 0xcf9   :  { %v2478_v63 = vpop.permute.xlu1 %2477 }
 0xd01   :  { %v2490_v5 = vpop.permute.xlu1 %2489 }
 0xd02   :  { %v2498_v39 = vsel %vm231_vm2, %v2478_v63, %v2490_v5 }
 0xd07   :  { %2117 = vadd.xlane.f32.xlu2 %v2116_v46 }
 0xd09   :  { %v2476_v59 = vpop.permute.xlu1 %2475 }
 0xd1f   :  { %2725 = vrot.lane.b32.xlu2 %v6829_v53, %s6062_s27  ;;  %v2734_v53 = vsel %vm231_vm2, %v6940_v49, %v2724_v41  ;;  %v2530_v49 = vpop.permute.xlu1 %2529 }
 0xd27   :  { %v2716_v16 = vpop.permute.xlu1 %2715 }
 0xd28   :  { %v2736_v12 = vsel %vm231_vm2, %v2716_v16, %v2728_v52 }
 0xd2f   :  { %v2714_v0 = vpop.permute.xlu1 %2713 }
 0xd39   :  { %v2115_v48 = vpop.xlane.xlu2 %2114 }
 0xd3a   :  { %5782 = vrcp.f32 %v2115_v48 }
 0xd40   :  { %v5783_v44 = vpop.eup %5782 }
 0xd41   :  { %v2121_v32 = vmul.f32 %v5783_v44, %v5779_v19  ;;  %v2488_v31 = vpop.permute.xlu2 %2487 }
 0xd42   :  { %v2497_v29 = vsel %vm231_vm2, %v2476_v59, %v2488_v31 }
 0xd43   :  { %5322 = vmatmul.msk.f32.vlgmr.msrb.gmra.mxu2 %vm7992_vm12, %v2121_v32 }
 0xd44   :  { %5332 = vmatpush.xpose.msk.msrb.mxu2 %vm432_vm3, %v2496_v43 }
 0xd48   :  { %5333 = vmatpush.xpose.msk.msrb.mxu2 %vm432_vm3, %v2495_v2 }
 0xd4b   :  { %5329 = vmatmul.msk.f32.vlgmr.msra.gmra.mxu2 %vm432_vm3, %v2288_v11  ;;  %v2768_v11 = vpop.permute.xlu1 %2767 }
 0xd4c   :  { %5340 = vmatpush.xpose.msk.msra.mxu2 %vm432_vm3, %v2734_v53 }
 0xd50   :  { %5341 = vmatpush.xpose.msk.msra.mxu2 %vm432_vm3, %v2733_v37 }
 0xd53   :  { %5334 = vmatmul.msk.f32.vlgmr.msrb.gmra.mxu2 %vm432_vm3, %v2500_v28 }
 0xd5b   :  { %5342 = vmatmul.msk.f32.vlgmr.msra.gmra.mxu2 %vm432_vm3, %v2738_v21 }
 0xd7a   :  { %v2118_v18 = vpop.xlane.xlu2 %2117 }
 0xd7b   :  { %5784 = vrcp.f32 %v2118_v18 }
 0xd7c   :  { %5786 = vrcp.f32 %v2341_v55 }
 0xd81   :  { %v5785_v4 = vpop.eup %5784 }
 0xd82   :  { %v2122_v13 = vmul.f32 %v5785_v4, %v5781_v15  ;;  %v5787_v47 = vpop.eup %5786  ;;  %v2726_v34 = vpop.permute.xlu2 %2725 }
 0xd83   :  { %v2347_v7 = vmul.f32 %v5787_v47, %v6953_v57  ;;  %v2735_v1 = vsel %vm231_vm2, %v2714_v0, %v2726_v34 }
 0xd84   :  { %5323 = vmatmul.msk.f32.vlgmr.msra.gmra.mxu0 %vm7992_vm12, %v2122_v13 }
 0xd85   :  { %5335 = vmatpush.xpose.msk.msra.mxu0 %vm432_vm3, %v2498_v39 }
 0xd89   :  { %5336 = vmatpush.xpose.msk.msra.mxu0 %vm432_vm3, %v2497_v29 }
 0xd8c   :  { %5330 = vmatmul.msk.f32.vlgmr.msrb.gmra.mxu0 %vm7992_vm12, %v2347_v7 }
 0xd8d   :  { %5343 = vmatpush.xpose.msk.msrb.mxu0 %vm432_vm3, %v2736_v12 }
 0xd91   :  { %5344 = vmatpush.xpose.msk.msrb.mxu0 %vm432_vm3, %v2735_v1 }
 0xd94   :  { %5337 = vmatmul.msk.f32.vlgmr.msra.gmra.mxu0 %vm432_vm3, %v2530_v49 }
 0xd9c   :  { %5345 = vmatmul.msk.f32.vlgmr.msrb.gmra.mxu0 %vm432_vm3, %v2768_v11 }
 0xdc6   :  { %v7053_v57 = vpop.f32.mrf.mxu2 }
 0xdce   :  { %v2314_v23 = vpop.f32.mrf.mxu2 }
 0xdcf   :  { %v2318_v9 = vmul.f32 2.0, %v2314_v23 }
 0xdd1   :  { %v2320_v61 = vadd.f32 2.0, %v2318_v9 }
 0xdd3   :  { %v2322_v19 = vmul.f32 %v2320_v61, %v6886_v22 }
 0xdd5   :  { %v2324_v27 = vadd.f32 %v2322_v19, %v6896_v45 }
 0xdd6   :  { %v2526_v51 = vpop.f32.mrf.mxu2 }
 0xdd7   :  { %v2559_v41 = vmul.f32 2.0, %v2526_v51  ;;  %v2326_v21 = vadd.f32 %v2324_v27, %v6894_v8 }
 0xdd9   :  { %v2561_v36 = vadd.f32 2.0, %v2559_v41  ;;  %v2330_v56 = vsel %vm7992_vm12, %v2326_v21, -inf }
 0xdda   :  { %2331 = vmax.xlane.f32.xlu1 %v2330_v56 }
 0xddb   :  { %v2563_v24 = vmul.f32 %v2561_v36, %v6886_v22 }
 0xddd   :  { %v2565_v30 = vadd.f32 %v2563_v24, %v6896_v45  ;;  %v2169_v24 = vmul.f32 %v7053_v57, %v7053_v57 }
 0xdde   :  { %v2764_v17 = vpop.f32.mrf.mxu2 }
 0xddf   :  { %v2797_v26 = vmul.f32 2.0, %v2764_v17  ;;  %v2567_v62 = vadd.f32 %v2565_v30, %v6911_v6  ;;  %v2171_v17 = vsel %vm432_vm3, %v2169_v24, 0.0 }
 0xde1   :  { %v2799_v40 = vadd.f32 2.0, %v2797_v26  ;;  %v2569_v35 = vsel %vm7992_vm12, %v2567_v62, -inf }
 0xde2   :  { %2570 = vmax.xlane.f32.xlu2 %v2569_v35 }
 0xde3   :  { %v2801_v42 = vmul.f32 %v2799_v40, %v6886_v22 }
 0xde5   :  { %v2803_v60 = vadd.f32 %v2801_v42, %v6896_v45 }
 0xde7   :  { %v2805_v3 = vadd.f32 %v2803_v60, %v6911_v6 }
 0xde9   :  { %v2807_v14 = vsel %vm7992_vm12, %v2805_v3, -inf }
 0xdea   :  { %2808 = vmax.xlane.f32.xlu0 %v2807_v14 }
 0xdf3   :  { %5523 = vrot.lane.b32.xlu1 %v6970_v25, %s6062_s27 }
 0xe01   :  { %v7069_v15 = vpop.f32.mrf.mxu0 }
 0xe09   :  { %v7071_v46 = vpop.f32.mrf.mxu0 }
 0xe0a   :  { %v2411_v30 = vmul.f32 %v7071_v46, %v7071_v46 }
 0xe0c   :  { %v2413_v26 = vsel %vm432_vm3, %v2411_v30, 0.0 }
 0xe11   :  { %v2556_v28 = vpop.f32.mrf.mxu0 }
 0xe12   :  { %v2560_v38 = vmul.f32 2.0, %v2556_v28 }
 0xe14   :  { %v2562_v48 = vadd.f32 2.0, %v2560_v38 }
 0xe16   :  { %v2564_v44 = vmul.f32 %v2562_v48, %v6886_v22 }
 0xe18   :  { %v2566_v32 = vadd.f32 %v2564_v44, %v6896_v45 }
 0xe19   :  { %v2794_v43 = vpop.f32.mrf.mxu0 }
 0xe1a   :  { %v2798_v2 = vmul.f32 2.0, %v2794_v43  ;;  %v2568_v6 = vadd.f32 %v2566_v32, %v6894_v8 }
 0xe1c   :  { %v2800_v53 = vadd.f32 2.0, %v2798_v2  ;;  %v2572_v37 = vsel %vm7992_vm12, %v2568_v6, -inf }
 0xe1d   :  { %2573 = vmax.xlane.f32.xlu2 %v2572_v37 }
 0xe1e   :  { %v2802_v63 = vmul.f32 %v2800_v53, %v6886_v22 }
 0xe20   :  { %v2804_v5 = vadd.f32 %v2802_v63, %v6896_v45 }
 0xe22   :  { %v2806_v59 = vadd.f32 %v2804_v5, %v6894_v8 }
 0xe24   :  { %v2810_v31 = vsel %vm7992_vm12, %v2806_v59, -inf }
 0xe25   :  { %2811 = vmax.xlane.f32.xlu0 %v2810_v31 }
 0xe35   :  { %5518 = vrot.lane.b32.xlu2 %v6970_v25, %s6061_s2 }
 0xe4d   :  { %v2332_v18 = vpop.xlane.xlu1 %2331 }
 0xe4e   :  { %v2334_v49 = vsub.f32 %v2326_v21, %v2332_v18 }
 0xe50   :  { %v2337_v55 = vmul.f32 1.442695, %v2334_v49  ;;  %v2419_v49 = vmul.f32 2.0, %v7071_v46 }
 0xe52   :  { %5788 = vpow2.f32 %v2337_v55 }
 0xe55   :  { %v2571_v4 = vpop.xlane.xlu2 %2570 }
 0xe56   :  { %v2575_v13 = vsub.f32 %v2567_v62, %v2571_v4 }
 0xe58   :  { %v7083_v39 = vpop.eup %5788  ;;  %v2577_v16 = vmul.f32 1.442695, %v2575_v13  ;;  %v2421_v13 = vmul.f32 %v2419_v49, %v7071_v46 }
 0xe59   :  { %v2342_v22 = vsel %vm7992_vm12, %v7083_v39, 0.0 }
 0xe5a   :  { %5790 = vpow2.f32 %v2577_v16  ;;  %2343 = vadd.xlane.f32.xlu0 %v2342_v22 }
 0xe5d   :  { %v2809_v8 = vpop.xlane.xlu0 %2808 }
 0xe5e   :  { %v2813_v45 = vsub.f32 %v2805_v3, %v2809_v8 }
 0xe60   :  { %v5791_v47 = vpop.eup %5790  ;;  %v2815_v29 = vmul.f32 1.442695, %v2813_v45 }
 0xe61   :  { %v2581_v25 = vsel %vm7992_vm12, %v5791_v47, 0.0 }
 0xe62   :  { %5792 = vpow2.f32 %v2815_v29  ;;  %2582 = vadd.xlane.f32.xlu1 %v2581_v25 }
 0xe65   :  { %v5524_v23 = vpop.permute.xlu1 %5523 }
 0xe66   :  { %v5525_v41 = vunpack.i.l.bf16 %v5524_v23 }
 0xe68   :  { %v5793_v7 = vpop.eup %5792 }
 0xe69   :  { %v2819_v52 = vsel %vm7992_vm12, %v5793_v7, 0.0 }
 0xe6a   :  { %2820 = vadd.xlane.f32.xlu0 %v2819_v52 }
 0xe7b   :  { %5533 = vrot.lane.b32.xlu1 %v7009_v50, %s6061_s2 }
 0xe7e   :  { %5528 = vrot.lane.b32.xlu0 %v7009_v50, %s6060_s26 }
 0xe86   :  { %5538 = vrot.lane.b32.xlu0 %v7009_v50, %s6062_s27  ;;  %v5526_v50 = vunpack.i.h.bf16 %v5524_v23 }
 0xe90   :  { %v2574_v12 = vpop.xlane.xlu2 %2573 }
 0xe91   :  { %v2576_v34 = vsub.f32 %v2568_v6, %v2574_v12 }
 0xe93   :  { %v2579_v0 = vmul.f32 1.442695, %v2576_v34 }
 0xe95   :  { %5794 = vpow2.f32 %v2579_v0 }
 0xe98   :  { %v2812_v1 = vpop.xlane.xlu0 %2811  ;;  %v5519_v11 = vpop.permute.xlu2 %5518 }
 0xe99   :  { %v2814_v9 = vsub.f32 %v2806_v59, %v2812_v1  ;;  %v5520_v61 = vunpack.i.l.bf16 %v5519_v11  ;;  %v5521_v51 = vunpack.i.h.bf16 %v5519_v11 }
 0xe9b   :  { %v5795_v19 = vpop.eup %5794  ;;  %v2817_v27 = vmul.f32 1.442695, %v2814_v9  ;;  %2614 = vmatpush.msra.mxu3 %v5520_v61 }
 0xe9c   :  { %v2584_v21 = vsel %vm7992_vm12, %v5795_v19, 0.0 }
 0xe9d   :  { %5796 = vpow2.f32 %v2817_v27  ;;  %2585 = vadd.xlane.f32.xlu2 %v2584_v21  ;;  %2615 = vmatpush.msra.mxu3 %v5521_v51 }
 0xe9f   :  { %2852 = vmatpush.msrb.mxu3 %v5525_v41 }
 0xea1   :  { %2853 = vmatpush.msrb.mxu3 %v5526_v50 }
 0xea3   :  { %v5797_v36 = vpop.eup %5796 }
 0xea4   :  { %v2822_v56 = vsel %vm7992_vm12, %v5797_v36, 0.0 }
 0xea5   :  { %2823 = vadd.xlane.f32.xlu1 %v2822_v56 }
 0xead   :  { %2172 = vadd.xlane.f32.xlu1 %v2171_v17 }
 0xeb0   :  { %2414 = vadd.xlane.f32.xlu0 %v2413_v26 }
 0xecd   :  { %v2344_v62 = vpop.xlane.xlu0 %2343 }
 0xed5   :  { %v2583_v40 = vpop.xlane.xlu1 %2582 }
 0xed6   :  { %5798 = vrcp.f32 %v2583_v40 }
 0xedc   :  { %v5799_v35 = vpop.eup %5798 }
 0xedd   :  { %v2589_v42 = vmul.f32 %v5799_v35, %v5791_v47  ;;  %v2821_v60 = vpop.xlane.xlu0 %2820 }
 0xede   :  { %5800 = vrcp.f32 %v2821_v60 }
 0xedf   :  { %5338 = vmatmul.msk.f32.vlgmr.msra.gmra.mxu3 %vm7992_vm12, %v2589_v42  ;;  %5802 = vrcp.f32 %v2344_v62 }
 0xee4   :  { %v5801_v3 = vpop.eup %5800 }
 0xee5   :  { %v2827_v14 = vmul.f32 %v5801_v3, %v5793_v7  ;;  %v5803_v38 = vpop.eup %5802 }
 0xee6   :  { %v2348_v43 = vmul.f32 %v5803_v38, %v7083_v39 }
 0xee7   :  { %5346 = vmatmul.msk.f32.vlgmr.msrb.gmra.mxu3 %vm7992_vm12, %v2827_v14 }
 0xeed   :  { %v5534_v44 = vpop.permute.xlu1 %5533 }
 0xeee   :  { %v5535_v2 = vunpack.i.l.bf16 %v5534_v44  ;;  %v5536_v6 = vunpack.i.h.bf16 %v5534_v44 }
 0xef0   :  { %v5529_v28 = vpop.permute.xlu0 %5528 }
 0xef1   :  { %v5530_v48 = vunpack.i.l.bf16 %v5529_v28  ;;  %v5531_v32 = vunpack.i.h.bf16 %v5529_v28 }
 0xef3   :  { %2405 = vmatpush.msra.mxu1 %v5530_v48 }
 0xef5   :  { %2406 = vmatpush.msra.mxu1 %v5531_v32 }
 0xef6   :  { %5331 = vmatmul.msk.f32.vlgmr.msra.gmra.mxu1 %vm7992_vm12, %v2348_v43 }
 0xef7   :  { %2643 = vmatpush.msrb.mxu1 %v5535_v2 }
 0xef8   :  { %v5539_v53 = vpop.permute.xlu0 %5538 }
 0xef9   :  { %v5540_v37 = vunpack.i.l.bf16 %v5539_v53  ;;  %2644 = vmatpush.msrb.mxu1 %v5536_v6  ;;  %v5541_v63 = vunpack.i.h.bf16 %v5539_v53  ;;  %v2177_v6 = vmul.f32 2.0, %v7053_v57 }
 0xefb   :  { %2881 = vmatpush.msra.mxu1 %v5540_v37 }
 0xefd   :  { %2882 = vmatpush.msra.mxu1 %v5541_v63 }
 0xf10   :  { %v2586_v5 = vpop.xlane.xlu2 %2585 }
 0xf11   :  { %5804 = vrcp.f32 %v2586_v5 }
 0xf17   :  { %v5805_v59 = vpop.eup %5804 }
 0xf18   :  { %v2590_v31 = vmul.f32 %v5805_v59, %v5795_v19  ;;  %v2824_v18 = vpop.xlane.xlu1 %2823 }
 0xf19   :  { %5806 = vrcp.f32 %v2824_v18 }
 0xf1a   :  { %5339 = vmatmul.msk.f32.vlgmr.msrb.gmra.mxu1 %vm7992_vm12, %v2590_v31  ;;  %v2179_v31 = vmul.f32 %v2177_v6, %v7053_v57 }
 0xf1f   :  { %v5807_v55 = vpop.eup %5806 }
 0xf20   :  { %v2828_v4 = vmul.f32 %v5807_v55, %v5797_v36  ;;  %v2173_v63 = vpop.xlane.xlu1 %2172 }
 0xf21   :  { %v2181_v49 = vsub.f32 %v2173_v63, %v2179_v31 }
 0xf22   :  { %5347 = vmatmul.msk.f32.vlgmr.msra.gmra.mxu1 %vm7992_vm12, %v2828_v4 }
 0xf23   :  { %v2415_v39 = vpop.xlane.xlu0 %2414 }
 0xf24   :  { %v2423_v16 = vsub.f32 %v2415_v39, %v2421_v13 }
 0xf26   :  { %v2425_v22 = vand.u32 2147483647, %v2423_v16 }
 0xf28   :  { %v2427_v8 = vmax.f32 %v2425_v22, 1e-08  ;;  %v2183_v22 = vand.u32 2147483647, %v2181_v49 }
 0xf2a   :  { %5808 = vrsqrt.f32 %v2427_v8  ;;  %vm2435_vm4 = vweird.f32 %v2427_v8 }
 0xf30   :  { %v5809_v45 = vpop.eup %5808 }
 0xf31   :  { %v2430_v47 = vmul.f32 %v5809_v45, %v2427_v8  ;;  %vm2436_vm5 = vweird.f32 %v5809_v45 }
 0xf32   :  { %vm2437_vm6 = vmor %vm2435_vm4, %vm2436_vm5 }
 0xf33   :  { %v2431_v29 = vmul.f32 %v5809_v45, %v2430_v47 }
 0xf35   :  { %v2432_v25 = vmul.f32 0.5, %v2431_v29 }
 0xf37   :  { %v2433_v7 = vsub.f32 1.5, %v2432_v25 }
 0xf39   :  { %v2434_v52 = vmul.f32 %v5809_v45, %v2433_v7  ;;  %v2185_v7 = vmax.f32 %v2183_v22, 1e-08 }
 0xf3b   :  { %v2438_v12 = vsel %vm2437_vm6, %v5809_v45, %v2434_v52 }
 0xf3c   :  { %2451 = vperm.xlu0 %5542, %v2438_v12  }
 0xf62   :  { %v7115_v1 = vpop.f32.mrf.mxu3 }
 0xf63   :  { %v2649_v23 = vmul.f32 %v7115_v1, %v7115_v1  ;;  %v2657_v17 = vmul.f32 2.0, %v7115_v1 }
 0xf65   :  { %v2651_v9 = vsel %vm432_vm3, %v2649_v23, 0.0  ;;  %v2659_v40 = vmul.f32 %v2657_v17, %v7115_v1 }
 0xf6a   :  { %v7121_v61 = vpop.f32.mrf.mxu3 }
 0xf6b   :  { %v2887_v19 = vmul.f32 %v7121_v61, %v7121_v61  ;;  %v2895_v14 = vmul.f32 2.0, %v7121_v61 }
 0xf6d   :  { %v2889_v27 = vsel %vm432_vm3, %v2887_v19, 0.0  ;;  %v2897_v48 = vmul.f32 %v2895_v14, %v7121_v61 }
 0xf73   :  { %v7111_v34 = vpop.f32.mrf.mxu1 }
 0xf74   :  { %v2412_v0 = vmul.f32 %v7111_v34, %v7111_v34  ;;  %v2420_v30 = vmul.f32 2.0, %v7111_v34 }
 0xf76   :  { %v2416_v11 = vsel %vm432_vm3, %v2412_v0, 0.0  ;;  %v2422_v26 = vmul.f32 %v2420_v30, %v7111_v34 }
 0xf77   :  { %2417 = vadd.xlane.f32.xlu2 %v2416_v11 }
 0xf7f   :  { %2652 = vadd.xlane.f32.xlu2 %v2651_v9 }
 0xf87   :  { %2890 = vadd.xlane.f32.xlu2 %v2889_v27 }
 0xf97   :  { %v7126_v51 = vpop.f32.mrf.mxu1 }
 0xf98   :  { %v2650_v41 = vmul.f32 %v7126_v51, %v7126_v51  ;;  %v2658_v8 = vmul.f32 2.0, %v7126_v51 }
 0xf9a   :  { %v2654_v21 = vsel %vm432_vm3, %v2650_v41, 0.0  ;;  %v2660_v52 = vmul.f32 %v2658_v8, %v7126_v51 }
 0xf9b   :  { %2655 = vadd.xlane.f32.xlu1 %v2654_v21 }
 0xf9f   :  { %v7131_v50 = vpop.f32.mrf.mxu1 }
 0xfa0   :  { %v2888_v36 = vmul.f32 %v7131_v50, %v7131_v50  ;;  %v2896_v27 = vmul.f32 2.0, %v7131_v50 }
 0xfa2   :  { %v2892_v56 = vsel %vm432_vm3, %v2888_v36, 0.0 }
 0xfa3   :  { %2893 = vadd.xlane.f32.xlu2 %v2892_v56  ;;  %v2898_v56 = vmul.f32 %v2896_v27, %v7131_v50 }
 0xfea   :  { %v2418_v24 = vpop.xlane.xlu2 %2417 }
 0xfeb   :  { %v2424_v62 = vsub.f32 %v2418_v24, %v2422_v26 }
 0xfed   :  { %v2426_v60 = vand.u32 2147483647, %v2424_v62 }
 0xfef   :  { %v2428_v38 = vmax.f32 %v2426_v60, 1e-08 }
 0xff1   :  { %vm2445_vm4 = vweird.f32 %v2428_v38 }
 0xff2   :  { %v2653_v35 = vpop.xlane.xlu2 %2652 }
 0xff3   :  { %v2661_v42 = vsub.f32 %v2653_v35, %v2659_v40 }
 0xff5   :  { %v2663_v3 = vand.u32 2147483647, %v2661_v42 }
 0xff7   :  { %v2665_v28 = vmax.f32 %v2663_v3, 1e-08 }
 0xff9   :  { %5810 = vrsqrt.f32 %v2665_v28  ;;  %vm2673_vm11 = vweird.f32 %v2665_v28 }
 0xffa   :  { %v2891_v44 = vpop.xlane.xlu2 %2890  ;;  %5812 = vrsqrt.f32 %v2428_v38 }
 0xffb   :  { %v2899_v32 = vsub.f32 %v2891_v44, %v2897_v48 }
 0xffd   :  { %v2901_v43 = vand.u32 2147483647, %v2899_v32 }
 0xfff   :  { %v5811_v2 = vpop.eup %5810  ;;  %v2903_v53 = vmax.f32 %v2901_v43, 1e-08 }
0x1000   :  { %v2668_v37 = vmul.f32 %v5811_v2, %v2665_v28  ;;  %v5813_v59 = vpop.eup %5812  ;;  %vm2674_vm10 = vweird.f32 %v5811_v2 }
0x1001   :  { %5814 = vrsqrt.f32 %v2903_v53  ;;  %v2440_v55 = vmul.f32 %v5813_v59, %v2428_v38  ;;  %vm2675_vm13 = vmor %vm2673_vm11, %vm2674_vm10  ;;  %vm2911_vm15 = vweird.f32 %v2903_v53  ;;  %vm2446_vm5 = vweird.f32 %v5813_v59 }
0x1002   :  { %v2669_v5 = vmul.f32 %v5811_v2, %v2668_v37  ;;  %5816 = vrsqrt.f32 %v2185_v7  ;;  %vm2447_vm6 = vmor %vm2445_vm4, %vm2446_vm5 }
0x1003   :  { %v2441_v45 = vmul.f32 %v5813_v59, %v2440_v55  ;;  %v2170_v55 = vmul.f32 %v7069_v15, %v7069_v15 }
0x1004   :  { %v2670_v18 = vmul.f32 0.5, %v2669_v5 }
0x1005   :  { %v2442_v12 = vmul.f32 0.5, %v2441_v45 }
0x1006   :  { %v2671_v4 = vsub.f32 1.5, %v2670_v18 }
0x1007   :  { %v5815_v13 = vpop.eup %5814  ;;  %v2443_v21 = vsub.f32 1.5, %v2442_v12  ;;  %v2178_v12 = vmul.f32 2.0, %v7069_v15 }
0x1008   :  { %v2906_v39 = vmul.f32 %v5815_v13, %v2903_v53  ;;  %v2672_v16 = vmul.f32 %v5811_v2, %v2671_v4  ;;  %vm2912_vm14 = vweird.f32 %v5815_v13  ;;  %v5817_v17 = vpop.eup %5816  ;;  %v2452_v4 = vpop.permute.xlu0 %2451 }
0x1009   :  { %vm2913_vm1 = vmor %vm2911_vm15, %vm2912_vm14  ;;  %v2444_v30 = vmul.f32 %v5813_v59, %v2443_v21  ;;  %v2188_v40 = vmul.f32 %v5817_v17, %v2185_v7  ;;  %vm2194_vm14 = vweird.f32 %v5817_v17 }
0x100a   :  { %v2907_v47 = vmul.f32 %v5815_v13, %v2906_v39  ;;  %v2676_v29 = vsel %vm2675_vm13, %v5811_v2, %v2672_v16  ;;  %v2459_v39 = vmul.f32 %v2452_v4, %v7071_v46  ;;  %v3021_v4 = vstv %s7206_s6  ;;  %s6069_s6 = smov [#allocation6]  }
0x100b   :  { %2689 = vperm.xlu2 %5543, %v2676_v29   ;;  %v2448_v35 = vsel %vm2447_vm6, %v5813_v59, %v2444_v30  ;;  %v2189_v14 = vmul.f32 %v5817_v17, %v2188_v40  ;;  %v2952_v30 = vld [vmem:[%s7975_s15 + $0x18] sm:$0xff] }
0x100c   :  { %v2908_v25 = vmul.f32 0.5, %v2907_v47  ;;  %2972 = vmatpush.msrb.mxu2 %v2952_v30 }
0x100d   :  { %v2190_v44 = vmul.f32 0.5, %v2189_v14 }
0x100e   :  { %v2656_v0 = vpop.xlane.xlu1 %2655  ;;  %v2909_v11 = vsub.f32 1.5, %v2908_v25 }
0x100f   :  { %v2662_v23 = vsub.f32 %v2656_v0, %v2660_v52  ;;  %v2191_v37 = vsub.f32 1.5, %v2190_v44 }
0x1010   :  { %v2910_v9 = vmul.f32 %v5815_v13, %v2909_v11 }
0x1011   :  { %v2664_v19 = vand.u32 2147483647, %v2662_v23  ;;  %v2192_v59 = vmul.f32 %v5817_v17, %v2191_v37 }
0x1012   :  { %v2914_v41 = vsel %vm2913_vm1, %v5815_v13, %v2910_v9  ;;  %vm2193_vm1 = vweird.f32 %v2185_v7  ;;  %v2174_v13 = vsel %vm432_vm3, %v2170_v55, 0.0 }
0x1013   :  { %v2666_v36 = vmax.f32 %v2664_v19, 1e-08  ;;  %2927 = vperm.xlu1 %5544, %v2914_v41   ;;  %vm2195_vm4 = vmor %vm2193_vm1, %vm2194_vm14 }
0x1014   :  { %v2196_v49 = vsel %vm2195_vm4, %v5817_v17, %v2192_v59  ;;  %v2951_v17 = vld [vmem:[%s7975_s15 + $0x10] sm:$0xff] }
0x1015   :  { %5818 = vrsqrt.f32 %v2666_v36  ;;  %vm2683_vm11 = vweird.f32 %v2666_v36  ;;  %2973 = vmatpush.msrb.mxu2 %v2951_v17 }
0x1016   :  { %v2894_v24 = vpop.xlane.xlu2 %2893 }
0x1017   :  { %v2900_v26 = vsub.f32 %v2894_v24, %v2898_v56 }
0x1019   :  { %v2902_v62 = vand.u32 2147483647, %v2900_v26  ;;  %v2950_v26 = vld [vmem:[%s7975_s15 + $0x8] sm:$0xff] }
0x101a   :  { %2974 = vmatpush.msrb.mxu2 %v2950_v26 }
0x101b   :  { %v5819_v42 = vpop.eup %5818  ;;  %v2904_v60 = vmax.f32 %v2902_v62, 1e-08  ;;  %2456 = vperm.xlu1 %5544, %v2448_v35  }
0x101c   :  { %v2678_v3 = vmul.f32 %v5819_v42, %v2666_v36  ;;  %vm2684_vm10 = vweird.f32 %v5819_v42 }
0x101d   :  { %5820 = vrsqrt.f32 %v2904_v60  ;;  %vm2685_vm13 = vmor %vm2683_vm11, %vm2684_vm10  ;;  %vm2921_vm5 = vweird.f32 %v2904_v60 }
0x101e   :  { %v2679_v28 = vmul.f32 %v5819_v42, %v2678_v3 }
0x1020   :  { %v2680_v48 = vmul.f32 0.5, %v2679_v28 }
0x1022   :  { %v2681_v32 = vsub.f32 1.5, %v2680_v48 }
0x1023   :  { %v5821_v43 = vpop.eup %5820 }
0x1024   :  { %v2916_v2 = vmul.f32 %v5821_v43, %v2904_v60  ;;  %v2682_v6 = vmul.f32 %v5819_v42, %v2681_v32  ;;  %vm2922_vm15 = vweird.f32 %v5821_v43 }
0x1025   :  { %vm2923_vm6 = vmor %vm2921_vm5, %vm2922_vm15 }
0x1026   :  { %v2917_v38 = vmul.f32 %v5821_v43, %v2916_v2  ;;  %v2686_v53 = vsel %vm2685_vm13, %v5819_v42, %v2682_v6  ;;  %v3107_v2 = vld [vmem:[%s7972_s12 + $0x10] sm:$0xff]  ;;  %v3108_v6 = vld [vmem:[%s7972_s12 + $0x18] sm:$0xff] }
0x1027   :  { %2694 = vperm.xlu0 %5542, %v2686_v53   ;;  %3131 = vmatpush.msra.mxu0 %v3108_v6 }
0x1028   :  { %v2918_v63 = vmul.f32 0.5, %v2917_v38 }
0x1029   :  { %3132 = vmatpush.msra.mxu0 %v3107_v2 }
0x102a   :  { %v2919_v5 = vsub.f32 1.5, %v2918_v63 }
0x102c   :  { %v2920_v31 = vmul.f32 %v5821_v43, %v2919_v5 }
0x102e   :  { %v2924_v18 = vsel %vm2923_vm6, %v5821_v43, %v2920_v31 }
0x102f   :  { %2932 = vperm.xlu1 %5544, %v2924_v18   ;;  %2209 = vperm.xlu0 %5542, %v2196_v49  }
0x1034   :  { %2175 = vadd.xlane.f32.xlu2 %v2174_v13 }
0x1037   :  { %2463 = vrot.lane.b32.xlu1 %v2459_v39, %s6066_s8 }
0x1065   :  { %v2690_v16 = vpop.permute.xlu2 %2689 }
0x1066   :  { %v2697_v22 = vmul.f32 %v2690_v16, %v7115_v1 }
0x1068   :  { %2701 = vrot.lane.b32.xlu0 %v2697_v22, %s6067_s5 }
0x1085   :  { %v2928_v8 = vpop.permute.xlu1 %2927 }
0x1086   :  { %v2935_v45 = vmul.f32 %v2928_v8, %v7121_v61  ;;  %v2180_v61 = vmul.f32 %v2178_v12, %v7069_v15  ;;  %v3105_v8 = vld [vmem:[%s7972_s12] sm:$0xff] }
0x1088   :  { %2939 = vrot.lane.b32.xlu1 %v2935_v45, %s6068_s9  ;;  %v3106_v45 = vld [vmem:[%s7972_s12 + $0x8] sm:$0xff] }
0x1089   :  { %3133 = vmatpush.msra.mxu0 %v3106_v45 }
0x108b   :  { %3134 = vmatpush.msra.mxu0 %v3105_v8 }
0x108d   :  { %v2457_v47 = vpop.permute.xlu1 %2456 }
0x108e   :  { %v2460_v29 = vmul.f32 %v2457_v47, %v7111_v34  ;;  %v5550_v47 = vpack.i.bf16 %v3105_v8, %v3106_v45 }
0x1090   :  { %2465 = vrot.lane.b32.xlu1 %v2460_v29, %s6066_s8 }
0x1099   :  { %v2695_v25 = vpop.permute.xlu0 %2694 }
0x109a   :  { %v2698_v46 = vmul.f32 %v2695_v25, %v7126_v51 }
0x109c   :  { %2703 = vrot.lane.b32.xlu2 %v2698_v46, %s6067_s5 }
0x10a1   :  { %v2210_v7 = vpop.permute.xlu0 %2209  ;;  %v2933_v52 = vpop.permute.xlu1 %2932 }
0x10a2   :  { %v2217_v1 = vmul.f32 %v2210_v7, %v7053_v57  ;;  %v2936_v56 = vmul.f32 %v2933_v52, %v7131_v50  ;;  %v2949_v50 = vld [vmem:[%s7975_s15] sm:$0xff] }
0x10a3   :  { %2975 = vmatpush.msrb.mxu2 %v2949_v50 }
0x10a4   :  { %2219 = vst.msk [vmem:[#allocation2] sm:$0xff] %vm432_vm3, %v2217_v1 }
0x10a7   :  { %v2176_v0 = vpop.xlane.xlu2 %2175 }
0x10a8   :  { %v2182_v11 = vsub.f32 %v2176_v0, %v2180_v61 }
0x10a9   :  { %v2464_v34 = vpop.permute.xlu1 %2463 }
0x10aa   :  { %v2184_v23 = vand.u32 2147483647, %v2182_v11  ;;  %2469 = vst.msk [vmem:[#allocation2] sm:$0xff] %vm7991_vm7, %v2464_v34 }
0x10ac   :  { %v2186_v9 = vmax.f32 %v2184_v23, 1e-08 }
0x10ae   :  { %5822 = vrsqrt.f32 %v2186_v9  ;;  %vm2203_vm11 = vweird.f32 %v2186_v9 }
0x10b4   :  { %v5823_v51 = vpop.eup %5822 }
0x10b5   :  { %v2198_v19 = vmul.f32 %v5823_v51, %v2186_v9  ;;  %vm2204_vm10 = vweird.f32 %v5823_v51 }
0x10b6   :  { %vm2205_vm13 = vmor %vm2203_vm11, %vm2204_vm10 }
0x10b7   :  { %v2199_v27 = vmul.f32 %v5823_v51, %v2198_v19 }
0x10b9   :  { %v2200_v41 = vmul.f32 0.5, %v2199_v27 }
0x10bb   :  { %v2201_v21 = vsub.f32 1.5, %v2200_v41 }
0x10bd   :  { %v2202_v57 = vmul.f32 %v5823_v51, %v2201_v21 }
0x10bf   :  { %v2206_v36 = vsel %vm2205_vm13, %v5823_v51, %v2202_v57 }
0x10c0   :  { %2214 = vperm.xlu0 %5542, %v2206_v36  }
0x10c8   :  { %2941 = vrot.lane.b32.xlu0 %v2936_v56, %s6068_s9 }
0x10da   :  { %v2702_v24 = vpop.permute.xlu0 %2701 }
0x10db   :  { %2707 = vst.msk [vmem:[#allocation2] sm:$0xff] %vm7990_vm8, %v2702_v24 }
0x10f6   :  { %v2704_v3 = vpop.permute.xlu2 %2703 }
0x10fa   :  { %v2940_v62 = vpop.permute.xlu1 %2939 }
0x10fb   :  { %2945 = vst.msk [vmem:[#allocation2] sm:$0xff] %vm7989_vm9, %v2940_v62 }
0x1102   :  { %v2947_v40 = vld [vmem:[#allocation2] sm:$0xff]  ;;  %v2466_v60 = vpop.permute.xlu1 %2465 }
0x1103   :  { %5349 = vmatmul.msk.f32.vlgmr.msrb.gmra.mxu2 %vm114_vm0, %v2947_v40 }
0x1132   :  { %v2215_v35 = vpop.permute.xlu0 %2214 }
0x1133   :  { %v2218_v42 = vmul.f32 %v2215_v35, %v7069_v15  ;;  %v3094_v35 = vld [vmem:[%s8014_s10] sm:$0xff] }
0x1135   :  { %2220 = vst.msk [vmem:[#allocation2 + $0x8] sm:$0xff] %vm432_vm3, %v2218_v42 }
0x1136   :  { %2470 = vst.msk [vmem:[#allocation2 + $0x8] sm:$0xff] %vm7991_vm7, %v2466_v60 }
0x1137   :  { %2708 = vst.msk [vmem:[#allocation2 + $0x8] sm:$0xff] %vm7990_vm8, %v2704_v3 }
0x113a   :  { %v2942_v14 = vpop.permute.xlu0 %2941 }
0x113b   :  { %2946 = vst.msk [vmem:[#allocation2 + $0x8] sm:$0xff] %vm7989_vm9, %v2942_v14  ;;  %v3095_v14 = vld [vmem:[%s8014_s10 + $0x8] sm:$0xff] }
0x1142   :  { %v2948_v28 = vld [vmem:[#allocation2 + $0x8] sm:$0xff] }
0x1143   :  { %5350 = vmatmul.msk.f32.gmra.mxu2 %vm114_vm0, %v2948_v28 }
0x1186   :  { %v2977_v48 = vpop.f32.mrf.mxu2 }
0x1187   :  { %v7190_v44 = vadd.f32 %v2977_v48, %v6615_v54  ;;  %v5545_v54 = vpack.i.bf16 %v3107_v2, %v3108_v6 }
0x1189   :  { %v5351_v15 = vmul.f32 -1.442695, %v7190_v44  ;;  %v7195_v32 = vmul.f32 %v7190_v44, %v7190_v44  ;;  %5546 = vrot.lane.b32.xlu2 %v5545_v54, %s6058_s24 }
0x118b   :  { %5824 = vpow2.f32 %v5351_v15  ;;  %v3028_v43 = vsel %vm114_vm0, %v7195_v32, 0.0 }
0x118c   :  { %3029 = vadd.xlane.f32.xlu1 %v3028_v43 }
0x1191   :  { %v5825_v38 = vpop.eup %5824  ;;  %5551 = vrot.lane.b32.xlu2 %v5550_v47, %s6058_s24 }
0x1192   :  { %v2989_v53 = vadd.f32 1.0, %v5825_v38 }
0x1194   :  { %5826 = vrcp.f32 %v2989_v53  ;;  %v3002_v59 = vand.u32 2147483648, %v2989_v53  ;;  %v3000_v18 = vand.u32 2147483647, %v2989_v53  ;;  %vm2996_vm15 = vweird.f32 %v2989_v53 }
0x1196   :  { %v3003_v55 = vor.u32 1.1754944e-38, %v3002_v59  ;;  %vm3001_vm5 = vcmp.eq.f32.partialorder %v3000_v18, 8.507059e+37 }
0x119a   :  { %v5827_v37 = vpop.eup %5826 }
0x119b   :  { %v2992_v63 = vmul.f32 %v5827_v37, %v2989_v53  ;;  %vm2997_vm14 = vweird.f32 %v5827_v37 }
0x119c   :  { %vm2998_vm1 = vmor %vm2996_vm15, %vm2997_vm14 }
0x119d   :  { %v2993_v5 = vsub.f32 1.0, %v2992_v63  ;;  %v3097_v63 = vld [vmem:[%s8014_s10 + $0x18] sm:$0xff] }
0x119f   :  { %v2994_v31 = vmul.f32 %v5827_v37, %v2993_v5 }
0x11a1   :  { %v2995_v49 = vadd.f32 %v5827_v37, %v2994_v31 }
0x11a3   :  { %v2999_v13 = vsel %vm2998_vm1, %v5827_v37, %v2995_v49 }
0x11a4   :  { %v3004_v39 = vsel %vm3001_vm5, %v3003_v55, %v2999_v13 }
0x11a5   :  { %v3022_v16 = vmul.f32 %v3021_v4, %v3004_v39 }
0x11a7   :  { %v3024_v22 = vadd.f32 1.1, %v3022_v16 }
0x11a9   :  { %3084 = vperm.xlu1 %5544, %v3024_v22   ;;  %v3038_v50 = vmul.f32 %v3024_v22, %v3024_v22 }
0x11ab   :  { %v5353_v42 = vadd.f32 -1.0, %v3038_v50 }
0x11c6   :  { %v2980_v29 = vpop.f32.mrf.mxu2 }
0x11c7   :  { %v7217_v25 = vadd.f32 %v2980_v29, %v6725_v20 }
0x11c9   :  { %v5352_v46 = vmul.f32 -1.442695, %v7217_v25  ;;  %v7222_v7 = vmul.f32 %v7217_v25, %v7217_v25 }
0x11cb   :  { %5828 = vpow2.f32 %v5352_v46  ;;  %v3031_v52 = vsel %vm114_vm0, %v7222_v7, 0.0 }
0x11cc   :  { %3032 = vadd.xlane.f32.xlu0 %v3031_v52 }
0x11d1   :  { %v5829_v1 = vpop.eup %5828 }
0x11d2   :  { %v2990_v12 = vadd.f32 1.0, %v5829_v1 }
0x11d4   :  { %5830 = vrcp.f32 %v2990_v12  ;;  %v3017_v34 = vand.u32 2147483648, %v2990_v12  ;;  %v3015_v23 = vand.u32 2147483647, %v2990_v12  ;;  %vm3011_vm6 = vweird.f32 %v2990_v12 }
0x11d6   :  { %v3018_v51 = vor.u32 1.1754944e-38, %v3017_v34  ;;  %vm3016_vm11 = vcmp.eq.f32.partialorder %v3015_v23, 8.507059e+37 }
0x11da   :  { %v5831_v61 = vpop.eup %5830 }
0x11db   :  { %v3007_v0 = vmul.f32 %v5831_v61, %v2990_v12  ;;  %vm3012_vm4 = vweird.f32 %v5831_v61 }
0x11dc   :  { %vm3013_vm10 = vmor %vm3011_vm6, %vm3012_vm4 }
0x11dd   :  { %v3008_v11 = vsub.f32 1.0, %v3007_v0 }
0x11df   :  { %v3009_v20 = vmul.f32 %v5831_v61, %v3008_v11 }
0x11e1   :  { %v3010_v9 = vadd.f32 %v5831_v61, %v3009_v20 }
0x11e3   :  { %v3014_v19 = vsel %vm3013_vm10, %v5831_v61, %v3010_v9  ;;  %v5547_v57 = vpop.permute.xlu2 %5546 }
0x11e4   :  { %v3019_v27 = vsel %vm3016_vm11, %v3018_v51, %v3014_v19  ;;  %v5549_v36 = vunpack.i.h.bf16 %v5547_v57  ;;  %v5548_v56 = vunpack.i.l.bf16 %v5547_v57 }
0x11e5   :  { %v3023_v41 = vmul.f32 %v3021_v4, %v3019_v27 }
0x11e6   :  { %3185 = vmatpush.msra.mxu3 %v5548_v56 }
0x11e7   :  { %v3025_v21 = vadd.f32 1.1, %v3023_v41 }
0x11e8   :  { %3186 = vmatpush.msra.mxu3 %v5549_v36 }
0x11e9   :  { %3089 = vperm.xlu0 %5542, %v3025_v21   ;;  %v3039_v18 = vmul.f32 %v3025_v21, %v3025_v21 }
0x11eb   :  { %v5552_v26 = vpop.permute.xlu2 %5551  ;;  %v5354_v49 = vadd.f32 -1.0, %v3039_v18 }
0x11ec   :  { %v5554_v62 = vunpack.i.h.bf16 %v5552_v26  ;;  %v5553_v40 = vunpack.i.l.bf16 %v5552_v26 }
0x11ee   :  { %3187 = vmatpush.msra.mxu3 %v5553_v40 }
0x11f0   :  { %3188 = vmatpush.msra.mxu3 %v5554_v62 }
0x11f1   :  { %5362 = vmatmul.msk.f32.vlgmr.msra.gmra.mxu3 %vm114_vm0, %v3094_v35 }
0x11f9   :  { %5363 = vmatmul.msk.f32.gmra.mxu3 %vm114_vm0, %v3095_v14 }
0x11ff   :  { %v3030_v24 = vpop.xlane.xlu1 %3029 }
0x1200   :  { %v3034_v30 = vsub.f32 %v3030_v24, %v7195_v32  ;;  %v3096_v32 = vld [vmem:[%s8014_s10 + $0x10] sm:$0xff] }
0x1201   :  { %5364 = vmatmul.msk.f32.gmra.mxu3 %vm114_vm0, %v3096_v32 }
0x1202   :  { %v3036_v17 = vmax.f32 %v3034_v30, 1e-08 }
0x1204   :  { %5832 = vrcp.f32 %v3036_v17 }
0x1209   :  { %5365 = vmatmul.msk.f32.gmra.mxu3 %vm114_vm0, %v3097_v63 }
0x120a   :  { %v5833_v60 = vpop.eup %5832 }
0x120b   :  { %v3044_v3 = vmul.f32 %v5833_v60, %v5353_v42 }
0x120d   :  { %5834 = vrsqrt.f32 %v3044_v3  ;;  %vm3053_vm13 = vcmp.eq.f32.partialorder %v3044_v3, inf  ;;  %v3056_v38 = vand.u32 2147483648, %v3044_v3  ;;  %vm3055_vm14 = vcmp.eq.f32.partialorder %v3044_v3, 0.0 }
0x1213   :  { %v5835_v28 = vpop.eup %5834 }
0x1214   :  { %v3047_v48 = vmul.f32 %v5835_v28, %v3044_v3 }
0x1216   :  { %v3048_v15 = vmul.f32 %v5835_v28, %v3047_v48 }
0x1218   :  { %v3049_v43 = vmul.f32 0.5, %v3048_v15 }
0x121a   :  { %v3050_v2 = vsub.f32 1.5, %v3049_v43 }
0x121b   :  { %v3085_v61 = vpop.permute.xlu1 %3084 }
0x121c   :  { %v3051_v6 = vmul.f32 %v5835_v28, %v3050_v2 }
0x121e   :  { %v3052_v54 = vmul.f32 %v3051_v6, %v3044_v3 }
0x1220   :  { %v3054_v53 = vsel %vm3053_vm13, %v3044_v3, %v3052_v54 }
0x1221   :  { %v3057_v37 = vsel %vm3055_vm14, %v3056_v38, %v3054_v53 }
0x1222   :  { %3072 = vperm.xlu2 %5543, %v3057_v37  }
0x123f   :  { %v3033_v5 = vpop.xlane.xlu0 %3032 }
0x1240   :  { %v3035_v59 = vsub.f32 %v3033_v5, %v7222_v7  ;;  %v7247_v7 = vld [vmem:[%s7973_s13] ss:$0 sm:$0xff]  ;;  %s5356_s13 = sld [smem:[#allocation3 + $0xb]]  ;;  %v3534_v5 = vstv %s5357_s25  ;;  %s6070_s25 = smov 128  }
0x1242   :  { %v3037_v31 = vmax.f32 %v3035_v59, 1e-08 }
0x1244   :  { %5836 = vrcp.f32 %v3037_v31 }
0x1246   :  { %v7307_v63 = vstv %s5356_s13  ;;  %s5229_s13 = sshll.u32 %s6069_s6, 4  ;;  %s5230_s13 = int_to_ptr.vmem [resolvable:$true] %s5229_s13 }
0x124a   :  { %v5837_v55 = vpop.eup %5836 }
0x124b   :  { %v3045_v4 = vmul.f32 %v5837_v55, %v5354_v49 }
0x124d   :  { %5838 = vrsqrt.f32 %v3045_v4  ;;  %vm3065_vm15 = vcmp.eq.f32.partialorder %v3045_v4, inf  ;;  %v3068_v29 = vand.u32 2147483648, %v3045_v4  ;;  %vm3067_vm1 = vcmp.eq.f32.partialorder %v3045_v4, 0.0 }
0x1253   :  { %v5839_v13 = vpop.eup %5838 }
0x1254   :  { %v3059_v39 = vmul.f32 %v5839_v13, %v3045_v4 }
0x1256   :  { %v3060_v16 = vmul.f32 %v5839_v13, %v3059_v39 }
0x1258   :  { %v3061_v22 = vmul.f32 0.5, %v3060_v16 }
0x125a   :  { %v3062_v8 = vsub.f32 1.5, %v3061_v22 }
0x125b   :  { %v3090_v51 = vpop.permute.xlu0 %3089 }
0x125c   :  { %v3063_v45 = vmul.f32 %v5839_v13, %v3062_v8 }
0x125e   :  { %v3064_v47 = vmul.f32 %v3063_v45, %v3045_v4 }
0x1260   :  { %v3066_v46 = vsel %vm3065_vm15, %v3045_v4, %v3064_v47 }
0x1261   :  { %v3069_v52 = vsel %vm3067_vm1, %v3068_v29, %v3066_v46 }
0x1262   :  { %3077 = vperm.xlu2 %5543, %v3069_v52  }
0x126a   :  { %3158 = vrot.lane.b32.xlu2 %v7247_v7, %s6058_s24 }
0x1274   :  { %v3190_v11 = vpop.f32.mrf.mxu3 }
0x127c   :  { %v3073_v1 = vpop.permute.xlu2 %3072  ;;  %v3193_v34 = vpop.f32.mrf.mxu3 }
0x127d   :  { %v3080_v12 = vmul.f32 %v3073_v1, %v7190_v44 }
0x127f   :  { %v7254_v0 = vsel %vm231_vm2, %v3085_v61, %v3080_v12 }
0x1280   :  { %5360 = vmatmul.msk.f32.vlgmr.msra.gmra.mxu0 %vm114_vm0, %v7254_v0 }
0x1284   :  { %v3196_v20 = vpop.f32.mrf.mxu3 }
0x128c   :  { %v3199_v44 = vpop.f32.mrf.mxu3 }
0x12bc   :  { %v3078_v23 = vpop.permute.xlu2 %3077 }
0x12bd   :  { %v3081_v9 = vmul.f32 %v3078_v23, %v7217_v25 }
0x12bf   :  { %v7261_v19 = vsel %vm231_vm2, %v3090_v51, %v3081_v9 }
0x12c0   :  { %5361 = vmatmul.msk.f32.gmra.mxu0 %vm114_vm0, %v7261_v19 }
0x12c4   :  { %v3159_v27 = vpop.permute.xlu2 %3158 }
0x12c5   :  { %v7265_v41 = vadd.f32 %v3190_v11, %v3159_v27  ;;  %v7267_v21 = vadd.f32 %v3193_v34, %v3159_v27  ;;  %v7269_v57 = vadd.f32 %v3196_v20, %v3159_v27  ;;  %v7271_v36 = vadd.f32 %v3199_v44, %v3159_v27 }
0x12c7   :  { %v5370_v25 = vmul.f32 -1.442695, %v7265_v41  ;;  %v5371_v56 = vmul.f32 -1.442695, %v7267_v21  ;;  %v5372_v24 = vmul.f32 -1.442695, %v7269_v57  ;;  %v7278_v30 = vmul.f32 %v7267_v21, %v7267_v21 }
0x12c8   :  { %v5373_v17 = vmul.f32 -1.442695, %v7271_v36  ;;  %v7283_v26 = vmul.f32 %v7265_v41, %v7265_v41  ;;  %v7291_v40 = vmul.f32 %v7271_v36, %v7271_v36  ;;  %v7295_v35 = vmul.f32 %v7269_v57, %v7269_v57 }
0x12c9   :  { %5840 = vpow2.f32 %v5370_v25  ;;  %v3405_v50 = vsel %vm114_vm0, %v7278_v30, 0.0 }
0x12ca   :  { %5842 = vpow2.f32 %v5371_v56  ;;  %3406 = vadd.xlane.f32.xlu2 %v3405_v50  ;;  %v3402_v62 = vsel %vm114_vm0, %v7283_v26, 0.0  ;;  %v3411_v48 = vsel %vm114_vm0, %v7291_v40, 0.0  ;;  %v3408_v43 = vsel %vm114_vm0, %v7295_v35, 0.0 }
0x12cb   :  { %5844 = vpow2.f32 %v5372_v24  ;;  %3403 = vadd.xlane.f32.xlu1 %v3402_v62 }
0x12cc   :  { %5846 = vpow2.f32 %v5373_v17 }
0x12cf   :  { %v5841_v42 = vpop.eup %5840 }
0x12d0   :  { %v5843_v60 = vpop.eup %5842  ;;  %v3325_v3 = vadd.f32 1.0, %v5841_v42 }
0x12d1   :  { %v5845_v14 = vpop.eup %5844  ;;  %v3326_v28 = vadd.f32 1.0, %v5843_v60 }
0x12d2   :  { %v5847_v15 = vpop.eup %5846  ;;  %v7299_v32 = vadd.f32 1.0, %v5845_v14  ;;  %5848 = vrcp.f32 %v3325_v3  ;;  %3412 = vadd.xlane.f32.xlu2 %v3411_v48  ;;  %v3338_v6 = vand.u32 2147483647, %v3325_v3  ;;  %vm3334_vm5 = vweird.f32 %v3325_v3 }
0x12d3   :  { %v7303_v2 = vadd.f32 1.0, %v5847_v15  ;;  %5850 = vrcp.f32 %v3326_v28  ;;  %3409 = vadd.xlane.f32.xlu1 %v3408_v43  ;;  %v3353_v54 = vand.u32 2147483647, %v3326_v28  ;;  %v3355_v53 = vand.u32 2147483648, %v3326_v28 }
0x12d4   :  { %5852 = vrcp.f32 %v7299_v32  ;;  %vm3349_vm4 = vweird.f32 %v3326_v28  ;;  %vm7309_vm6 = vcmp.eq.f32.partialorder %v3338_v6, 8.507059e+37  ;;  %v3340_v55 = vand.u32 2147483648, %v3325_v3 }
0x12d5   :  { %5854 = vrcp.f32 %v7303_v2  ;;  %vm7313_vm10 = vcmp.eq.f32.partialorder %v3353_v54, 8.507059e+37  ;;  %vm3379_vm11 = vweird.f32 %v7303_v2  ;;  %v3356_v8 = vor.u32 1.1754944e-38, %v3355_v53 }
0x12d6   :  { %v3383_v47 = vand.u32 2147483647, %v7303_v2  ;;  %v3385_v46 = vand.u32 2147483648, %v7303_v2  ;;  %v3370_v61 = vand.u32 2147483648, %v7299_v32  ;;  %v3368_v20 = vand.u32 2147483647, %v7299_v32 }
0x12d7   :  { %v3341_v9 = vor.u32 1.1754944e-38, %v3340_v55  ;;  %vm3364_vm7 = vweird.f32 %v7299_v32 }
0x12d8   :  { %v5849_v38 = vpop.eup %5848  ;;  %v3386_v27 = vor.u32 1.1754944e-38, %v3385_v46  ;;  %v3371_v50 = vor.u32 1.1754944e-38, %v3370_v61 }
0x12d9   :  { %v5851_v37 = vpop.eup %5850  ;;  %v3330_v59 = vmul.f32 %v5849_v38, %v3325_v3  ;;  %vm3335_vm13 = vweird.f32 %v5849_v38 }
0x12da   :  { %v5853_v31 = vpop.eup %5852  ;;  %v3345_v18 = vmul.f32 %v5851_v37, %v3326_v28  ;;  %vm3350_vm14 = vweird.f32 %v5851_v37  ;;  %vm3336_vm1 = vmor %vm3334_vm5, %vm3335_vm13  ;;  %vm3384_vm13 = vcmp.eq.f32.partialorder %v3383_v47, 8.507059e+37 }
0x12db   :  { %v5855_v4 = vpop.eup %5854  ;;  %v3331_v39 = vsub.f32 1.0, %v3330_v59  ;;  %v3360_v16 = vmul.f32 %v5853_v31, %v7299_v32  ;;  %vm3365_vm15 = vweird.f32 %v5853_v31  ;;  %vm3351_vm8 = vmor %vm3349_vm4, %vm3350_vm14  ;;  %vm3369_vm4 = vcmp.eq.f32.partialorder %v3368_v20, 8.507059e+37 }
0x12dc   :  { %v3346_v22 = vsub.f32 1.0, %v3345_v18  ;;  %v3375_v45 = vmul.f32 %v5855_v4, %v7303_v2  ;;  %vm3380_vm9 = vweird.f32 %v5855_v4  ;;  %vm3366_vm12 = vmor %vm3364_vm7, %vm3365_vm15 }
0x12dd   :  { %v3332_v29 = vmul.f32 %v5849_v38, %v3331_v39  ;;  %v3361_v52 = vsub.f32 1.0, %v3360_v16  ;;  %vm3381_vm5 = vmor %vm3379_vm11, %vm3380_vm9 }
0x12de   :  { %v3347_v1 = vmul.f32 %v5851_v37, %v3346_v22  ;;  %v3376_v12 = vsub.f32 1.0, %v3375_v45 }
0x12df   :  { %v3333_v11 = vadd.f32 %v5849_v38, %v3332_v29  ;;  %v3362_v34 = vmul.f32 %v5853_v31, %v3361_v52  ;;  %v3240_v52 = vstv %s7357_s3 }
0x12e0   :  { %v3348_v23 = vadd.f32 %v5851_v37, %v3347_v1  ;;  %v3377_v51 = vmul.f32 %v5855_v4, %v3376_v12 }
0x12e1   :  { %v3337_v44 = vsel %vm3336_vm1, %v5849_v38, %v3333_v11  ;;  %v3363_v25 = vadd.f32 %v5853_v31, %v3362_v34 }
0x12e2   :  { %v3352_v56 = vsel %vm3351_vm8, %v5851_v37, %v3348_v23  ;;  %v3342_v24 = vsel %vm7309_vm6, %v3341_v9, %v3337_v44  ;;  %v3378_v17 = vadd.f32 %v5855_v4, %v3377_v51 }
0x12e3   :  { %v3357_v62 = vsel %vm7313_vm10, %v3356_v8, %v3352_v56  ;;  %v3367_v42 = vsel %vm3366_vm12, %v5853_v31, %v3363_v25  ;;  %v3535_v60 = vmul.f32 %v3534_v5, %v3342_v24  ;;  %v3390_v23 = vmul.f32 %v7307_v63, %v3342_v24 }
0x12e4   :  { %v3536_v3 = vmul.f32 %v3534_v5, %v3357_v62  ;;  %v3382_v14 = vsel %vm3381_vm5, %v5855_v4, %v3378_v17  ;;  %v3372_v28 = vsel %vm3369_vm4, %v3371_v50, %v3367_v42  ;;  %v3391_v32 = vmul.f32 %v7307_v63, %v3357_v62 }
0x12e5   :  { %v3387_v48 = vsel %vm3384_vm13, %v3386_v27, %v3382_v14  ;;  %v7334_v15 = vadd.f32 1.1, %v3535_v60  ;;  %v3537_v6 = vmul.f32 %v3534_v5, %v3372_v28  ;;  %v7372_v17 = vadd.f32 1.1, %v3390_v23 }
0x12e6   :  { %v7337_v43 = vadd.f32 1.1, %v3536_v3  ;;  %v3538_v54 = vmul.f32 %v3534_v5, %v3387_v48  ;;  %v3395_v53 = vadd.f32 1.1, %v3391_v32  ;;  %v3393_v42 = vmul.f32 %v7307_v63, %v3387_v48 }
0x12e7   :  { %v7339_v38 = vadd.f32 1.1, %v3537_v6  ;;  %v3392_v24 = vmul.f32 %v7307_v63, %v3372_v28 }
0x12e8   :  { %v5558_v2 = vpack.i.bf16 %v7334_v15, %v7337_v43  ;;  %v7343_v37 = vadd.f32 1.1, %v3538_v54  ;;  %v3423_v62 = vmul.f32 %v3395_v53, %v3395_v53  ;;  %v7379_v6 = vadd.f32 1.1, %v3393_v42 }
0x12ea   :  { %v5568_v59 = vpack.i.bf16 %v7339_v38, %v7343_v37  ;;  %v5375_v32 = vadd.f32 -1.0, %v3423_v62 }
0x12ec   :  { %3517 = vperm.xlu1 %5544, %v3395_v53  }
0x12fd   :  { %v3136_v31 = vpop.f32.mrf.mxu0 }
0x12fe   :  { %v7348_v18 = vadd.f32 %v7247_v7, %v3136_v31 }
0x1300   :  { %v5366_v49 = vmul.f32 -1.442695, %v7348_v18  ;;  %v7353_v5 = vmul.f32 %v7348_v18, %v7348_v18 }
0x1302   :  { %5856 = vpow2.f32 %v5366_v49  ;;  %v3247_v55 = vsel %vm114_vm0, %v7353_v5, 0.0  ;;  %v7382_v49 = vadd.f32 1.1, %v3392_v24 }
0x1303   :  { %3248 = vadd.xlane.f32.xlu0 %v3247_v55 }
0x1308   :  { %v5857_v4 = vpop.eup %5856 }
0x1309   :  { %v3208_v13 = vadd.f32 1.0, %v5857_v4 }
0x130b   :  { %5858 = vrcp.f32 %v3208_v13  ;;  %v3221_v8 = vand.u32 2147483648, %v3208_v13  ;;  %v3219_v47 = vand.u32 2147483647, %v3208_v13  ;;  %vm3215_vm8 = vweird.f32 %v3208_v13 }
0x130d   :  { %v3222_v46 = vor.u32 1.1754944e-38, %v3221_v8  ;;  %vm3220_vm12 = vcmp.eq.f32.partialorder %v3219_v47, 8.507059e+37 }
0x1311   :  { %v5859_v39 = vpop.eup %5858 }
0x1312   :  { %v3211_v16 = vmul.f32 %v5859_v39, %v3208_v13  ;;  %vm3216_vm7 = vweird.f32 %v5859_v39 }
0x1313   :  { %vm3217_vm9 = vmor %vm3215_vm8, %vm3216_vm7 }
0x1314   :  { %v3212_v22 = vsub.f32 1.0, %v3211_v16  ;;  %v3425_v16 = vmul.f32 %v7379_v6, %v7379_v6 }
0x1316   :  { %v3213_v45 = vmul.f32 %v5859_v39, %v3212_v22  ;;  %v3424_v22 = vmul.f32 %v7382_v49, %v7382_v49  ;;  %v5377_v8 = vadd.f32 -1.0, %v3425_v16 }
0x1318   :  { %v3214_v29 = vadd.f32 %v5859_v39, %v3213_v45  ;;  %v5376_v47 = vadd.f32 -1.0, %v3424_v22 }
0x131a   :  { %v3218_v1 = vsel %vm3217_vm9, %v5859_v39, %v3214_v29 }
0x131b   :  { %v3223_v12 = vsel %vm3220_vm12, %v3222_v46, %v3218_v1 }
0x131c   :  { %v3241_v61 = vmul.f32 %v3240_v52, %v3223_v12 }
0x131e   :  { %v7362_v11 = vadd.f32 1.1, %v3241_v61 }
0x1320   :  { %3303 = vperm.xlu1 %5544, %v7362_v11  }
0x133d   :  { %v3407_v34 = vpop.xlane.xlu2 %3406  ;;  %v3139_v20 = vpop.f32.mrf.mxu0 }
0x133e   :  { %v3415_v9 = vsub.f32 %v3407_v34, %v7278_v30  ;;  %v7368_v51 = vadd.f32 %v7247_v7, %v3139_v20  ;;  %v3404_v44 = vpop.xlane.xlu1 %3403  ;;  %v3422_v7 = vmul.f32 %v7372_v17, %v7372_v17 }
0x133f   :  { %v3414_v27 = vsub.f32 %v3404_v44, %v7283_v26 }
0x1340   :  { %v3419_v25 = vmax.f32 %v3415_v9, 1e-08  ;;  %v5367_v56 = vmul.f32 -1.442695, %v7368_v51  ;;  %v5374_v4 = vadd.f32 -1.0, %v3422_v7 }
0x1341   :  { %v3418_v50 = vmax.f32 %v3414_v27, 1e-08 }
0x1342   :  { %5860 = vrcp.f32 %v3419_v25 }
0x1343   :  { %5862 = vpow2.f32 %v5367_v56 }
0x1344   :  { %5864 = vrcp.f32 %v3418_v50 }
0x1345   :  { %v3413_v60 = vpop.xlane.xlu2 %3412 }
0x1346   :  { %v3417_v3 = vsub.f32 %v3413_v60, %v7291_v40  ;;  %v3410_v14 = vpop.xlane.xlu1 %3409 }
0x1347   :  { %v3416_v54 = vsub.f32 %v3410_v14, %v7295_v35 }
0x1348   :  { %v5861_v31 = vpop.eup %5860  ;;  %v3421_v53 = vmax.f32 %v3417_v3, 1e-08 }
0x1349   :  { %v5863_v48 = vpop.eup %5862  ;;  %v3435_v55 = vmul.f32 %v5861_v31, %v5375_v32  ;;  %v3420_v63 = vmax.f32 %v3416_v54, 1e-08 }
0x134a   :  { %v5865_v28 = vpop.eup %5864  ;;  %v7384_v13 = vadd.f32 1.0, %v5863_v48  ;;  %5866 = vrcp.f32 %v3421_v53 }
0x134b   :  { %v3434_v39 = vmul.f32 %v5865_v28, %v5374_v4  ;;  %5868 = vrcp.f32 %v3420_v63  ;;  %vm3457_vm6 = vcmp.eq.f32.partialorder %v3435_v55, inf  ;;  %vm3459_vm10 = vcmp.eq.f32.partialorder %v3435_v55, 0.0 }
0x134c   :  { %5870 = vrcp.f32 %v7384_v13  ;;  %v3460_v63 = vand.u32 2147483648, %v3435_v55  ;;  %vm3230_vm1 = vweird.f32 %v7384_v13 }
0x134d   :  { %5872 = vrsqrt.f32 %v3435_v55  ;;  %vm3445_vm11 = vcmp.eq.f32.partialorder %v3434_v39, inf  ;;  %vm3447_vm14 = vcmp.eq.f32.partialorder %v3434_v39, 0.0 }
0x134e   :  { %5874 = vrsqrt.f32 %v3434_v39 }
0x1350   :  { %v5867_v45 = vpop.eup %5866 }
0x1351   :  { %v5869_v29 = vpop.eup %5868  ;;  %v7391_v46 = vmul.f32 %v5867_v45, %v5377_v8  ;;  %v3448_v8 = vand.u32 2147483648, %v3434_v39 }
0x1352   :  { %v5871_v1 = vpop.eup %5870  ;;  %v3436_v12 = vmul.f32 %v5869_v29, %v5376_v47 }
0x1353   :  { %v5873_v61 = vpop.eup %5872  ;;  %5876 = vrsqrt.f32 %v7391_v46  ;;  %v3226_v23 = vmul.f32 %v5871_v1, %v7384_v13  ;;  %vm3231_vm15 = vweird.f32 %v5871_v1  ;;  %vm3481_vm8 = vcmp.eq.f32.partialorder %v7391_v46, inf }
0x1354   :  { %v5875_v34 = vpop.eup %5874  ;;  %v3451_v20 = vmul.f32 %v5873_v61, %v3435_v55  ;;  %5878 = vrsqrt.f32 %v3436_v12  ;;  %vm3232_vm5 = vmor %vm3230_vm1, %vm3231_vm15  ;;  %vm3469_vm4 = vcmp.eq.f32.partialorder %v3436_v12, inf  ;;  %vm3471_vm13 = vcmp.eq.f32.partialorder %v3436_v12, 0.0 }
0x1355   :  { %v3439_v9 = vmul.f32 %v5875_v34, %v3434_v39  ;;  %v3227_v62 = vsub.f32 1.0, %v3226_v23  ;;  %v3236_v23 = vand.u32 2147483648, %v7384_v13  ;;  %vm3483_vm9 = vcmp.eq.f32.partialorder %v7391_v46, 0.0 }
0x1356   :  { %v3452_v44 = vmul.f32 %v5873_v61, %v3451_v20 }
0x1357   :  { %v3440_v27 = vmul.f32 %v5875_v34, %v3439_v9  ;;  %v3228_v53 = vmul.f32 %v5871_v1, %v3227_v62 }
0x1358   :  { %v3453_v25 = vmul.f32 0.5, %v3452_v44  ;;  %v3234_v44 = vand.u32 2147483647, %v7384_v13 }
0x1359   :  { %v5877_v56 = vpop.eup %5876  ;;  %v3441_v50 = vmul.f32 0.5, %v3440_v27 }
0x135a   :  { %v5879_v42 = vpop.eup %5878  ;;  %v3454_v24 = vsub.f32 1.5, %v3453_v25  ;;  %v3475_v7 = vmul.f32 %v5877_v56, %v7391_v46  ;;  %v3472_v25 = vand.u32 2147483648, %v3436_v12  ;;  %vm3235_vm7 = vcmp.eq.f32.partialorder %v3234_v44, 8.507059e+37 }
0x135b   :  { %v3442_v60 = vsub.f32 1.5, %v3441_v50  ;;  %v3463_v3 = vmul.f32 %v5879_v42, %v3436_v12  ;;  %v3237_v50 = vor.u32 1.1754944e-38, %v3236_v23 }
0x135c   :  { %v3455_v14 = vmul.f32 %v5873_v61, %v3454_v24  ;;  %v3476_v32 = vmul.f32 %v5877_v56, %v3475_v7  ;;  %v3229_v61 = vadd.f32 %v5871_v1, %v3228_v53 }
0x135d   :  { %v3443_v54 = vmul.f32 %v5875_v34, %v3442_v60  ;;  %v3464_v31 = vmul.f32 %v5879_v42, %v3463_v3  ;;  %v3484_v60 = vand.u32 2147483648, %v7391_v46 }
0x135e   :  { %v3456_v48 = vmul.f32 %v3455_v14, %v3435_v55  ;;  %v3477_v4 = vmul.f32 0.5, %v3476_v32  ;;  %v3233_v27 = vsel %vm3232_vm5, %v5871_v1, %v3229_v61 }
0x135f   :  { %v3444_v28 = vmul.f32 %v3443_v54, %v3434_v39  ;;  %v3465_v16 = vmul.f32 0.5, %v3464_v31  ;;  %v3238_v7 = vsel %vm3235_vm7, %v3237_v50, %v3233_v27 }
0x1360   :  { %v3458_v22 = vsel %vm3457_vm6, %v3435_v55, %v3456_v48  ;;  %v3478_v20 = vsub.f32 1.5, %v3477_v4  ;;  %v3242_v13 = vmul.f32 %v3240_v52, %v3238_v7  ;;  %v3257_v52 = vmul.f32 %v7362_v11, %v7362_v11 }
0x1361   :  { %v3461_v45 = vsel %vm3459_vm10, %v3460_v63, %v3458_v22  ;;  %v3446_v47 = vsel %vm3445_vm11, %v3434_v39, %v3444_v28  ;;  %v3466_v29 = vsub.f32 1.5, %v3465_v16 }
0x1362   :  { %3493 = vperm.xlu2 %5543, %v3461_v45   ;;  %v3449_v34 = vsel %vm3447_vm14, %v3448_v8, %v3446_v47  ;;  %v3479_v39 = vmul.f32 %v5877_v56, %v3478_v20  ;;  %v3244_v56 = vadd.f32 1.1, %v3242_v13  ;;  %v5368_v32 = vadd.f32 -1.0, %v3257_v52 }
0x1363   :  { %3488 = vperm.xlu0 %5542, %v3449_v34   ;;  %v3467_v9 = vmul.f32 %v5879_v42, %v3466_v29  ;;  %v3518_v29 = vpop.permute.xlu1 %3517 }
0x1364   :  { %v3480_v42 = vmul.f32 %v3479_v39, %v7391_v46 }
0x1365   :  { %v3468_v55 = vmul.f32 %v3467_v9, %v3436_v12 }
0x1366   :  { %v3482_v1 = vsel %vm3481_vm8, %v7391_v46, %v3480_v42  ;;  %v3246_v46 = vmul.f32 %v7368_v51, %v7368_v51 }
0x1367   :  { %v3470_v62 = vsel %vm3469_vm4, %v3436_v12, %v3468_v55  ;;  %v3485_v12 = vsel %vm3483_vm9, %v3484_v60, %v3482_v1  ;;  %vm8019_vm9 = vcmask 130048  }
0x1368   :  { %v3473_v24 = vsel %vm3471_vm13, %v3472_v25, %v3470_v62  ;;  %v3250_v48 = vsel %vm114_vm0, %v3246_v46, 0.0  ;;  %v3258_v62 = vmul.f32 %v3244_v56, %v3244_v56 }
0x1369   :  { %3498 = vperm.xlu1 %5544, %v3473_v24  }
0x136a   :  { %3512 = vperm.xlu2 %5543, %v7372_v17   ;;  %v5369_v24 = vadd.f32 -1.0, %v3258_v62 }
0x1371   :  { %3308 = vperm.xlu1 %5544, %v3244_v56  }
0x1372   :  { %3503 = vperm.xlu2 %5543, %v3485_v12  }
0x1376   :  { %v3249_v3 = vpop.xlane.xlu0 %3248 }
0x1377   :  { %v3253_v14 = vsub.f32 %v3249_v3, %v7353_v5 }
0x1379   :  { %v3255_v17 = vmax.f32 %v3253_v14, 1e-08  ;;  %5555 = vset.pattern.permute.xlu1 %v6057_v10 }
0x137a   :  { %3522 = vperm.xlu2 %5543, %v7382_v49  }
0x137b   :  { %5880 = vrcp.f32 %v3255_v17 }
0x1381   :  { %v5881_v54 = vpop.eup %5880 }
0x1382   :  { %v3263_v31 = vmul.f32 %v5881_v54, %v5368_v32  ;;  %5556 = vset.pattern.permute.xlu2 %v6057_v10 }
0x1384   :  { %5882 = vrsqrt.f32 %v3263_v31  ;;  %vm3272_vm12 = vcmp.eq.f32.partialorder %v3263_v31, inf  ;;  %v3275_v22 = vand.u32 2147483648, %v3263_v31  ;;  %vm3274_vm6 = vcmp.eq.f32.partialorder %v3263_v31, 0.0 }
0x138a   :  { %v5883_v53 = vpop.eup %5882 }
0x138b   :  { %v3266_v5 = vmul.f32 %v5883_v53, %v3263_v31 }
0x138d   :  { %3251 = vadd.xlane.f32.xlu0 %v3250_v48  ;;  %v3267_v4 = vmul.f32 %v5883_v53, %v3266_v5 }
0x138f   :  { %v3268_v49 = vmul.f32 0.5, %v3267_v4 }
0x1391   :  { %v3269_v63 = vsub.f32 1.5, %v3268_v49 }
0x1392   :  { %v3304_v13 = vpop.permute.xlu1 %3303 }
0x1393   :  { %v3270_v28 = vmul.f32 %v5883_v53, %v3269_v63 }
0x1395   :  { %v3271_v16 = vmul.f32 %v3270_v28, %v3263_v31 }
0x1397   :  { %v3273_v11 = vsel %vm3272_vm12, %v3263_v31, %v3271_v16  ;;  %vm8020_vm12 = vmmov %vm8019_vm9 }
0x1398   :  { %v3276_v8 = vsel %vm3274_vm6, %v3275_v22, %v3273_v11  ;;  %vm8021_vm6 = vmmov %vm8019_vm9 }
0x13a1   :  { %3291 = vperm.xlu0 %5542, %v3276_v8  }
0x13a9   :  { %3527 = vperm.xlu0 %5542, %v7379_v6  }
0x13bc   :  { %v3494_v45 = vpop.permute.xlu2 %3493 }
0x13bd   :  { %v3507_v47 = vmul.f32 %v3494_v45, %v7267_v21 }
0x13bf   :  { %v7420_v61 = vsel %vm231_vm2, %v3518_v29, %v3507_v47 }
0x13c0   :  { %3927 = vrot.lane.b32.xlu0 %v7420_v61, %s6060_s26  ;;  %v7425_v34 = vsub.f32 0.0, %v7420_v61 }
0x13c2   :  { %3911 = vrot.lane.b32.xlu2 %v7425_v34, %s6060_s26  ;;  %v3712_v6 = vsel %vm231_vm2, %v7425_v34, %v7420_v61 }
0x13c3   :  { %5382 = vmatpush.xpose.msk.msrb.mxu1 %vm432_vm3, %v3712_v6 }
0x13c4   :  { %v3513_v9 = vpop.permute.xlu2 %3512 }
0x13cc   :  { %v3504_v1 = vpop.permute.xlu2 %3503 }
0x13cd   :  { %v3509_v31 = vmul.f32 %v3504_v1, %v7271_v36 }
0x13d5   :  { %v3489_v20 = vpop.permute.xlu0 %3488 }
0x13d6   :  { %v3506_v23 = vmul.f32 %v3489_v20, %v7265_v41 }
0x13d8   :  { %v7437_v44 = vsel %vm231_vm2, %v3513_v9, %v3506_v23 }
0x13d9   :  { %3925 = vrot.lane.b32.xlu2 %v7437_v44, %s6060_s26  ;;  %v7442_v55 = vsub.f32 0.0, %v7437_v44 }
0x13db   :  { %3909 = vrot.lane.b32.xlu1 %v7442_v55, %s6060_s26  ;;  %v3711_v27 = vsel %vm231_vm2, %v7442_v55, %v7437_v44  ;;  %v3499_v14 = vpop.permute.xlu1 %3498 }
0x13dc   :  { %5383 = vmatpush.xpose.msk.msrb.mxu1 %vm432_vm3, %v3711_v27  ;;  %v3508_v32 = vmul.f32 %v3499_v14, %v7269_v57 }
0x13e1   :  { %3547 = vrot.lane.b32.xlu2 %v7283_v26, %s6058_s24 }
0x13e3   :  { %3549 = vrot.lane.b32.xlu1 %v7278_v30, %s6058_s24  ;;  %v3309_v20 = vpop.permute.xlu1 %3308 }
0x13eb   :  { %3551 = vrot.lane.b32.xlu1 %v7295_v35, %s6058_s24 }
0x1400   :  { %v3252_v25 = vpop.xlane.xlu0 %3251 }
0x1401   :  { %v3254_v39 = vsub.f32 %v3252_v25, %v3246_v46  ;;  %v3523_v46 = vpop.permute.xlu2 %3522 }
0x1403   :  { %v3256_v50 = vmax.f32 %v3254_v39, 1e-08 }
0x1405   :  { %5884 = vrcp.f32 %v3256_v50 }
0x140b   :  { %v5885_v7 = vpop.eup %5884 }
0x140c   :  { %v3264_v42 = vmul.f32 %v5885_v7, %v5369_v24 }
0x140e   :  { %5886 = vrsqrt.f32 %v3264_v42  ;;  %vm3284_vm10 = vcmp.eq.f32.partialorder %v3264_v42, inf  ;;  %v3287_v11 = vand.u32 2147483648, %v3264_v42  ;;  %vm3286_vm11 = vcmp.eq.f32.partialorder %v3264_v42, 0.0 }
0x1413   :  { %v3292_v60 = vpop.permute.xlu0 %3291 }
0x1414   :  { %v5887_v12 = vpop.eup %5886  ;;  %v3299_v3 = vmul.f32 %v3292_v60, %v7348_v18  ;;  %v7468_v18 = vsel %vm231_vm2, %v3523_v46, %v3508_v32 }
0x1415   :  { %v3278_v17 = vmul.f32 %v5887_v12, %v3264_v42  ;;  %v7478_v63 = vsub.f32 0.0, %v7468_v18 }
0x1416   :  { %v7460_v52 = vsel %vm231_vm2, %v3304_v13, %v3299_v3 }
0x1417   :  { %5384 = vmatmul.msk.f32.vlgmr.msrb.gmra.mxu1 %vm432_vm3, %v7460_v52  ;;  %v3279_v56 = vmul.f32 %v5887_v12, %v3278_v17  ;;  %v3713_v45 = vsel %vm231_vm2, %v7478_v63, %v7468_v18 }
0x1419   :  { %v3280_v54 = vmul.f32 0.5, %v3279_v56 }
0x141b   :  { %v3528_v53 = vpop.permute.xlu0 %3527  ;;  %v3281_v5 = vsub.f32 1.5, %v3280_v54 }
0x141c   :  { %v7472_v48 = vsel %vm231_vm2, %v3528_v53, %v3509_v31  ;;  %v3912_v47 = vpop.permute.xlu2 %3911 }
0x141d   :  { %v7475_v4 = vsub.f32 0.0, %v7472_v48  ;;  %v3282_v49 = vmul.f32 %v5887_v12, %v3281_v5 }
0x141f   :  { %v3714_v28 = vsel %vm231_vm2, %v7475_v4, %v7472_v48  ;;  %v3283_v16 = vmul.f32 %v3282_v49, %v3264_v42 }
0x1420   :  { %5385 = vmatpush.xpose.msk.msra.mxu1 %vm432_vm3, %v3714_v28 }
0x1421   :  { %v3285_v22 = vsel %vm3284_vm10, %v3264_v42, %v3283_v16  ;;  %v3581_v16 = vmul.f32 %v7339_v38, %v7339_v38  ;;  %vm8022_vm10 = vmmov %vm8021_vm6 }
0x1422   :  { %v3288_v8 = vsel %vm3286_vm11, %v3287_v11, %v3285_v22  ;;  %vm8023_vm11 = vmmov %vm8021_vm6 }
0x1423   :  { %3296 = vperm.xlu0 %5542, %v3288_v8   ;;  %v5380_v8 = vadd.f32 -1.0, %v3581_v16 }
0x1424   :  { %5386 = vmatpush.xpose.msk.msra.mxu1 %vm432_vm3, %v3713_v45 }
0x142b   :  { %3941 = vrot.lane.b32.xlu0 %v7460_v52, %s6060_s26 }
0x142c   :  { %5557 = vset.pattern.permute.xlu0 %v6057_v10 }
0x1432   :  { %v3928_v29 = vpop.permute.xlu0 %3927 }
0x1433   :  { %v3938_v6 = vsel %vm231_vm2, %v3912_v47, %v3928_v29  ;;  %3553 = vrot.lane.b32.xlu0 %v7291_v40, %s6058_s24  ;;  %v3926_v23 = vpop.permute.xlu2 %3925 }
0x1434   :  { %5390 = vmatpush.xpose.msk.msrb.mxu1 %vm432_vm3, %v3938_v6 }
0x143b   :  { %v3548_v39 = vpop.permute.xlu2 %3547 }
0x143c   :  { %v3559_v50 = vsel %vm114_vm0, %v3548_v39, 0.0 }
0x144d   :  { %v3910_v9 = vpop.permute.xlu1 %3909 }
0x144e   :  { %v3937_v27 = vsel %vm231_vm2, %v3910_v9, %v3926_v23 }
0x144f   :  { %5391 = vmatpush.xpose.msk.msrb.mxu1 %vm432_vm3, %v3937_v27 }
0x1455   :  { %v3550_v25 = vpop.permute.xlu1 %3549 }
0x1456   :  { %v3562_v10 = vsel %vm114_vm0, %v3550_v25, 0.0 }
0x1457   :  { %3563 = vadd.xlane.f32.xlu2 %v3562_v10 }
0x145d   :  { %3560 = vadd.xlane.f32.xlu0 %v3559_v50  ;;  %v3552_v62 = vpop.permute.xlu1 %3551 }
0x145e   :  { %v3565_v24 = vsel %vm114_vm0, %v3552_v62, 0.0 }
0x145f   :  { %3566 = vadd.xlane.f32.xlu2 %v3565_v24 }
0x1495   :  { %v3297_v7 = vpop.permute.xlu0 %3296 }
0x1496   :  { %v3300_v42 = vmul.f32 %v3297_v7, %v7368_v51  ;;  %v3580_v51 = vmul.f32 %v7337_v43, %v7337_v43 }
0x1498   :  { %v7507_v13 = vsel %vm231_vm2, %v3309_v20, %v3300_v42  ;;  %v5379_v53 = vadd.f32 -1.0, %v3580_v51 }
0x1499   :  { %5387 = vmatmul.msk.f32.vlgmr.msra.gmra.mxu1 %vm432_vm3, %v7507_v13 }
0x149d   :  { %v3942_v1 = vpop.permute.xlu0 %3941 }
0x14a1   :  { %5392 = vmatmul.msk.f32.vlgmr.msrb.gmra.mxu1 %vm432_vm3, %v3942_v1 }
0x14a5   :  { %v3554_v60 = vpop.permute.xlu0 %3553 }
0x14a6   :  { %v3568_v12 = vsel %vm114_vm0, %v3554_v60, 0.0 }
0x14a7   :  { %3569 = vadd.xlane.f32.xlu1 %v3568_v12 }
0x14ca   :  { %v3564_v3 = vpop.xlane.xlu2 %3563 }
0x14cb   :  { %v3572_v14 = vsub.f32 %v3564_v3, %v7278_v30  ;;  %v3579_v30 = vmul.f32 %v7334_v15, %v7334_v15  ;;  %v3582_v15 = vmul.f32 %v7343_v37, %v7343_v37 }
0x14cd   :  { %v3576_v17 = vmax.f32 %v3572_v14, 1e-08  ;;  %v5378_v11 = vadd.f32 -1.0, %v3579_v30  ;;  %v5381_v43 = vadd.f32 -1.0, %v3582_v15 }
0x14cf   :  { %5888 = vrcp.f32 %v3576_v17 }
0x14d0   :  { %v3561_v56 = vpop.xlane.xlu0 %3560 }
0x14d1   :  { %v3571_v32 = vsub.f32 %v3561_v56, %v7283_v26 }
0x14d2   :  { %v3567_v54 = vpop.xlane.xlu2 %3566 }
0x14d3   :  { %v3575_v31 = vmax.f32 %v3571_v32, 1e-08  ;;  %v3573_v46 = vsub.f32 %v3567_v54, %v7295_v35 }
0x14d5   :  { %v5889_v5 = vpop.eup %5888  ;;  %5890 = vrcp.f32 %v3575_v31  ;;  %v3577_v49 = vmax.f32 %v3573_v46, 1e-08 }
0x14d6   :  { %v3592_v28 = vmul.f32 %v5889_v5, %v5379_v53 }
0x14d7   :  { %5892 = vrcp.f32 %v3577_v49 }
0x14d8   :  { %5894 = vrsqrt.f32 %v3592_v28  ;;  %vm3614_vm14 = vcmp.eq.f32.partialorder %v3592_v28, inf  ;;  %v3617_v42 = vand.u32 2147483648, %v3592_v28  ;;  %vm3616_vm15 = vcmp.eq.f32.partialorder %v3592_v28, 0.0 }
0x14db   :  { %v5891_v22 = vpop.eup %5890 }
0x14dc   :  { %v3591_v26 = vmul.f32 %v5891_v22, %v5378_v11 }
0x14dd   :  { %v5893_v45 = vpop.eup %5892 }
0x14de   :  { %v5895_v47 = vpop.eup %5894  ;;  %v3593_v35 = vmul.f32 %v5893_v45, %v5380_v8  ;;  %5896 = vrsqrt.f32 %v3591_v26  ;;  %vm3602_vm1 = vcmp.eq.f32.partialorder %v3591_v26, inf  ;;  %v3605_v32 = vand.u32 2147483648, %v3591_v26 }
0x14df   :  { %v3608_v29 = vmul.f32 %v5895_v47, %v3592_v28  ;;  %vm3604_vm5 = vcmp.eq.f32.partialorder %v3591_v26, 0.0 }
0x14e0   :  { %5898 = vrsqrt.f32 %v3593_v35  ;;  %vm3626_vm4 = vcmp.eq.f32.partialorder %v3593_v35, inf  ;;  %v3629_v53 = vand.u32 2147483648, %v3593_v35  ;;  %vm3628_vm13 = vcmp.eq.f32.partialorder %v3593_v35, 0.0 }
0x14e1   :  { %v3609_v6 = vmul.f32 %v5895_v47, %v3608_v29 }
0x14e3   :  { %v3610_v20 = vmul.f32 0.5, %v3609_v6 }
0x14e4   :  { %v5897_v23 = vpop.eup %5896 }
0x14e5   :  { %v3611_v9 = vsub.f32 1.5, %v3610_v20  ;;  %v3596_v27 = vmul.f32 %v5897_v23, %v3591_v26 }
0x14e6   :  { %v5899_v25 = vpop.eup %5898 }
0x14e7   :  { %v3612_v10 = vmul.f32 %v5895_v47, %v3611_v9  ;;  %v3597_v39 = vmul.f32 %v5897_v23, %v3596_v27  ;;  %v3620_v50 = vmul.f32 %v5899_v25, %v3593_v35 }
0x14e9   :  { %v3613_v62 = vmul.f32 %v3612_v10, %v3592_v28  ;;  %v3598_v24 = vmul.f32 0.5, %v3597_v39  ;;  %v3621_v7 = vmul.f32 %v5899_v25, %v3620_v50  ;;  %v7577_v10 = vstv %s5359_s29 }
0x14eb   :  { %v3615_v1 = vsel %vm3614_vm14, %v3592_v28, %v3613_v62  ;;  %v3599_v60 = vsub.f32 1.5, %v3598_v24  ;;  %v3622_v12 = vmul.f32 0.5, %v3621_v7  ;;  %v7585_v7 = vld [vmem:[%s7967_s7] sm:$0xff]  ;;  %vm8024_vm14 = vmmov %vm8021_vm6 }
0x14ec   :  { %v3618_v3 = vsel %vm3616_vm15, %v3617_v42, %v3615_v1  ;;  %vm8025_vm15 = vmmov %vm8021_vm6 }
0x14ed   :  { %3650 = vperm.xlu1 %5555, %v3618_v3   ;;  %v3600_v14 = vmul.f32 %v5897_v23, %v3599_v60  ;;  %v3623_v17 = vsub.f32 1.5, %v3622_v12 }
0x14ef   :  { %v3601_v51 = vmul.f32 %v3600_v14, %v3591_v26  ;;  %v3624_v56 = vmul.f32 %v5899_v25, %v3623_v17 }
0x14f1   :  { %v3603_v54 = vsel %vm3602_vm1, %v3591_v26, %v3601_v51  ;;  %v3625_v31 = vmul.f32 %v3624_v56, %v3593_v35  ;;  %vm8026_vm1 = vmmov %vm8021_vm6 }
0x14f2   :  { %v3606_v46 = vsel %vm3604_vm5, %v3605_v32, %v3603_v54  ;;  %vm8027_vm5 = vmmov %vm8026_vm1 }
0x14f3   :  { %3645 = vperm.xlu2 %5556, %v3606_v46   ;;  %v3627_v5 = vsel %vm3626_vm4, %v3593_v35, %v3625_v31  ;;  %vm8028_vm4 = vmmov %vm8026_vm1 }
0x14f4   :  { %v3630_v49 = vsel %vm3628_vm13, %v3629_v53, %v3627_v5  ;;  %vm8029_vm13 = vmmov %vm8026_vm1 }
0x14f5   :  { %3655 = vperm.xlu1 %5555, %v3630_v49   ;;  %v7604_v49 = vld [vmem:[%s7967_s7 + $0x8] sm:$0xff] }
0x14fb   :  { %5559 = vperm.xlu2 %5556, %v5558_v2  }
0x14fd   :  { %5609 = vset.pattern.permute.xlu1 %v6059_v58 }
0x1503   :  { %5569 = vperm.xlu2 %5556, %v5568_v59  }
0x150b   :  { %4405 = vrot.lane.b32.xlu2 %v7437_v44, %s6062_s27 }
0x150c   :  { %5608 = vset.pattern.permute.xlu2 %v6059_v58 }
0x151a   :  { %v3570_v28 = vpop.xlane.xlu1 %3569 }
0x151b   :  { %v3574_v30 = vsub.f32 %v3570_v28, %v7291_v40 }
0x151d   :  { %v3578_v16 = vmax.f32 %v3574_v30, 1e-08 }
0x151f   :  { %5900 = vrcp.f32 %v3578_v16 }
0x1525   :  { %v5901_v2 = vpop.eup %5900 }
0x1526   :  { %v3594_v11 = vmul.f32 %v5901_v2, %v5381_v43 }
0x1528   :  { %5902 = vrsqrt.f32 %v3594_v11  ;;  %vm3638_vm7 = vcmp.eq.f32.partialorder %v3594_v11, inf  ;;  %v3641_v35 = vand.u32 2147483648, %v3594_v11  ;;  %vm3640_vm8 = vcmp.eq.f32.partialorder %v3594_v11, 0.0 }
0x152e   :  { %v5903_v22 = vpop.eup %5902 }
0x152f   :  { %v3632_v38 = vmul.f32 %v5903_v22, %v3594_v11 }
0x1531   :  { %v3633_v59 = vmul.f32 %v5903_v22, %v3632_v38 }
0x1533   :  { %v3634_v26 = vmul.f32 0.5, %v3633_v59 }
0x1535   :  { %v3635_v8 = vsub.f32 1.5, %v3634_v26 }
0x1537   :  { %v3636_v45 = vmul.f32 %v5903_v22, %v3635_v8 }
0x1539   :  { %v3637_v47 = vmul.f32 %v3636_v45, %v3594_v11 }
0x153b   :  { %v3639_v29 = vsel %vm3638_vm7, %v3594_v11, %v3637_v47  ;;  %vm8030_vm7 = vmmov %vm8026_vm1 }
0x153c   :  { %v3642_v40 = vsel %vm3640_vm8, %v3641_v35, %v3639_v29  ;;  %vm8031_vm8 = vmmov %vm8026_vm1 }
0x153d   :  { %3660 = vperm.xlu0 %5557, %v3642_v40  }
0x1545   :  { %3929 = vrot.lane.b32.xlu0 %v7468_v18, %s6060_s26 }
0x1546   :  { %5610 = vset.pattern.permute.xlu0 %v6059_v58 }
0x154d   :  { %4157 = vrot.lane.b32.xlu0 %v7425_v34, %s6061_s2  ;;  %v3646_v37 = vpop.permute.xlu2 %3645 }
0x154e   :  { %v3663_v20 = vmul.f32 %v3646_v37, %v7265_v41 }
0x1555   :  { %4155 = vrot.lane.b32.xlu0 %v7442_v55, %s6061_s2  ;;  %v5560_v62 = vpop.permute.xlu2 %5559 }
0x1556   :  { %v5562_v60 = vunpack.i.h.bf16 %v5560_v62  ;;  %v5561_v12 = vunpack.i.l.bf16 %v5560_v62 }
0x155d   :  { %v5570_v45 = vpop.permute.xlu2 %5569 }
0x155e   :  { %v5572_v35 = vunpack.i.h.bf16 %v5570_v45  ;;  %v5571_v29 = vunpack.i.l.bf16 %v5570_v45 }
0x155f   :  { %v3651_v6 = vpop.permute.xlu1 %3650 }
0x1560   :  { %v3664_v23 = vmul.f32 %v3651_v6, %v7267_v21 }
0x1562   :  { %v5563_v9 = vpack.i.bf16 %v3663_v20, %v3664_v23 }
0x1564   :  { %5564 = vrot.lane.b32.xlu1 %v5563_v9, %s6058_s24 }
0x1565   :  { %v4406_v9 = vpop.permute.xlu2 %4405 }
0x1567   :  { %v3656_v58 = vpop.permute.xlu1 %3655 }
0x1568   :  { %v3665_v21 = vmul.f32 %v3656_v58, %v7269_v57 }
0x156c   :  { %3915 = vrot.lane.b32.xlu1 %v7475_v4, %s6060_s26 }
0x1574   :  { %3931 = vrot.lane.b32.xlu1 %v7472_v48, %s6060_s26 }
0x157c   :  { %3913 = vrot.lane.b32.xlu1 %v7478_v63, %s6060_s26 }
0x1584   :  { %4169 = vrot.lane.b32.xlu1 %v7420_v61, %s6061_s2 }
0x158c   :  { %4167 = vrot.lane.b32.xlu1 %v7437_v44, %s6061_s2  ;;  %v3741_v44 = vpop.f32.mrf.mxu1 }
0x1594   :  { %4183 = vrot.lane.b32.xlu1 %v7460_v52, %s6061_s2  ;;  %v3770_v57 = vpop.f32.mrf.mxu1 }
0x1595   :  { %v3774_v39 = vmul.f32 2.0, %v3770_v57 }
0x1597   :  { %v3776_v24 = vadd.f32 2.0, %v3774_v39 }
0x159c   :  { %3971 = vrot.lane.b32.xlu1 %v7507_v13, %s6060_s26  ;;  %v3968_v42 = vpop.f32.mrf.mxu1 }
0x159d   :  { %v4001_v56 = vmul.f32 2.0, %v3968_v42 }
0x159f   :  { %v4003_v46 = vadd.f32 2.0, %v4001_v56 }
0x15a4   :  { %4407 = vrot.lane.b32.xlu1 %v7420_v61, %s6062_s27  ;;  %v3773_v61 = vmul.f32 2.0, %v3741_v44 }
0x15ac   :  { %4393 = vrot.lane.b32.xlu1 %v7442_v55, %s6062_s27  ;;  %v3775_v55 = vadd.f32 2.0, %v3773_v61 }
0x15af   :  { %v3661_v41 = vpop.permute.xlu0 %3660 }
0x15b0   :  { %v3666_v27 = vmul.f32 %v3661_v41, %v7271_v36  ;;  %v7574_v36 = vstv %s5358_s28 }
0x15b1   :  { %v3779_v51 = vmul.f32 %v7574_v36, %v3776_v24  ;;  %v4005_v28 = vmul.f32 %v4003_v46, %v7574_v36 }
0x15b2   :  { %v5573_v25 = vpack.i.bf16 %v3665_v21, %v3666_v27 }
0x15b3   :  { %v3782_v31 = vadd.f32 %v7577_v10, %v3779_v51  ;;  %v4007_v30 = vadd.f32 %v4005_v28, %v7577_v10 }
0x15b4   :  { %4421 = vrot.lane.b32.xlu1 %v7460_v52, %s6062_s27  ;;  %5574 = vrot.lane.b32.xlu0 %v5573_v25, %s6058_s24  ;;  %v3778_v52 = vmul.f32 %v7574_v36, %v3775_v55 }
0x15b5   :  { %v4009_v2 = vadd.f32 %v4007_v30, %v7585_v7 }
0x15b6   :  { %v3781_v50 = vadd.f32 %v7577_v10, %v3778_v52 }
0x15b7   :  { %v4011_v11 = vsel %vm8021_vm6, %v4009_v2, -inf  ;;  %v3930_v22 = vpop.permute.xlu0 %3929  ;;  %vm8034_vm6 = vmmov %vm8026_vm1 }
0x15b8   :  { %v3783_v17 = vadd.f32 %v3781_v50, %v7585_v7 }
0x15ba   :  { %v3785_v53 = vsel %vm8019_vm9, %v3783_v17, -inf  ;;  %vm8032_vm9 = vmmov %vm8026_vm1 }
0x15bc   :  { %4161 = vrot.lane.b32.xlu1 %v7475_v4, %s6061_s2 }
0x15bf   :  { %v4158_v26 = vpop.permute.xlu0 %4157 }
0x15c4   :  { %4159 = vrot.lane.b32.xlu1 %v7478_v63, %s6061_s2 }
0x15c7   :  { %v4156_v8 = vpop.permute.xlu0 %4155 }
0x15cc   :  { %4213 = vrot.lane.b32.xlu1 %v7507_v13, %s6061_s2 }
0x15d4   :  { %4397 = vrot.lane.b32.xlu1 %v7478_v63, %s6062_s27 }
0x15d6   :  { %v5565_v1 = vpop.permute.xlu1 %5564 }
0x15d7   :  { %v5567_v3 = vunpack.i.h.bf16 %v5565_v1  ;;  %v5566_v14 = vunpack.i.l.bf16 %v5565_v1 }
0x15d9   :  { %v3703_v63 = vsel %vm231_vm2, %v5562_v60, %v5567_v3  ;;  %v3704_v32 = vsel %vm231_vm2, %v5561_v12, %v5566_v14 }
0x15da   :  { %3824 = vmatpush.msra.mxu2 %v3704_v32  ;;  %v7593_v54 = vpack.i.bf16 %v3703_v63, %v3704_v32 }
0x15dc   :  { %4451 = vrot.lane.b32.xlu1 %v7507_v13, %s6062_s27  ;;  %5579 = vrot.lane.b32.xlu2 %v7593_v54, %s6060_s26  ;;  %v3784_v13 = vadd.f32 %v3782_v31, %v7604_v49 }
0x15dd   :  { %3825 = vmatpush.msra.mxu2 %v3703_v63 }
0x15de   :  { %3786 = vmax.xlane.f32.xlu0 %v3785_v53  ;;  %v3916_v5 = vpop.permute.xlu1 %3915  ;;  %v3788_v16 = vsel %vm8020_vm12, %v3784_v13, -inf  ;;  %vm8033_vm12 = vmmov %vm8026_vm1 }
0x15e4   :  { %4173 = vrot.lane.b32.xlu2 %v7472_v48, %s6061_s2 }
0x15e6   :  { %3789 = vmax.xlane.f32.xlu0 %v3788_v16  ;;  %v3932_v15 = vpop.permute.xlu1 %3931 }
0x15e7   :  { %v3940_v43 = vsel %vm231_vm2, %v3916_v5, %v3932_v15 }
0x15e8   :  { %5393 = vmatpush.xpose.msk.msrb.mxu2 %vm432_vm3, %v3940_v43 }
0x15ec   :  { %4171 = vrot.lane.b32.xlu2 %v7468_v18, %s6061_s2 }
0x15ee   :  { %4012 = vmax.xlane.f32.xlu0 %v4011_v11  ;;  %v3914_v38 = vpop.permute.xlu1 %3913 }
0x15ef   :  { %v3939_v59 = vsel %vm231_vm2, %v3914_v38, %v3930_v22 }
0x15f0   :  { %5394 = vmatpush.xpose.msk.msrb.mxu2 %vm432_vm3, %v3939_v59 }
0x15f6   :  { %v4170_v12 = vpop.permute.xlu1 %4169 }
0x15f7   :  { %v4180_v31 = vsel %vm231_vm2, %v4158_v26, %v4170_v12 }
0x15fe   :  { %v4168_v3 = vpop.permute.xlu1 %4167 }
0x1602   :  { %4395 = vrot.lane.b32.xlu0 %v7425_v34, %s6062_s27 }
0x1626   :  { %v5575_v47 = vpop.permute.xlu0 %5574 }
0x1627   :  { %v5577_v40 = vunpack.i.h.bf16 %v5575_v47  ;;  %v5576_v37 = vunpack.i.l.bf16 %v5575_v47 }
0x1629   :  { %v3706_v6 = vsel %vm231_vm2, %v5571_v29, %v5576_v37  ;;  %v3705_v20 = vsel %vm231_vm2, %v5572_v35, %v5577_v40 }
0x162a   :  { %3847 = vmatpush.msrb.mxu0 %v3706_v6  ;;  %v7628_v23 = vpack.i.bf16 %v3705_v20, %v3706_v6 }
0x162c   :  { %3848 = vmatpush.msrb.mxu0 %v3705_v20 }
0x1636   :  { %v5580_v34 = vpop.permute.xlu2 %5579 }
0x1637   :  { %v5581_v58 = vunpack.i.l.bf16 %v5580_v34  ;;  %v5582_v41 = vunpack.i.h.bf16 %v5580_v34 }
0x1639   :  { %4058 = vmatpush.msra.mxu0 %v5581_v58 }
0x163b   :  { %4059 = vmatpush.msra.mxu0 %v5582_v41 }
0x163e   :  { %v4174_v14 = vpop.permute.xlu2 %4173 }
0x1646   :  { %v4172_v51 = vpop.permute.xlu2 %4171 }
0x1651   :  { %v3787_v21 = vpop.xlane.xlu0 %3786 }
0x1652   :  { %v3791_v27 = vsub.f32 %v3783_v17, %v3787_v21  ;;  %v4184_v17 = vpop.permute.xlu1 %4183 }
0x1654   :  { %v3793_v25 = vmul.f32 1.442695, %v3791_v27 }
0x1656   :  { %5904 = vpow2.f32 %v3793_v25 }
0x1659   :  { %v3790_v44 = vpop.xlane.xlu0 %3789 }
0x165a   :  { %v3792_v24 = vsub.f32 %v3784_v13, %v3790_v44  ;;  %v3972_v56 = vpop.permute.xlu1 %3971 }
0x165c   :  { %v5905_v61 = vpop.eup %5904  ;;  %v3795_v42 = vmul.f32 1.442695, %v3792_v24 }
0x165d   :  { %v3797_v55 = vsel %vm8022_vm10, %v5905_v61, 0.0  ;;  %vm8035_vm10 = vmmov %vm8026_vm1 }
0x165e   :  { %3798 = vadd.xlane.f32.xlu2 %v3797_v55 }
0x1661   :  { %v4013_v57 = vpop.xlane.xlu0 %4012 }
0x1662   :  { %v4017_v52 = vsub.f32 %v4009_v2, %v4013_v57  ;;  %v4408_v32 = vpop.permute.xlu1 %4407 }
0x1664   :  { %v4019_v39 = vmul.f32 1.442695, %v4017_v52 }
0x1666   :  { %5906 = vpow2.f32 %v4019_v39 }
0x1667   :  { %5908 = vpow2.f32 %v3795_v42 }
0x166a   :  { %v4394_v5 = vpop.permute.xlu1 %4393 }
0x166b   :  { %v4417_v28 = vsel %vm231_vm2, %v4394_v5, %v4406_v9 }
0x166c   :  { %v5907_v50 = vpop.eup %5906 }
0x166d   :  { %v4023_v62 = vsel %vm8023_vm11, %v5907_v50, 0.0  ;;  %v5909_v1 = vpop.eup %5908  ;;  %vm8036_vm11 = vmmov %vm8026_vm1 }
0x166e   :  { %4024 = vadd.xlane.f32.xlu0 %v4023_v62  ;;  %v3800_v60 = vsel %vm8024_vm14, %v5909_v1, 0.0  ;;  %vm8037_vm14 = vmmov %vm8026_vm1 }
0x1672   :  { %v4422_v13 = vpop.permute.xlu1 %4421 }
0x1674   :  { %v4396_v46 = vpop.permute.xlu0 %4395 }
0x1675   :  { %v4418_v53 = vsel %vm231_vm2, %v4396_v46, %v4408_v32 }
0x1676   :  { %4399 = vrot.lane.b32.xlu2 %v7475_v4, %s6062_s27 }
0x167a   :  { %v4162_v30 = vpop.permute.xlu1 %4161 }
0x167b   :  { %v4182_v38 = vsel %vm231_vm2, %v4162_v30, %v4174_v14 }
0x1682   :  { %4411 = vrot.lane.b32.xlu0 %v7472_v48, %s6062_s27  ;;  %v4160_v43 = vpop.permute.xlu1 %4159 }
0x168a   :  { %v4214_v59 = vpop.permute.xlu1 %4213 }
0x1692   :  { %v4398_v40 = vpop.permute.xlu1 %4397 }
0x169a   :  { %v4452_v6 = vpop.permute.xlu1 %4451 }
0x169f   :  { %3801 = vadd.xlane.f32.xlu2 %v3800_v60 }
0x16b7   :  { %4409 = vrot.lane.b32.xlu2 %v7468_v18, %s6062_s27  ;;  %v4179_v18 = vsel %vm231_vm2, %v4156_v8, %v4168_v3  ;;  %v4181_v8 = vsel %vm231_vm2, %v4160_v43, %v4172_v51 }
0x16d1   :  { %v3799_v4 = vpop.xlane.xlu2 %3798 }
0x16d2   :  { %5910 = vrcp.f32 %v3799_v4 }
0x16d8   :  { %v5911_v63 = vpop.eup %5910 }
0x16d9   :  { %v3805_v48 = vmul.f32 %v5911_v63, %v5905_v61  ;;  %v4400_v16 = vpop.permute.xlu2 %4399 }
0x16db   :  { %5388 = vmatmul.msk.f32.vlgmr.msra.gmra.mxu2 %vm8025_vm15, %v3805_v48  ;;  %vm8038_vm15 = vmmov %vm8026_vm1 }
0x16dc   :  { %5398 = vmatpush.xpose.msk.msra.mxu2 %vm432_vm3, %v4180_v31 }
0x16e0   :  { %5399 = vmatpush.xpose.msk.msra.mxu2 %vm432_vm3, %v4179_v18 }
0x16e1   :  { %v4025_v2 = vpop.xlane.xlu0 %4024 }
0x16e3   :  { %5395 = vmatmul.msk.f32.vlgmr.msrb.gmra.mxu2 %vm432_vm3, %v3972_v56 }
0x16e4   :  { %5406 = vmatpush.xpose.msk.msrb.mxu2 %vm432_vm3, %v4418_v53 }
0x16e8   :  { %5407 = vmatpush.xpose.msk.msrb.mxu2 %vm432_vm3, %v4417_v28 }
0x16eb   :  { %5400 = vmatmul.msk.f32.vlgmr.msra.gmra.mxu2 %vm432_vm3, %v4184_v17 }
0x16f3   :  { %5408 = vmatmul.msk.f32.vlgmr.msrb.gmra.mxu2 %vm432_vm3, %v4422_v13 }
0x16f4   :  { %v4412_v45 = vpop.permute.xlu0 %4411 }
0x16f5   :  { %v4420_v35 = vsel %vm231_vm2, %v4400_v16, %v4412_v45 }
0x1712   :  { %v3802_v15 = vpop.xlane.xlu2 %3801 }
0x1713   :  { %5912 = vrcp.f32 %v3802_v15 }
0x1714   :  { %5914 = vrcp.f32 %v4025_v2 }
0x1719   :  { %v5913_v11 = vpop.eup %5912 }
0x171a   :  { %v3806_v22 = vmul.f32 %v5913_v11, %v5909_v1  ;;  %v5915_v26 = vpop.eup %5914  ;;  %v4410_v29 = vpop.permute.xlu2 %4409 }
0x171b   :  { %v4031_v47 = vmul.f32 %v5915_v26, %v5907_v50  ;;  %v4419_v37 = vsel %vm231_vm2, %v4398_v40, %v4410_v29 }
0x171c   :  { %5389 = vmatmul.msk.f32.vlgmr.msrb.gmra.mxu0 %vm8026_vm1, %v3806_v22 }
0x171d   :  { %5401 = vmatpush.xpose.msk.msrb.mxu0 %vm432_vm3, %v4182_v38 }
0x1721   :  { %5402 = vmatpush.xpose.msk.msrb.mxu0 %vm432_vm3, %v4181_v8 }
0x1724   :  { %5396 = vmatmul.msk.f32.vlgmr.msra.gmra.mxu0 %vm8027_vm5, %v4031_v47  ;;  %vm8039_vm5 = vmmov %vm8026_vm1 }
0x1725   :  { %5409 = vmatpush.xpose.msk.msra.mxu0 %vm432_vm3, %v4420_v35 }
0x1729   :  { %5410 = vmatpush.xpose.msk.msra.mxu0 %vm432_vm3, %v4419_v37 }
0x172c   :  { %5403 = vmatmul.msk.f32.vlgmr.msrb.gmra.mxu0 %vm432_vm3, %v4214_v59 }
0x1734   :  { %5411 = vmatmul.msk.f32.vlgmr.msra.gmra.mxu0 %vm432_vm3, %v4452_v6 }
0x175e   :  { %v7671_v20 = vpop.f32.mrf.mxu2 }
0x1766   :  { %v3998_v9 = vpop.f32.mrf.mxu2 }
0x1767   :  { %v4002_v34 = vmul.f32 2.0, %v3998_v9 }
0x1769   :  { %v4004_v58 = vadd.f32 2.0, %v4002_v34 }
0x176b   :  { %v4006_v41 = vmul.f32 %v4004_v58, %v7574_v36 }
0x176d   :  { %v4008_v21 = vadd.f32 %v4006_v41, %v7577_v10 }
0x176e   :  { %v4210_v27 = vpop.f32.mrf.mxu2 }
0x176f   :  { %v4243_v25 = vmul.f32 2.0, %v4210_v27  ;;  %v4010_v44 = vadd.f32 %v4008_v21, %v7604_v49 }
0x1771   :  { %v4245_v61 = vadd.f32 2.0, %v4243_v25  ;;  %v4014_v55 = vsel %vm8028_vm4, %v4010_v44, -inf  ;;  %vm8040_vm4 = vmmov %vm8026_vm1 }
0x1772   :  { %4015 = vmax.xlane.f32.xlu1 %v4014_v55 }
0x1773   :  { %v4247_v57 = vmul.f32 %v4245_v61, %v7574_v36 }
0x1775   :  { %v4249_v52 = vadd.f32 %v4247_v57, %v7577_v10 }
0x1776   :  { %v4448_v39 = vpop.f32.mrf.mxu2 }
0x1777   :  { %v4481_v50 = vmul.f32 2.0, %v4448_v39  ;;  %v4251_v62 = vadd.f32 %v4249_v52, %v7585_v7 }
0x1779   :  { %v4483_v24 = vadd.f32 2.0, %v4481_v50  ;;  %v4253_v42 = vsel %vm8029_vm13, %v4251_v62, -inf  ;;  %vm8041_vm13 = vmmov %vm8026_vm1 }
0x177a   :  { %4254 = vmax.xlane.f32.xlu2 %v4253_v42 }
0x177b   :  { %v4485_v1 = vmul.f32 %v4483_v24, %v7574_v36 }
0x177d   :  { %v4487_v60 = vadd.f32 %v4485_v1, %v7577_v10 }
0x177f   :  { %v4489_v12 = vadd.f32 %v4487_v60, %v7585_v7 }
0x1781   :  { %v4491_v3 = vsel %vm8030_vm7, %v4489_v12, -inf }
0x1782   :  { %4492 = vmax.xlane.f32.xlu0 %v4491_v3 }
0x1796   :  { %5589 = vrot.lane.b32.xlu0 %v7628_v23, %s6060_s26 }
0x1799   :  { %v7687_v14 = vpop.f32.mrf.mxu0 }
0x17a1   :  { %v7689_v17 = vpop.f32.mrf.mxu0 }
0x17a2   :  { %v4095_v21 = vmul.f32 %v7689_v17, %v7689_v17 }
0x17a4   :  { %v4097_v25 = vsel %vm432_vm3, %v4095_v21, 0.0 }
0x17a9   :  { %v4240_v51 = vpop.f32.mrf.mxu0 }
0x17aa   :  { %v4244_v56 = vmul.f32 2.0, %v4240_v51 }
0x17ac   :  { %v4246_v4 = vadd.f32 2.0, %v4244_v56 }
0x17ae   :  { %v4248_v63 = vmul.f32 %v4246_v4, %v7574_v36 }
0x17b0   :  { %v4250_v48 = vadd.f32 %v4248_v63, %v7577_v10 }
0x17b1   :  { %v4478_v32 = vpop.f32.mrf.mxu0 }
0x17b2   :  { %v4482_v31 = vmul.f32 2.0, %v4478_v32  ;;  %v4252_v7 = vadd.f32 %v4250_v48, %v7604_v49 }
0x17b4   :  { %v4484_v18 = vadd.f32 2.0, %v4482_v31  ;;  %v4256_v46 = vsel %vm8031_vm8, %v4252_v7, -inf }
0x17b5   :  { %4257 = vmax.xlane.f32.xlu2 %v4256_v46 }
0x17b6   :  { %v4486_v53 = vmul.f32 %v4484_v18, %v7574_v36 }
0x17b8   :  { %v4488_v5 = vadd.f32 %v4486_v53, %v7577_v10 }
0x17ba   :  { %v4490_v28 = vadd.f32 %v4488_v5, %v7604_v49 }
0x17bc   :  { %v4494_v13 = vsel %vm8032_vm9, %v4490_v28, -inf }
0x17bd   :  { %4495 = vmax.xlane.f32.xlu1 %v4494_v13 }
0x17d6   :  { %5584 = vrot.lane.b32.xlu1 %v7593_v54, %s6061_s2 }
0x17e5   :  { %v4016_v30 = vpop.xlane.xlu1 %4015 }
0x17e6   :  { %v4018_v16 = vsub.f32 %v4010_v44, %v4016_v30 }
0x17e8   :  { %v4021_v15 = vmul.f32 1.442695, %v4018_v16 }
0x17ea   :  { %5916 = vpow2.f32 %v4021_v15  ;;  %v4103_v15 = vmul.f32 2.0, %v7689_v17 }
0x17ed   :  { %v4255_v43 = vpop.xlane.xlu2 %4254 }
0x17ee   :  { %v4259_v2 = vsub.f32 %v4251_v62, %v4255_v43 }
0x17f0   :  { %v5917_v11 = vpop.eup %5916  ;;  %v4261_v22 = vmul.f32 1.442695, %v4259_v2  ;;  %v4105_v2 = vmul.f32 %v4103_v15, %v7689_v17 }
0x17f1   :  { %v4026_v36 = vsel %vm8033_vm12, %v5917_v11, 0.0 }
0x17f2   :  { %5918 = vpow2.f32 %v4261_v22  ;;  %4027 = vadd.xlane.f32.xlu0 %v4026_v36 }
0x17f5   :  { %v4493_v10 = vpop.xlane.xlu0 %4492 }
0x17f6   :  { %v4497_v49 = vsub.f32 %v4489_v12, %v4493_v10 }
0x17f8   :  { %v5919_v38 = vpop.eup %5918  ;;  %v4499_v59 = vmul.f32 1.442695, %v4497_v49 }
0x17f9   :  { %v4265_v26 = vsel %vm8034_vm6, %v5919_v38, 0.0 }
0x17fa   :  { %5920 = vpow2.f32 %v4499_v59  ;;  %4266 = vadd.xlane.f32.xlu2 %v4265_v26  ;;  %v3854_v26 = vmul.f32 %v7687_v14, %v7687_v14 }
0x1800   :  { %v7703_v8 = vpop.eup %5920 }
0x1801   :  { %v4503_v45 = vsel %vm8035_vm10, %v7703_v8, 0.0 }
0x1802   :  { %4504 = vadd.xlane.f32.xlu2 %v4503_v45 }
0x1806   :  { %5599 = vrot.lane.b32.xlu0 %v7628_v23, %s6061_s2 }
0x1808   :  { %v5590_v47 = vpop.permute.xlu0 %5589 }
0x1809   :  { %v5591_v35 = vunpack.i.l.bf16 %v5590_v47  ;;  %v5592_v29 = vunpack.i.h.bf16 %v5590_v47 }
0x180b   :  { %4089 = vmatpush.msra.mxu1 %v5591_v35  ;;  %v3858_v35 = vsel %vm432_vm3, %v3854_v26, 0.0 }
0x180d   :  { %4090 = vmatpush.msra.mxu1 %v5592_v29 }
0x180e   :  { %5604 = vrot.lane.b32.xlu0 %v7628_v23, %s6062_s27 }
0x1828   :  { %v4258_v40 = vpop.xlane.xlu2 %4257 }
0x1829   :  { %v4260_v37 = vsub.f32 %v4252_v7, %v4258_v40 }
0x182b   :  { %v4263_v6 = vmul.f32 1.442695, %v4260_v37 }
0x182d   :  { %5922 = vpow2.f32 %v4263_v6 }
0x1830   :  { %v4496_v9 = vpop.xlane.xlu1 %4495 }
0x1831   :  { %v4498_v34 = vsub.f32 %v4490_v28, %v4496_v9 }
0x1833   :  { %v5923_v58 = vpop.eup %5922  ;;  %v4501_v41 = vmul.f32 1.442695, %v4498_v34 }
0x1834   :  { %v4268_v27 = vsel %vm8036_vm11, %v5923_v58, 0.0 }
0x1835   :  { %5924 = vpow2.f32 %v4501_v41  ;;  %4269 = vadd.xlane.f32.xlu2 %v4268_v27  ;;  %v3853_v27 = vmul.f32 %v7671_v20, %v7671_v20 }
0x1838   :  { %4098 = vadd.xlane.f32.xlu0 %v4097_v25 }
0x183b   :  { %v5925_v44 = vpop.eup %5924 }
0x183c   :  { %v4506_v23 = vsel %vm8037_vm14, %v5925_v44, 0.0 }
0x183d   :  { %4507 = vadd.xlane.f32.xlu1 %v4506_v23 }
0x1848   :  { %v5585_v61 = vpop.permute.xlu1 %5584 }
0x1849   :  { %v5586_v55 = vunpack.i.l.bf16 %v5585_v61  ;;  %v5587_v57 = vunpack.i.h.bf16 %v5585_v61 }
0x184b   :  { %4298 = vmatpush.msrb.mxu3 %v5586_v55 }
0x184d   :  { %5594 = vrot.lane.b32.xlu2 %v7593_v54, %s6062_s27  ;;  %4299 = vmatpush.msrb.mxu3 %v5587_v57 }
0x1865   :  { %v4028_v52 = vpop.xlane.xlu0 %4027 }
0x1866   :  { %5926 = vrcp.f32 %v4028_v52 }
0x186c   :  { %v5927_v39 = vpop.eup %5926 }
0x186d   :  { %v4032_v50 = vmul.f32 %v5927_v39, %v5917_v11  ;;  %v4267_v62 = vpop.xlane.xlu2 %4266 }
0x186e   :  { %5928 = vrcp.f32 %v4267_v62 }
0x186f   :  { %5397 = vmatmul.msk.f32.vlgmr.msra.gmra.mxu1 %vm8038_vm15, %v4032_v50 }
0x1874   :  { %v5929_v24 = vpop.eup %5928 }
0x1875   :  { %v4273_v42 = vmul.f32 %v5929_v24, %v5919_v38  ;;  %v4505_v56 = vpop.xlane.xlu2 %4504 }
0x1877   :  { %5404 = vmatmul.msk.f32.vlgmr.msrb.gmra.mxu3 %vm8026_vm1, %v4273_v42 }
0x1878   :  { %v5600_v1 = vpop.permute.xlu0 %5599 }
0x1879   :  { %v5601_v60 = vunpack.i.l.bf16 %v5600_v1  ;;  %v5602_v12 = vunpack.i.h.bf16 %v5600_v1 }
0x187b   :  { %4327 = vmatpush.msrb.mxu1 %v5601_v60 }
0x187d   :  { %4328 = vmatpush.msrb.mxu1 %v5602_v12 }
0x1880   :  { %v5605_v3 = vpop.permute.xlu0 %5604 }
0x1881   :  { %v5606_v54 = vunpack.i.l.bf16 %v5605_v3  ;;  %v5607_v51 = vunpack.i.h.bf16 %v5605_v3 }
0x1883   :  { %4565 = vmatpush.msra.mxu1 %v5606_v54 }
0x1885   :  { %4566 = vmatpush.msra.mxu1 %v5607_v51 }
0x18a8   :  { %v4270_v4 = vpop.xlane.xlu2 %4269 }
0x18a9   :  { %5930 = vrcp.f32 %v4270_v4 }
0x18aa   :  { %5932 = vrcp.f32 %v4505_v56 }
0x18ab   :  { %v4099_v43 = vpop.xlane.xlu0 %4098 }
0x18ac   :  { %v4107_v22 = vsub.f32 %v4099_v43, %v4105_v2 }
0x18ae   :  { %v4109_v36 = vand.u32 2147483647, %v4107_v22 }
0x18af   :  { %v5931_v63 = vpop.eup %5930 }
0x18b0   :  { %v4274_v48 = vmul.f32 %v5931_v63, %v5923_v58  ;;  %v5595_v32 = vpop.permute.xlu2 %5594  ;;  %v4508_v31 = vpop.xlane.xlu1 %4507  ;;  %v4111_v38 = vmax.f32 %v4109_v36, 1e-08 }
0x18b1   :  { %v5933_v7 = vpop.eup %5932  ;;  %v5596_v18 = vunpack.i.l.bf16 %v5595_v32  ;;  %5934 = vrcp.f32 %v4508_v31  ;;  %v5597_v46 = vunpack.i.h.bf16 %v5595_v32 }
0x18b2   :  { %5405 = vmatmul.msk.f32.vlgmr.msrb.gmra.mxu1 %vm8039_vm5, %v4274_v48  ;;  %v4511_v53 = vmul.f32 %v5933_v7, %v7703_v8  ;;  %5936 = vrsqrt.f32 %v4111_v38  ;;  %vm4119_vm8 = vweird.f32 %v4111_v38 }
0x18b3   :  { %4536 = vmatpush.msra.mxu3 %v5596_v18 }
0x18b5   :  { %4537 = vmatpush.msra.mxu3 %v5597_v46 }
0x18b6   :  { %5412 = vmatmul.msk.f32.vlgmr.msra.gmra.mxu3 %vm8040_vm4, %v4511_v53 }
0x18b7   :  { %v5935_v5 = vpop.eup %5934 }
0x18b8   :  { %v4512_v28 = vmul.f32 %v5935_v5, %v5925_v44  ;;  %v5937_v37 = vpop.eup %5936  ;;  %v3855_v44 = vsel %vm432_vm3, %v3853_v27, 0.0 }
0x18b9   :  { %v4114_v9 = vmul.f32 %v5937_v37, %v4111_v38  ;;  %vm4120_vm7 = vweird.f32 %v5937_v37 }
0x18ba   :  { %5413 = vmatmul.msk.f32.vlgmr.msra.gmra.mxu1 %vm8041_vm13, %v4512_v28  ;;  %vm4121_vm9 = vmor %vm4119_vm8, %vm4120_vm7 }
0x18bb   :  { %v4115_v58 = vmul.f32 %v5937_v37, %v4114_v9 }
0x18bd   :  { %v4116_v21 = vmul.f32 0.5, %v4115_v58 }
0x18bf   :  { %v4117_v25 = vsub.f32 1.5, %v4116_v21 }
0x18c1   :  { %v4118_v23 = vmul.f32 %v5937_v37, %v4117_v25 }
0x18c3   :  { %v4122_v61 = vsel %vm4121_vm9, %v5937_v37, %v4118_v23 }
0x18ec   :  { %v7731_v11 = vpop.f32.mrf.mxu1 }
0x18ed   :  { %v4096_v34 = vmul.f32 %v7731_v11, %v7731_v11  ;;  %v4104_v2 = vmul.f32 2.0, %v7731_v11 }
0x18ef   :  { %v4100_v41 = vsel %vm432_vm3, %v4096_v34, 0.0 }
0x18fa   :  { %v7724_v13 = vpop.f32.mrf.mxu3 }
0x18fb   :  { %v4333_v30 = vmul.f32 %v7724_v13, %v7724_v13  ;;  %v4341_v55 = vmul.f32 2.0, %v7724_v13 }
0x18fd   :  { %v4335_v16 = vsel %vm432_vm3, %v4333_v30, 0.0  ;;  %v4343_v57 = vmul.f32 %v4341_v55, %v7724_v13 }
0x18fe   :  { %4336 = vadd.xlane.f32.xlu2 %v4335_v16 }
0x192f   :  { %v7733_v10 = vpop.f32.mrf.mxu1 }
0x1930   :  { %v4334_v49 = vmul.f32 %v7733_v10, %v7733_v10  ;;  %v4342_v51 = vmul.f32 2.0, %v7733_v10 }
0x1932   :  { %v4338_v59 = vsel %vm432_vm3, %v4334_v49, 0.0  ;;  %v4344_v56 = vmul.f32 %v4342_v51, %v7733_v10 }
0x1933   :  { %4339 = vadd.xlane.f32.xlu0 %v4338_v59  ;;  %v4106_v59 = vmul.f32 %v4104_v2, %v7731_v11 }
0x1937   :  { %v7740_v8 = vpop.f32.mrf.mxu1 }
0x1938   :  { %v4572_v45 = vmul.f32 %v7740_v8, %v7740_v8  ;;  %v4580_v32 = vmul.f32 2.0, %v7740_v8 }
0x1939   :  { %v7744_v47 = vpop.f32.mrf.mxu3 }
0x193a   :  { %v4576_v29 = vsel %vm432_vm3, %v4572_v45, 0.0  ;;  %v4571_v40 = vmul.f32 %v7744_v47, %v7744_v47  ;;  %v4579_v7 = vmul.f32 2.0, %v7744_v47  ;;  %v4582_v18 = vmul.f32 %v4580_v32, %v7740_v8 }
0x193b   :  { %3859 = vadd.xlane.f32.xlu0 %v3858_v35  ;;  %4577 = vadd.xlane.f32.xlu2 %v4576_v29  ;;  %v3862_v35 = vmul.f32 2.0, %v7687_v14 }
0x193c   :  { %v4573_v6 = vsel %vm432_vm3, %v4571_v40, 0.0  ;;  %v4581_v5 = vmul.f32 %v4579_v7, %v7744_v47 }
0x193d   :  { %4574 = vadd.xlane.f32.xlu1 %v4573_v6  ;;  %v3861_v6 = vmul.f32 2.0, %v7671_v20 }
0x193f   :  { %v3863_v23 = vmul.f32 %v3861_v6, %v7671_v20 }
0x1945   :  { %4101 = vadd.xlane.f32.xlu1 %v4100_v41  ;;  %v3864_v41 = vmul.f32 %v3862_v35, %v7687_v14 }
0x194d   :  { %3856 = vadd.xlane.f32.xlu1 %v3855_v44 }
0x1953   :  { %4135 = vperm.xlu2 %5608, %v4122_v61  }
0x1971   :  { %v4337_v52 = vpop.xlane.xlu2 %4336 }
0x1972   :  { %v4345_v39 = vsub.f32 %v4337_v52, %v4343_v57 }
0x1974   :  { %v4347_v50 = vand.u32 2147483647, %v4345_v39 }
0x1976   :  { %v4349_v62 = vmax.f32 %v4347_v50, 1e-08 }
0x1978   :  { %5938 = vrsqrt.f32 %v4349_v62  ;;  %vm4357_vm6 = vweird.f32 %v4349_v62 }
0x197e   :  { %v5939_v24 = vpop.eup %5938 }
0x197f   :  { %v4352_v42 = vmul.f32 %v5939_v24, %v4349_v62  ;;  %vm4358_vm12 = vweird.f32 %v5939_v24 }
0x1980   :  { %vm4359_vm10 = vmor %vm4357_vm6, %vm4358_vm12 }
0x1981   :  { %v4353_v1 = vmul.f32 %v5939_v24, %v4352_v42 }
0x1983   :  { %v4354_v60 = vmul.f32 0.5, %v4353_v1 }
0x1985   :  { %v4355_v12 = vsub.f32 1.5, %v4354_v60 }
0x1987   :  { %v4356_v3 = vmul.f32 %v5939_v24, %v4355_v12 }
0x1989   :  { %v4360_v54 = vsel %vm4359_vm10, %v5939_v24, %v4356_v3 }
0x198a   :  { %4373 = vperm.xlu1 %5609, %v4360_v54  }
0x19a6   :  { %v4340_v4 = vpop.xlane.xlu0 %4339 }
0x19a7   :  { %v4346_v63 = vsub.f32 %v4340_v4, %v4344_v56 }
0x19a9   :  { %v4348_v48 = vand.u32 2147483647, %v4346_v63 }
0x19ab   :  { %v4350_v31 = vmax.f32 %v4348_v48, 1e-08 }
0x19ad   :  { %5940 = vrsqrt.f32 %v4350_v31  ;;  %vm4367_vm14 = vweird.f32 %v4350_v31 }
0x19ae   :  { %v4578_v46 = vpop.xlane.xlu2 %4577  ;;  %v3860_v9 = vpop.xlane.xlu0 %3859 }
0x19af   :  { %v4584_v53 = vsub.f32 %v4578_v46, %v4582_v18  ;;  %v3866_v44 = vsub.f32 %v3860_v9, %v3864_v41 }
0x19b0   :  { %v4575_v28 = vpop.xlane.xlu1 %4574 }
0x19b1   :  { %v4583_v30 = vsub.f32 %v4575_v28, %v4581_v5  ;;  %v4586_v15 = vand.u32 2147483647, %v4584_v53  ;;  %v3868_v50 = vand.u32 2147483647, %v3866_v44 }
0x19b3   :  { %v5941_v16 = vpop.eup %5940  ;;  %v4585_v43 = vand.u32 2147483647, %v4583_v30  ;;  %v7766_v38 = vmax.f32 %v4586_v15, 1e-08  ;;  %v3870_v54 = vmax.f32 %v3868_v50, 1e-08 }
0x19b4   :  { %v4362_v22 = vmul.f32 %v5941_v16, %v4350_v31  ;;  %vm4368_vm11 = vweird.f32 %v5941_v16 }
0x19b5   :  { %v4587_v36 = vmax.f32 %v4585_v43, 1e-08  ;;  %vm4369_vm15 = vmor %vm4367_vm14, %vm4368_vm11  ;;  %vm4605_vm6 = vweird.f32 %v7766_v38 }
0x19b6   :  { %v4363_v49 = vmul.f32 %v5941_v16, %v4362_v22 }
0x19b7   :  { %5942 = vrsqrt.f32 %v4587_v36  ;;  %vm4595_vm5 = vweird.f32 %v4587_v36 }
0x19b8   :  { %v4364_v26 = vmul.f32 0.5, %v4363_v49  ;;  %v4102_v45 = vpop.xlane.xlu1 %4101  ;;  %5944 = vrsqrt.f32 %v7766_v38 }
0x19b9   :  { %v4108_v29 = vsub.f32 %v4102_v45, %v4106_v59 }
0x19ba   :  { %v4365_v40 = vsub.f32 1.5, %v4364_v26  ;;  %v4136_v26 = vpop.permute.xlu2 %4135 }
0x19bb   :  { %v4110_v37 = vand.u32 2147483647, %v4108_v29  ;;  %v4143_v45 = vmul.f32 %v4136_v26, %v7689_v17 }
0x19bc   :  { %v4366_v34 = vmul.f32 %v5941_v16, %v4365_v40 }
0x19bd   :  { %v5943_v58 = vpop.eup %5942  ;;  %v4112_v21 = vmax.f32 %v4110_v37, 1e-08 }
0x19be   :  { %v4590_v27 = vmul.f32 %v5943_v58, %v4587_v36  ;;  %v4370_v25 = vsel %vm4369_vm15, %v5941_v16, %v4366_v34  ;;  %v5945_v57 = vpop.eup %5944  ;;  %vm4596_vm1 = vweird.f32 %v5943_v58 }
0x19bf   :  { %5946 = vrsqrt.f32 %v4112_v21  ;;  %4378 = vperm.xlu1 %5609, %v4370_v25   ;;  %v4600_v24 = vmul.f32 %v5945_v57, %v7766_v38  ;;  %vm4597_vm4 = vmor %vm4595_vm5, %vm4596_vm1  ;;  %vm4129_vm7 = vweird.f32 %v4112_v21  ;;  %vm4606_vm9 = vweird.f32 %v5945_v57 }
0x19c0   :  { %v4591_v61 = vmul.f32 %v5943_v58, %v4590_v27  ;;  %v3857_v55 = vpop.xlane.xlu1 %3856  ;;  %vm4607_vm11 = vmor %vm4605_vm6, %vm4606_vm9  ;;  %vm3887_vm1 = vweird.f32 %v3870_v54 }
0x19c1   :  { %v3865_v52 = vsub.f32 %v3857_v55, %v3863_v23  ;;  %v4601_v51 = vmul.f32 %v5945_v57, %v4600_v24  ;;  %v4633_v23 = vld [vmem:[%s7976_s16] sm:$0xff] }
0x19c2   :  { %v4592_v39 = vmul.f32 0.5, %v4591_v61 }
0x19c3   :  { %v3867_v62 = vand.u32 2147483647, %v3865_v52  ;;  %v4602_v48 = vmul.f32 0.5, %v4601_v51 }
0x19c4   :  { %v4593_v42 = vsub.f32 1.5, %v4592_v39 }
0x19c5   :  { %v5947_v1 = vpop.eup %5946  ;;  %v3869_v60 = vmax.f32 %v3867_v62, 1e-08  ;;  %v4603_v46 = vsub.f32 1.5, %v4602_v48 }
0x19c6   :  { %v4124_v12 = vmul.f32 %v5947_v1, %v4112_v21  ;;  %v4594_v3 = vmul.f32 %v5943_v58, %v4593_v42  ;;  %vm4130_vm13 = vweird.f32 %v5947_v1 }
0x19c7   :  { %5948 = vrsqrt.f32 %v3869_v60  ;;  %vm4131_vm8 = vmor %vm4129_vm7, %vm4130_vm13  ;;  %v4604_v43 = vmul.f32 %v5945_v57, %v4603_v46  ;;  %vm3877_vm10 = vweird.f32 %v3869_v60  ;;  %vm8043_vm13 = vcmask 195712  }
0x19c8   :  { %v4125_v56 = vmul.f32 %v5947_v1, %v4124_v12  ;;  %v4598_v4 = vsel %vm4597_vm4, %v5943_v58, %v4594_v3  ;;  %5950 = vrsqrt.f32 %v3870_v54  ;;  %vm8042_vm4 = vcmask 130112  }
0x19c9   :  { %4611 = vperm.xlu0 %5610, %v4598_v4   ;;  %v4608_v36 = vsel %vm4607_vm11, %v5945_v57, %v4604_v43  ;;  %vm8045_vm7 = vcmask 261312  }
0x19ca   :  { %v4126_v63 = vmul.f32 0.5, %v4125_v56  ;;  %vm8047_vm9 = vmmov %vm8045_vm7 }
0x19cc   :  { %v4127_v32 = vsub.f32 1.5, %v4126_v63 }
0x19cd   :  { %v5949_v31 = vpop.eup %5948 }
0x19ce   :  { %v3872_v7 = vmul.f32 %v5949_v31, %v3869_v60  ;;  %v4128_v18 = vmul.f32 %v5947_v1, %v4127_v32  ;;  %v5951_v28 = vpop.eup %5950  ;;  %vm3878_vm12 = vweird.f32 %v5949_v31 }
0x19cf   :  { %v3882_v16 = vmul.f32 %v5951_v28, %v3870_v54  ;;  %vm3879_vm14 = vmor %vm3877_vm10, %vm3878_vm12  ;;  %vm3888_vm15 = vweird.f32 %v5951_v28 }
0x19d0   :  { %v3873_v53 = vmul.f32 %v5949_v31, %v3872_v7  ;;  %v4132_v5 = vsel %vm4131_vm8, %v5947_v1, %v4128_v18  ;;  %vm3889_vm5 = vmor %vm3887_vm1, %vm3888_vm15 }
0x19d1   :  { %4140 = vperm.xlu2 %5608, %v4132_v5   ;;  %v3883_v22 = vmul.f32 %v5951_v28, %v3882_v16  ;;  %vm8046_vm8 = vmmov %vm8043_vm13 }
0x19d2   :  { %v3874_v30 = vmul.f32 0.5, %v3873_v53 }
0x19d3   :  { %v3884_v59 = vmul.f32 0.5, %v3883_v22 }
0x19d4   :  { %v3875_v15 = vsub.f32 1.5, %v3874_v30 }
0x19d5   :  { %v3885_v35 = vsub.f32 1.5, %v3884_v59 }
0x19d6   :  { %v3876_v2 = vmul.f32 %v5949_v31, %v3875_v15 }
0x19d7   :  { %v3886_v29 = vmul.f32 %v5951_v28, %v3885_v35 }
0x19d8   :  { %v3880_v49 = vsel %vm3879_vm14, %v5949_v31, %v3876_v2 }
0x19d9   :  { %4616 = vperm.xlu2 %5608, %v4608_v36   ;;  %3893 = vperm.xlu1 %5609, %v3880_v49   ;;  %v3890_v38 = vsel %vm3889_vm5, %v5951_v28, %v3886_v29 }
0x19e1   :  { %4147 = vrot.lane.b32.xlu2 %v4143_v45, %s6066_s8 }
0x19e9   :  { %3898 = vperm.xlu2 %5608, %v3890_v38  }
0x19fc   :  { %v4374_v40 = vpop.permute.xlu1 %4373 }
0x19fd   :  { %v4381_v37 = vmul.f32 %v4374_v40, %v7724_v13 }
0x19ff   :  { %4385 = vrot.lane.b32.xlu1 %v4381_v37, %s6067_s5 }
0x1a2b   :  { %v4141_v6 = vpop.permute.xlu2 %4140 }
0x1a2c   :  { %v4144_v9 = vmul.f32 %v4141_v6, %v7731_v11 }
0x1a2e   :  { %4149 = vrot.lane.b32.xlu1 %v4144_v9, %s6066_s8 }
0x1a31   :  { %v4379_v27 = vpop.permute.xlu1 %4378 }
0x1a32   :  { %v4382_v25 = vmul.f32 %v4379_v27, %v7733_v10  ;;  %v4636_v10 = vld [vmem:[%s7976_s16 + $0x18] sm:$0xff] }
0x1a33   :  { %v4617_v17 = vpop.permute.xlu2 %4616  ;;  %4656 = vmatpush.msra.mxu2 %v4636_v10  ;;  %v4780_v10 = vld [vmem:[%s7978_s18 + $0x10] sm:$0xff] }
0x1a34   :  { %v4620_v34 = vmul.f32 %v4617_v17, %v7740_v8 }
0x1a36   :  { %4625 = vrot.lane.b32.xlu2 %v4620_v34, %s6068_s9 }
0x1a3b   :  { %v4612_v58 = vpop.permute.xlu0 %4611  ;;  %v4148_v41 = vpop.permute.xlu2 %4147 }
0x1a3c   :  { %v4619_v21 = vmul.f32 %v4612_v58, %v7744_v47 }
0x1a3e   :  { %4623 = vrot.lane.b32.xlu0 %v4619_v21, %s6068_s9 }
0x1a43   :  { %v3899_v13 = vpop.permute.xlu2 %3898 }
0x1a44   :  { %v3902_v44 = vmul.f32 %v3899_v13, %v7687_v14  ;;  %v4635_v14 = vld [vmem:[%s7976_s16 + $0x10] sm:$0xff] }
0x1a45   :  { %4657 = vmatpush.msra.mxu2 %v4635_v14 }
0x1a46   :  { %3904 = vst.msk [vmem:[#allocation2 + $0x8] sm:$0xff] %vm432_vm3, %v3902_v44  ;;  %4387 = vrot.lane.b32.xlu0 %v4382_v25, %s6067_s5 }
0x1a4b   :  { %v3894_v11 = vpop.permute.xlu1 %3893 }
0x1a4c   :  { %v3901_v8 = vmul.f32 %v3894_v11, %v7671_v20  ;;  %v4634_v20 = vld [vmem:[%s7976_s16 + $0x8] sm:$0xff]  ;;  %s7825_s16 = sld [smem:[#allocation3 + $0x11]] }
0x1a4d   :  { %4658 = vmatpush.msra.mxu2 %v4634_v20 }
0x1a4e   :  { %3903 = vst.msk [vmem:[#allocation2] sm:$0xff] %vm432_vm3, %v3901_v8  ;;  %vm8044_vm3 = vmmov %vm8042_vm4 }
0x1a4f   :  { %4153 = vst.msk [vmem:[#allocation2] sm:$0xff] %vm8042_vm4, %v4148_v41  ;;  %4659 = vmatpush.msra.mxu2 %v4633_v23 }
0x1a52   :  { %v4705_v46 = vstv %s7825_s16 }
0x1a71   :  { %v4386_v47 = vpop.permute.xlu1 %4385 }
0x1a72   :  { %4391 = vst.msk [vmem:[#allocation2] sm:$0xff] %vm8043_vm13, %v4386_v47  ;;  %v4781_v47 = vld [vmem:[%s7978_s18 + $0x18] sm:$0xff] }
0x1a73   :  { %4805 = vmatpush.msrb.mxu0 %v4781_v47 }
0x1a75   :  { %4806 = vmatpush.msrb.mxu0 %v4780_v10 }
0x1a90   :  { %v4626_v39 = vpop.permute.xlu2 %4625 }
0x1aa0   :  { %v4150_v61 = vpop.permute.xlu1 %4149 }
0x1aa1   :  { %4154 = vst.msk [vmem:[#allocation2 + $0x8] sm:$0xff] %vm8044_vm3, %v4150_v61 }
0x1ab0   :  { %v4624_v55 = vpop.permute.xlu0 %4623 }
0x1ab1   :  { %4629 = vst.msk [vmem:[#allocation2] sm:$0xff] %vm8045_vm7, %v4624_v55 }
0x1ab8   :  { %v4388_v57 = vpop.permute.xlu0 %4387  ;;  %v4631_v52 = vld [vmem:[#allocation2] sm:$0xff] }
0x1ab9   :  { %4392 = vst.msk [vmem:[#allocation2 + $0x8] sm:$0xff] %vm8046_vm8, %v4388_v57  ;;  %5415 = vmatmul.msk.f32.vlgmr.msra.gmra.mxu2 %vm114_vm0, %v4631_v52 }
0x1aba   :  { %4630 = vst.msk [vmem:[#allocation2 + $0x8] sm:$0xff] %vm8047_vm9, %v4626_v39 }
0x1ac1   :  { %v4632_v50 = vld [vmem:[#allocation2 + $0x8] sm:$0xff] }
0x1ac2   :  { %5416 = vmatmul.msk.f32.gmra.mxu2 %vm114_vm0, %v4632_v50 }
0x1b3c   :  { %v4661_v62 = vpop.f32.mrf.mxu2 }
0x1b3d   :  { %v7813_v24 = vadd.f32 %v4661_v62, %v7254_v0 }
0x1b3f   :  { %v5417_v42 = vmul.f32 -1.442695, %v7813_v24  ;;  %v4710_v1 = vmul.f32 %v7813_v24, %v7813_v24 }
0x1b41   :  { %5952 = vpow2.f32 %v5417_v42  ;;  %v4712_v60 = vsel %vm114_vm0, %v4710_v1, 0.0 }
0x1b42   :  { %4713 = vadd.xlane.f32.xlu1 %v4712_v60 }
0x1b45   :  { %v4664_v12 = vpop.f32.mrf.mxu2 }
0x1b46   :  { %v7820_v3 = vadd.f32 %v4664_v12, %v7261_v19 }
0x1b47   :  { %v5953_v54 = vpop.eup %5952 }
0x1b48   :  { %v4673_v51 = vadd.f32 1.0, %v5953_v54  ;;  %v4711_v56 = vmul.f32 %v7820_v3, %v7820_v3  ;;  %v5418_v16 = vmul.f32 -1.442695, %v7820_v3 }
0x1b4a   :  { %5954 = vrcp.f32 %v4673_v51  ;;  %v4715_v0 = vsel %vm114_vm0, %v4711_v56, 0.0  ;;  %v4686_v32 = vand.u32 2147483648, %v4673_v51  ;;  %v4684_v19 = vand.u32 2147483647, %v4673_v51 }
0x1b4b   :  { %4716 = vadd.xlane.f32.xlu0 %v4715_v0  ;;  %vm4680_vm6 = vweird.f32 %v4673_v51  ;;  %5956 = vpow2.f32 %v5418_v16 }
0x1b4c   :  { %v4687_v18 = vor.u32 1.1754944e-38, %v4686_v32  ;;  %vm4685_vm11 = vcmp.eq.f32.partialorder %v4684_v19, 8.507059e+37  ;;  %v4779_v32 = vld [vmem:[%s7978_s18 + $0x8] sm:$0xff] }
0x1b4d   :  { %4807 = vmatpush.msrb.mxu0 %v4779_v32 }
0x1b50   :  { %v5955_v4 = vpop.eup %5954 }
0x1b51   :  { %v4676_v63 = vmul.f32 %v5955_v4, %v4673_v51  ;;  %vm4681_vm12 = vweird.f32 %v5955_v4  ;;  %v5957_v15 = vpop.eup %5956 }
0x1b52   :  { %vm4682_vm10 = vmor %vm4680_vm6, %vm4681_vm12  ;;  %v4674_v43 = vadd.f32 1.0, %v5957_v15 }
0x1b53   :  { %v4677_v48 = vsub.f32 1.0, %v4676_v63 }
0x1b54   :  { %5958 = vrcp.f32 %v4674_v43  ;;  %v4701_v26 = vand.u32 2147483648, %v4674_v43  ;;  %vm4695_vm15 = vweird.f32 %v4674_v43  ;;  %v4699_v45 = vand.u32 2147483647, %v4674_v43 }
0x1b55   :  { %v4678_v31 = vmul.f32 %v5955_v4, %v4677_v48 }
0x1b56   :  { %v4702_v40 = vor.u32 1.1754944e-38, %v4701_v26  ;;  %vm4700_vm5 = vcmp.eq.f32.partialorder %v4699_v45, 8.507059e+37 }
0x1b57   :  { %v4679_v7 = vadd.f32 %v5955_v4, %v4678_v31  ;;  %v4778_v31 = vld [vmem:[%s7978_s18] sm:$0xff] }
0x1b58   :  { %4808 = vmatpush.msrb.mxu0 %v4778_v31 }
0x1b59   :  { %v4683_v53 = vsel %vm4682_vm10, %v5955_v4, %v4679_v7 }
0x1b5a   :  { %v4688_v5 = vsel %vm4685_vm11, %v4687_v18, %v4683_v53  ;;  %v5959_v2 = vpop.eup %5958 }
0x1b5b   :  { %v4706_v28 = vmul.f32 %v4705_v46, %v4688_v5  ;;  %v4691_v22 = vmul.f32 %v5959_v2, %v4674_v43  ;;  %vm4696_vm14 = vweird.f32 %v5959_v2 }
0x1b5c   :  { %vm4697_vm1 = vmor %vm4695_vm15, %vm4696_vm14 }
0x1b5d   :  { %v4708_v30 = vadd.f32 1.1, %v4706_v28  ;;  %v4692_v36 = vsub.f32 1.0, %v4691_v22 }
0x1b5f   :  { %4768 = vperm.xlu2 %5608, %v4708_v30   ;;  %v4693_v49 = vmul.f32 %v5959_v2, %v4692_v36  ;;  %v4722_v9 = vmul.f32 %v4708_v30, %v4708_v30 }
0x1b61   :  { %v4694_v59 = vadd.f32 %v5959_v2, %v4693_v49  ;;  %v5419_v58 = vadd.f32 -1.0, %v4722_v9 }
0x1b63   :  { %v4698_v29 = vsel %vm4697_vm1, %v5959_v2, %v4694_v59 }
0x1b64   :  { %v4703_v6 = vsel %vm4700_vm5, %v4702_v40, %v4698_v29 }
0x1b65   :  { %v4707_v17 = vmul.f32 %v4705_v46, %v4703_v6 }
0x1b67   :  { %v4709_v27 = vadd.f32 1.1, %v4707_v17 }
0x1b69   :  { %v4723_v44 = vmul.f32 %v4709_v27, %v4709_v27 }
0x1b6b   :  { %v5420_v11 = vadd.f32 -1.0, %v4723_v44 }
0x1bb5   :  { %v4714_v35 = vpop.xlane.xlu1 %4713 }
0x1bb6   :  { %v4718_v38 = vsub.f32 %v4714_v35, %v4710_v1 }
0x1bb8   :  { %v4720_v37 = vmax.f32 %v4718_v38, 1e-08 }
0x1bb9   :  { %v4769_v19 = vpop.permute.xlu2 %4768 }
0x1bba   :  { %5960 = vrcp.f32 %v4720_v37 }
0x1bbe   :  { %v4717_v34 = vpop.xlane.xlu0 %4716 }
0x1bbf   :  { %v4719_v41 = vsub.f32 %v4717_v34, %v4711_v56 }
0x1bc0   :  { %v5961_v21 = vpop.eup %5960 }
0x1bc1   :  { %v4728_v13 = vmul.f32 %v5961_v21, %v5419_v58  ;;  %v4721_v25 = vmax.f32 %v4719_v41, 1e-08 }
0x1bc3   :  { %5962 = vrcp.f32 %v4721_v25  ;;  %vm4737_vm4 = vcmp.eq.f32.partialorder %v4728_v13, inf  ;;  %v4740_v1 = vand.u32 2147483648, %v4728_v13  ;;  %vm4739_vm13 = vcmp.eq.f32.partialorder %v4728_v13, 0.0 }
0x1bc4   :  { %5964 = vrsqrt.f32 %v4728_v13 }
0x1bc9   :  { %v5963_v8 = vpop.eup %5962 }
0x1bca   :  { %v5965_v14 = vpop.eup %5964  ;;  %v4729_v20 = vmul.f32 %v5963_v8, %v5420_v11 }
0x1bcb   :  { %v4731_v23 = vmul.f32 %v5965_v14, %v4728_v13 }
0x1bcc   :  { %5966 = vrsqrt.f32 %v4729_v20  ;;  %vm4749_vm3 = vcmp.eq.f32.partialorder %v4729_v20, inf  ;;  %v4752_v4 = vand.u32 2147483648, %v4729_v20  ;;  %vm4751_vm7 = vcmp.eq.f32.partialorder %v4729_v20, 0.0 }
0x1bcd   :  { %v4732_v61 = vmul.f32 %v5965_v14, %v4731_v23 }
0x1bcf   :  { %v4733_v55 = vmul.f32 0.5, %v4732_v61 }
0x1bd1   :  { %v4734_v57 = vsub.f32 1.5, %v4733_v55 }
0x1bd2   :  { %v5967_v52 = vpop.eup %5966 }
0x1bd3   :  { %v4735_v39 = vmul.f32 %v5965_v14, %v4734_v57  ;;  %v4743_v50 = vmul.f32 %v5967_v52, %v4729_v20 }
0x1bd5   :  { %v4736_v62 = vmul.f32 %v4735_v39, %v4728_v13  ;;  %v4744_v42 = vmul.f32 %v5967_v52, %v4743_v50 }
0x1bd7   :  { %v4738_v60 = vsel %vm4737_vm4, %v4728_v13, %v4736_v62  ;;  %v4745_v12 = vmul.f32 0.5, %v4744_v42 }
0x1bd8   :  { %v4741_v54 = vsel %vm4739_vm13, %v4740_v1, %v4738_v60 }
0x1bd9   :  { %4756 = vperm.xlu2 %5608, %v4741_v54   ;;  %v4746_v51 = vsub.f32 1.5, %v4745_v12 }
0x1bdb   :  { %v4747_v56 = vmul.f32 %v5967_v52, %v4746_v51 }
0x1bdd   :  { %v4748_v0 = vmul.f32 %v4747_v56, %v4729_v20 }
0x1bdf   :  { %v4750_v63 = vsel %vm4749_vm3, %v4729_v20, %v4748_v0 }
0x1be0   :  { %v4753_v48 = vsel %vm4751_vm7, %v4752_v4, %v4750_v63 }
0x1be1   :  { %4761 = vperm.xlu2 %5608, %v4753_v48  }
0x1be9   :  { %4773 = vperm.xlu2 %5608, %v4709_v27  }
0x1c33   :  { %v4757_v7 = vpop.permute.xlu2 %4756 }
0x1c34   :  { %v4764_v18 = vmul.f32 %v4757_v7, %v7813_v24  ;;  %v5614_v24 = vld [vmem:[%s7979_s19] ss:$0 sm:$0xff]  ;;  %s7869_s19 = sld [smem:[#allocation3 + $0x13]] }
0x1c36   :  { %v7844_v46 = vsel %vm231_vm2, %v4769_v19, %v4764_v18  ;;  %v4930_v18 = vld [vmem:[%s7980_s20 + $0x18] sm:$0xff] }
0x1c37   :  { %5422 = vmatmul.msk.f32.vlgmr.msrb.gmra.mxu0 %vm114_vm0, %v7844_v46  ;;  %4956 = vmatpush.msrb.mxu3 %v4930_v18 }
0x1c3a   :  { %v4854_v41 = vstv %s7869_s19 }
0x1c3b   :  { %v4762_v53 = vpop.permute.xlu2 %4761 }
0x1c3c   :  { %v4765_v5 = vmul.f32 %v4762_v53, %v7820_v3 }
0x1c43   :  { %v4774_v28 = vpop.permute.xlu2 %4773 }
0x1c44   :  { %v7851_v30 = vsel %vm231_vm2, %v4774_v28, %v4765_v5 }
0x1c45   :  { %5423 = vmatmul.msk.f32.gmra.mxu0 %vm114_vm0, %v7851_v30 }
0x1cb4   :  { %v4810_v16 = vpop.f32.mrf.mxu0 }
0x1cb5   :  { %v7858_v15 = vadd.f32 %v5614_v24, %v4810_v16 }
0x1cb7   :  { %v5424_v43 = vmul.f32 -1.442695, %v7858_v15  ;;  %v4859_v3 = vmul.f32 %v7858_v15, %v7858_v15 }
0x1cb9   :  { %5968 = vpow2.f32 %v5424_v43  ;;  %v4861_v2 = vsel %vm114_vm0, %v4859_v3, 0.0 }
0x1cba   :  { %4862 = vadd.xlane.f32.xlu2 %v4861_v2 }
0x1cbf   :  { %v5969_v22 = vpop.eup %5968 }
0x1cc0   :  { %v4822_v36 = vadd.f32 1.0, %v5969_v22 }
0x1cc2   :  { %5970 = vrcp.f32 %v4822_v36  ;;  %v4813_v49 = vpop.f32.mrf.mxu0  ;;  %v4835_v6 = vand.u32 2147483648, %v4822_v36  ;;  %vm4829_vm9 = vweird.f32 %v4822_v36  ;;  %v4833_v9 = vand.u32 2147483647, %v4822_v36 }
0x1cc3   :  { %v7864_v59 = vadd.f32 %v5614_v24, %v4813_v49 }
0x1cc4   :  { %v4836_v34 = vor.u32 1.1754944e-38, %v4835_v6  ;;  %vm4834_vm6 = vcmp.eq.f32.partialorder %v4833_v9, 8.507059e+37  ;;  %v4928_v6 = vld [vmem:[%s7980_s20 + $0x8] sm:$0xff]  ;;  %v4927_v9 = vld [vmem:[%s7980_s20] sm:$0xff] }
0x1cc5   :  { %v4860_v26 = vmul.f32 %v7864_v59, %v7864_v59  ;;  %v5425_v13 = vmul.f32 -1.442695, %v7864_v59 }
0x1cc7   :  { %v4864_v45 = vsel %vm114_vm0, %v4860_v26, 0.0  ;;  %5972 = vpow2.f32 %v5425_v13 }
0x1cc8   :  { %v5971_v35 = vpop.eup %5970  ;;  %4865 = vadd.xlane.f32.xlu1 %v4864_v45 }
0x1cc9   :  { %v4825_v29 = vmul.f32 %v5971_v35, %v4822_v36  ;;  %vm4830_vm8 = vweird.f32 %v5971_v35 }
0x1cca   :  { %vm4831_vm12 = vmor %vm4829_vm9, %vm4830_vm8 }
0x1ccb   :  { %v4826_v38 = vsub.f32 1.0, %v4825_v29 }
0x1ccd   :  { %v4827_v40 = vmul.f32 %v5971_v35, %v4826_v38  ;;  %v5973_v25 = vpop.eup %5972 }
0x1cce   :  { %v4823_v44 = vadd.f32 1.0, %v5973_v25 }
0x1ccf   :  { %v4828_v37 = vadd.f32 %v5971_v35, %v4827_v40 }
0x1cd0   :  { %5974 = vrcp.f32 %v4823_v44  ;;  %v4850_v61 = vand.u32 2147483648, %v4823_v44  ;;  %vm4844_vm11 = vweird.f32 %v4823_v44  ;;  %v4848_v57 = vand.u32 2147483647, %v4823_v44 }
0x1cd1   :  { %v4832_v17 = vsel %vm4831_vm12, %v5971_v35, %v4828_v37  ;;  %v4929_v37 = vld [vmem:[%s7980_s20 + $0x10] sm:$0xff] }
0x1cd2   :  { %v4837_v58 = vsel %vm4834_vm6, %v4836_v34, %v4832_v17  ;;  %v4851_v50 = vor.u32 1.1754944e-38, %v4850_v61  ;;  %vm4849_vm15 = vcmp.eq.f32.partialorder %v4848_v57, 8.507059e+37  ;;  %4957 = vmatpush.msrb.mxu3 %v4929_v37 }
0x1cd3   :  { %v4855_v21 = vmul.f32 %v4854_v41, %v4837_v58 }
0x1cd4   :  { %4958 = vmatpush.msrb.mxu3 %v4928_v6 }
0x1cd5   :  { %v4857_v27 = vadd.f32 1.1, %v4855_v21 }
0x1cd6   :  { %v5975_v11 = vpop.eup %5974  ;;  %4959 = vmatpush.msrb.mxu3 %v4927_v9 }
0x1cd7   :  { %v4840_v8 = vmul.f32 %v5975_v11, %v4823_v44  ;;  %vm4845_vm10 = vweird.f32 %v5975_v11  ;;  %v4871_v52 = vmul.f32 %v4857_v27, %v4857_v27 }
0x1cd8   :  { %vm4846_vm14 = vmor %vm4844_vm11, %vm4845_vm10 }
0x1cd9   :  { %v4841_v47 = vsub.f32 1.0, %v4840_v8  ;;  %v5426_v42 = vadd.f32 -1.0, %v4871_v52 }
0x1cdb   :  { %v4842_v10 = vmul.f32 %v5975_v11, %v4841_v47 }
0x1cdd   :  { %v4843_v23 = vadd.f32 %v5975_v11, %v4842_v10 }
0x1cdf   :  { %v4847_v39 = vsel %vm4846_vm14, %v5975_v11, %v4843_v23 }
0x1ce0   :  { %v4852_v62 = vsel %vm4849_vm15, %v4851_v50, %v4847_v39 }
0x1ce1   :  { %4917 = vperm.xlu1 %5609, %v4857_v27   ;;  %v4856_v60 = vmul.f32 %v4854_v41, %v4852_v62 }
0x1ce3   :  { %v4858_v56 = vadd.f32 1.1, %v4856_v60 }
0x1ce5   :  { %v4872_v63 = vmul.f32 %v4858_v56, %v4858_v56 }
0x1ce7   :  { %v5427_v31 = vadd.f32 -1.0, %v4872_v63 }
0x1d2d   :  { %v4863_v14 = vpop.xlane.xlu2 %4862 }
0x1d2e   :  { %v4867_v20 = vsub.f32 %v4863_v14, %v4859_v3 }
0x1d30   :  { %v4869_v55 = vmax.f32 %v4867_v20, 1e-08 }
0x1d32   :  { %5976 = vrcp.f32 %v4869_v55 }
0x1d38   :  { %v5977_v1 = vpop.eup %5976 }
0x1d39   :  { %v4877_v12 = vmul.f32 %v5977_v1, %v5426_v42 }
0x1d3b   :  { %v4866_v54 = vpop.xlane.xlu1 %4865  ;;  %5978 = vrsqrt.f32 %v4877_v12  ;;  %vm4886_vm1 = vcmp.eq.f32.partialorder %v4877_v12, inf  ;;  %v4889_v16 = vand.u32 2147483648, %v4877_v12  ;;  %vm4888_vm5 = vcmp.eq.f32.partialorder %v4877_v12, 0.0 }
0x1d3c   :  { %v4868_v51 = vsub.f32 %v4866_v54, %v4860_v26 }
0x1d3e   :  { %v4870_v0 = vmax.f32 %v4868_v51, 1e-08 }
0x1d40   :  { %5980 = vrcp.f32 %v4870_v0 }
0x1d41   :  { %v5979_v4 = vpop.eup %5978 }
0x1d42   :  { %v4880_v48 = vmul.f32 %v5979_v4, %v4877_v12 }
0x1d44   :  { %v4881_v32 = vmul.f32 %v5979_v4, %v4880_v48 }
0x1d46   :  { %v5981_v19 = vpop.eup %5980  ;;  %v4882_v7 = vmul.f32 0.5, %v4881_v32 }
0x1d47   :  { %v4878_v53 = vmul.f32 %v5981_v19, %v5427_v31 }
0x1d48   :  { %v4883_v5 = vsub.f32 1.5, %v4882_v7 }
0x1d49   :  { %5982 = vrsqrt.f32 %v4878_v53  ;;  %vm4898_vm4 = vcmp.eq.f32.partialorder %v4878_v53, inf  ;;  %v4901_v29 = vand.u32 2147483648, %v4878_v53  ;;  %vm4900_vm13 = vcmp.eq.f32.partialorder %v4878_v53, 0.0 }
0x1d4a   :  { %v4884_v28 = vmul.f32 %v5979_v4, %v4883_v5 }
0x1d4c   :  { %v4885_v24 = vmul.f32 %v4884_v28, %v4877_v12 }
0x1d4e   :  { %v4887_v43 = vsel %vm4886_vm1, %v4877_v12, %v4885_v24 }
0x1d4f   :  { %v5983_v3 = vpop.eup %5982  ;;  %v4890_v2 = vsel %vm4888_vm5, %v4889_v16, %v4887_v43 }
0x1d50   :  { %4905 = vperm.xlu0 %5610, %v4890_v2   ;;  %v4892_v22 = vmul.f32 %v5983_v3, %v4878_v53 }
0x1d52   :  { %v4893_v36 = vmul.f32 %v5983_v3, %v4892_v22 }
0x1d53   :  { %v4918_v58 = vpop.permute.xlu1 %4917 }
0x1d54   :  { %v4894_v49 = vmul.f32 0.5, %v4893_v36 }
0x1d56   :  { %v4895_v26 = vsub.f32 1.5, %v4894_v49 }
0x1d58   :  { %v4896_v45 = vmul.f32 %v5983_v3, %v4895_v26 }
0x1d5a   :  { %v4897_v35 = vmul.f32 %v4896_v45, %v4878_v53 }
0x1d5c   :  { %v4899_v38 = vsel %vm4898_vm4, %v4878_v53, %v4897_v35 }
0x1d5d   :  { %v4902_v40 = vsel %vm4900_vm13, %v4901_v29, %v4899_v38 }
0x1d5e   :  { %4910 = vperm.xlu0 %5610, %v4902_v40  }
0x1d66   :  { %4922 = vperm.xlu0 %5610, %v4858_v56  }
0x1dc2   :  { %v4906_v17 = vpop.permute.xlu0 %4905 }
0x1dc3   :  { %v4913_v34 = vmul.f32 %v4906_v17, %v7858_v15  ;;  %v5615_v15 = vld [vmem:[%s7981_s21] ss:$0 sm:$0xff]  ;;  %s7907_s21 = sld [smem:[#allocation3 + $0x14]] }
0x1dc5   :  { %v4925_v41 = vsel %vm231_vm2, %v4918_v58, %v4913_v34 }
0x1dc6   :  { %v4933_v21 = vmax.f32 %v4925_v41, 0.0 }
0x1dc8   :  { %5429 = vmatmul.msk.f32.vlgmr.msrb.gmra.mxu3 %vm114_vm0, %v4933_v21 }
0x1dc9   :  { %v5005_v0 = vstv %s7907_s21 }
0x1dd0   :  { %v4911_v27 = vpop.permute.xlu0 %4910 }
0x1dd1   :  { %v4914_v13 = vmul.f32 %v4911_v27, %v7864_v59 }
0x1dd8   :  { %v4923_v25 = vpop.permute.xlu0 %4922 }
0x1dd9   :  { %v4926_v44 = vsel %vm231_vm2, %v4923_v25, %v4914_v13 }
0x1dda   :  { %v4934_v11 = vmax.f32 %v4926_v44, 0.0 }
0x1ddc   :  { %5430 = vmatmul.msk.f32.gmra.mxu3 %vm114_vm0, %v4934_v11  ;;  %v5081_v11 = vld [vmem:[%s7977_s17 + $0x18] sm:$0xff] }
0x1ddd   :  { %5101 = vmatpush.msrb.mxu1 %v5081_v11 }
0x1e4b   :  { %v4961_v8 = vpop.f32.mrf.mxu3 }
0x1e4c   :  { %v7896_v47 = vadd.f32 %v5615_v15, %v4961_v8 }
0x1e4e   :  { %v5431_v10 = vmul.f32 -1.442695, %v7896_v47  ;;  %v5010_v14 = vmul.f32 %v7896_v47, %v7896_v47 }
0x1e50   :  { %5984 = vpow2.f32 %v5431_v10  ;;  %v5012_v59 = vsel %vm114_vm0, %v5010_v14, 0.0 }
0x1e51   :  { %5013 = vadd.xlane.f32.xlu1 %v5012_v59 }
0x1e56   :  { %v5985_v20 = vpop.eup %5984 }
0x1e57   :  { %v4973_v23 = vadd.f32 1.0, %v5985_v20 }
0x1e59   :  { %5986 = vrcp.f32 %v4973_v23  ;;  %v4986_v60 = vand.u32 2147483648, %v4973_v23  ;;  %vm4980_vm7 = vweird.f32 %v4973_v23  ;;  %v4984_v12 = vand.u32 2147483647, %v4973_v23 }
0x1e5b   :  { %v4987_v51 = vor.u32 1.1754944e-38, %v4986_v60  ;;  %vm4985_vm9 = vcmp.eq.f32.partialorder %v4984_v12, 8.507059e+37  ;;  %v5079_v60 = vld [vmem:[%s7977_s17 + $0x8] sm:$0xff]  ;;  %v5078_v12 = vld [vmem:[%s7977_s17] sm:$0xff] }
0x1e5f   :  { %v5987_v61 = vpop.eup %5986  ;;  %v4964_v55 = vpop.f32.mrf.mxu3 }
0x1e60   :  { %v7902_v57 = vadd.f32 %v5615_v15, %v4964_v55  ;;  %v4976_v52 = vmul.f32 %v5987_v61, %v4973_v23  ;;  %vm4981_vm3 = vweird.f32 %v5987_v61  ;;  %v5080_v15 = vld [vmem:[%s7977_s17 + $0x10] sm:$0xff]  ;;  %s7938_s17 = sld [smem:[#allocation3 + $0x12]] }
0x1e61   :  { %vm4982_vm8 = vmor %vm4980_vm7, %vm4981_vm3  ;;  %5102 = vmatpush.msrb.mxu1 %v5080_v15 }
0x1e62   :  { %v5011_v39 = vmul.f32 %v7902_v57, %v7902_v57  ;;  %v4977_v62 = vsub.f32 1.0, %v4976_v52  ;;  %v5432_v48 = vmul.f32 -1.442695, %v7902_v57 }
0x1e63   :  { %5103 = vmatpush.msrb.mxu1 %v5079_v60 }
0x1e64   :  { %v5015_v50 = vsel %vm114_vm0, %v5011_v39, 0.0  ;;  %v4978_v42 = vmul.f32 %v5987_v61, %v4977_v62  ;;  %5988 = vpow2.f32 %v5432_v48 }
0x1e65   :  { %5016 = vadd.xlane.f32.xlu2 %v5015_v50  ;;  %5104 = vmatpush.msrb.mxu1 %v5078_v12 }
0x1e66   :  { %v4979_v1 = vadd.f32 %v5987_v61, %v4978_v42 }
0x1e68   :  { %v4983_v54 = vsel %vm4982_vm8, %v5987_v61, %v4979_v1 }
0x1e69   :  { %v4988_v56 = vsel %vm4985_vm9, %v4987_v51, %v4983_v54 }
0x1e6a   :  { %v5006_v4 = vmul.f32 %v5005_v0, %v4988_v56  ;;  %v5989_v32 = vpop.eup %5988 }
0x1e6b   :  { %v4974_v31 = vadd.f32 1.0, %v5989_v32 }
0x1e6c   :  { %v5008_v63 = vadd.f32 1.1, %v5006_v4 }
0x1e6d   :  { %5990 = vrcp.f32 %v4974_v31  ;;  %v5001_v3 = vand.u32 2147483648, %v4974_v31  ;;  %vm4995_vm6 = vweird.f32 %v4974_v31  ;;  %v4999_v22 = vand.u32 2147483647, %v4974_v31 }
0x1e6e   :  { %v5022_v16 = vmul.f32 %v5008_v63, %v5008_v63 }
0x1e6f   :  { %v5002_v45 = vor.u32 1.1754944e-38, %v5001_v3  ;;  %vm5000_vm11 = vcmp.eq.f32.partialorder %v4999_v22, 8.507059e+37 }
0x1e70   :  { %v5433_v2 = vadd.f32 -1.0, %v5022_v16 }
0x1e73   :  { %v5991_v19 = vpop.eup %5990 }
0x1e74   :  { %v4991_v7 = vmul.f32 %v5991_v19, %v4974_v31  ;;  %vm4996_vm12 = vweird.f32 %v5991_v19 }
0x1e75   :  { %vm4997_vm10 = vmor %vm4995_vm6, %vm4996_vm12 }
0x1e76   :  { %v4992_v18 = vsub.f32 1.0, %v4991_v7 }
0x1e78   :  { %v4993_v24 = vmul.f32 %v5991_v19, %v4992_v18 }
0x1e7a   :  { %v4994_v43 = vadd.f32 %v5991_v19, %v4993_v24 }
0x1e7c   :  { %v4998_v49 = vsel %vm4997_vm10, %v5991_v19, %v4994_v43 }
0x1e7d   :  { %5068 = vperm.xlu2 %5608, %v5008_v63   ;;  %v5003_v35 = vsel %vm5000_vm11, %v5002_v45, %v4998_v49  ;;  %v5150_v49 = vstv %s7938_s17 }
0x1e7e   :  { %v5007_v29 = vmul.f32 %v5005_v0, %v5003_v35 }
0x1e80   :  { %v5009_v9 = vadd.f32 1.1, %v5007_v29 }
0x1e82   :  { %v5023_v41 = vmul.f32 %v5009_v9, %v5009_v9 }
0x1e84   :  { %v5434_v13 = vadd.f32 -1.0, %v5023_v41 }
0x1ec4   :  { %v5014_v53 = vpop.xlane.xlu1 %5013 }
0x1ec5   :  { %v5018_v5 = vsub.f32 %v5014_v53, %v5010_v14 }
0x1ec7   :  { %v5020_v28 = vmax.f32 %v5018_v5, 1e-08 }
0x1ec9   :  { %5992 = vrcp.f32 %v5020_v28 }
0x1ecf   :  { %v5993_v36 = vpop.eup %5992 }
0x1ed0   :  { %v5028_v26 = vmul.f32 %v5993_v36, %v5433_v2 }
0x1ed2   :  { %5994 = vrsqrt.f32 %v5028_v26  ;;  %vm5037_vm14 = vcmp.eq.f32.partialorder %v5028_v26, inf  ;;  %v5040_v10 = vand.u32 2147483648, %v5028_v26  ;;  %vm5039_vm15 = vcmp.eq.f32.partialorder %v5028_v26, 0.0 }
0x1ed8   :  { %v5995_v38 = vpop.eup %5994  ;;  %v5017_v40 = vpop.xlane.xlu2 %5016 }
0x1ed9   :  { %v5019_v37 = vsub.f32 %v5017_v40, %v5011_v39  ;;  %v5031_v6 = vmul.f32 %v5995_v38, %v5028_v26 }
0x1edb   :  { %v5021_v17 = vmax.f32 %v5019_v37, 1e-08  ;;  %v5032_v34 = vmul.f32 %v5995_v38, %v5031_v6 }
0x1edd   :  { %5996 = vrcp.f32 %v5021_v17  ;;  %v5033_v58 = vmul.f32 0.5, %v5032_v34 }
0x1edf   :  { %v5034_v21 = vsub.f32 1.5, %v5033_v58 }
0x1ee0   :  { %v5069_v56 = vpop.permute.xlu2 %5068 }
0x1ee1   :  { %v5035_v27 = vmul.f32 %v5995_v38, %v5034_v21 }
0x1ee3   :  { %v5997_v25 = vpop.eup %5996  ;;  %v5036_v44 = vmul.f32 %v5035_v27, %v5028_v26 }
0x1ee4   :  { %v5029_v8 = vmul.f32 %v5997_v25, %v5434_v13 }
0x1ee5   :  { %v5038_v14 = vsel %vm5037_vm14, %v5028_v26, %v5036_v44 }
0x1ee6   :  { %v5041_v59 = vsel %vm5039_vm15, %v5040_v10, %v5038_v14  ;;  %5998 = vrsqrt.f32 %v5029_v8  ;;  %vm5049_vm1 = vcmp.eq.f32.partialorder %v5029_v8, inf  ;;  %v5052_v62 = vand.u32 2147483648, %v5029_v8 }
0x1ee7   :  { %5056 = vperm.xlu0 %5610, %v5041_v59   ;;  %vm5051_vm5 = vcmp.eq.f32.partialorder %v5029_v8, 0.0 }
0x1eec   :  { %v5999_v20 = vpop.eup %5998 }
0x1eed   :  { %v5043_v23 = vmul.f32 %v5999_v20, %v5029_v8 }
0x1eef   :  { %v5044_v61 = vmul.f32 %v5999_v20, %v5043_v23 }
0x1ef1   :  { %v5045_v55 = vmul.f32 0.5, %v5044_v61 }
0x1ef3   :  { %v5046_v52 = vsub.f32 1.5, %v5045_v55 }
0x1ef5   :  { %v5047_v39 = vmul.f32 %v5999_v20, %v5046_v52 }
0x1ef7   :  { %v5048_v50 = vmul.f32 %v5047_v39, %v5029_v8 }
0x1ef9   :  { %v5050_v42 = vsel %vm5049_vm1, %v5029_v8, %v5048_v50 }
0x1efa   :  { %v5053_v1 = vsel %vm5051_vm5, %v5052_v62, %v5050_v42 }
0x1efb   :  { %5061 = vperm.xlu0 %5610, %v5053_v1  }
0x1f03   :  { %5073 = vperm.xlu0 %5610, %v5009_v9  }
0x1f59   :  { %v5057_v54 = vpop.permute.xlu0 %5056 }
0x1f5a   :  { %v5064_v51 = vmul.f32 %v5057_v54, %v7896_v47 }
0x1f5c   :  { %v5076_v0 = vsel %vm231_vm2, %v5069_v56, %v5064_v51 }
0x1f5d   :  { %5436 = vmatmul.msk.f32.vlgmr.msrb.gmra.mxu1 %vm114_vm0, %v5076_v0 }
0x1f6d   :  { %v5062_v4 = vpop.permute.xlu0 %5061 }
0x1f6e   :  { %v5065_v63 = vmul.f32 %v5062_v4, %v7902_v57 }
0x1f75   :  { %v5074_v48 = vpop.permute.xlu0 %5073 }
0x1f76   :  { %v5077_v32 = vsel %vm231_vm2, %v5074_v48, %v5065_v63 }
0x1f77   :  { %5437 = vmatmul.msk.f32.gmra.mxu1 %vm114_vm0, %v5077_v32 }
0x1fda   :  { %v5106_v31 = vpop.f32.mrf.mxu1 }
0x1fdb   :  { %v7932_v19 = vadd.f32 %v5106_v31, %v7844_v46 }
0x1fdd   :  { %v5438_v47 = vmul.f32 -1.442695, %v7932_v19  ;;  %v5155_v7 = vmul.f32 %v7932_v19, %v7932_v19 }
0x1fdf   :  { %6000 = vpow2.f32 %v5438_v47  ;;  %v5157_v18 = vsel %vm114_vm0, %v5155_v7, 0.0 }
0x1fe0   :  { %5158 = vadd.xlane.f32.xlu0 %v5157_v18 }
0x1fe5   :  { %v6001_v57 = vpop.eup %6000 }
0x1fe6   :  { %v5118_v53 = vadd.f32 1.0, %v6001_v57 }
0x1fe8   :  { %6002 = vrcp.f32 %v5118_v53  ;;  %v5131_v46 = vand.u32 2147483648, %v5118_v53  ;;  %v5129_v43 = vand.u32 2147483647, %v5118_v53  ;;  %vm5125_vm13 = vweird.f32 %v5118_v53 }
0x1fea   :  { %v5132_v36 = vor.u32 1.1754944e-38, %v5131_v46  ;;  %vm5130_vm7 = vcmp.eq.f32.partialorder %v5129_v43, 8.507059e+37 }
0x1fee   :  { %v6003_v5 = vpop.eup %6002 }
0x1fef   :  { %v5121_v28 = vmul.f32 %v6003_v5, %v5118_v53  ;;  %vm5126_vm4 = vweird.f32 %v6003_v5 }
0x1ff0   :  { %vm5127_vm3 = vmor %vm5125_vm13, %vm5126_vm4 }
0x1ff1   :  { %v5122_v24 = vsub.f32 1.0, %v5121_v28 }
0x1ff3   :  { %v5123_v16 = vmul.f32 %v6003_v5, %v5122_v24 }
0x1ff4   :  { %v5109_v3 = vpop.f32.mrf.mxu1 }
0x1ff5   :  { %v7941_v2 = vadd.f32 %v5109_v3, %v7851_v30  ;;  %v5124_v22 = vadd.f32 %v6003_v5, %v5123_v16 }
0x1ff7   :  { %v5156_v26 = vmul.f32 %v7941_v2, %v7941_v2  ;;  %v5128_v45 = vsel %vm5127_vm3, %v6003_v5, %v5124_v22  ;;  %v5439_v30 = vmul.f32 -1.442695, %v7941_v2 }
0x1ff8   :  { %v5133_v35 = vsel %vm5130_vm7, %v5132_v36, %v5128_v45 }
0x1ff9   :  { %v5160_v29 = vsel %vm114_vm0, %v5156_v26, 0.0  ;;  %v5151_v38 = vmul.f32 %v5150_v49, %v5133_v35  ;;  %6004 = vpow2.f32 %v5439_v30 }
0x1ffa   :  { %5161 = vadd.xlane.f32.xlu2 %v5160_v29 }
0x1ffb   :  { %v5153_v40 = vadd.f32 1.1, %v5151_v38 }
0x1ffd   :  { %5213 = vperm.xlu0 %5610, %v5153_v40   ;;  %v5167_v27 = vmul.f32 %v5153_v40, %v5153_v40 }
0x1fff   :  { %v6005_v37 = vpop.eup %6004  ;;  %v5440_v25 = vadd.f32 -1.0, %v5167_v27 }
0x2000   :  { %v5119_v6 = vadd.f32 1.0, %v6005_v37 }
0x2002   :  { %6006 = vrcp.f32 %v5119_v6  ;;  %v5146_v8 = vand.u32 2147483648, %v5119_v6  ;;  %vm5140_vm9 = vweird.f32 %v5119_v6  ;;  %v5144_v10 = vand.u32 2147483647, %v5119_v6 }
0x2004   :  { %v5147_v59 = vor.u32 1.1754944e-38, %v5146_v8  ;;  %vm5145_vm6 = vcmp.eq.f32.partialorder %v5144_v10, 8.507059e+37 }
0x2008   :  { %v6007_v9 = vpop.eup %6006 }
0x2009   :  { %v5136_v58 = vmul.f32 %v6007_v9, %v5119_v6  ;;  %vm5141_vm8 = vweird.f32 %v6007_v9 }
0x200a   :  { %vm5142_vm12 = vmor %vm5140_vm9, %vm5141_vm8 }
0x200b   :  { %v5137_v21 = vsub.f32 1.0, %v5136_v58 }
0x200d   :  { %v5138_v13 = vmul.f32 %v6007_v9, %v5137_v21 }
0x200f   :  { %v5139_v15 = vadd.f32 %v6007_v9, %v5138_v13 }
0x2011   :  { %v5143_v14 = vsel %vm5142_vm12, %v6007_v9, %v5139_v15 }
0x2012   :  { %v5148_v23 = vsel %vm5145_vm6, %v5147_v59, %v5143_v14 }
0x2013   :  { %v5152_v52 = vmul.f32 %v5150_v49, %v5148_v23 }
0x2015   :  { %v5154_v1 = vadd.f32 1.1, %v5152_v52 }
0x2017   :  { %v5168_v51 = vmul.f32 %v5154_v1, %v5154_v1 }
0x2019   :  { %v5441_v63 = vadd.f32 -1.0, %v5168_v51 }
0x2053   :  { %v5159_v17 = vpop.xlane.xlu0 %5158 }
0x2054   :  { %v5163_v34 = vsub.f32 %v5159_v17, %v5155_v7 }
0x2056   :  { %v5165_v41 = vmax.f32 %v5163_v34, 1e-08 }
0x2058   :  { %6008 = vrcp.f32 %v5165_v41 }
0x205e   :  { %v6009_v44 = vpop.eup %6008 }
0x205f   :  { %v5173_v11 = vmul.f32 %v6009_v44, %v5440_v25 }
0x2061   :  { %6010 = vrsqrt.f32 %v5173_v11  ;;  %vm5182_vm10 = vcmp.eq.f32.partialorder %v5173_v11, inf  ;;  %v5185_v56 = vand.u32 2147483648, %v5173_v11  ;;  %vm5184_vm11 = vcmp.eq.f32.partialorder %v5173_v11, 0.0 }
0x2067   :  { %v6011_v20 = vpop.eup %6010 }
0x2068   :  { %v5176_v61 = vmul.f32 %v6011_v20, %v5173_v11 }
0x206a   :  { %v5177_v55 = vmul.f32 %v6011_v20, %v5176_v61 }
0x206c   :  { %v5178_v39 = vmul.f32 0.5, %v5177_v55 }
0x206d   :  { %v5162_v50 = vpop.xlane.xlu2 %5161 }
0x206e   :  { %v5164_v62 = vsub.f32 %v5162_v50, %v5156_v26  ;;  %v5179_v42 = vsub.f32 1.5, %v5178_v39 }
0x206f   :  { %v5214_v3 = vpop.permute.xlu0 %5213 }
0x2070   :  { %v5166_v60 = vmax.f32 %v5164_v62, 1e-08  ;;  %v5180_v12 = vmul.f32 %v6011_v20, %v5179_v42 }
0x2072   :  { %6012 = vrcp.f32 %v5166_v60  ;;  %v5181_v54 = vmul.f32 %v5180_v12, %v5173_v11 }
0x2074   :  { %v5183_v0 = vsel %vm5182_vm10, %v5173_v11, %v5181_v54 }
0x2075   :  { %v5186_v4 = vsel %vm5184_vm11, %v5185_v56, %v5183_v0 }
0x2076   :  { %5201 = vperm.xlu1 %5609, %v5186_v4  }
0x2078   :  { %v6013_v48 = vpop.eup %6012 }
0x2079   :  { %v5174_v32 = vmul.f32 %v6013_v48, %v5441_v63 }
0x207b   :  { %6014 = vrsqrt.f32 %v5174_v32  ;;  %vm5194_vm14 = vcmp.eq.f32.partialorder %v5174_v32, inf  ;;  %v5197_v28 = vand.u32 2147483648, %v5174_v32  ;;  %vm5196_vm15 = vcmp.eq.f32.partialorder %v5174_v32, 0.0 }
0x2081   :  { %v6015_v31 = vpop.eup %6014 }
0x2082   :  { %v5188_v47 = vmul.f32 %v6015_v31, %v5174_v32 }
0x2084   :  { %v5189_v7 = vmul.f32 %v6015_v31, %v5188_v47 }
0x2086   :  { %v5190_v18 = vmul.f32 0.5, %v5189_v7 }
0x2088   :  { %v5191_v57 = vsub.f32 1.5, %v5190_v18 }
0x208a   :  { %v5192_v53 = vmul.f32 %v6015_v31, %v5191_v57 }
0x208c   :  { %v5193_v5 = vmul.f32 %v5192_v53, %v5174_v32 }
0x208e   :  { %v5195_v24 = vsel %vm5194_vm14, %v5174_v32, %v5193_v5 }
0x208f   :  { %v5198_v46 = vsel %vm5196_vm15, %v5197_v28, %v5195_v24 }
0x2090   :  { %5206 = vperm.xlu1 %5609, %v5198_v46  }
0x2098   :  { %5218 = vperm.xlu1 %5609, %v5154_v1  }
0x20e8   :  { %v5202_v16 = vpop.permute.xlu1 %5201 }
0x20e9   :  { %v5209_v43 = vmul.f32 %v5202_v16, %v7932_v19 }
0x20eb   :  { %v5221_v22 = vsel %vm231_vm2, %v5214_v3, %v5209_v43 }
0x20ec   :  { %5223 = vst.msk [vmem:[#allocation6] sm:$0xff] %vm114_vm0, %v5221_v22 }
0x2102   :  { %v5207_v36 = vpop.permute.xlu1 %5206 }
0x2103   :  { %v5210_v49 = vmul.f32 %v5207_v36, %v7941_v2 }
0x210a   :  { %v5219_v26 = vpop.permute.xlu1 %5218 }
0x210b   :  { %v5222_v19 = vsel %vm231_vm2, %v5219_v26, %v5210_v49 }
0x210c   :  { %5224 = vst.msk [vmem:[#allocation6 + $0x8] sm:$0xff] %vm114_vm0, %v5222_v19 }
0x210d   :  { %5237 = dma.vmem_to_hbm [thread:$0]  %s5230_s13, 256, %s5232_s1, [#allocation4], %s6070_s25, %s6070_s25, %s6066_s8  }
0x210e   :  { %6054 = dma.done.wait [#allocation4], 256  }
0x210f   :  { %6055 = vsyncadd [#allocation4], 4294967040 }
0x2110   :  { %5242 = vsyncpa [#allocation4], 1 }
0x2111   :  { %5243 = vsyncpa [#allocation5], 1 }

</bundles_post_ra>
